<compile_context>
chip_gen: v6e
topology: v6e:2x2x1
jax: 0.10.0
libtpu: 0.0.40
codegen_flags: <defaults>
</compile_context>

<pallas_src>
import functools

import jax
import jax.numpy as jnp
from jax.experimental import pallas as pl
from jax.experimental.pallas import tpu as pltpu


# ----------------------------------------------------------------------------
# Pallas kernel 1: generic stride-1 KxK conv (+bias +activation).
# grid = (batch,); one batch element's (pre-padded) feature map is resident in
# VMEM and the K*K taps are accumulated per output row -> no HBM im2col.
# ----------------------------------------------------------------------------
def _conv_s1_kernel(x_ref, w_ref, b_ref, o_ref, *, kh, kw, act):
    # x_ref: [Hin, Win, Cin] (bf16)   w_ref: [kh*kw, Cin, Cout] (bf16)
    # b_ref: [1, Cout] (f32)          o_ref: [Ho, Wo, Cout]
    Ho, Wo, Cout = o_ref.shape
    bias = jnp.broadcast_to(b_ref[...], (Wo, Cout)).astype(jnp.float32)
    for ho in range(Ho):                              # static unroll (small Ho)
        acc = bias
        for dy in range(kh):
            for dx in range(kw):
                win = x_ref[ho + dy, dx:dx + Wo, :]   # [Wo, Cin]  (VMEM slice)
                acc = acc + jnp.dot(win, w_ref[dy * kw + dx],
                                    preferred_element_type=jnp.float32)
        if act == "relu":
            acc = jnp.maximum(acc, 0.0)
        elif act == "sigmoid":
            acc = 1.0 / (1.0 + jnp.exp(-acc))
        o_ref[ho] = acc.astype(o_ref.dtype)


def _conv_s1(x, w_flat, b, *, kh, kw, act, out_dtype):
    """x: [N, Hin, Win, Cin], already spatially padded / parity-stacked."""
    N, Hin, Win, Cin = x.shape
    K2, _, Cout = w_flat.shape
    assert K2 == kh * kw
    Ho, Wo = Hin - kh + 1, Win - kw + 1
    return pl.pallas_call(
        functools.partial(_conv_s1_kernel, kh=kh, kw=kw, act=act),
        out_shape=jax.ShapeDtypeStruct((N, Ho, Wo, Cout), out_dtype),
        grid=(N,),
        in_specs=[
            pl.BlockSpec((None, Hin, Win, Cin), lambda n: (n, 0, 0, 0)),
            pl.BlockSpec((K2, Cin, Cout), lambda n: (0, 0, 0)),
            pl.BlockSpec((1, Cout), lambda n: (0, 0)),
        ],
        out_specs=pl.BlockSpec((None, Ho, Wo, Cout), lambda n: (n, 0, 0, 0)),
        compiler_params=pltpu.CompilerParams(
            dimension_semantics=("parallel",)),
    )(x, w_flat, b)


def conv3x3_s2(x, w2_flat, b, *, act):
    """3x3 stride-2 pad-1 conv, computed as a 2x2 stride-1 conv over the four
    channel-stacked spatial-parity planes (cheap ~1x space-to-depth in the
    wrapper; replaces the old 9-tap im2col-in-HBM)."""
    N, H, W, C = x.shape                      # H, W assumed even (/2 /4 pyramid)
    xp = jnp.pad(x, ((0, 0), (1, 1), (1, 1), (0, 0)))
    planes = [xp[:, py::2, px::2, :] for py in (0, 1) for px in (0, 1)]
    xs = jnp.concatenate(planes, axis=-1).astype(jnp.bfloat16)
    return _conv_s1(xs, w2_flat, b, kh=2, kw=2, act=act, out_dtype=jnp.bfloat16)


# ----------------------------------------------------------------------------
# Pallas kernel 2: fused flowdecode + VGGdecode + depthNN fuse stage.
# 12 decode heads, 6 fuse convs and the 6-way sum in a single pallas_call.
# ----------------------------------------------------------------------------
def _decode_fuse_kernel(x1_ref, x2_ref, wf_ref, bf_ref, wv_ref, bv_ref,
                        gf_ref, gv_ref, bg_ref, s_ref, o_ref):
    # x1/x2: [tm, 16] bf16;  wf/wv: [16, 96] bf16;  gf/gv: [96, 96] block-diag
    # bf16; s: [96, 16] group-sum matrix bf16;  biases f32.
    f = jnp.dot(x1_ref[...], wf_ref[...], preferred_element_type=jnp.float32)
    f = jnp.maximum(f + bf_ref[...], 0.0)          # 6 flowdecode heads [tm, 96]
    v = jnp.dot(x2_ref[...], wv_ref[...], preferred_element_type=jnp.float32)
    v = jnp.maximum(v + bv_ref[...], 0.0)          # 6 VGGdecode heads  [tm, 96]
    g = (jnp.dot(f.astype(jnp.bfloat16), gf_ref[...],
                 preferred_element_type=jnp.float32)
         + jnp.dot(v.astype(jnp.bfloat16), gv_ref[...],
                   preferred_element_type=jnp.float32)
         + bg_ref[...])
    g = jnp.maximum(g, 0.0)                        # 6 fused groups     [tm, 96]
    fsum = jnp.dot(g.astype(jnp.bfloat16), s_ref[...],
                   preferred_element_type=jnp.float32)   # sum of groups [tm,16]
    o_ref[...] = fsum.astype(o_ref.dtype)


def decode_fuse(x1, x2, pk):
    N, H4, W4, C2 = x1.shape
    Cd6 = pk["wf"].shape[1]
    Cd = pk["S"].shape[1]
    M = N * H4 * W4
    x1f = x1.reshape(M, C2)
    x2f = x2.reshape(M, C2)
    tm = 1024 if M >= 1024 else ((M + 7) // 8) * 8
    Mp = ((M + tm - 1) // tm) * tm
    if Mp != M:
        # Single pad for the whole fused stage; no in-kernel reduction over M,
        # so the padded rows are harmless and sliced off below.
        x1f = jnp.pad(x1f, ((0, Mp - M), (0, 0)))
        x2f = jnp.pad(x2f, ((0, Mp - M), (0, 0)))
    out = pl.pallas_call(
        _decode_fuse_kernel,
        out_shape=jax.ShapeDtypeStruct((Mp, Cd), jnp.bfloat16),
        grid=(Mp // tm,),
        in_specs=[
            pl.BlockSpec((tm, C2), lambda i: (i, 0)),
            pl.BlockSpec((tm, C2), lambda i: (i, 0)),
            pl.BlockSpec((C2, Cd6), lambda i: (0, 0)),
            pl.BlockSpec((1, Cd6), lambda i: (0, 0)),
            pl.BlockSpec((C2, Cd6), lambda i: (0, 0)),
            pl.BlockSpec((1, Cd6), lambda i: (0, 0)),
            pl.BlockSpec((Cd6, Cd6), lambda i: (0, 0)),
            pl.BlockSpec((Cd6, Cd6), lambda i: (0, 0)),
            pl.BlockSpec((1, Cd6), lambda i: (0, 0)),
            pl.BlockSpec((Cd6, Cd), lambda i: (0, 0)),
        ],
        out_specs=pl.BlockSpec((tm, Cd), lambda i: (i, 0)),
        compiler_params=pltpu.CompilerParams(
            dimension_semantics=("parallel",)),
    )(x1f, x2f, pk["wf"], pk["bf"], pk["wv"], pk["bv"],
      pk["gf"], pk["gv"], pk["bg"], pk["S"])
    return out[:M].reshape(N, H4, W4, Cd)


# ----------------------------------------------------------------------------
# Deterministic parameter init (synthetic; shapes implied by the forward pass)
# ----------------------------------------------------------------------------
def _conv_params(key, kh, kw, cin, cout):
    kw_, kb_ = jax.random.split(key)
    scale = 1.0 / jnp.sqrt(jnp.float32(kh * kw * cin))
    w = jax.random.normal(kw_, (kh, kw, cin, cout), jnp.float32) * scale
    b = jax.random.normal(kb_, (cout,), jnp.float32) * 0.01
    return w, b


def init_params(key, c_flow_in=2, c_depth_in=3, c1=8, c2=16, c_dec=16):
    keys = iter(jax.random.split(key, 64))
    return {
        "flow": [_conv_params(next(keys), 3, 3, c_flow_in, c1),
                 _conv_params(next(keys), 3, 3, c1, c2)],
        "vgg":  [_conv_params(next(keys), 3, 3, c_depth_in, c1),
                 _conv_params(next(keys), 3, 3, c1, c2)],
        "flowdec": [_conv_params(next(keys), 1, 1, c2, c_dec) for _ in range(6)],
        "vggdec":  [_conv_params(next(keys), 1, 1, c2, c_dec) for _ in range(6)],
        "fuse":    [_conv_params(next(keys), 1, 1, 2 * c_dec, c_dec)
                    for _ in range(6)],
        "final":   _conv_params(next(keys), 3, 3, c_dec, 1),
    }


def pack_params(params):
    """Repack PyTorch-style per-layer weights into the fused bf16 layouts."""
    c_dec = params["fuse"][0][0].shape[-1]
    n_heads = len(params["flowdec"])

    def pack_s2(w, b):
        # [3,3,Cin,Cout] 3x3/s2 conv  ->  [4, 4*Cin, Cout] 2x2/s1 conv over the
        # channel-stacked parity planes (plane order: (py,px) = 00,01,10,11).
        _, _, cin, cout = w.shape
        w2 = jnp.zeros((2, 2, 4 * cin, cout), jnp.float32)
        for ry in range(2):
            for rx in range(2):
                for py in range(2):
                    for px in range(2):
                        dy, dx = 2 * ry + py, 2 * rx + px
                        if dy < 3 and dx < 3:
                            p = py * 2 + px
                            w2 = w2.at[ry, rx, p * cin:(p + 1) * cin, :].set(
                                w[dy, dx])
        return (w2.reshape(4, 4 * cin, cout).astype(jnp.bfloat16),
                b.reshape(1, cout).astype(jnp.float32))

    def stack_1x1(pairs):
        ws = jnp.concatenate(
            [w.reshape(w.shape[2], w.shape[3]) for w, _ in pairs], axis=1)
        bs = jnp.concatenate([b for _, b in pairs], axis=0)
        return ws.astype(jnp.bfloat16), bs.reshape(1, -1).astype(jnp.float32)

    wf, bf = stack_1x1(params["flowdec"])
    wv, bv = stack_1x1(params["vggdec"])

    gf = jnp.zeros((n_heads * c_dec, n_heads * c_dec), jnp.float32)
    gv = jnp.zeros((n_heads * c_dec, n_heads * c_dec), jnp.float32)
    bg = []
    for i, (w, b) in enumerate(params["fuse"]):
        wmat = w.reshape(2 * c_dec, c_dec)          # rows 0:16 -> flow feature,
        sl = slice(i * c_dec, (i + 1) * c_dec)      # rows 16:32 -> vgg feature
        gf = gf.at[sl, sl].set(wmat[:c_dec])
        gv = gv.at[sl, sl].set(wmat[c_dec:])
        bg.append(b)
    bg = jnp.concatenate(bg).reshape(1, -1).astype(jnp.float32)
    S = jnp.tile(jnp.eye(c_dec, dtype=jnp.float32), (n_heads, 1))

    wfin, bfin = params["final"]
    return {
        "flow1": pack_s2(*params["flow"][0]),
        "flow2": pack_s2(*params["flow"][1]),
        "vgg1": pack_s2(*params["vgg"][0]),
        "vgg2": pack_s2(*params["vgg"][1]),
        "wf": wf, "bf": bf, "wv": wv, "bv": bv,
        "gf": gf.astype(jnp.bfloat16), "gv": gv.astype(jnp.bfloat16),
        "bg": bg, "S": S.astype(jnp.bfloat16),
        "final": (wfin.reshape(9, wfin.shape[2], wfin.shape[3]).astype(jnp.bfloat16),
                  bfin.reshape(1, -1).astype(jnp.float32)),
    }


# ----------------------------------------------------------------------------
# DepthAns forward
# ----------------------------------------------------------------------------
def depth_ans_forward(packed, flow_input, depth_input):
    """flow_input: [N,2,H,W], depth_input: [N,3,H,W] (NCHW, f32).
    Returns [N,1,H,W] depth in [0,1]."""
    xf = jnp.transpose(flow_input, (0, 2, 3, 1))    # NCHW -> NHWC (XLA glue)
    xd = jnp.transpose(depth_input, (0, 2, 3, 1))

    # flowNN / VGG11NN encoders (4 pallas_calls)
    x1 = conv3x3_s2(xf, *packed["flow1"], act="relu")
    x1 = conv3x3_s2(x1, *packed["flow2"], act="relu")
    x2 = conv3x3_s2(xd, *packed["vgg1"], act="relu")
    x2 = conv3x3_s2(x2, *packed["vgg2"], act="relu")

    # flowdecode + VGGdecode + depthNN fuse stage (1 pallas_call)
    fsum = decode_fuse(x1, x2, packed)              # [N, H/4, W/4, 16] bf16

    # depthNN head: 3x3 conv + sigmoid (1 pallas_call), then bilinear upsample.
    # TODO(synk): fsum->final conv still round-trips a tiny map through HBM;
    #             could be folded into the fuse kernel with a spatial grid.
    wfin, bfin = packed["final"]
    fsum_p = jnp.pad(fsum, ((0, 0), (1, 1), (1, 1), (0, 0)))
    d = _conv_s1(fsum_p, wfin, bfin, kh=3, kw=3, act="sigmoid",
                 out_dtype=jnp.float32)             # [N, H/4, W/4, 1]

    N = d.shape[0]
    H, W = flow_input.shape[2], flow_input.shape[3]
    # TODO(synk): jax.image.resize is half-pixel (align_corners=False) bilinear.
    d = jax.image.resize(d, (N, H, W, 1), method="bilinear")
    return jnp.transpose(d, (0, 3, 1, 2))           # NHWC -> NCHW


# ----------------------------------------------------------------------------
if __name__ == "__main__":
    key = jax.random.PRNGKey(0)
    k_params, k_flow, k_depth = jax.random.split(key, 3)

    N, H, W = 2, 16, 16
    flow_input = jax.random.normal(k_flow, (N, 2, H, W), jnp.float32)
    depth_input = jax.random.normal(k_depth, (N, 3, H, W), jnp.float32)

    params = init_params(k_params)
    packed = pack_params(params)

    out = jax.jit(depth_ans_forward)(packed, flow_input, depth_input)
    out = jax.block_until_ready(out)

    assert out.shape == (N, 1, H, W), out.shape
    assert bool(jnp.all(jnp.isfinite(out)))
    print("KERNEL_OK")
</pallas_src>

<mosaic_0001>
module attributes {stable_mosaic.version = 11 : i64} {
  func.func @_conv_s1_kernel(%arg0: i32, %arg1: memref<1x9x9x12xbf16, #tpu.memory_space<vmem>>, %arg2: memref<4x12x8xbf16, #tpu.memory_space<vmem>>, %arg3: memref<1x8xf32, #tpu.memory_space<vmem>>, %arg4: memref<1x8x8x8xbf16, #tpu.memory_space<vmem>>) attributes {dimension_semantics = [#tpu.dimension_semantics<parallel>], iteration_bounds = array<i64: 2>, scalar_prefetch = 0 : i64, scratch_operands = 0 : i64, tpu.core_type = #tpu.core_type<tc>, window_params = [{transform_indices = @transform_0, window_bounds = array<i64: 1, 9, 9, 12>}, {pipeline_mode = #tpu.pipeline_mode<synchronous>, transform_indices = @transform_1, window_bounds = array<i64: 4, 12, 8>}, {pipeline_mode = #tpu.pipeline_mode<synchronous>, transform_indices = @transform_2, window_bounds = array<i64: 1, 8>}, {transform_indices = @transform_3, window_bounds = array<i64: 1, 8, 8, 8>}]} {
    %c0 = arith.constant 0 : index
    %c0_0 = arith.constant 0 : index
    %0 = vector.load %arg3[%c0, %c0_0] : memref<1x8xf32, #tpu.memory_space<vmem>>, vector<1x8xf32>
    %1 = vector.shape_cast %0 : vector<1x8xf32> to vector<1x8xf32>
    %2 = vector.broadcast %1 : vector<1x8xf32> to vector<8x8xf32>
    %c0_1 = arith.constant 0 : index
    %c0_2 = arith.constant 0 : index
    %c0_3 = arith.constant 0 : index
    %c0_4 = arith.constant 0 : index
    %3 = vector.load %arg1[%c0_1, %c0_2, %c0_3, %c0_4] : memref<1x9x9x12xbf16, #tpu.memory_space<vmem>>, vector<1x1x8x12xbf16>
    %4 = vector.shape_cast %3 : vector<1x1x8x12xbf16> to vector<8x12xbf16>
    %c0_5 = arith.constant 0 : index
    %c0_6 = arith.constant 0 : index
    %c0_7 = arith.constant 0 : index
    %5 = vector.load %arg2[%c0_5, %c0_6, %c0_7] : memref<4x12x8xbf16, #tpu.memory_space<vmem>>, vector<1x12x8xbf16>
    %6 = vector.shape_cast %5 : vector<1x12x8xbf16> to vector<12x8xbf16>
    %cst = arith.constant dense<0.000000e+00> : vector<8x8xf32>
    %7 = tpu.matmul %4, %6, %cst {dimension_numbers = #tpu.dot_dimension_numbers<[1], [0], [0], [1], [0, 0, 1, 1], [], []>} : vector<8x12xbf16>, vector<12x8xbf16>, vector<8x8xf32> -> vector<8x8xf32>
    %8 = arith.addf %2, %7 : vector<8x8xf32>
    %c0_8 = arith.constant 0 : index
    %c0_9 = arith.constant 0 : index
    %c1 = arith.constant 1 : index
    %c0_10 = arith.constant 0 : index
    %9 = vector.load %arg1[%c0_8, %c0_9, %c1, %c0_10] : memref<1x9x9x12xbf16, #tpu.memory_space<vmem>>, vector<1x1x8x12xbf16>
    %10 = vector.shape_cast %9 : vector<1x1x8x12xbf16> to vector<8x12xbf16>
    %c1_11 = arith.constant 1 : index
    %c0_12 = arith.constant 0 : index
    %c0_13 = arith.constant 0 : index
    %11 = vector.load %arg2[%c1_11, %c0_12, %c0_13] : memref<4x12x8xbf16, #tpu.memory_space<vmem>>, vector<1x12x8xbf16>
    %12 = vector.shape_cast %11 : vector<1x12x8xbf16> to vector<12x8xbf16>
    %cst_14 = arith.constant dense<0.000000e+00> : vector<8x8xf32>
    %13 = tpu.matmul %10, %12, %cst_14 {dimension_numbers = #tpu.dot_dimension_numbers<[1], [0], [0], [1], [0, 0, 1, 1], [], []>} : vector<8x12xbf16>, vector<12x8xbf16>, vector<8x8xf32> -> vector<8x8xf32>
    %14 = arith.addf %8, %13 : vector<8x8xf32>
    %c0_15 = arith.constant 0 : index
    %c1_16 = arith.constant 1 : index
    %c0_17 = arith.constant 0 : index
    %c0_18 = arith.constant 0 : index
    %15 = vector.load %arg1[%c0_15, %c1_16, %c0_17, %c0_18] : memref<1x9x9x12xbf16, #tpu.memory_space<vmem>>, vector<1x1x8x12xbf16>
    %16 = vector.shape_cast %15 : vector<1x1x8x12xbf16> to vector<8x12xbf16>
    %c2 = arith.constant 2 : index
    %c0_19 = arith.constant 0 : index
    %c0_20 = arith.constant 0 : index
    %17 = vector.load %arg2[%c2, %c0_19, %c0_20] : memref<4x12x8xbf16, #tpu.memory_space<vmem>>, vector<1x12x8xbf16>
    %18 = vector.shape_cast %17 : vector<1x12x8xbf16> to vector<12x8xbf16>
    %cst_21 = arith.constant dense<0.000000e+00> : vector<8x8xf32>
    %19 = tpu.matmul %16, %18, %cst_21 {dimension_numbers = #tpu.dot_dimension_numbers<[1], [0], [0], [1], [0, 0, 1, 1], [], []>} : vector<8x12xbf16>, vector<12x8xbf16>, vector<8x8xf32> -> vector<8x8xf32>
    %20 = arith.addf %14, %19 : vector<8x8xf32>
    %c0_22 = arith.constant 0 : index
    %c1_23 = arith.constant 1 : index
    %c1_24 = arith.constant 1 : index
    %c0_25 = arith.constant 0 : index
    %21 = vector.load %arg1[%c0_22, %c1_23, %c1_24, %c0_25] : memref<1x9x9x12xbf16, #tpu.memory_space<vmem>>, vector<1x1x8x12xbf16>
    %22 = vector.shape_cast %21 : vector<1x1x8x12xbf16> to vector<8x12xbf16>
    %c3 = arith.constant 3 : index
    %c0_26 = arith.constant 0 : index
    %c0_27 = arith.constant 0 : index
    %23 = vector.load %arg2[%c3, %c0_26, %c0_27] : memref<4x12x8xbf16, #tpu.memory_space<vmem>>, vector<1x12x8xbf16>
    %24 = vector.shape_cast %23 : vector<1x12x8xbf16> to vector<12x8xbf16>
    %cst_28 = arith.constant dense<0.000000e+00> : vector<8x8xf32>
    %25 = tpu.matmul %22, %24, %cst_28 {dimension_numbers = #tpu.dot_dimension_numbers<[1], [0], [0], [1], [0, 0, 1, 1], [], []>} : vector<8x12xbf16>, vector<12x8xbf16>, vector<8x8xf32> -> vector<8x8xf32>
    %26 = arith.addf %20, %25 : vector<8x8xf32>
    %cst_29 = arith.constant 0.000000e+00 : f32
    %27 = vector.broadcast %cst_29 : f32 to vector<8x8xf32>
    %28 = arith.maximumf %26, %27 : vector<8x8xf32>
    %29 = arith.truncf %28 : vector<8x8xf32> to vector<8x8xbf16>
    %c0_30 = arith.constant 0 : index
    %c0_31 = arith.constant 0 : index
    %c0_32 = arith.constant 0 : index
    %c0_33 = arith.constant 0 : index
    %30 = vector.load %arg4[%c0_30, %c0_31, %c0_32, %c0_33] : memref<1x8x8x8xbf16, #tpu.memory_space<vmem>>, vector<1x1x8x8xbf16>
    %31 = vector.shape_cast %30 : vector<1x1x8x8xbf16> to vector<8x8xbf16>
    %32 = vector.shape_cast %29 : vector<8x8xbf16> to vector<1x1x8x8xbf16>
    tpu.vector_store %arg4[%c0_30, %c0_31, %c0_32, %c0_33], %32 {strides = array<i32>} : memref<1x8x8x8xbf16, #tpu.memory_space<vmem>>, vector<1x1x8x8xbf16>,
    %c0_34 = arith.constant 0 : index
    %c1_35 = arith.constant 1 : index
    %c0_36 = arith.constant 0 : index
    %c0_37 = arith.constant 0 : index
    %33 = vector.load %arg1[%c0_34, %c1_35, %c0_36, %c0_37] : memref<1x9x9x12xbf16, #tpu.memory_space<vmem>>, vector<1x1x8x12xbf16>
    %34 = vector.shape_cast %33 : vector<1x1x8x12xbf16> to vector<8x12xbf16>
    %c0_38 = arith.constant 0 : index
    %c0_39 = arith.constant 0 : index
    %c0_40 = arith.constant 0 : index
    %35 = vector.load %arg2[%c0_38, %c0_39, %c0_40] : memref<4x12x8xbf16, #tpu.memory_space<vmem>>, vector<1x12x8xbf16>
    %36 = vector.shape_cast %35 : vector<1x12x8xbf16> to vector<12x8xbf16>
    %cst_41 = arith.constant dense<0.000000e+00> : vector<8x8xf32>
    %37 = tpu.matmul %34, %36, %cst_41 {dimension_numbers = #tpu.dot_dimension_numbers<[1], [0], [0], [1], [0, 0, 1, 1], [], []>} : vector<8x12xbf16>, vector<12x8xbf16>, vector<8x8xf32> -> vector<8x8xf32>
    %38 = arith.addf %2, %37 : vector<8x8xf32>
    %c0_42 = arith.constant 0 : index
    %c1_43 = arith.constant 1 : index
    %c1_44 = arith.constant 1 : index
    %c0_45 = arith.constant 0 : index
    %39 = vector.load %arg1[%c0_42, %c1_43, %c1_44, %c0_45] : memref<1x9x9x12xbf16, #tpu.memory_space<vmem>>, vector<1x1x8x12xbf16>
    %40 = vector.shape_cast %39 : vector<1x1x8x12xbf16> to vector<8x12xbf16>
    %c1_46 = arith.constant 1 : index
    %c0_47 = arith.constant 0 : index
    %c0_48 = arith.constant 0 : index
    %41 = vector.load %arg2[%c1_46, %c0_47, %c0_48] : memref<4x12x8xbf16, #tpu.memory_space<vmem>>, vector<1x12x8xbf16>
    %42 = vector.shape_cast %41 : vector<1x12x8xbf16> to vector<12x8xbf16>
    %cst_49 = arith.constant dense<0.000000e+00> : vector<8x8xf32>
    %43 = tpu.matmul %40, %42, %cst_49 {dimension_numbers = #tpu.dot_dimension_numbers<[1], [0], [0], [1], [0, 0, 1, 1], [], []>} : vector<8x12xbf16>, vector<12x8xbf16>, vector<8x8xf32> -> vector<8x8xf32>
    %44 = arith.addf %38, %43 : vector<8x8xf32>
    %c0_50 = arith.constant 0 : index
    %c2_51 = arith.constant 2 : index
    %c0_52 = arith.constant 0 : index
    %c0_53 = arith.constant 0 : index
    %45 = vector.load %arg1[%c0_50, %c2_51, %c0_52, %c0_53] : memref<1x9x9x12xbf16, #tpu.memory_space<vmem>>, vector<1x1x8x12xbf16>
    %46 = vector.shape_cast %45 : vector<1x1x8x12xbf16> to vector<8x12xbf16>
    %c2_54 = arith.constant 2 : index
    %c0_55 = arith.constant 0 : index
    %c0_56 = arith.constant 0 : index
    %47 = vector.load %arg2[%c2_54, %c0_55, %c0_56] : memref<4x12x8xbf16, #tpu.memory_space<vmem>>, vector<1x12x8xbf16>
    %48 = vector.shape_cast %47 : vector<1x12x8xbf16> to vector<12x8xbf16>
    %cst_57 = arith.constant dense<0.000000e+00> : vector<8x8xf32>
    %49 = tpu.matmul %46, %48, %cst_57 {dimension_numbers = #tpu.dot_dimension_numbers<[1], [0], [0], [1], [0, 0, 1, 1], [], []>} : vector<8x12xbf16>, vector<12x8xbf16>, vector<8x8xf32> -> vector<8x8xf32>
    %50 = arith.addf %44, %49 : vector<8x8xf32>
    %c0_58 = arith.constant 0 : index
    %c2_59 = arith.constant 2 : index
    %c1_60 = arith.constant 1 : index
    %c0_61 = arith.constant 0 : index
    %51 = vector.load %arg1[%c0_58, %c2_59, %c1_60, %c0_61] : memref<1x9x9x12xbf16, #tpu.memory_space<vmem>>, vector<1x1x8x12xbf16>
    %52 = vector.shape_cast %51 : vector<1x1x8x12xbf16> to vector<8x12xbf16>
    %c3_62 = arith.constant 3 : index
    %c0_63 = arith.constant 0 : index
    %c0_64 = arith.constant 0 : index
    %53 = vector.load %arg2[%c3_62, %c0_63, %c0_64] : memref<4x12x8xbf16, #tpu.memory_space<vmem>>, vector<1x12x8xbf16>
    %54 = vector.shape_cast %53 : vector<1x12x8xbf16> to vector<12x8xbf16>
    %cst_65 = arith.constant dense<0.000000e+00> : vector<8x8xf32>
    %55 = tpu.matmul %52, %54, %cst_65 {dimension_numbers = #tpu.dot_dimension_numbers<[1], [0], [0], [1], [0, 0, 1, 1], [], []>} : vector<8x12xbf16>, vector<12x8xbf16>, vector<8x8xf32> -> vector<8x8xf32>
    %56 = arith.addf %50, %55 : vector<8x8xf32>
    %cst_66 = arith.constant 0.000000e+00 : f32
    %57 = vector.broadcast %cst_66 : f32 to vector<8x8xf32>
    %58 = arith.maximumf %56, %57 : vector<8x8xf32>
    %59 = arith.truncf %58 : vector<8x8xf32> to vector<8x8xbf16>
    %c0_67 = arith.constant 0 : index
    %c1_68 = arith.constant 1 : index
    %c0_69 = arith.constant 0 : index
    %c0_70 = arith.constant 0 : index
    %60 = vector.load %arg4[%c0_67, %c1_68, %c0_69, %c0_70] : memref<1x8x8x8xbf16, #tpu.memory_space<vmem>>, vector<1x1x8x8xbf16>
    %61 = vector.shape_cast %60 : vector<1x1x8x8xbf16> to vector<8x8xbf16>
    %62 = vector.shape_cast %59 : vector<8x8xbf16> to vector<1x1x8x8xbf16>
    tpu.vector_store %arg4[%c0_67, %c1_68, %c0_69, %c0_70], %62 {strides = array<i32>} : memref<1x8x8x8xbf16, #tpu.memory_space<vmem>>, vector<1x1x8x8xbf16>,
    %c0_71 = arith.constant 0 : index
    %c2_72 = arith.constant 2 : index
    %c0_73 = arith.constant 0 : index
    %c0_74 = arith.constant 0 : index
    %63 = vector.load %arg1[%c0_71, %c2_72, %c0_73, %c0_74] : memref<1x9x9x12xbf16, #tpu.memory_space<vmem>>, vector<1x1x8x12xbf16>
    %64 = vector.shape_cast %63 : vector<1x1x8x12xbf16> to vector<8x12xbf16>
    %c0_75 = arith.constant 0 : index
    %c0_76 = arith.constant 0 : index
    %c0_77 = arith.constant 0 : index
    %65 = vector.load %arg2[%c0_75, %c0_76, %c0_77] : memref<4x12x8xbf16, #tpu.memory_space<vmem>>, vector<1x12x8xbf16>
    %66 = vector.shape_cast %65 : vector<1x12x8xbf16> to vector<12x8xbf16>
    %cst_78 = arith.constant dense<0.000000e+00> : vector<8x8xf32>
    %67 = tpu.matmul %64, %66, %cst_78 {dimension_numbers = #tpu.dot_dimension_numbers<[1], [0], [0], [1], [0, 0, 1, 1], [], []>} : vector<8x12xbf16>, vector<12x8xbf16>, vector<8x8xf32> -> vector<8x8xf32>
    %68 = arith.addf %2, %67 : vector<8x8xf32>
    %c0_79 = arith.constant 0 : index
    %c2_80 = arith.constant 2 : index
    %c1_81 = arith.constant 1 : index
    %c0_82 = arith.constant 0 : index
    %69 = vector.load %arg1[%c0_79, %c2_80, %c1_81, %c0_82] : memref<1x9x9x12xbf16, #tpu.memory_space<vmem>>, vector<1x1x8x12xbf16>
    %70 = vector.shape_cast %69 : vector<1x1x8x12xbf16> to vector<8x12xbf16>
    %c1_83 = arith.constant 1 : index
    %c0_84 = arith.constant 0 : index
    %c0_85 = arith.constant 0 : index
    %71 = vector.load %arg2[%c1_83, %c0_84, %c0_85] : memref<4x12x8xbf16, #tpu.memory_space<vmem>>, vector<1x12x8xbf16>
    %72 = vector.shape_cast %71 : vector<1x12x8xbf16> to vector<12x8xbf16>
    %cst_86 = arith.constant dense<0.000000e+00> : vector<8x8xf32>
    %73 = tpu.matmul %70, %72, %cst_86 {dimension_numbers = #tpu.dot_dimension_numbers<[1], [0], [0], [1], [0, 0, 1, 1], [], []>} : vector<8x12xbf16>, vector<12x8xbf16>, vector<8x8xf32> -> vector<8x8xf32>
    %74 = arith.addf %68, %73 : vector<8x8xf32>
    %c0_87 = arith.constant 0 : index
    %c3_88 = arith.constant 3 : index
    %c0_89 = arith.constant 0 : index
    %c0_90 = arith.constant 0 : index
    %75 = vector.load %arg1[%c0_87, %c3_88, %c0_89, %c0_90] : memref<1x9x9x12xbf16, #tpu.memory_space<vmem>>, vector<1x1x8x12xbf16>
    %76 = vector.shape_cast %75 : vector<1x1x8x12xbf16> to vector<8x12xbf16>
    %c2_91 = arith.constant 2 : index
    %c0_92 = arith.constant 0 : index
    %c0_93 = arith.constant 0 : index
    %77 = vector.load %arg2[%c2_91, %c0_92, %c0_93] : memref<4x12x8xbf16, #tpu.memory_space<vmem>>, vector<1x12x8xbf16>
    %78 = vector.shape_cast %77 : vector<1x12x8xbf16> to vector<12x8xbf16>
    %cst_94 = arith.constant dense<0.000000e+00> : vector<8x8xf32>
    %79 = tpu.matmul %76, %78, %cst_94 {dimension_numbers = #tpu.dot_dimension_numbers<[1], [0], [0], [1], [0, 0, 1, 1], [], []>} : vector<8x12xbf16>, vector<12x8xbf16>, vector<8x8xf32> -> vector<8x8xf32>
    %80 = arith.addf %74, %79 : vector<8x8xf32>
    %c0_95 = arith.constant 0 : index
    %c3_96 = arith.constant 3 : index
    %c1_97 = arith.constant 1 : index
    %c0_98 = arith.constant 0 : index
    %81 = vector.load %arg1[%c0_95, %c3_96, %c1_97, %c0_98] : memref<1x9x9x12xbf16, #tpu.memory_space<vmem>>, vector<1x1x8x12xbf16>
    %82 = vector.shape_cast %81 : vector<1x1x8x12xbf16> to vector<8x12xbf16>
    %c3_99 = arith.constant 3 : index
    %c0_100 = arith.constant 0 : index
    %c0_101 = arith.constant 0 : index
    %83 = vector.load %arg2[%c3_99, %c0_100, %c0_101] : memref<4x12x8xbf16, #tpu.memory_space<vmem>>, vector<1x12x8xbf16>
    %84 = vector.shape_cast %83 : vector<1x12x8xbf16> to vector<12x8xbf16>
    %cst_102 = arith.constant dense<0.000000e+00> : vector<8x8xf32>
    %85 = tpu.matmul %82, %84, %cst_102 {dimension_numbers = #tpu.dot_dimension_numbers<[1], [0], [0], [1], [0, 0, 1, 1], [], []>} : vector<8x12xbf16>, vector<12x8xbf16>, vector<8x8xf32> -> vector<8x8xf32>
    %86 = arith.addf %80, %85 : vector<8x8xf32>
    %cst_103 = arith.constant 0.000000e+00 : f32
    %87 = vector.broadcast %cst_103 : f32 to vector<8x8xf32>
    %88 = arith.maximumf %86, %87 : vector<8x8xf32>
    %89 = arith.truncf %88 : vector<8x8xf32> to vector<8x8xbf16>
    %c0_104 = arith.constant 0 : index
    %c2_105 = arith.constant 2 : index
    %c0_106 = arith.constant 0 : index
    %c0_107 = arith.constant 0 : index
    %90 = vector.load %arg4[%c0_104, %c2_105, %c0_106, %c0_107] : memref<1x8x8x8xbf16, #tpu.memory_space<vmem>>, vector<1x1x8x8xbf16>
    %91 = vector.shape_cast %90 : vector<1x1x8x8xbf16> to vector<8x8xbf16>
    %92 = vector.shape_cast %89 : vector<8x8xbf16> to vector<1x1x8x8xbf16>
    tpu.vector_store %arg4[%c0_104, %c2_105, %c0_106, %c0_107], %92 {strides = array<i32>} : memref<1x8x8x8xbf16, #tpu.memory_space<vmem>>, vector<1x1x8x8xbf16>,
    %c0_108 = arith.constant 0 : index
    %c3_109 = arith.constant 3 : index
    %c0_110 = arith.constant 0 : index
    %c0_111 = arith.constant 0 : index
    %93 = vector.load %arg1[%c0_108, %c3_109, %c0_110, %c0_111] : memref<1x9x9x12xbf16, #tpu.memory_space<vmem>>, vector<1x1x8x12xbf16>
    %94 = vector.shape_cast %93 : vector<1x1x8x12xbf16> to vector<8x12xbf16>
    %c0_112 = arith.constant 0 : index
    %c0_113 = arith.constant 0 : index
    %c0_114 = arith.constant 0 : index
    %95 = vector.load %arg2[%c0_112, %c0_113, %c0_114] : memref<4x12x8xbf16, #tpu.memory_space<vmem>>, vector<1x12x8xbf16>
    %96 = vector.shape_cast %95 : vector<1x12x8xbf16> to vector<12x8xbf16>
    %cst_115 = arith.constant dense<0.000000e+00> : vector<8x8xf32>
    %97 = tpu.matmul %94, %96, %cst_115 {dimension_numbers = #tpu.dot_dimension_numbers<[1], [0], [0], [1], [0, 0, 1, 1], [], []>} : vector<8x12xbf16>, vector<12x8xbf16>, vector<8x8xf32> -> vector<8x8xf32>
    %98 = arith.addf %2, %97 : vector<8x8xf32>
    %c0_116 = arith.constant 0 : index
    %c3_117 = arith.constant 3 : index
    %c1_118 = arith.constant 1 : index
    %c0_119 = arith.constant 0 : index
    %99 = vector.load %arg1[%c0_116, %c3_117, %c1_118, %c0_119] : memref<1x9x9x12xbf16, #tpu.memory_space<vmem>>, vector<1x1x8x12xbf16>
    %100 = vector.shape_cast %99 : vector<1x1x8x12xbf16> to vector<8x12xbf16>
    %c1_120 = arith.constant 1 : index
    %c0_121 = arith.constant 0 : index
    %c0_122 = arith.constant 0 : index
    %101 = vector.load %arg2[%c1_120, %c0_121, %c0_122] : memref<4x12x8xbf16, #tpu.memory_space<vmem>>, vector<1x12x8xbf16>
    %102 = vector.shape_cast %101 : vector<1x12x8xbf16> to vector<12x8xbf16>
    %cst_123 = arith.constant dense<0.000000e+00> : vector<8x8xf32>
    %103 = tpu.matmul %100, %102, %cst_123 {dimension_numbers = #tpu.dot_dimension_numbers<[1], [0], [0], [1], [0, 0, 1, 1], [], []>} : vector<8x12xbf16>, vector<12x8xbf16>, vector<8x8xf32> -> vector<8x8xf32>
    %104 = arith.addf %98, %103 : vector<8x8xf32>
    %c0_124 = arith.constant 0 : index
    %c4 = arith.constant 4 : index
    %c0_125 = arith.constant 0 : index
    %c0_126 = arith.constant 0 : index
    %105 = vector.load %arg1[%c0_124, %c4, %c0_125, %c0_126] : memref<1x9x9x12xbf16, #tpu.memory_space<vmem>>, vector<1x1x8x12xbf16>
    %106 = vector.shape_cast %105 : vector<1x1x8x12xbf16> to vector<8x12xbf16>
    %c2_127 = arith.constant 2 : index
    %c0_128 = arith.constant 0 : index
    %c0_129 = arith.constant 0 : index
    %107 = vector.load %arg2[%c2_127, %c0_128, %c0_129] : memref<4x12x8xbf16, #tpu.memory_space<vmem>>, vector<1x12x8xbf16>
    %108 = vector.shape_cast %107 : vector<1x12x8xbf16> to vector<12x8xbf16>
    %cst_130 = arith.constant dense<0.000000e+00> : vector<8x8xf32>
    %109 = tpu.matmul %106, %108, %cst_130 {dimension_numbers = #tpu.dot_dimension_numbers<[1], [0], [0], [1], [0, 0, 1, 1], [], []>} : vector<8x12xbf16>, vector<12x8xbf16>, vector<8x8xf32> -> vector<8x8xf32>
    %110 = arith.addf %104, %109 : vector<8x8xf32>
    %c0_131 = arith.constant 0 : index
    %c4_132 = arith.constant 4 : index
    %c1_133 = arith.constant 1 : index
    %c0_134 = arith.constant 0 : index
    %111 = vector.load %arg1[%c0_131, %c4_132, %c1_133, %c0_134] : memref<1x9x9x12xbf16, #tpu.memory_space<vmem>>, vector<1x1x8x12xbf16>
    %112 = vector.shape_cast %111 : vector<1x1x8x12xbf16> to vector<8x12xbf16>
    %c3_135 = arith.constant 3 : index
    %c0_136 = arith.constant 0 : index
    %c0_137 = arith.constant 0 : index
    %113 = vector.load %arg2[%c3_135, %c0_136, %c0_137] : memref<4x12x8xbf16, #tpu.memory_space<vmem>>, vector<1x12x8xbf16>
    %114 = vector.shape_cast %113 : vector<1x12x8xbf16> to vector<12x8xbf16>
    %cst_138 = arith.constant dense<0.000000e+00> : vector<8x8xf32>
    %115 = tpu.matmul %112, %114, %cst_138 {dimension_numbers = #tpu.dot_dimension_numbers<[1], [0], [0], [1], [0, 0, 1, 1], [], []>} : vector<8x12xbf16>, vector<12x8xbf16>, vector<8x8xf32> -> vector<8x8xf32>
    %116 = arith.addf %110, %115 : vector<8x8xf32>
    %cst_139 = arith.constant 0.000000e+00 : f32
    %117 = vector.broadcast %cst_139 : f32 to vector<8x8xf32>
    %118 = arith.maximumf %116, %117 : vector<8x8xf32>
    %119 = arith.truncf %118 : vector<8x8xf32> to vector<8x8xbf16>
    %c0_140 = arith.constant 0 : index
    %c3_141 = arith.constant 3 : index
    %c0_142 = arith.constant 0 : index
    %c0_143 = arith.constant 0 : index
    %120 = vector.load %arg4[%c0_140, %c3_141, %c0_142, %c0_143] : memref<1x8x8x8xbf16, #tpu.memory_space<vmem>>, vector<1x1x8x8xbf16>
    %121 = vector.shape_cast %120 : vector<1x1x8x8xbf16> to vector<8x8xbf16>
    %122 = vector.shape_cast %119 : vector<8x8xbf16> to vector<1x1x8x8xbf16>
    tpu.vector_store %arg4[%c0_140, %c3_141, %c0_142, %c0_143], %122 {strides = array<i32>} : memref<1x8x8x8xbf16, #tpu.memory_space<vmem>>, vector<1x1x8x8xbf16>,
    %c0_144 = arith.constant 0 : index
    %c4_145 = arith.constant 4 : index
    %c0_146 = arith.constant 0 : index
    %c0_147 = arith.constant 0 : index
    %123 = vector.load %arg1[%c0_144, %c4_145, %c0_146, %c0_147] : memref<1x9x9x12xbf16, #tpu.memory_space<vmem>>, vector<1x1x8x12xbf16>
    %124 = vector.shape_cast %123 : vector<1x1x8x12xbf16> to vector<8x12xbf16>
    %c0_148 = arith.constant 0 : index
    %c0_149 = arith.constant 0 : index
    %c0_150 = arith.constant 0 : index
    %125 = vector.load %arg2[%c0_148, %c0_149, %c0_150] : memref<4x12x8xbf16, #tpu.memory_space<vmem>>, vector<1x12x8xbf16>
    %126 = vector.shape_cast %125 : vector<1x12x8xbf16> to vector<12x8xbf16>
    %cst_151 = arith.constant dense<0.000000e+00> : vector<8x8xf32>
    %127 = tpu.matmul %124, %126, %cst_151 {dimension_numbers = #tpu.dot_dimension_numbers<[1], [0], [0], [1], [0, 0, 1, 1], [], []>} : vector<8x12xbf16>, vector<12x8xbf16>, vector<8x8xf32> -> vector<8x8xf32>
    %128 = arith.addf %2, %127 : vector<8x8xf32>
    %c0_152 = arith.constant 0 : index
    %c4_153 = arith.constant 4 : index
    %c1_154 = arith.constant 1 : index
    %c0_155 = arith.constant 0 : index
    %129 = vector.load %arg1[%c0_152, %c4_153, %c1_154, %c0_155] : memref<1x9x9x12xbf16, #tpu.memory_space<vmem>>, vector<1x1x8x12xbf16>
    %130 = vector.shape_cast %129 : vector<1x1x8x12xbf16> to vector<8x12xbf16>
    %c1_156 = arith.constant 1 : index
    %c0_157 = arith.constant 0 : index
    %c0_158 = arith.constant 0 : index
    %131 = vector.load %arg2[%c1_156, %c0_157, %c0_158] : memref<4x12x8xbf16, #tpu.memory_space<vmem>>, vector<1x12x8xbf16>
    %132 = vector.shape_cast %131 : vector<1x12x8xbf16> to vector<12x8xbf16>
    %cst_159 = arith.constant dense<0.000000e+00> : vector<8x8xf32>
    %133 = tpu.matmul %130, %132, %cst_159 {dimension_numbers = #tpu.dot_dimension_numbers<[1], [0], [0], [1], [0, 0, 1, 1], [], []>} : vector<8x12xbf16>, vector<12x8xbf16>, vector<8x8xf32> -> vector<8x8xf32>
    %134 = arith.addf %128, %133 : vector<8x8xf32>
    %c0_160 = arith.constant 0 : index
    %c5 = arith.constant 5 : index
    %c0_161 = arith.constant 0 : index
    %c0_162 = arith.constant 0 : index
    %135 = vector.load %arg1[%c0_160, %c5, %c0_161, %c0_162] : memref<1x9x9x12xbf16, #tpu.memory_space<vmem>>, vector<1x1x8x12xbf16>
    %136 = vector.shape_cast %135 : vector<1x1x8x12xbf16> to vector<8x12xbf16>
    %c2_163 = arith.constant 2 : index
    %c0_164 = arith.constant 0 : index
    %c0_165 = arith.constant 0 : index
    %137 = vector.load %arg2[%c2_163, %c0_164, %c0_165] : memref<4x12x8xbf16, #tpu.memory_space<vmem>>, vector<1x12x8xbf16>
    %138 = vector.shape_cast %137 : vector<1x12x8xbf16> to vector<12x8xbf16>
    %cst_166 = arith.constant dense<0.000000e+00> : vector<8x8xf32>
    %139 = tpu.matmul %136, %138, %cst_166 {dimension_numbers = #tpu.dot_dimension_numbers<[1], [0], [0], [1], [0, 0, 1, 1], [], []>} : vector<8x12xbf16>, vector<12x8xbf16>, vector<8x8xf32> -> vector<8x8xf32>
    %140 = arith.addf %134, %139 : vector<8x8xf32>
    %c0_167 = arith.constant 0 : index
    %c5_168 = arith.constant 5 : index
    %c1_169 = arith.constant 1 : index
    %c0_170 = arith.constant 0 : index
    %141 = vector.load %arg1[%c0_167, %c5_168, %c1_169, %c0_170] : memref<1x9x9x12xbf16, #tpu.memory_space<vmem>>, vector<1x1x8x12xbf16>
    %142 = vector.shape_cast %141 : vector<1x1x8x12xbf16> to vector<8x12xbf16>
    %c3_171 = arith.constant 3 : index
    %c0_172 = arith.constant 0 : index
    %c0_173 = arith.constant 0 : index
    %143 = vector.load %arg2[%c3_171, %c0_172, %c0_173] : memref<4x12x8xbf16, #tpu.memory_space<vmem>>, vector<1x12x8xbf16>
    %144 = vector.shape_cast %143 : vector<1x12x8xbf16> to vector<12x8xbf16>
    %cst_174 = arith.constant dense<0.000000e+00> : vector<8x8xf32>
    %145 = tpu.matmul %142, %144, %cst_174 {dimension_numbers = #tpu.dot_dimension_numbers<[1], [0], [0], [1], [0, 0, 1, 1], [], []>} : vector<8x12xbf16>, vector<12x8xbf16>, vector<8x8xf32> -> vector<8x8xf32>
    %146 = arith.addf %140, %145 : vector<8x8xf32>
    %cst_175 = arith.constant 0.000000e+00 : f32
    %147 = vector.broadcast %cst_175 : f32 to vector<8x8xf32>
    %148 = arith.maximumf %146, %147 : vector<8x8xf32>
    %149 = arith.truncf %148 : vector<8x8xf32> to vector<8x8xbf16>
    %c0_176 = arith.constant 0 : index
    %c4_177 = arith.constant 4 : index
    %c0_178 = arith.constant 0 : index
    %c0_179 = arith.constant 0 : index
    %150 = vector.load %arg4[%c0_176, %c4_177, %c0_178, %c0_179] : memref<1x8x8x8xbf16, #tpu.memory_space<vmem>>, vector<1x1x8x8xbf16>
    %151 = vector.shape_cast %150 : vector<1x1x8x8xbf16> to vector<8x8xbf16>
    %152 = vector.shape_cast %149 : vector<8x8xbf16> to vector<1x1x8x8xbf16>
    tpu.vector_store %arg4[%c0_176, %c4_177, %c0_178, %c0_179], %152 {strides = array<i32>} : memref<1x8x8x8xbf16, #tpu.memory_space<vmem>>, vector<1x1x8x8xbf16>,
    %c0_180 = arith.constant 0 : index
    %c5_181 = arith.constant 5 : index
    %c0_182 = arith.constant 0 : index
    %c0_183 = arith.constant 0 : index
    %153 = vector.load %arg1[%c0_180, %c5_181, %c0_182, %c0_183] : memref<1x9x9x12xbf16, #tpu.memory_space<vmem>>, vector<1x1x8x12xbf16>
    %154 = vector.shape_cast %153 : vector<1x1x8x12xbf16> to vector<8x12xbf16>
    %c0_184 = arith.constant 0 : index
    %c0_185 = arith.constant 0 : index
    %c0_186 = arith.constant 0 : index
    %155 = vector.load %arg2[%c0_184, %c0_185, %c0_186] : memref<4x12x8xbf16, #tpu.memory_space<vmem>>, vector<1x12x8xbf16>
    %156 = vector.shape_cast %155 : vector<1x12x8xbf16> to vector<12x8xbf16>
    %cst_187 = arith.constant dense<0.000000e+00> : vector<8x8xf32>
    %157 = tpu.matmul %154, %156, %cst_187 {dimension_numbers = #tpu.dot_dimension_numbers<[1], [0], [0], [1], [0, 0, 1, 1], [], []>} : vector<8x12xbf16>, vector<12x8xbf16>, vector<8x8xf32> -> vector<8x8xf32>
    %158 = arith.addf %2, %157 : vector<8x8xf32>
    %c0_188 = arith.constant 0 : index
    %c5_189 = arith.constant 5 : index
    %c1_190 = arith.constant 1 : index
    %c0_191 = arith.constant 0 : index
    %159 = vector.load %arg1[%c0_188, %c5_189, %c1_190, %c0_191] : memref<1x9x9x12xbf16, #tpu.memory_space<vmem>>, vector<1x1x8x12xbf16>
    %160 = vector.shape_cast %159 : vector<1x1x8x12xbf16> to vector<8x12xbf16>
    %c1_192 = arith.constant 1 : index
    %c0_193 = arith.constant 0 : index
    %c0_194 = arith.constant 0 : index
    %161 = vector.load %arg2[%c1_192, %c0_193, %c0_194] : memref<4x12x8xbf16, #tpu.memory_space<vmem>>, vector<1x12x8xbf16>
    %162 = vector.shape_cast %161 : vector<1x12x8xbf16> to vector<12x8xbf16>
    %cst_195 = arith.constant dense<0.000000e+00> : vector<8x8xf32>
    %163 = tpu.matmul %160, %162, %cst_195 {dimension_numbers = #tpu.dot_dimension_numbers<[1], [0], [0], [1], [0, 0, 1, 1], [], []>} : vector<8x12xbf16>, vector<12x8xbf16>, vector<8x8xf32> -> vector<8x8xf32>
    %164 = arith.addf %158, %163 : vector<8x8xf32>
    %c0_196 = arith.constant 0 : index
    %c6 = arith.constant 6 : index
    %c0_197 = arith.constant 0 : index
    %c0_198 = arith.constant 0 : index
    %165 = vector.load %arg1[%c0_196, %c6, %c0_197, %c0_198] : memref<1x9x9x12xbf16, #tpu.memory_space<vmem>>, vector<1x1x8x12xbf16>
    %166 = vector.shape_cast %165 : vector<1x1x8x12xbf16> to vector<8x12xbf16>
    %c2_199 = arith.constant 2 : index
    %c0_200 = arith.constant 0 : index
    %c0_201 = arith.constant 0 : index
    %167 = vector.load %arg2[%c2_199, %c0_200, %c0_201] : memref<4x12x8xbf16, #tpu.memory_space<vmem>>, vector<1x12x8xbf16>
    %168 = vector.shape_cast %167 : vector<1x12x8xbf16> to vector<12x8xbf16>
    %cst_202 = arith.constant dense<0.000000e+00> : vector<8x8xf32>
    %169 = tpu.matmul %166, %168, %cst_202 {dimension_numbers = #tpu.dot_dimension_numbers<[1], [0], [0], [1], [0, 0, 1, 1], [], []>} : vector<8x12xbf16>, vector<12x8xbf16>, vector<8x8xf32> -> vector<8x8xf32>
    %170 = arith.addf %164, %169 : vector<8x8xf32>
    %c0_203 = arith.constant 0 : index
    %c6_204 = arith.constant 6 : index
    %c1_205 = arith.constant 1 : index
    %c0_206 = arith.constant 0 : index
    %171 = vector.load %arg1[%c0_203, %c6_204, %c1_205, %c0_206] : memref<1x9x9x12xbf16, #tpu.memory_space<vmem>>, vector<1x1x8x12xbf16>
    %172 = vector.shape_cast %171 : vector<1x1x8x12xbf16> to vector<8x12xbf16>
    %c3_207 = arith.constant 3 : index
    %c0_208 = arith.constant 0 : index
    %c0_209 = arith.constant 0 : index
    %173 = vector.load %arg2[%c3_207, %c0_208, %c0_209] : memref<4x12x8xbf16, #tpu.memory_space<vmem>>, vector<1x12x8xbf16>
    %174 = vector.shape_cast %173 : vector<1x12x8xbf16> to vector<12x8xbf16>
    %cst_210 = arith.constant dense<0.000000e+00> : vector<8x8xf32>
    %175 = tpu.matmul %172, %174, %cst_210 {dimension_numbers = #tpu.dot_dimension_numbers<[1], [0], [0], [1], [0, 0, 1, 1], [], []>} : vector<8x12xbf16>, vector<12x8xbf16>, vector<8x8xf32> -> vector<8x8xf32>
    %176 = arith.addf %170, %175 : vector<8x8xf32>
    %cst_211 = arith.constant 0.000000e+00 : f32
    %177 = vector.broadcast %cst_211 : f32 to vector<8x8xf32>
    %178 = arith.maximumf %176, %177 : vector<8x8xf32>
    %179 = arith.truncf %178 : vector<8x8xf32> to vector<8x8xbf16>
    %c0_212 = arith.constant 0 : index
    %c5_213 = arith.constant 5 : index
    %c0_214 = arith.constant 0 : index
    %c0_215 = arith.constant 0 : index
    %180 = vector.load %arg4[%c0_212, %c5_213, %c0_214, %c0_215] : memref<1x8x8x8xbf16, #tpu.memory_space<vmem>>, vector<1x1x8x8xbf16>
    %181 = vector.shape_cast %180 : vector<1x1x8x8xbf16> to vector<8x8xbf16>
    %182 = vector.shape_cast %179 : vector<8x8xbf16> to vector<1x1x8x8xbf16>
    tpu.vector_store %arg4[%c0_212, %c5_213, %c0_214, %c0_215], %182 {strides = array<i32>} : memref<1x8x8x8xbf16, #tpu.memory_space<vmem>>, vector<1x1x8x8xbf16>,
    %c0_216 = arith.constant 0 : index
    %c6_217 = arith.constant 6 : index
    %c0_218 = arith.constant 0 : index
    %c0_219 = arith.constant 0 : index
    %183 = vector.load %arg1[%c0_216, %c6_217, %c0_218, %c0_219] : memref<1x9x9x12xbf16, #tpu.memory_space<vmem>>, vector<1x1x8x12xbf16>
    %184 = vector.shape_cast %183 : vector<1x1x8x12xbf16> to vector<8x12xbf16>
    %c0_220 = arith.constant 0 : index
    %c0_221 = arith.constant 0 : index
    %c0_222 = arith.constant 0 : index
    %185 = vector.load %arg2[%c0_220, %c0_221, %c0_222] : memref<4x12x8xbf16, #tpu.memory_space<vmem>>, vector<1x12x8xbf16>
    %186 = vector.shape_cast %185 : vector<1x12x8xbf16> to vector<12x8xbf16>
    %cst_223 = arith.constant dense<0.000000e+00> : vector<8x8xf32>
    %187 = tpu.matmul %184, %186, %cst_223 {dimension_numbers = #tpu.dot_dimension_numbers<[1], [0], [0], [1], [0, 0, 1, 1], [], []>} : vector<8x12xbf16>, vector<12x8xbf16>, vector<8x8xf32> -> vector<8x8xf32>
    %188 = arith.addf %2, %187 : vector<8x8xf32>
    %c0_224 = arith.constant 0 : index
    %c6_225 = arith.constant 6 : index
    %c1_226 = arith.constant 1 : index
    %c0_227 = arith.constant 0 : index
    %189 = vector.load %arg1[%c0_224, %c6_225, %c1_226, %c0_227] : memref<1x9x9x12xbf16, #tpu.memory_space<vmem>>, vector<1x1x8x12xbf16>
    %190 = vector.shape_cast %189 : vector<1x1x8x12xbf16> to vector<8x12xbf16>
    %c1_228 = arith.constant 1 : index
    %c0_229 = arith.constant 0 : index
    %c0_230 = arith.constant 0 : index
    %191 = vector.load %arg2[%c1_228, %c0_229, %c0_230] : memref<4x12x8xbf16, #tpu.memory_space<vmem>>, vector<1x12x8xbf16>
    %192 = vector.shape_cast %191 : vector<1x12x8xbf16> to vector<12x8xbf16>
    %cst_231 = arith.constant dense<0.000000e+00> : vector<8x8xf32>
    %193 = tpu.matmul %190, %192, %cst_231 {dimension_numbers = #tpu.dot_dimension_numbers<[1], [0], [0], [1], [0, 0, 1, 1], [], []>} : vector<8x12xbf16>, vector<12x8xbf16>, vector<8x8xf32> -> vector<8x8xf32>
    %194 = arith.addf %188, %193 : vector<8x8xf32>
    %c0_232 = arith.constant 0 : index
    %c7 = arith.constant 7 : index
    %c0_233 = arith.constant 0 : index
    %c0_234 = arith.constant 0 : index
    %195 = vector.load %arg1[%c0_232, %c7, %c0_233, %c0_234] : memref<1x9x9x12xbf16, #tpu.memory_space<vmem>>, vector<1x1x8x12xbf16>
    %196 = vector.shape_cast %195 : vector<1x1x8x12xbf16> to vector<8x12xbf16>
    %c2_235 = arith.constant 2 : index
    %c0_236 = arith.constant 0 : index
    %c0_237 = arith.constant 0 : index
    %197 = vector.load %arg2[%c2_235, %c0_236, %c0_237] : memref<4x12x8xbf16, #tpu.memory_space<vmem>>, vector<1x12x8xbf16>
    %198 = vector.shape_cast %197 : vector<1x12x8xbf16> to vector<12x8xbf16>
    %cst_238 = arith.constant dense<0.000000e+00> : vector<8x8xf32>
    %199 = tpu.matmul %196, %198, %cst_238 {dimension_numbers = #tpu.dot_dimension_numbers<[1], [0], [0], [1], [0, 0, 1, 1], [], []>} : vector<8x12xbf16>, vector<12x8xbf16>, vector<8x8xf32> -> vector<8x8xf32>
    %200 = arith.addf %194, %199 : vector<8x8xf32>
    %c0_239 = arith.constant 0 : index
    %c7_240 = arith.constant 7 : index
    %c1_241 = arith.constant 1 : index
    %c0_242 = arith.constant 0 : index
    %201 = vector.load %arg1[%c0_239, %c7_240, %c1_241, %c0_242] : memref<1x9x9x12xbf16, #tpu.memory_space<vmem>>, vector<1x1x8x12xbf16>
    %202 = vector.shape_cast %201 : vector<1x1x8x12xbf16> to vector<8x12xbf16>
    %c3_243 = arith.constant 3 : index
    %c0_244 = arith.constant 0 : index
    %c0_245 = arith.constant 0 : index
    %203 = vector.load %arg2[%c3_243, %c0_244, %c0_245] : memref<4x12x8xbf16, #tpu.memory_space<vmem>>, vector<1x12x8xbf16>
    %204 = vector.shape_cast %203 : vector<1x12x8xbf16> to vector<12x8xbf16>
    %cst_246 = arith.constant dense<0.000000e+00> : vector<8x8xf32>
    %205 = tpu.matmul %202, %204, %cst_246 {dimension_numbers = #tpu.dot_dimension_numbers<[1], [0], [0], [1], [0, 0, 1, 1], [], []>} : vector<8x12xbf16>, vector<12x8xbf16>, vector<8x8xf32> -> vector<8x8xf32>
    %206 = arith.addf %200, %205 : vector<8x8xf32>
    %cst_247 = arith.constant 0.000000e+00 : f32
    %207 = vector.broadcast %cst_247 : f32 to vector<8x8xf32>
    %208 = arith.maximumf %206, %207 : vector<8x8xf32>
    %209 = arith.truncf %208 : vector<8x8xf32> to vector<8x8xbf16>
    %c0_248 = arith.constant 0 : index
    %c6_249 = arith.constant 6 : index
    %c0_250 = arith.constant 0 : index
    %c0_251 = arith.constant 0 : index
    %210 = vector.load %arg4[%c0_248, %c6_249, %c0_250, %c0_251] : memref<1x8x8x8xbf16, #tpu.memory_space<vmem>>, vector<1x1x8x8xbf16>
    %211 = vector.shape_cast %210 : vector<1x1x8x8xbf16> to vector<8x8xbf16>
    %212 = vector.shape_cast %209 : vector<8x8xbf16> to vector<1x1x8x8xbf16>
    tpu.vector_store %arg4[%c0_248, %c6_249, %c0_250, %c0_251], %212 {strides = array<i32>} : memref<1x8x8x8xbf16, #tpu.memory_space<vmem>>, vector<1x1x8x8xbf16>,
    %c0_252 = arith.constant 0 : index
    %c7_253 = arith.constant 7 : index
    %c0_254 = arith.constant 0 : index
    %c0_255 = arith.constant 0 : index
    %213 = vector.load %arg1[%c0_252, %c7_253, %c0_254, %c0_255] : memref<1x9x9x12xbf16, #tpu.memory_space<vmem>>, vector<1x1x8x12xbf16>
    %214 = vector.shape_cast %213 : vector<1x1x8x12xbf16> to vector<8x12xbf16>
    %c0_256 = arith.constant 0 : index
    %c0_257 = arith.constant 0 : index
    %c0_258 = arith.constant 0 : index
    %215 = vector.load %arg2[%c0_256, %c0_257, %c0_258] : memref<4x12x8xbf16, #tpu.memory_space<vmem>>, vector<1x12x8xbf16>
    %216 = vector.shape_cast %215 : vector<1x12x8xbf16> to vector<12x8xbf16>
    %cst_259 = arith.constant dense<0.000000e+00> : vector<8x8xf32>
    %217 = tpu.matmul %214, %216, %cst_259 {dimension_numbers = #tpu.dot_dimension_numbers<[1], [0], [0], [1], [0, 0, 1, 1], [], []>} : vector<8x12xbf16>, vector<12x8xbf16>, vector<8x8xf32> -> vector<8x8xf32>
    %218 = arith.addf %2, %217 : vector<8x8xf32>
    %c0_260 = arith.constant 0 : index
    %c7_261 = arith.constant 7 : index
    %c1_262 = arith.constant 1 : index
    %c0_263 = arith.constant 0 : index
    %219 = vector.load %arg1[%c0_260, %c7_261, %c1_262, %c0_263] : memref<1x9x9x12xbf16, #tpu.memory_space<vmem>>, vector<1x1x8x12xbf16>
    %220 = vector.shape_cast %219 : vector<1x1x8x12xbf16> to vector<8x12xbf16>
    %c1_264 = arith.constant 1 : index
    %c0_265 = arith.constant 0 : index
    %c0_266 = arith.constant 0 : index
    %221 = vector.load %arg2[%c1_264, %c0_265, %c0_266] : memref<4x12x8xbf16, #tpu.memory_space<vmem>>, vector<1x12x8xbf16>
    %222 = vector.shape_cast %221 : vector<1x12x8xbf16> to vector<12x8xbf16>
    %cst_267 = arith.constant dense<0.000000e+00> : vector<8x8xf32>
    %223 = tpu.matmul %220, %222, %cst_267 {dimension_numbers = #tpu.dot_dimension_numbers<[1], [0], [0], [1], [0, 0, 1, 1], [], []>} : vector<8x12xbf16>, vector<12x8xbf16>, vector<8x8xf32> -> vector<8x8xf32>
    %224 = arith.addf %218, %223 : vector<8x8xf32>
    %c0_268 = arith.constant 0 : index
    %c8 = arith.constant 8 : index
    %c0_269 = arith.constant 0 : index
    %c0_270 = arith.constant 0 : index
    %225 = vector.load %arg1[%c0_268, %c8, %c0_269, %c0_270] : memref<1x9x9x12xbf16, #tpu.memory_space<vmem>>, vector<1x1x8x12xbf16>
    %226 = vector.shape_cast %225 : vector<1x1x8x12xbf16> to vector<8x12xbf16>
    %c2_271 = arith.constant 2 : index
    %c0_272 = arith.constant 0 : index
    %c0_273 = arith.constant 0 : index
    %227 = vector.load %arg2[%c2_271, %c0_272, %c0_273] : memref<4x12x8xbf16, #tpu.memory_space<vmem>>, vector<1x12x8xbf16>
    %228 = vector.shape_cast %227 : vector<1x12x8xbf16> to vector<12x8xbf16>
    %cst_274 = arith.constant dense<0.000000e+00> : vector<8x8xf32>
    %229 = tpu.matmul %226, %228, %cst_274 {dimension_numbers = #tpu.dot_dimension_numbers<[1], [0], [0], [1], [0, 0, 1, 1], [], []>} : vector<8x12xbf16>, vector<12x8xbf16>, vector<8x8xf32> -> vector<8x8xf32>
    %230 = arith.addf %224, %229 : vector<8x8xf32>
    %c0_275 = arith.constant 0 : index
    %c8_276 = arith.constant 8 : index
    %c1_277 = arith.constant 1 : index
    %c0_278 = arith.constant 0 : index
    %231 = vector.load %arg1[%c0_275, %c8_276, %c1_277, %c0_278] : memref<1x9x9x12xbf16, #tpu.memory_space<vmem>>, vector<1x1x8x12xbf16>
    %232 = vector.shape_cast %231 : vector<1x1x8x12xbf16> to vector<8x12xbf16>
    %c3_279 = arith.constant 3 : index
    %c0_280 = arith.constant 0 : index
    %c0_281 = arith.constant 0 : index
    %233 = vector.load %arg2[%c3_279, %c0_280, %c0_281] : memref<4x12x8xbf16, #tpu.memory_space<vmem>>, vector<1x12x8xbf16>
    %234 = vector.shape_cast %233 : vector<1x12x8xbf16> to vector<12x8xbf16>
    %cst_282 = arith.constant dense<0.000000e+00> : vector<8x8xf32>
    %235 = tpu.matmul %232, %234, %cst_282 {dimension_numbers = #tpu.dot_dimension_numbers<[1], [0], [0], [1], [0, 0, 1, 1], [], []>} : vector<8x12xbf16>, vector<12x8xbf16>, vector<8x8xf32> -> vector<8x8xf32>
    %236 = arith.addf %230, %235 : vector<8x8xf32>
    %cst_283 = arith.constant 0.000000e+00 : f32
    %237 = vector.broadcast %cst_283 : f32 to vector<8x8xf32>
    %238 = arith.maximumf %236, %237 : vector<8x8xf32>
    %239 = arith.truncf %238 : vector<8x8xf32> to vector<8x8xbf16>
    %c0_284 = arith.constant 0 : index
    %c7_285 = arith.constant 7 : index
    %c0_286 = arith.constant 0 : index
    %c0_287 = arith.constant 0 : index
    %240 = vector.load %arg4[%c0_284, %c7_285, %c0_286, %c0_287] : memref<1x8x8x8xbf16, #tpu.memory_space<vmem>>, vector<1x1x8x8xbf16>
    %241 = vector.shape_cast %240 : vector<1x1x8x8xbf16> to vector<8x8xbf16>
    %242 = vector.shape_cast %239 : vector<8x8xbf16> to vector<1x1x8x8xbf16>
    tpu.vector_store %arg4[%c0_284, %c7_285, %c0_286, %c0_287], %242 {strides = array<i32>} : memref<1x8x8x8xbf16, #tpu.memory_space<vmem>>, vector<1x1x8x8xbf16>,
    return
  }
  func.func @transform_0(%arg0: i32) -> (i32, i32, i32, i32) {
    %c0_i32 = arith.constant 0 : i32
    %c0_i32_0 = arith.constant 0 : i32
    %c0_i32_1 = arith.constant 0 : i32
    %c0_i32_2 = arith.constant 0 : i32
    return %arg0, %c0_i32, %c0_i32_0, %c0_i32_1 : i32, i32, i32, i32
  }
  func.func @transform_1(%arg0: i32) -> (i32, i32, i32) {
    %c0_i32 = arith.constant 0 : i32
    %c0_i32_0 = arith.constant 0 : i32
    %c0_i32_1 = arith.constant 0 : i32
    %c0_i32_2 = arith.constant 0 : i32
    return %c0_i32, %c0_i32_0, %c0_i32_1 : i32, i32, i32
  }
  func.func @transform_2(%arg0: i32) -> (i32, i32) {
    %c0_i32 = arith.constant 0 : i32
    %c0_i32_0 = arith.constant 0 : i32
    %c0_i32_1 = arith.constant 0 : i32
    return %c0_i32, %c0_i32_0 : i32, i32
  }
  func.func @transform_3(%arg0: i32) -> (i32, i32, i32, i32) {
    %c0_i32 = arith.constant 0 : i32
    %c0_i32_0 = arith.constant 0 : i32
    %c0_i32_1 = arith.constant 0 : i32
    %c0_i32_2 = arith.constant 0 : i32
    return %arg0, %c0_i32, %c0_i32_0, %c0_i32_1 : i32, i32, i32, i32
  }
}

module attributes {stable_mosaic.version = 11 : i64} {
  func.func @_conv_s1_kernel(%arg0: i32, %arg1: memref<1x5x5x32xbf16, #tpu.memory_space<vmem>>, %arg2: memref<4x32x16xbf16, #tpu.memory_space<vmem>>, %arg3: memref<1x16xf32, #tpu.memory_space<vmem>>, %arg4: memref<1x4x4x16xbf16, #tpu.memory_space<vmem>>) attributes {dimension_semantics = [#tpu.dimension_semantics<parallel>], iteration_bounds = array<i64: 2>, scalar_prefetch = 0 : i64, scratch_operands = 0 : i64, tpu.core_type = #tpu.core_type<tc>, window_params = [{transform_indices = @transform_0, window_bounds = array<i64: 1, 5, 5, 32>}, {pipeline_mode = #tpu.pipeline_mode<synchronous>, transform_indices = @transform_1, window_bounds = array<i64: 4, 32, 16>}, {pipeline_mode = #tpu.pipeline_mode<synchronous>, transform_indices = @transform_2, window_bounds = array<i64: 1, 16>}, {transform_indices = @transform_3, window_bounds = array<i64: 1, 4, 4, 16>}]} {
    %c0 = arith.constant 0 : index
    %c0_0 = arith.constant 0 : index
    %0 = vector.load %arg3[%c0, %c0_0] : memref<1x16xf32, #tpu.memory_space<vmem>>, vector<1x16xf32>
    %1 = vector.shape_cast %0 : vector<1x16xf32> to vector<1x16xf32>
    %2 = vector.broadcast %1 : vector<1x16xf32> to vector<4x16xf32>
    %c0_1 = arith.constant 0 : index
    %c0_2 = arith.constant 0 : index
    %c0_3 = arith.constant 0 : index
    %c0_4 = arith.constant 0 : index
    %3 = vector.load %arg1[%c0_1, %c0_2, %c0_3, %c0_4] : memref<1x5x5x32xbf16, #tpu.memory_space<vmem>>, vector<1x1x4x32xbf16>
    %4 = vector.shape_cast %3 : vector<1x1x4x32xbf16> to vector<4x32xbf16>
    %c0_5 = arith.constant 0 : index
    %c0_6 = arith.constant 0 : index
    %c0_7 = arith.constant 0 : index
    %5 = vector.load %arg2[%c0_5, %c0_6, %c0_7] : memref<4x32x16xbf16, #tpu.memory_space<vmem>>, vector<1x32x16xbf16>
    %6 = vector.shape_cast %5 : vector<1x32x16xbf16> to vector<32x16xbf16>
    %cst = arith.constant dense<0.000000e+00> : vector<4x16xf32>
    %7 = tpu.matmul %4, %6, %cst {dimension_numbers = #tpu.dot_dimension_numbers<[1], [0], [0], [1], [0, 0, 1, 1], [], []>} : vector<4x32xbf16>, vector<32x16xbf16>, vector<4x16xf32> -> vector<4x16xf32>
    %8 = arith.addf %2, %7 : vector<4x16xf32>
    %c0_8 = arith.constant 0 : index
    %c0_9 = arith.constant 0 : index
    %c1 = arith.constant 1 : index
    %c0_10 = arith.constant 0 : index
    %9 = vector.load %arg1[%c0_8, %c0_9, %c1, %c0_10] : memref<1x5x5x32xbf16, #tpu.memory_space<vmem>>, vector<1x1x4x32xbf16>
    %10 = vector.shape_cast %9 : vector<1x1x4x32xbf16> to vector<4x32xbf16>
    %c1_11 = arith.constant 1 : index
    %c0_12 = arith.constant 0 : index
    %c0_13 = arith.constant 0 : index
    %11 = vector.load %arg2[%c1_11, %c0_12, %c0_13] : memref<4x32x16xbf16, #tpu.memory_space<vmem>>, vector<1x32x16xbf16>
    %12 = vector.shape_cast %11 : vector<1x32x16xbf16> to vector<32x16xbf16>
    %cst_14 = arith.constant dense<0.000000e+00> : vector<4x16xf32>
    %13 = tpu.matmul %10, %12, %cst_14 {dimension_numbers = #tpu.dot_dimension_numbers<[1], [0], [0], [1], [0, 0, 1, 1], [], []>} : vector<4x32xbf16>, vector<32x16xbf16>, vector<4x16xf32> -> vector<4x16xf32>
    %14 = arith.addf %8, %13 : vector<4x16xf32>
    %c0_15 = arith.constant 0 : index
    %c1_16 = arith.constant 1 : index
    %c0_17 = arith.constant 0 : index
    %c0_18 = arith.constant 0 : index
    %15 = vector.load %arg1[%c0_15, %c1_16, %c0_17, %c0_18] : memref<1x5x5x32xbf16, #tpu.memory_space<vmem>>, vector<1x1x4x32xbf16>
    %16 = vector.shape_cast %15 : vector<1x1x4x32xbf16> to vector<4x32xbf16>
    %c2 = arith.constant 2 : index
    %c0_19 = arith.constant 0 : index
    %c0_20 = arith.constant 0 : index
    %17 = vector.load %arg2[%c2, %c0_19, %c0_20] : memref<4x32x16xbf16, #tpu.memory_space<vmem>>, vector<1x32x16xbf16>
    %18 = vector.shape_cast %17 : vector<1x32x16xbf16> to vector<32x16xbf16>
    %cst_21 = arith.constant dense<0.000000e+00> : vector<4x16xf32>
    %19 = tpu.matmul %16, %18, %cst_21 {dimension_numbers = #tpu.dot_dimension_numbers<[1], [0], [0], [1], [0, 0, 1, 1], [], []>} : vector<4x32xbf16>, vector<32x16xbf16>, vector<4x16xf32> -> vector<4x16xf32>
    %20 = arith.addf %14, %19 : vector<4x16xf32>
    %c0_22 = arith.constant 0 : index
    %c1_23 = arith.constant 1 : index
    %c1_24 = arith.constant 1 : index
    %c0_25 = arith.constant 0 : index
    %21 = vector.load %arg1[%c0_22, %c1_23, %c1_24, %c0_25] : memref<1x5x5x32xbf16, #tpu.memory_space<vmem>>, vector<1x1x4x32xbf16>
    %22 = vector.shape_cast %21 : vector<1x1x4x32xbf16> to vector<4x32xbf16>
    %c3 = arith.constant 3 : index
    %c0_26 = arith.constant 0 : index
    %c0_27 = arith.constant 0 : index
    %23 = vector.load %arg2[%c3, %c0_26, %c0_27] : memref<4x32x16xbf16, #tpu.memory_space<vmem>>, vector<1x32x16xbf16>
    %24 = vector.shape_cast %23 : vector<1x32x16xbf16> to vector<32x16xbf16>
    %cst_28 = arith.constant dense<0.000000e+00> : vector<4x16xf32>
    %25 = tpu.matmul %22, %24, %cst_28 {dimension_numbers = #tpu.dot_dimension_numbers<[1], [0], [0], [1], [0, 0, 1, 1], [], []>} : vector<4x32xbf16>, vector<32x16xbf16>, vector<4x16xf32> -> vector<4x16xf32>
    %26 = arith.addf %20, %25 : vector<4x16xf32>
    %cst_29 = arith.constant 0.000000e+00 : f32
    %27 = vector.broadcast %cst_29 : f32 to vector<4x16xf32>
    %28 = arith.maximumf %26, %27 : vector<4x16xf32>
    %29 = arith.truncf %28 : vector<4x16xf32> to vector<4x16xbf16>
    %c0_30 = arith.constant 0 : index
    %c0_31 = arith.constant 0 : index
    %c0_32 = arith.constant 0 : index
    %c0_33 = arith.constant 0 : index
    %30 = vector.load %arg4[%c0_30, %c0_31, %c0_32, %c0_33] : memref<1x4x4x16xbf16, #tpu.memory_space<vmem>>, vector<1x1x4x16xbf16>
    %31 = vector.shape_cast %30 : vector<1x1x4x16xbf16> to vector<4x16xbf16>
    %32 = vector.shape_cast %29 : vector<4x16xbf16> to vector<1x1x4x16xbf16>
    tpu.vector_store %arg4[%c0_30, %c0_31, %c0_32, %c0_33], %32 {strides = array<i32>} : memref<1x4x4x16xbf16, #tpu.memory_space<vmem>>, vector<1x1x4x16xbf16>,
    %c0_34 = arith.constant 0 : index
    %c1_35 = arith.constant 1 : index
    %c0_36 = arith.constant 0 : index
    %c0_37 = arith.constant 0 : index
    %33 = vector.load %arg1[%c0_34, %c1_35, %c0_36, %c0_37] : memref<1x5x5x32xbf16, #tpu.memory_space<vmem>>, vector<1x1x4x32xbf16>
    %34 = vector.shape_cast %33 : vector<1x1x4x32xbf16> to vector<4x32xbf16>
    %c0_38 = arith.constant 0 : index
    %c0_39 = arith.constant 0 : index
    %c0_40 = arith.constant 0 : index
    %35 = vector.load %arg2[%c0_38, %c0_39, %c0_40] : memref<4x32x16xbf16, #tpu.memory_space<vmem>>, vector<1x32x16xbf16>
    %36 = vector.shape_cast %35 : vector<1x32x16xbf16> to vector<32x16xbf16>
    %cst_41 = arith.constant dense<0.000000e+00> : vector<4x16xf32>
    %37 = tpu.matmul %34, %36, %cst_41 {dimension_numbers = #tpu.dot_dimension_numbers<[1], [0], [0], [1], [0, 0, 1, 1], [], []>} : vector<4x32xbf16>, vector<32x16xbf16>, vector<4x16xf32> -> vector<4x16xf32>
    %38 = arith.addf %2, %37 : vector<4x16xf32>
    %c0_42 = arith.constant 0 : index
    %c1_43 = arith.constant 1 : index
    %c1_44 = arith.constant 1 : index
    %c0_45 = arith.constant 0 : index
    %39 = vector.load %arg1[%c0_42, %c1_43, %c1_44, %c0_45] : memref<1x5x5x32xbf16, #tpu.memory_space<vmem>>, vector<1x1x4x32xbf16>
    %40 = vector.shape_cast %39 : vector<1x1x4x32xbf16> to vector<4x32xbf16>
    %c1_46 = arith.constant 1 : index
    %c0_47 = arith.constant 0 : index
    %c0_48 = arith.constant 0 : index
    %41 = vector.load %arg2[%c1_46, %c0_47, %c0_48] : memref<4x32x16xbf16, #tpu.memory_space<vmem>>, vector<1x32x16xbf16>
    %42 = vector.shape_cast %41 : vector<1x32x16xbf16> to vector<32x16xbf16>
    %cst_49 = arith.constant dense<0.000000e+00> : vector<4x16xf32>
    %43 = tpu.matmul %40, %42, %cst_49 {dimension_numbers = #tpu.dot_dimension_numbers<[1], [0], [0], [1], [0, 0, 1, 1], [], []>} : vector<4x32xbf16>, vector<32x16xbf16>, vector<4x16xf32> -> vector<4x16xf32>
    %44 = arith.addf %38, %43 : vector<4x16xf32>
    %c0_50 = arith.constant 0 : index
    %c2_51 = arith.constant 2 : index
    %c0_52 = arith.constant 0 : index
    %c0_53 = arith.constant 0 : index
    %45 = vector.load %arg1[%c0_50, %c2_51, %c0_52, %c0_53] : memref<1x5x5x32xbf16, #tpu.memory_space<vmem>>, vector<1x1x4x32xbf16>
    %46 = vector.shape_cast %45 : vector<1x1x4x32xbf16> to vector<4x32xbf16>
    %c2_54 = arith.constant 2 : index
    %c0_55 = arith.constant 0 : index
    %c0_56 = arith.constant 0 : index
    %47 = vector.load %arg2[%c2_54, %c0_55, %c0_56] : memref<4x32x16xbf16, #tpu.memory_space<vmem>>, vector<1x32x16xbf16>
    %48 = vector.shape_cast %47 : vector<1x32x16xbf16> to vector<32x16xbf16>
    %cst_57 = arith.constant dense<0.000000e+00> : vector<4x16xf32>
    %49 = tpu.matmul %46, %48, %cst_57 {dimension_numbers = #tpu.dot_dimension_numbers<[1], [0], [0], [1], [0, 0, 1, 1], [], []>} : vector<4x32xbf16>, vector<32x16xbf16>, vector<4x16xf32> -> vector<4x16xf32>
    %50 = arith.addf %44, %49 : vector<4x16xf32>
    %c0_58 = arith.constant 0 : index
    %c2_59 = arith.constant 2 : index
    %c1_60 = arith.constant 1 : index
    %c0_61 = arith.constant 0 : index
    %51 = vector.load %arg1[%c0_58, %c2_59, %c1_60, %c0_61] : memref<1x5x5x32xbf16, #tpu.memory_space<vmem>>, vector<1x1x4x32xbf16>
    %52 = vector.shape_cast %51 : vector<1x1x4x32xbf16> to vector<4x32xbf16>
    %c3_62 = arith.constant 3 : index
    %c0_63 = arith.constant 0 : index
    %c0_64 = arith.constant 0 : index
    %53 = vector.load %arg2[%c3_62, %c0_63, %c0_64] : memref<4x32x16xbf16, #tpu.memory_space<vmem>>, vector<1x32x16xbf16>
    %54 = vector.shape_cast %53 : vector<1x32x16xbf16> to vector<32x16xbf16>
    %cst_65 = arith.constant dense<0.000000e+00> : vector<4x16xf32>
    %55 = tpu.matmul %52, %54, %cst_65 {dimension_numbers = #tpu.dot_dimension_numbers<[1], [0], [0], [1], [0, 0, 1, 1], [], []>} : vector<4x32xbf16>, vector<32x16xbf16>, vector<4x16xf32> -> vector<4x16xf32>
    %56 = arith.addf %50, %55 : vector<4x16xf32>
    %cst_66 = arith.constant 0.000000e+00 : f32
    %57 = vector.broadcast %cst_66 : f32 to vector<4x16xf32>
    %58 = arith.maximumf %56, %57 : vector<4x16xf32>
    %59 = arith.truncf %58 : vector<4x16xf32> to vector<4x16xbf16>
    %c0_67 = arith.constant 0 : index
    %c1_68 = arith.constant 1 : index
    %c0_69 = arith.constant 0 : index
    %c0_70 = arith.constant 0 : index
    %60 = vector.load %arg4[%c0_67, %c1_68, %c0_69, %c0_70] : memref<1x4x4x16xbf16, #tpu.memory_space<vmem>>, vector<1x1x4x16xbf16>
    %61 = vector.shape_cast %60 : vector<1x1x4x16xbf16> to vector<4x16xbf16>
    %62 = vector.shape_cast %59 : vector<4x16xbf16> to vector<1x1x4x16xbf16>
    tpu.vector_store %arg4[%c0_67, %c1_68, %c0_69, %c0_70], %62 {strides = array<i32>} : memref<1x4x4x16xbf16, #tpu.memory_space<vmem>>, vector<1x1x4x16xbf16>,
    %c0_71 = arith.constant 0 : index
    %c2_72 = arith.constant 2 : index
    %c0_73 = arith.constant 0 : index
    %c0_74 = arith.constant 0 : index
    %63 = vector.load %arg1[%c0_71, %c2_72, %c0_73, %c0_74] : memref<1x5x5x32xbf16, #tpu.memory_space<vmem>>, vector<1x1x4x32xbf16>
    %64 = vector.shape_cast %63 : vector<1x1x4x32xbf16> to vector<4x32xbf16>
    %c0_75 = arith.constant 0 : index
    %c0_76 = arith.constant 0 : index
    %c0_77 = arith.constant 0 : index
    %65 = vector.load %arg2[%c0_75, %c0_76, %c0_77] : memref<4x32x16xbf16, #tpu.memory_space<vmem>>, vector<1x32x16xbf16>
    %66 = vector.shape_cast %65 : vector<1x32x16xbf16> to vector<32x16xbf16>
    %cst_78 = arith.constant dense<0.000000e+00> : vector<4x16xf32>
    %67 = tpu.matmul %64, %66, %cst_78 {dimension_numbers = #tpu.dot_dimension_numbers<[1], [0], [0], [1], [0, 0, 1, 1], [], []>} : vector<4x32xbf16>, vector<32x16xbf16>, vector<4x16xf32> -> vector<4x16xf32>
    %68 = arith.addf %2, %67 : vector<4x16xf32>
    %c0_79 = arith.constant 0 : index
    %c2_80 = arith.constant 2 : index
    %c1_81 = arith.constant 1 : index
    %c0_82 = arith.constant 0 : index
    %69 = vector.load %arg1[%c0_79, %c2_80, %c1_81, %c0_82] : memref<1x5x5x32xbf16, #tpu.memory_space<vmem>>, vector<1x1x4x32xbf16>
    %70 = vector.shape_cast %69 : vector<1x1x4x32xbf16> to vector<4x32xbf16>
    %c1_83 = arith.constant 1 : index
    %c0_84 = arith.constant 0 : index
    %c0_85 = arith.constant 0 : index
    %71 = vector.load %arg2[%c1_83, %c0_84, %c0_85] : memref<4x32x16xbf16, #tpu.memory_space<vmem>>, vector<1x32x16xbf16>
    %72 = vector.shape_cast %71 : vector<1x32x16xbf16> to vector<32x16xbf16>
    %cst_86 = arith.constant dense<0.000000e+00> : vector<4x16xf32>
    %73 = tpu.matmul %70, %72, %cst_86 {dimension_numbers = #tpu.dot_dimension_numbers<[1], [0], [0], [1], [0, 0, 1, 1], [], []>} : vector<4x32xbf16>, vector<32x16xbf16>, vector<4x16xf32> -> vector<4x16xf32>
    %74 = arith.addf %68, %73 : vector<4x16xf32>
    %c0_87 = arith.constant 0 : index
    %c3_88 = arith.constant 3 : index
    %c0_89 = arith.constant 0 : index
    %c0_90 = arith.constant 0 : index
    %75 = vector.load %arg1[%c0_87, %c3_88, %c0_89, %c0_90] : memref<1x5x5x32xbf16, #tpu.memory_space<vmem>>, vector<1x1x4x32xbf16>
    %76 = vector.shape_cast %75 : vector<1x1x4x32xbf16> to vector<4x32xbf16>
    %c2_91 = arith.constant 2 : index
    %c0_92 = arith.constant 0 : index
    %c0_93 = arith.constant 0 : index
    %77 = vector.load %arg2[%c2_91, %c0_92, %c0_93] : memref<4x32x16xbf16, #tpu.memory_space<vmem>>, vector<1x32x16xbf16>
    %78 = vector.shape_cast %77 : vector<1x32x16xbf16> to vector<32x16xbf16>
    %cst_94 = arith.constant dense<0.000000e+00> : vector<4x16xf32>
    %79 = tpu.matmul %76, %78, %cst_94 {dimension_numbers = #tpu.dot_dimension_numbers<[1], [0], [0], [1], [0, 0, 1, 1], [], []>} : vector<4x32xbf16>, vector<32x16xbf16>, vector<4x16xf32> -> vector<4x16xf32>
    %80 = arith.addf %74, %79 : vector<4x16xf32>
    %c0_95 = arith.constant 0 : index
    %c3_96 = arith.constant 3 : index
    %c1_97 = arith.constant 1 : index
    %c0_98 = arith.constant 0 : index
    %81 = vector.load %arg1[%c0_95, %c3_96, %c1_97, %c0_98] : memref<1x5x5x32xbf16, #tpu.memory_space<vmem>>, vector<1x1x4x32xbf16>
    %82 = vector.shape_cast %81 : vector<1x1x4x32xbf16> to vector<4x32xbf16>
    %c3_99 = arith.constant 3 : index
    %c0_100 = arith.constant 0 : index
    %c0_101 = arith.constant 0 : index
    %83 = vector.load %arg2[%c3_99, %c0_100, %c0_101] : memref<4x32x16xbf16, #tpu.memory_space<vmem>>, vector<1x32x16xbf16>
    %84 = vector.shape_cast %83 : vector<1x32x16xbf16> to vector<32x16xbf16>
    %cst_102 = arith.constant dense<0.000000e+00> : vector<4x16xf32>
    %85 = tpu.matmul %82, %84, %cst_102 {dimension_numbers = #tpu.dot_dimension_numbers<[1], [0], [0], [1], [0, 0, 1, 1], [], []>} : vector<4x32xbf16>, vector<32x16xbf16>, vector<4x16xf32> -> vector<4x16xf32>
    %86 = arith.addf %80, %85 : vector<4x16xf32>
    %cst_103 = arith.constant 0.000000e+00 : f32
    %87 = vector.broadcast %cst_103 : f32 to vector<4x16xf32>
    %88 = arith.maximumf %86, %87 : vector<4x16xf32>
    %89 = arith.truncf %88 : vector<4x16xf32> to vector<4x16xbf16>
    %c0_104 = arith.constant 0 : index
    %c2_105 = arith.constant 2 : index
    %c0_106 = arith.constant 0 : index
    %c0_107 = arith.constant 0 : index
    %90 = vector.load %arg4[%c0_104, %c2_105, %c0_106, %c0_107] : memref<1x4x4x16xbf16, #tpu.memory_space<vmem>>, vector<1x1x4x16xbf16>
    %91 = vector.shape_cast %90 : vector<1x1x4x16xbf16> to vector<4x16xbf16>
    %92 = vector.shape_cast %89 : vector<4x16xbf16> to vector<1x1x4x16xbf16>
    tpu.vector_store %arg4[%c0_104, %c2_105, %c0_106, %c0_107], %92 {strides = array<i32>} : memref<1x4x4x16xbf16, #tpu.memory_space<vmem>>, vector<1x1x4x16xbf16>,
    %c0_108 = arith.constant 0 : index
    %c3_109 = arith.constant 3 : index
    %c0_110 = arith.constant 0 : index
    %c0_111 = arith.constant 0 : index
    %93 = vector.load %arg1[%c0_108, %c3_109, %c0_110, %c0_111] : memref<1x5x5x32xbf16, #tpu.memory_space<vmem>>, vector<1x1x4x32xbf16>
    %94 = vector.shape_cast %93 : vector<1x1x4x32xbf16> to vector<4x32xbf16>
    %c0_112 = arith.constant 0 : index
    %c0_113 = arith.constant 0 : index
    %c0_114 = arith.constant 0 : index
    %95 = vector.load %arg2[%c0_112, %c0_113, %c0_114] : memref<4x32x16xbf16, #tpu.memory_space<vmem>>, vector<1x32x16xbf16>
    %96 = vector.shape_cast %95 : vector<1x32x16xbf16> to vector<32x16xbf16>
    %cst_115 = arith.constant dense<0.000000e+00> : vector<4x16xf32>
    %97 = tpu.matmul %94, %96, %cst_115 {dimension_numbers = #tpu.dot_dimension_numbers<[1], [0], [0], [1], [0, 0, 1, 1], [], []>} : vector<4x32xbf16>, vector<32x16xbf16>, vector<4x16xf32> -> vector<4x16xf32>
    %98 = arith.addf %2, %97 : vector<4x16xf32>
    %c0_116 = arith.constant 0 : index
    %c3_117 = arith.constant 3 : index
    %c1_118 = arith.constant 1 : index
    %c0_119 = arith.constant 0 : index
    %99 = vector.load %arg1[%c0_116, %c3_117, %c1_118, %c0_119] : memref<1x5x5x32xbf16, #tpu.memory_space<vmem>>, vector<1x1x4x32xbf16>
    %100 = vector.shape_cast %99 : vector<1x1x4x32xbf16> to vector<4x32xbf16>
    %c1_120 = arith.constant 1 : index
    %c0_121 = arith.constant 0 : index
    %c0_122 = arith.constant 0 : index
    %101 = vector.load %arg2[%c1_120, %c0_121, %c0_122] : memref<4x32x16xbf16, #tpu.memory_space<vmem>>, vector<1x32x16xbf16>
    %102 = vector.shape_cast %101 : vector<1x32x16xbf16> to vector<32x16xbf16>
    %cst_123 = arith.constant dense<0.000000e+00> : vector<4x16xf32>
    %103 = tpu.matmul %100, %102, %cst_123 {dimension_numbers = #tpu.dot_dimension_numbers<[1], [0], [0], [1], [0, 0, 1, 1], [], []>} : vector<4x32xbf16>, vector<32x16xbf16>, vector<4x16xf32> -> vector<4x16xf32>
    %104 = arith.addf %98, %103 : vector<4x16xf32>
    %c0_124 = arith.constant 0 : index
    %c4 = arith.constant 4 : index
    %c0_125 = arith.constant 0 : index
    %c0_126 = arith.constant 0 : index
    %105 = vector.load %arg1[%c0_124, %c4, %c0_125, %c0_126] : memref<1x5x5x32xbf16, #tpu.memory_space<vmem>>, vector<1x1x4x32xbf16>
    %106 = vector.shape_cast %105 : vector<1x1x4x32xbf16> to vector<4x32xbf16>
    %c2_127 = arith.constant 2 : index
    %c0_128 = arith.constant 0 : index
    %c0_129 = arith.constant 0 : index
    %107 = vector.load %arg2[%c2_127, %c0_128, %c0_129] : memref<4x32x16xbf16, #tpu.memory_space<vmem>>, vector<1x32x16xbf16>
    %108 = vector.shape_cast %107 : vector<1x32x16xbf16> to vector<32x16xbf16>
    %cst_130 = arith.constant dense<0.000000e+00> : vector<4x16xf32>
    %109 = tpu.matmul %106, %108, %cst_130 {dimension_numbers = #tpu.dot_dimension_numbers<[1], [0], [0], [1], [0, 0, 1, 1], [], []>} : vector<4x32xbf16>, vector<32x16xbf16>, vector<4x16xf32> -> vector<4x16xf32>
    %110 = arith.addf %104, %109 : vector<4x16xf32>
    %c0_131 = arith.constant 0 : index
    %c4_132 = arith.constant 4 : index
    %c1_133 = arith.constant 1 : index
    %c0_134 = arith.constant 0 : index
    %111 = vector.load %arg1[%c0_131, %c4_132, %c1_133, %c0_134] : memref<1x5x5x32xbf16, #tpu.memory_space<vmem>>, vector<1x1x4x32xbf16>
    %112 = vector.shape_cast %111 : vector<1x1x4x32xbf16> to vector<4x32xbf16>
    %c3_135 = arith.constant 3 : index
    %c0_136 = arith.constant 0 : index
    %c0_137 = arith.constant 0 : index
    %113 = vector.load %arg2[%c3_135, %c0_136, %c0_137] : memref<4x32x16xbf16, #tpu.memory_space<vmem>>, vector<1x32x16xbf16>
    %114 = vector.shape_cast %113 : vector<1x32x16xbf16> to vector<32x16xbf16>
    %cst_138 = arith.constant dense<0.000000e+00> : vector<4x16xf32>
    %115 = tpu.matmul %112, %114, %cst_138 {dimension_numbers = #tpu.dot_dimension_numbers<[1], [0], [0], [1], [0, 0, 1, 1], [], []>} : vector<4x32xbf16>, vector<32x16xbf16>, vector<4x16xf32> -> vector<4x16xf32>
    %116 = arith.addf %110, %115 : vector<4x16xf32>
    %cst_139 = arith.constant 0.000000e+00 : f32
    %117 = vector.broadcast %cst_139 : f32 to vector<4x16xf32>
    %118 = arith.maximumf %116, %117 : vector<4x16xf32>
    %119 = arith.truncf %118 : vector<4x16xf32> to vector<4x16xbf16>
    %c0_140 = arith.constant 0 : index
    %c3_141 = arith.constant 3 : index
    %c0_142 = arith.constant 0 : index
    %c0_143 = arith.constant 0 : index
    %120 = vector.load %arg4[%c0_140, %c3_141, %c0_142, %c0_143] : memref<1x4x4x16xbf16, #tpu.memory_space<vmem>>, vector<1x1x4x16xbf16>
    %121 = vector.shape_cast %120 : vector<1x1x4x16xbf16> to vector<4x16xbf16>
    %122 = vector.shape_cast %119 : vector<4x16xbf16> to vector<1x1x4x16xbf16>
    tpu.vector_store %arg4[%c0_140, %c3_141, %c0_142, %c0_143], %122 {strides = array<i32>} : memref<1x4x4x16xbf16, #tpu.memory_space<vmem>>, vector<1x1x4x16xbf16>,
    return
  }
  func.func @transform_0(%arg0: i32) -> (i32, i32, i32, i32) {
    %c0_i32 = arith.constant 0 : i32
    %c0_i32_0 = arith.constant 0 : i32
    %c0_i32_1 = arith.constant 0 : i32
    %c0_i32_2 = arith.constant 0 : i32
    return %arg0, %c0_i32, %c0_i32_0, %c0_i32_1 : i32, i32, i32, i32
  }
  func.func @transform_1(%arg0: i32) -> (i32, i32, i32) {
    %c0_i32 = arith.constant 0 : i32
    %c0_i32_0 = arith.constant 0 : i32
    %c0_i32_1 = arith.constant 0 : i32
    %c0_i32_2 = arith.constant 0 : i32
    return %c0_i32, %c0_i32_0, %c0_i32_1 : i32, i32, i32
  }
  func.func @transform_2(%arg0: i32) -> (i32, i32) {
    %c0_i32 = arith.constant 0 : i32
    %c0_i32_0 = arith.constant 0 : i32
    %c0_i32_1 = arith.constant 0 : i32
    return %c0_i32, %c0_i32_0 : i32, i32
  }
  func.func @transform_3(%arg0: i32) -> (i32, i32, i32, i32) {
    %c0_i32 = arith.constant 0 : i32
    %c0_i32_0 = arith.constant 0 : i32
    %c0_i32_1 = arith.constant 0 : i32
    %c0_i32_2 = arith.constant 0 : i32
    return %arg0, %c0_i32, %c0_i32_0, %c0_i32_1 : i32, i32, i32, i32
  }
}

module attributes {stable_mosaic.version = 11 : i64} {
  func.func @_conv_s1_kernel(%arg0: i32, %arg1: memref<1x9x9x8xbf16, #tpu.memory_space<vmem>>, %arg2: memref<4x8x8xbf16, #tpu.memory_space<vmem>>, %arg3: memref<1x8xf32, #tpu.memory_space<vmem>>, %arg4: memref<1x8x8x8xbf16, #tpu.memory_space<vmem>>) attributes {dimension_semantics = [#tpu.dimension_semantics<parallel>], iteration_bounds = array<i64: 2>, scalar_prefetch = 0 : i64, scratch_operands = 0 : i64, tpu.core_type = #tpu.core_type<tc>, window_params = [{transform_indices = @transform_0, window_bounds = array<i64: 1, 9, 9, 8>}, {pipeline_mode = #tpu.pipeline_mode<synchronous>, transform_indices = @transform_1, window_bounds = array<i64: 4, 8, 8>}, {pipeline_mode = #tpu.pipeline_mode<synchronous>, transform_indices = @transform_2, window_bounds = array<i64: 1, 8>}, {transform_indices = @transform_3, window_bounds = array<i64: 1, 8, 8, 8>}]} {
    %c0 = arith.constant 0 : index
    %c0_0 = arith.constant 0 : index
    %0 = vector.load %arg3[%c0, %c0_0] : memref<1x8xf32, #tpu.memory_space<vmem>>, vector<1x8xf32>
    %1 = vector.shape_cast %0 : vector<1x8xf32> to vector<1x8xf32>
    %2 = vector.broadcast %1 : vector<1x8xf32> to vector<8x8xf32>
    %c0_1 = arith.constant 0 : index
    %c0_2 = arith.constant 0 : index
    %c0_3 = arith.constant 0 : index
    %c0_4 = arith.constant 0 : index
    %3 = vector.load %arg1[%c0_1, %c0_2, %c0_3, %c0_4] : memref<1x9x9x8xbf16, #tpu.memory_space<vmem>>, vector<1x1x8x8xbf16>
    %4 = vector.shape_cast %3 : vector<1x1x8x8xbf16> to vector<8x8xbf16>
    %c0_5 = arith.constant 0 : index
    %c0_6 = arith.constant 0 : index
    %c0_7 = arith.constant 0 : index
    %5 = vector.load %arg2[%c0_5, %c0_6, %c0_7] : memref<4x8x8xbf16, #tpu.memory_space<vmem>>, vector<1x8x8xbf16>
    %6 = vector.shape_cast %5 : vector<1x8x8xbf16> to vector<8x8xbf16>
    %cst = arith.constant dense<0.000000e+00> : vector<8x8xf32>
    %7 = tpu.matmul %4, %6, %cst {dimension_numbers = #tpu.dot_dimension_numbers<[1], [0], [0], [1], [0, 0, 1, 1], [], []>} : vector<8x8xbf16>, vector<8x8xbf16>, vector<8x8xf32> -> vector<8x8xf32>
    %8 = arith.addf %2, %7 : vector<8x8xf32>
    %c0_8 = arith.constant 0 : index
    %c0_9 = arith.constant 0 : index
    %c1 = arith.constant 1 : index
    %c0_10 = arith.constant 0 : index
    %9 = vector.load %arg1[%c0_8, %c0_9, %c1, %c0_10] : memref<1x9x9x8xbf16, #tpu.memory_space<vmem>>, vector<1x1x8x8xbf16>
    %10 = vector.shape_cast %9 : vector<1x1x8x8xbf16> to vector<8x8xbf16>
    %c1_11 = arith.constant 1 : index
    %c0_12 = arith.constant 0 : index
    %c0_13 = arith.constant 0 : index
    %11 = vector.load %arg2[%c1_11, %c0_12, %c0_13] : memref<4x8x8xbf16, #tpu.memory_space<vmem>>, vector<1x8x8xbf16>
    %12 = vector.shape_cast %11 : vector<1x8x8xbf16> to vector<8x8xbf16>
    %cst_14 = arith.constant dense<0.000000e+00> : vector<8x8xf32>
    %13 = tpu.matmul %10, %12, %cst_14 {dimension_numbers = #tpu.dot_dimension_numbers<[1], [0], [0], [1], [0, 0, 1, 1], [], []>} : vector<8x8xbf16>, vector<8x8xbf16>, vector<8x8xf32> -> vector<8x8xf32>
    %14 = arith.addf %8, %13 : vector<8x8xf32>
    %c0_15 = arith.constant 0 : index
    %c1_16 = arith.constant 1 : index
    %c0_17 = arith.constant 0 : index
    %c0_18 = arith.constant 0 : index
    %15 = vector.load %arg1[%c0_15, %c1_16, %c0_17, %c0_18] : memref<1x9x9x8xbf16, #tpu.memory_space<vmem>>, vector<1x1x8x8xbf16>
    %16 = vector.shape_cast %15 : vector<1x1x8x8xbf16> to vector<8x8xbf16>
    %c2 = arith.constant 2 : index
    %c0_19 = arith.constant 0 : index
    %c0_20 = arith.constant 0 : index
    %17 = vector.load %arg2[%c2, %c0_19, %c0_20] : memref<4x8x8xbf16, #tpu.memory_space<vmem>>, vector<1x8x8xbf16>
    %18 = vector.shape_cast %17 : vector<1x8x8xbf16> to vector<8x8xbf16>
    %cst_21 = arith.constant dense<0.000000e+00> : vector<8x8xf32>
    %19 = tpu.matmul %16, %18, %cst_21 {dimension_numbers = #tpu.dot_dimension_numbers<[1], [0], [0], [1], [0, 0, 1, 1], [], []>} : vector<8x8xbf16>, vector<8x8xbf16>, vector<8x8xf32> -> vector<8x8xf32>
    %20 = arith.addf %14, %19 : vector<8x8xf32>
    %c0_22 = arith.constant 0 : index
    %c1_23 = arith.constant 1 : index
    %c1_24 = arith.constant 1 : index
    %c0_25 = arith.constant 0 : index
    %21 = vector.load %arg1[%c0_22, %c1_23, %c1_24, %c0_25] : memref<1x9x9x8xbf16, #tpu.memory_space<vmem>>, vector<1x1x8x8xbf16>
    %22 = vector.shape_cast %21 : vector<1x1x8x8xbf16> to vector<8x8xbf16>
    %c3 = arith.constant 3 : index
    %c0_26 = arith.constant 0 : index
    %c0_27 = arith.constant 0 : index
    %23 = vector.load %arg2[%c3, %c0_26, %c0_27] : memref<4x8x8xbf16, #tpu.memory_space<vmem>>, vector<1x8x8xbf16>
    %24 = vector.shape_cast %23 : vector<1x8x8xbf16> to vector<8x8xbf16>
    %cst_28 = arith.constant dense<0.000000e+00> : vector<8x8xf32>
    %25 = tpu.matmul %22, %24, %cst_28 {dimension_numbers = #tpu.dot_dimension_numbers<[1], [0], [0], [1], [0, 0, 1, 1], [], []>} : vector<8x8xbf16>, vector<8x8xbf16>, vector<8x8xf32> -> vector<8x8xf32>
    %26 = arith.addf %20, %25 : vector<8x8xf32>
    %cst_29 = arith.constant 0.000000e+00 : f32
    %27 = vector.broadcast %cst_29 : f32 to vector<8x8xf32>
    %28 = arith.maximumf %26, %27 : vector<8x8xf32>
    %29 = arith.truncf %28 : vector<8x8xf32> to vector<8x8xbf16>
    %c0_30 = arith.constant 0 : index
    %c0_31 = arith.constant 0 : index
    %c0_32 = arith.constant 0 : index
    %c0_33 = arith.constant 0 : index
    %30 = vector.load %arg4[%c0_30, %c0_31, %c0_32, %c0_33] : memref<1x8x8x8xbf16, #tpu.memory_space<vmem>>, vector<1x1x8x8xbf16>
    %31 = vector.shape_cast %30 : vector<1x1x8x8xbf16> to vector<8x8xbf16>
    %32 = vector.shape_cast %29 : vector<8x8xbf16> to vector<1x1x8x8xbf16>
    tpu.vector_store %arg4[%c0_30, %c0_31, %c0_32, %c0_33], %32 {strides = array<i32>} : memref<1x8x8x8xbf16, #tpu.memory_space<vmem>>, vector<1x1x8x8xbf16>,
    %c0_34 = arith.constant 0 : index
    %c1_35 = arith.constant 1 : index
    %c0_36 = arith.constant 0 : index
    %c0_37 = arith.constant 0 : index
    %33 = vector.load %arg1[%c0_34, %c1_35, %c0_36, %c0_37] : memref<1x9x9x8xbf16, #tpu.memory_space<vmem>>, vector<1x1x8x8xbf16>
    %34 = vector.shape_cast %33 : vector<1x1x8x8xbf16> to vector<8x8xbf16>
    %c0_38 = arith.constant 0 : index
    %c0_39 = arith.constant 0 : index
    %c0_40 = arith.constant 0 : index
    %35 = vector.load %arg2[%c0_38, %c0_39, %c0_40] : memref<4x8x8xbf16, #tpu.memory_space<vmem>>, vector<1x8x8xbf16>
    %36 = vector.shape_cast %35 : vector<1x8x8xbf16> to vector<8x8xbf16>
    %cst_41 = arith.constant dense<0.000000e+00> : vector<8x8xf32>
    %37 = tpu.matmul %34, %36, %cst_41 {dimension_numbers = #tpu.dot_dimension_numbers<[1], [0], [0], [1], [0, 0, 1, 1], [], []>} : vector<8x8xbf16>, vector<8x8xbf16>, vector<8x8xf32> -> vector<8x8xf32>
    %38 = arith.addf %2, %37 : vector<8x8xf32>
    %c0_42 = arith.constant 0 : index
    %c1_43 = arith.constant 1 : index
    %c1_44 = arith.constant 1 : index
    %c0_45 = arith.constant 0 : index
    %39 = vector.load %arg1[%c0_42, %c1_43, %c1_44, %c0_45] : memref<1x9x9x8xbf16, #tpu.memory_space<vmem>>, vector<1x1x8x8xbf16>
    %40 = vector.shape_cast %39 : vector<1x1x8x8xbf16> to vector<8x8xbf16>
    %c1_46 = arith.constant 1 : index
    %c0_47 = arith.constant 0 : index
    %c0_48 = arith.constant 0 : index
    %41 = vector.load %arg2[%c1_46, %c0_47, %c0_48] : memref<4x8x8xbf16, #tpu.memory_space<vmem>>, vector<1x8x8xbf16>
    %42 = vector.shape_cast %41 : vector<1x8x8xbf16> to vector<8x8xbf16>
    %cst_49 = arith.constant dense<0.000000e+00> : vector<8x8xf32>
    %43 = tpu.matmul %40, %42, %cst_49 {dimension_numbers = #tpu.dot_dimension_numbers<[1], [0], [0], [1], [0, 0, 1, 1], [], []>} : vector<8x8xbf16>, vector<8x8xbf16>, vector<8x8xf32> -> vector<8x8xf32>
    %44 = arith.addf %38, %43 : vector<8x8xf32>
    %c0_50 = arith.constant 0 : index
    %c2_51 = arith.constant 2 : index
    %c0_52 = arith.constant 0 : index
    %c0_53 = arith.constant 0 : index
    %45 = vector.load %arg1[%c0_50, %c2_51, %c0_52, %c0_53] : memref<1x9x9x8xbf16, #tpu.memory_space<vmem>>, vector<1x1x8x8xbf16>
    %46 = vector.shape_cast %45 : vector<1x1x8x8xbf16> to vector<8x8xbf16>
    %c2_54 = arith.constant 2 : index
    %c0_55 = arith.constant 0 : index
    %c0_56 = arith.constant 0 : index
    %47 = vector.load %arg2[%c2_54, %c0_55, %c0_56] : memref<4x8x8xbf16, #tpu.memory_space<vmem>>, vector<1x8x8xbf16>
    %48 = vector.shape_cast %47 : vector<1x8x8xbf16> to vector<8x8xbf16>
    %cst_57 = arith.constant dense<0.000000e+00> : vector<8x8xf32>
    %49 = tpu.matmul %46, %48, %cst_57 {dimension_numbers = #tpu.dot_dimension_numbers<[1], [0], [0], [1], [0, 0, 1, 1], [], []>} : vector<8x8xbf16>, vector<8x8xbf16>, vector<8x8xf32> -> vector<8x8xf32>
    %50 = arith.addf %44, %49 : vector<8x8xf32>
    %c0_58 = arith.constant 0 : index
    %c2_59 = arith.constant 2 : index
    %c1_60 = arith.constant 1 : index
    %c0_61 = arith.constant 0 : index
    %51 = vector.load %arg1[%c0_58, %c2_59, %c1_60, %c0_61] : memref<1x9x9x8xbf16, #tpu.memory_space<vmem>>, vector<1x1x8x8xbf16>
    %52 = vector.shape_cast %51 : vector<1x1x8x8xbf16> to vector<8x8xbf16>
    %c3_62 = arith.constant 3 : index
    %c0_63 = arith.constant 0 : index
    %c0_64 = arith.constant 0 : index
    %53 = vector.load %arg2[%c3_62, %c0_63, %c0_64] : memref<4x8x8xbf16, #tpu.memory_space<vmem>>, vector<1x8x8xbf16>
    %54 = vector.shape_cast %53 : vector<1x8x8xbf16> to vector<8x8xbf16>
    %cst_65 = arith.constant dense<0.000000e+00> : vector<8x8xf32>
    %55 = tpu.matmul %52, %54, %cst_65 {dimension_numbers = #tpu.dot_dimension_numbers<[1], [0], [0], [1], [0, 0, 1, 1], [], []>} : vector<8x8xbf16>, vector<8x8xbf16>, vector<8x8xf32> -> vector<8x8xf32>
    %56 = arith.addf %50, %55 : vector<8x8xf32>
    %cst_66 = arith.constant 0.000000e+00 : f32
    %57 = vector.broadcast %cst_66 : f32 to vector<8x8xf32>
    %58 = arith.maximumf %56, %57 : vector<8x8xf32>
    %59 = arith.truncf %58 : vector<8x8xf32> to vector<8x8xbf16>
    %c0_67 = arith.constant 0 : index
    %c1_68 = arith.constant 1 : index
    %c0_69 = arith.constant 0 : index
    %c0_70 = arith.constant 0 : index
    %60 = vector.load %arg4[%c0_67, %c1_68, %c0_69, %c0_70] : memref<1x8x8x8xbf16, #tpu.memory_space<vmem>>, vector<1x1x8x8xbf16>
    %61 = vector.shape_cast %60 : vector<1x1x8x8xbf16> to vector<8x8xbf16>
    %62 = vector.shape_cast %59 : vector<8x8xbf16> to vector<1x1x8x8xbf16>
    tpu.vector_store %arg4[%c0_67, %c1_68, %c0_69, %c0_70], %62 {strides = array<i32>} : memref<1x8x8x8xbf16, #tpu.memory_space<vmem>>, vector<1x1x8x8xbf16>,
    %c0_71 = arith.constant 0 : index
    %c2_72 = arith.constant 2 : index
    %c0_73 = arith.constant 0 : index
    %c0_74 = arith.constant 0 : index
    %63 = vector.load %arg1[%c0_71, %c2_72, %c0_73, %c0_74] : memref<1x9x9x8xbf16, #tpu.memory_space<vmem>>, vector<1x1x8x8xbf16>
    %64 = vector.shape_cast %63 : vector<1x1x8x8xbf16> to vector<8x8xbf16>
    %c0_75 = arith.constant 0 : index
    %c0_76 = arith.constant 0 : index
    %c0_77 = arith.constant 0 : index
    %65 = vector.load %arg2[%c0_75, %c0_76, %c0_77] : memref<4x8x8xbf16, #tpu.memory_space<vmem>>, vector<1x8x8xbf16>
    %66 = vector.shape_cast %65 : vector<1x8x8xbf16> to vector<8x8xbf16>
    %cst_78 = arith.constant dense<0.000000e+00> : vector<8x8xf32>
    %67 = tpu.matmul %64, %66, %cst_78 {dimension_numbers = #tpu.dot_dimension_numbers<[1], [0], [0], [1], [0, 0, 1, 1], [], []>} : vector<8x8xbf16>, vector<8x8xbf16>, vector<8x8xf32> -> vector<8x8xf32>
    %68 = arith.addf %2, %67 : vector<8x8xf32>
    %c0_79 = arith.constant 0 : index
    %c2_80 = arith.constant 2 : index
    %c1_81 = arith.constant 1 : index
    %c0_82 = arith.constant 0 : index
    %69 = vector.load %arg1[%c0_79, %c2_80, %c1_81, %c0_82] : memref<1x9x9x8xbf16, #tpu.memory_space<vmem>>, vector<1x1x8x8xbf16>
    %70 = vector.shape_cast %69 : vector<1x1x8x8xbf16> to vector<8x8xbf16>
    %c1_83 = arith.constant 1 : index
    %c0_84 = arith.constant 0 : index
    %c0_85 = arith.constant 0 : index
    %71 = vector.load %arg2[%c1_83, %c0_84, %c0_85] : memref<4x8x8xbf16, #tpu.memory_space<vmem>>, vector<1x8x8xbf16>
    %72 = vector.shape_cast %71 : vector<1x8x8xbf16> to vector<8x8xbf16>
    %cst_86 = arith.constant dense<0.000000e+00> : vector<8x8xf32>
    %73 = tpu.matmul %70, %72, %cst_86 {dimension_numbers = #tpu.dot_dimension_numbers<[1], [0], [0], [1], [0, 0, 1, 1], [], []>} : vector<8x8xbf16>, vector<8x8xbf16>, vector<8x8xf32> -> vector<8x8xf32>
    %74 = arith.addf %68, %73 : vector<8x8xf32>
    %c0_87 = arith.constant 0 : index
    %c3_88 = arith.constant 3 : index
    %c0_89 = arith.constant 0 : index
    %c0_90 = arith.constant 0 : index
    %75 = vector.load %arg1[%c0_87, %c3_88, %c0_89, %c0_90] : memref<1x9x9x8xbf16, #tpu.memory_space<vmem>>, vector<1x1x8x8xbf16>
    %76 = vector.shape_cast %75 : vector<1x1x8x8xbf16> to vector<8x8xbf16>
    %c2_91 = arith.constant 2 : index
    %c0_92 = arith.constant 0 : index
    %c0_93 = arith.constant 0 : index
    %77 = vector.load %arg2[%c2_91, %c0_92, %c0_93] : memref<4x8x8xbf16, #tpu.memory_space<vmem>>, vector<1x8x8xbf16>
    %78 = vector.shape_cast %77 : vector<1x8x8xbf16> to vector<8x8xbf16>
    %cst_94 = arith.constant dense<0.000000e+00> : vector<8x8xf32>
    %79 = tpu.matmul %76, %78, %cst_94 {dimension_numbers = #tpu.dot_dimension_numbers<[1], [0], [0], [1], [0, 0, 1, 1], [], []>} : vector<8x8xbf16>, vector<8x8xbf16>, vector<8x8xf32> -> vector<8x8xf32>
    %80 = arith.addf %74, %79 : vector<8x8xf32>
    %c0_95 = arith.constant 0 : index
    %c3_96 = arith.constant 3 : index
    %c1_97 = arith.constant 1 : index
    %c0_98 = arith.constant 0 : index
    %81 = vector.load %arg1[%c0_95, %c3_96, %c1_97, %c0_98] : memref<1x9x9x8xbf16, #tpu.memory_space<vmem>>, vector<1x1x8x8xbf16>
    %82 = vector.shape_cast %81 : vector<1x1x8x8xbf16> to vector<8x8xbf16>
    %c3_99 = arith.constant 3 : index
    %c0_100 = arith.constant 0 : index
    %c0_101 = arith.constant 0 : index
    %83 = vector.load %arg2[%c3_99, %c0_100, %c0_101] : memref<4x8x8xbf16, #tpu.memory_space<vmem>>, vector<1x8x8xbf16>
    %84 = vector.shape_cast %83 : vector<1x8x8xbf16> to vector<8x8xbf16>
    %cst_102 = arith.constant dense<0.000000e+00> : vector<8x8xf32>
    %85 = tpu.matmul %82, %84, %cst_102 {dimension_numbers = #tpu.dot_dimension_numbers<[1], [0], [0], [1], [0, 0, 1, 1], [], []>} : vector<8x8xbf16>, vector<8x8xbf16>, vector<8x8xf32> -> vector<8x8xf32>
    %86 = arith.addf %80, %85 : vector<8x8xf32>
    %cst_103 = arith.constant 0.000000e+00 : f32
    %87 = vector.broadcast %cst_103 : f32 to vector<8x8xf32>
    %88 = arith.maximumf %86, %87 : vector<8x8xf32>
    %89 = arith.truncf %88 : vector<8x8xf32> to vector<8x8xbf16>
    %c0_104 = arith.constant 0 : index
    %c2_105 = arith.constant 2 : index
    %c0_106 = arith.constant 0 : index
    %c0_107 = arith.constant 0 : index
    %90 = vector.load %arg4[%c0_104, %c2_105, %c0_106, %c0_107] : memref<1x8x8x8xbf16, #tpu.memory_space<vmem>>, vector<1x1x8x8xbf16>
    %91 = vector.shape_cast %90 : vector<1x1x8x8xbf16> to vector<8x8xbf16>
    %92 = vector.shape_cast %89 : vector<8x8xbf16> to vector<1x1x8x8xbf16>
    tpu.vector_store %arg4[%c0_104, %c2_105, %c0_106, %c0_107], %92 {strides = array<i32>} : memref<1x8x8x8xbf16, #tpu.memory_space<vmem>>, vector<1x1x8x8xbf16>,
    %c0_108 = arith.constant 0 : index
    %c3_109 = arith.constant 3 : index
    %c0_110 = arith.constant 0 : index
    %c0_111 = arith.constant 0 : index
    %93 = vector.load %arg1[%c0_108, %c3_109, %c0_110, %c0_111] : memref<1x9x9x8xbf16, #tpu.memory_space<vmem>>, vector<1x1x8x8xbf16>
    %94 = vector.shape_cast %93 : vector<1x1x8x8xbf16> to vector<8x8xbf16>
    %c0_112 = arith.constant 0 : index
    %c0_113 = arith.constant 0 : index
    %c0_114 = arith.constant 0 : index
    %95 = vector.load %arg2[%c0_112, %c0_113, %c0_114] : memref<4x8x8xbf16, #tpu.memory_space<vmem>>, vector<1x8x8xbf16>
    %96 = vector.shape_cast %95 : vector<1x8x8xbf16> to vector<8x8xbf16>
    %cst_115 = arith.constant dense<0.000000e+00> : vector<8x8xf32>
    %97 = tpu.matmul %94, %96, %cst_115 {dimension_numbers = #tpu.dot_dimension_numbers<[1], [0], [0], [1], [0, 0, 1, 1], [], []>} : vector<8x8xbf16>, vector<8x8xbf16>, vector<8x8xf32> -> vector<8x8xf32>
    %98 = arith.addf %2, %97 : vector<8x8xf32>
    %c0_116 = arith.constant 0 : index
    %c3_117 = arith.constant 3 : index
    %c1_118 = arith.constant 1 : index
    %c0_119 = arith.constant 0 : index
    %99 = vector.load %arg1[%c0_116, %c3_117, %c1_118, %c0_119] : memref<1x9x9x8xbf16, #tpu.memory_space<vmem>>, vector<1x1x8x8xbf16>
    %100 = vector.shape_cast %99 : vector<1x1x8x8xbf16> to vector<8x8xbf16>
    %c1_120 = arith.constant 1 : index
    %c0_121 = arith.constant 0 : index
    %c0_122 = arith.constant 0 : index
    %101 = vector.load %arg2[%c1_120, %c0_121, %c0_122] : memref<4x8x8xbf16, #tpu.memory_space<vmem>>, vector<1x8x8xbf16>
    %102 = vector.shape_cast %101 : vector<1x8x8xbf16> to vector<8x8xbf16>
    %cst_123 = arith.constant dense<0.000000e+00> : vector<8x8xf32>
    %103 = tpu.matmul %100, %102, %cst_123 {dimension_numbers = #tpu.dot_dimension_numbers<[1], [0], [0], [1], [0, 0, 1, 1], [], []>} : vector<8x8xbf16>, vector<8x8xbf16>, vector<8x8xf32> -> vector<8x8xf32>
    %104 = arith.addf %98, %103 : vector<8x8xf32>
    %c0_124 = arith.constant 0 : index
    %c4 = arith.constant 4 : index
    %c0_125 = arith.constant 0 : index
    %c0_126 = arith.constant 0 : index
    %105 = vector.load %arg1[%c0_124, %c4, %c0_125, %c0_126] : memref<1x9x9x8xbf16, #tpu.memory_space<vmem>>, vector<1x1x8x8xbf16>
    %106 = vector.shape_cast %105 : vector<1x1x8x8xbf16> to vector<8x8xbf16>
    %c2_127 = arith.constant 2 : index
    %c0_128 = arith.constant 0 : index
    %c0_129 = arith.constant 0 : index
    %107 = vector.load %arg2[%c2_127, %c0_128, %c0_129] : memref<4x8x8xbf16, #tpu.memory_space<vmem>>, vector<1x8x8xbf16>
    %108 = vector.shape_cast %107 : vector<1x8x8xbf16> to vector<8x8xbf16>
    %cst_130 = arith.constant dense<0.000000e+00> : vector<8x8xf32>
    %109 = tpu.matmul %106, %108, %cst_130 {dimension_numbers = #tpu.dot_dimension_numbers<[1], [0], [0], [1], [0, 0, 1, 1], [], []>} : vector<8x8xbf16>, vector<8x8xbf16>, vector<8x8xf32> -> vector<8x8xf32>
    %110 = arith.addf %104, %109 : vector<8x8xf32>
    %c0_131 = arith.constant 0 : index
    %c4_132 = arith.constant 4 : index
    %c1_133 = arith.constant 1 : index
    %c0_134 = arith.constant 0 : index
    %111 = vector.load %arg1[%c0_131, %c4_132, %c1_133, %c0_134] : memref<1x9x9x8xbf16, #tpu.memory_space<vmem>>, vector<1x1x8x8xbf16>
    %112 = vector.shape_cast %111 : vector<1x1x8x8xbf16> to vector<8x8xbf16>
    %c3_135 = arith.constant 3 : index
    %c0_136 = arith.constant 0 : index
    %c0_137 = arith.constant 0 : index
    %113 = vector.load %arg2[%c3_135, %c0_136, %c0_137] : memref<4x8x8xbf16, #tpu.memory_space<vmem>>, vector<1x8x8xbf16>
    %114 = vector.shape_cast %113 : vector<1x8x8xbf16> to vector<8x8xbf16>
    %cst_138 = arith.constant dense<0.000000e+00> : vector<8x8xf32>
    %115 = tpu.matmul %112, %114, %cst_138 {dimension_numbers = #tpu.dot_dimension_numbers<[1], [0], [0], [1], [0, 0, 1, 1], [], []>} : vector<8x8xbf16>, vector<8x8xbf16>, vector<8x8xf32> -> vector<8x8xf32>
    %116 = arith.addf %110, %115 : vector<8x8xf32>
    %cst_139 = arith.constant 0.000000e+00 : f32
    %117 = vector.broadcast %cst_139 : f32 to vector<8x8xf32>
    %118 = arith.maximumf %116, %117 : vector<8x8xf32>
    %119 = arith.truncf %118 : vector<8x8xf32> to vector<8x8xbf16>
    %c0_140 = arith.constant 0 : index
    %c3_141 = arith.constant 3 : index
    %c0_142 = arith.constant 0 : index
    %c0_143 = arith.constant 0 : index
    %120 = vector.load %arg4[%c0_140, %c3_141, %c0_142, %c0_143] : memref<1x8x8x8xbf16, #tpu.memory_space<vmem>>, vector<1x1x8x8xbf16>
    %121 = vector.shape_cast %120 : vector<1x1x8x8xbf16> to vector<8x8xbf16>
    %122 = vector.shape_cast %119 : vector<8x8xbf16> to vector<1x1x8x8xbf16>
    tpu.vector_store %arg4[%c0_140, %c3_141, %c0_142, %c0_143], %122 {strides = array<i32>} : memref<1x8x8x8xbf16, #tpu.memory_space<vmem>>, vector<1x1x8x8xbf16>,
    %c0_144 = arith.constant 0 : index
    %c4_145 = arith.constant 4 : index
    %c0_146 = arith.constant 0 : index
    %c0_147 = arith.constant 0 : index
    %123 = vector.load %arg1[%c0_144, %c4_145, %c0_146, %c0_147] : memref<1x9x9x8xbf16, #tpu.memory_space<vmem>>, vector<1x1x8x8xbf16>
    %124 = vector.shape_cast %123 : vector<1x1x8x8xbf16> to vector<8x8xbf16>
    %c0_148 = arith.constant 0 : index
    %c0_149 = arith.constant 0 : index
    %c0_150 = arith.constant 0 : index
    %125 = vector.load %arg2[%c0_148, %c0_149, %c0_150] : memref<4x8x8xbf16, #tpu.memory_space<vmem>>, vector<1x8x8xbf16>
    %126 = vector.shape_cast %125 : vector<1x8x8xbf16> to vector<8x8xbf16>
    %cst_151 = arith.constant dense<0.000000e+00> : vector<8x8xf32>
    %127 = tpu.matmul %124, %126, %cst_151 {dimension_numbers = #tpu.dot_dimension_numbers<[1], [0], [0], [1], [0, 0, 1, 1], [], []>} : vector<8x8xbf16>, vector<8x8xbf16>, vector<8x8xf32> -> vector<8x8xf32>
    %128 = arith.addf %2, %127 : vector<8x8xf32>
    %c0_152 = arith.constant 0 : index
    %c4_153 = arith.constant 4 : index
    %c1_154 = arith.constant 1 : index
    %c0_155 = arith.constant 0 : index
    %129 = vector.load %arg1[%c0_152, %c4_153, %c1_154, %c0_155] : memref<1x9x9x8xbf16, #tpu.memory_space<vmem>>, vector<1x1x8x8xbf16>
    %130 = vector.shape_cast %129 : vector<1x1x8x8xbf16> to vector<8x8xbf16>
    %c1_156 = arith.constant 1 : index
    %c0_157 = arith.constant 0 : index
    %c0_158 = arith.constant 0 : index
    %131 = vector.load %arg2[%c1_156, %c0_157, %c0_158] : memref<4x8x8xbf16, #tpu.memory_space<vmem>>, vector<1x8x8xbf16>
    %132 = vector.shape_cast %131 : vector<1x8x8xbf16> to vector<8x8xbf16>
    %cst_159 = arith.constant dense<0.000000e+00> : vector<8x8xf32>
    %133 = tpu.matmul %130, %132, %cst_159 {dimension_numbers = #tpu.dot_dimension_numbers<[1], [0], [0], [1], [0, 0, 1, 1], [], []>} : vector<8x8xbf16>, vector<8x8xbf16>, vector<8x8xf32> -> vector<8x8xf32>
    %134 = arith.addf %128, %133 : vector<8x8xf32>
    %c0_160 = arith.constant 0 : index
    %c5 = arith.constant 5 : index
    %c0_161 = arith.constant 0 : index
    %c0_162 = arith.constant 0 : index
    %135 = vector.load %arg1[%c0_160, %c5, %c0_161, %c0_162] : memref<1x9x9x8xbf16, #tpu.memory_space<vmem>>, vector<1x1x8x8xbf16>
    %136 = vector.shape_cast %135 : vector<1x1x8x8xbf16> to vector<8x8xbf16>
    %c2_163 = arith.constant 2 : index
    %c0_164 = arith.constant 0 : index
    %c0_165 = arith.constant 0 : index
    %137 = vector.load %arg2[%c2_163, %c0_164, %c0_165] : memref<4x8x8xbf16, #tpu.memory_space<vmem>>, vector<1x8x8xbf16>
    %138 = vector.shape_cast %137 : vector<1x8x8xbf16> to vector<8x8xbf16>
    %cst_166 = arith.constant dense<0.000000e+00> : vector<8x8xf32>
    %139 = tpu.matmul %136, %138, %cst_166 {dimension_numbers = #tpu.dot_dimension_numbers<[1], [0], [0], [1], [0, 0, 1, 1], [], []>} : vector<8x8xbf16>, vector<8x8xbf16>, vector<8x8xf32> -> vector<8x8xf32>
    %140 = arith.addf %134, %139 : vector<8x8xf32>
    %c0_167 = arith.constant 0 : index
    %c5_168 = arith.constant 5 : index
    %c1_169 = arith.constant 1 : index
    %c0_170 = arith.constant 0 : index
    %141 = vector.load %arg1[%c0_167, %c5_168, %c1_169, %c0_170] : memref<1x9x9x8xbf16, #tpu.memory_space<vmem>>, vector<1x1x8x8xbf16>
    %142 = vector.shape_cast %141 : vector<1x1x8x8xbf16> to vector<8x8xbf16>
    %c3_171 = arith.constant 3 : index
    %c0_172 = arith.constant 0 : index
    %c0_173 = arith.constant 0 : index
    %143 = vector.load %arg2[%c3_171, %c0_172, %c0_173] : memref<4x8x8xbf16, #tpu.memory_space<vmem>>, vector<1x8x8xbf16>
    %144 = vector.shape_cast %143 : vector<1x8x8xbf16> to vector<8x8xbf16>
    %cst_174 = arith.constant dense<0.000000e+00> : vector<8x8xf32>
    %145 = tpu.matmul %142, %144, %cst_174 {dimension_numbers = #tpu.dot_dimension_numbers<[1], [0], [0], [1], [0, 0, 1, 1], [], []>} : vector<8x8xbf16>, vector<8x8xbf16>, vector<8x8xf32> -> vector<8x8xf32>
    %146 = arith.addf %140, %145 : vector<8x8xf32>
    %cst_175 = arith.constant 0.000000e+00 : f32
    %147 = vector.broadcast %cst_175 : f32 to vector<8x8xf32>
    %148 = arith.maximumf %146, %147 : vector<8x8xf32>
    %149 = arith.truncf %148 : vector<8x8xf32> to vector<8x8xbf16>
    %c0_176 = arith.constant 0 : index
    %c4_177 = arith.constant 4 : index
    %c0_178 = arith.constant 0 : index
    %c0_179 = arith.constant 0 : index
    %150 = vector.load %arg4[%c0_176, %c4_177, %c0_178, %c0_179] : memref<1x8x8x8xbf16, #tpu.memory_space<vmem>>, vector<1x1x8x8xbf16>
    %151 = vector.shape_cast %150 : vector<1x1x8x8xbf16> to vector<8x8xbf16>
    %152 = vector.shape_cast %149 : vector<8x8xbf16> to vector<1x1x8x8xbf16>
    tpu.vector_store %arg4[%c0_176, %c4_177, %c0_178, %c0_179], %152 {strides = array<i32>} : memref<1x8x8x8xbf16, #tpu.memory_space<vmem>>, vector<1x1x8x8xbf16>,
    %c0_180 = arith.constant 0 : index
    %c5_181 = arith.constant 5 : index
    %c0_182 = arith.constant 0 : index
    %c0_183 = arith.constant 0 : index
    %153 = vector.load %arg1[%c0_180, %c5_181, %c0_182, %c0_183] : memref<1x9x9x8xbf16, #tpu.memory_space<vmem>>, vector<1x1x8x8xbf16>
    %154 = vector.shape_cast %153 : vector<1x1x8x8xbf16> to vector<8x8xbf16>
    %c0_184 = arith.constant 0 : index
    %c0_185 = arith.constant 0 : index
    %c0_186 = arith.constant 0 : index
    %155 = vector.load %arg2[%c0_184, %c0_185, %c0_186] : memref<4x8x8xbf16, #tpu.memory_space<vmem>>, vector<1x8x8xbf16>
    %156 = vector.shape_cast %155 : vector<1x8x8xbf16> to vector<8x8xbf16>
    %cst_187 = arith.constant dense<0.000000e+00> : vector<8x8xf32>
    %157 = tpu.matmul %154, %156, %cst_187 {dimension_numbers = #tpu.dot_dimension_numbers<[1], [0], [0], [1], [0, 0, 1, 1], [], []>} : vector<8x8xbf16>, vector<8x8xbf16>, vector<8x8xf32> -> vector<8x8xf32>
    %158 = arith.addf %2, %157 : vector<8x8xf32>
    %c0_188 = arith.constant 0 : index
    %c5_189 = arith.constant 5 : index
    %c1_190 = arith.constant 1 : index
    %c0_191 = arith.constant 0 : index
    %159 = vector.load %arg1[%c0_188, %c5_189, %c1_190, %c0_191] : memref<1x9x9x8xbf16, #tpu.memory_space<vmem>>, vector<1x1x8x8xbf16>
    %160 = vector.shape_cast %159 : vector<1x1x8x8xbf16> to vector<8x8xbf16>
    %c1_192 = arith.constant 1 : index
    %c0_193 = arith.constant 0 : index
    %c0_194 = arith.constant 0 : index
    %161 = vector.load %arg2[%c1_192, %c0_193, %c0_194] : memref<4x8x8xbf16, #tpu.memory_space<vmem>>, vector<1x8x8xbf16>
    %162 = vector.shape_cast %161 : vector<1x8x8xbf16> to vector<8x8xbf16>
    %cst_195 = arith.constant dense<0.000000e+00> : vector<8x8xf32>
    %163 = tpu.matmul %160, %162, %cst_195 {dimension_numbers = #tpu.dot_dimension_numbers<[1], [0], [0], [1], [0, 0, 1, 1], [], []>} : vector<8x8xbf16>, vector<8x8xbf16>, vector<8x8xf32> -> vector<8x8xf32>
    %164 = arith.addf %158, %163 : vector<8x8xf32>
    %c0_196 = arith.constant 0 : index
    %c6 = arith.constant 6 : index
    %c0_197 = arith.constant 0 : index
    %c0_198 = arith.constant 0 : index
    %165 = vector.load %arg1[%c0_196, %c6, %c0_197, %c0_198] : memref<1x9x9x8xbf16, #tpu.memory_space<vmem>>, vector<1x1x8x8xbf16>
    %166 = vector.shape_cast %165 : vector<1x1x8x8xbf16> to vector<8x8xbf16>
    %c2_199 = arith.constant 2 : index
    %c0_200 = arith.constant 0 : index
    %c0_201 = arith.constant 0 : index
    %167 = vector.load %arg2[%c2_199, %c0_200, %c0_201] : memref<4x8x8xbf16, #tpu.memory_space<vmem>>, vector<1x8x8xbf16>
    %168 = vector.shape_cast %167 : vector<1x8x8xbf16> to vector<8x8xbf16>
    %cst_202 = arith.constant dense<0.000000e+00> : vector<8x8xf32>
    %169 = tpu.matmul %166, %168, %cst_202 {dimension_numbers = #tpu.dot_dimension_numbers<[1], [0], [0], [1], [0, 0, 1, 1], [], []>} : vector<8x8xbf16>, vector<8x8xbf16>, vector<8x8xf32> -> vector<8x8xf32>
    %170 = arith.addf %164, %169 : vector<8x8xf32>
    %c0_203 = arith.constant 0 : index
    %c6_204 = arith.constant 6 : index
    %c1_205 = arith.constant 1 : index
    %c0_206 = arith.constant 0 : index
    %171 = vector.load %arg1[%c0_203, %c6_204, %c1_205, %c0_206] : memref<1x9x9x8xbf16, #tpu.memory_space<vmem>>, vector<1x1x8x8xbf16>
    %172 = vector.shape_cast %171 : vector<1x1x8x8xbf16> to vector<8x8xbf16>
    %c3_207 = arith.constant 3 : index
    %c0_208 = arith.constant 0 : index
    %c0_209 = arith.constant 0 : index
    %173 = vector.load %arg2[%c3_207, %c0_208, %c0_209] : memref<4x8x8xbf16, #tpu.memory_space<vmem>>, vector<1x8x8xbf16>
    %174 = vector.shape_cast %173 : vector<1x8x8xbf16> to vector<8x8xbf16>
    %cst_210 = arith.constant dense<0.000000e+00> : vector<8x8xf32>
    %175 = tpu.matmul %172, %174, %cst_210 {dimension_numbers = #tpu.dot_dimension_numbers<[1], [0], [0], [1], [0, 0, 1, 1], [], []>} : vector<8x8xbf16>, vector<8x8xbf16>, vector<8x8xf32> -> vector<8x8xf32>
    %176 = arith.addf %170, %175 : vector<8x8xf32>
    %cst_211 = arith.constant 0.000000e+00 : f32
    %177 = vector.broadcast %cst_211 : f32 to vector<8x8xf32>
    %178 = arith.maximumf %176, %177 : vector<8x8xf32>
    %179 = arith.truncf %178 : vector<8x8xf32> to vector<8x8xbf16>
    %c0_212 = arith.constant 0 : index
    %c5_213 = arith.constant 5 : index
    %c0_214 = arith.constant 0 : index
    %c0_215 = arith.constant 0 : index
    %180 = vector.load %arg4[%c0_212, %c5_213, %c0_214, %c0_215] : memref<1x8x8x8xbf16, #tpu.memory_space<vmem>>, vector<1x1x8x8xbf16>
    %181 = vector.shape_cast %180 : vector<1x1x8x8xbf16> to vector<8x8xbf16>
    %182 = vector.shape_cast %179 : vector<8x8xbf16> to vector<1x1x8x8xbf16>
    tpu.vector_store %arg4[%c0_212, %c5_213, %c0_214, %c0_215], %182 {strides = array<i32>} : memref<1x8x8x8xbf16, #tpu.memory_space<vmem>>, vector<1x1x8x8xbf16>,
    %c0_216 = arith.constant 0 : index
    %c6_217 = arith.constant 6 : index
    %c0_218 = arith.constant 0 : index
    %c0_219 = arith.constant 0 : index
    %183 = vector.load %arg1[%c0_216, %c6_217, %c0_218, %c0_219] : memref<1x9x9x8xbf16, #tpu.memory_space<vmem>>, vector<1x1x8x8xbf16>
    %184 = vector.shape_cast %183 : vector<1x1x8x8xbf16> to vector<8x8xbf16>
    %c0_220 = arith.constant 0 : index
    %c0_221 = arith.constant 0 : index
    %c0_222 = arith.constant 0 : index
    %185 = vector.load %arg2[%c0_220, %c0_221, %c0_222] : memref<4x8x8xbf16, #tpu.memory_space<vmem>>, vector<1x8x8xbf16>
    %186 = vector.shape_cast %185 : vector<1x8x8xbf16> to vector<8x8xbf16>
    %cst_223 = arith.constant dense<0.000000e+00> : vector<8x8xf32>
    %187 = tpu.matmul %184, %186, %cst_223 {dimension_numbers = #tpu.dot_dimension_numbers<[1], [0], [0], [1], [0, 0, 1, 1], [], []>} : vector<8x8xbf16>, vector<8x8xbf16>, vector<8x8xf32> -> vector<8x8xf32>
    %188 = arith.addf %2, %187 : vector<8x8xf32>
    %c0_224 = arith.constant 0 : index
    %c6_225 = arith.constant 6 : index
    %c1_226 = arith.constant 1 : index
    %c0_227 = arith.constant 0 : index
    %189 = vector.load %arg1[%c0_224, %c6_225, %c1_226, %c0_227] : memref<1x9x9x8xbf16, #tpu.memory_space<vmem>>, vector<1x1x8x8xbf16>
    %190 = vector.shape_cast %189 : vector<1x1x8x8xbf16> to vector<8x8xbf16>
    %c1_228 = arith.constant 1 : index
    %c0_229 = arith.constant 0 : index
    %c0_230 = arith.constant 0 : index
    %191 = vector.load %arg2[%c1_228, %c0_229, %c0_230] : memref<4x8x8xbf16, #tpu.memory_space<vmem>>, vector<1x8x8xbf16>
    %192 = vector.shape_cast %191 : vector<1x8x8xbf16> to vector<8x8xbf16>
    %cst_231 = arith.constant dense<0.000000e+00> : vector<8x8xf32>
    %193 = tpu.matmul %190, %192, %cst_231 {dimension_numbers = #tpu.dot_dimension_numbers<[1], [0], [0], [1], [0, 0, 1, 1], [], []>} : vector<8x8xbf16>, vector<8x8xbf16>, vector<8x8xf32> -> vector<8x8xf32>
    %194 = arith.addf %188, %193 : vector<8x8xf32>
    %c0_232 = arith.constant 0 : index
    %c7 = arith.constant 7 : index
    %c0_233 = arith.constant 0 : index
    %c0_234 = arith.constant 0 : index
    %195 = vector.load %arg1[%c0_232, %c7, %c0_233, %c0_234] : memref<1x9x9x8xbf16, #tpu.memory_space<vmem>>, vector<1x1x8x8xbf16>
    %196 = vector.shape_cast %195 : vector<1x1x8x8xbf16> to vector<8x8xbf16>
    %c2_235 = arith.constant 2 : index
    %c0_236 = arith.constant 0 : index
    %c0_237 = arith.constant 0 : index
    %197 = vector.load %arg2[%c2_235, %c0_236, %c0_237] : memref<4x8x8xbf16, #tpu.memory_space<vmem>>, vector<1x8x8xbf16>
    %198 = vector.shape_cast %197 : vector<1x8x8xbf16> to vector<8x8xbf16>
    %cst_238 = arith.constant dense<0.000000e+00> : vector<8x8xf32>
    %199 = tpu.matmul %196, %198, %cst_238 {dimension_numbers = #tpu.dot_dimension_numbers<[1], [0], [0], [1], [0, 0, 1, 1], [], []>} : vector<8x8xbf16>, vector<8x8xbf16>, vector<8x8xf32> -> vector<8x8xf32>
    %200 = arith.addf %194, %199 : vector<8x8xf32>
    %c0_239 = arith.constant 0 : index
    %c7_240 = arith.constant 7 : index
    %c1_241 = arith.constant 1 : index
    %c0_242 = arith.constant 0 : index
    %201 = vector.load %arg1[%c0_239, %c7_240, %c1_241, %c0_242] : memref<1x9x9x8xbf16, #tpu.memory_space<vmem>>, vector<1x1x8x8xbf16>
    %202 = vector.shape_cast %201 : vector<1x1x8x8xbf16> to vector<8x8xbf16>
    %c3_243 = arith.constant 3 : index
    %c0_244 = arith.constant 0 : index
    %c0_245 = arith.constant 0 : index
    %203 = vector.load %arg2[%c3_243, %c0_244, %c0_245] : memref<4x8x8xbf16, #tpu.memory_space<vmem>>, vector<1x8x8xbf16>
    %204 = vector.shape_cast %203 : vector<1x8x8xbf16> to vector<8x8xbf16>
    %cst_246 = arith.constant dense<0.000000e+00> : vector<8x8xf32>
    %205 = tpu.matmul %202, %204, %cst_246 {dimension_numbers = #tpu.dot_dimension_numbers<[1], [0], [0], [1], [0, 0, 1, 1], [], []>} : vector<8x8xbf16>, vector<8x8xbf16>, vector<8x8xf32> -> vector<8x8xf32>
    %206 = arith.addf %200, %205 : vector<8x8xf32>
    %cst_247 = arith.constant 0.000000e+00 : f32
    %207 = vector.broadcast %cst_247 : f32 to vector<8x8xf32>
    %208 = arith.maximumf %206, %207 : vector<8x8xf32>
    %209 = arith.truncf %208 : vector<8x8xf32> to vector<8x8xbf16>
    %c0_248 = arith.constant 0 : index
    %c6_249 = arith.constant 6 : index
    %c0_250 = arith.constant 0 : index
    %c0_251 = arith.constant 0 : index
    %210 = vector.load %arg4[%c0_248, %c6_249, %c0_250, %c0_251] : memref<1x8x8x8xbf16, #tpu.memory_space<vmem>>, vector<1x1x8x8xbf16>
    %211 = vector.shape_cast %210 : vector<1x1x8x8xbf16> to vector<8x8xbf16>
    %212 = vector.shape_cast %209 : vector<8x8xbf16> to vector<1x1x8x8xbf16>
    tpu.vector_store %arg4[%c0_248, %c6_249, %c0_250, %c0_251], %212 {strides = array<i32>} : memref<1x8x8x8xbf16, #tpu.memory_space<vmem>>, vector<1x1x8x8xbf16>,
    %c0_252 = arith.constant 0 : index
    %c7_253 = arith.constant 7 : index
    %c0_254 = arith.constant 0 : index
    %c0_255 = arith.constant 0 : index
    %213 = vector.load %arg1[%c0_252, %c7_253, %c0_254, %c0_255] : memref<1x9x9x8xbf16, #tpu.memory_space<vmem>>, vector<1x1x8x8xbf16>
    %214 = vector.shape_cast %213 : vector<1x1x8x8xbf16> to vector<8x8xbf16>
    %c0_256 = arith.constant 0 : index
    %c0_257 = arith.constant 0 : index
    %c0_258 = arith.constant 0 : index
    %215 = vector.load %arg2[%c0_256, %c0_257, %c0_258] : memref<4x8x8xbf16, #tpu.memory_space<vmem>>, vector<1x8x8xbf16>
    %216 = vector.shape_cast %215 : vector<1x8x8xbf16> to vector<8x8xbf16>
    %cst_259 = arith.constant dense<0.000000e+00> : vector<8x8xf32>
    %217 = tpu.matmul %214, %216, %cst_259 {dimension_numbers = #tpu.dot_dimension_numbers<[1], [0], [0], [1], [0, 0, 1, 1], [], []>} : vector<8x8xbf16>, vector<8x8xbf16>, vector<8x8xf32> -> vector<8x8xf32>
    %218 = arith.addf %2, %217 : vector<8x8xf32>
    %c0_260 = arith.constant 0 : index
    %c7_261 = arith.constant 7 : index
    %c1_262 = arith.constant 1 : index
    %c0_263 = arith.constant 0 : index
    %219 = vector.load %arg1[%c0_260, %c7_261, %c1_262, %c0_263] : memref<1x9x9x8xbf16, #tpu.memory_space<vmem>>, vector<1x1x8x8xbf16>
    %220 = vector.shape_cast %219 : vector<1x1x8x8xbf16> to vector<8x8xbf16>
    %c1_264 = arith.constant 1 : index
    %c0_265 = arith.constant 0 : index
    %c0_266 = arith.constant 0 : index
    %221 = vector.load %arg2[%c1_264, %c0_265, %c0_266] : memref<4x8x8xbf16, #tpu.memory_space<vmem>>, vector<1x8x8xbf16>
    %222 = vector.shape_cast %221 : vector<1x8x8xbf16> to vector<8x8xbf16>
    %cst_267 = arith.constant dense<0.000000e+00> : vector<8x8xf32>
    %223 = tpu.matmul %220, %222, %cst_267 {dimension_numbers = #tpu.dot_dimension_numbers<[1], [0], [0], [1], [0, 0, 1, 1], [], []>} : vector<8x8xbf16>, vector<8x8xbf16>, vector<8x8xf32> -> vector<8x8xf32>
    %224 = arith.addf %218, %223 : vector<8x8xf32>
    %c0_268 = arith.constant 0 : index
    %c8 = arith.constant 8 : index
    %c0_269 = arith.constant 0 : index
    %c0_270 = arith.constant 0 : index
    %225 = vector.load %arg1[%c0_268, %c8, %c0_269, %c0_270] : memref<1x9x9x8xbf16, #tpu.memory_space<vmem>>, vector<1x1x8x8xbf16>
    %226 = vector.shape_cast %225 : vector<1x1x8x8xbf16> to vector<8x8xbf16>
    %c2_271 = arith.constant 2 : index
    %c0_272 = arith.constant 0 : index
    %c0_273 = arith.constant 0 : index
    %227 = vector.load %arg2[%c2_271, %c0_272, %c0_273] : memref<4x8x8xbf16, #tpu.memory_space<vmem>>, vector<1x8x8xbf16>
    %228 = vector.shape_cast %227 : vector<1x8x8xbf16> to vector<8x8xbf16>
    %cst_274 = arith.constant dense<0.000000e+00> : vector<8x8xf32>
    %229 = tpu.matmul %226, %228, %cst_274 {dimension_numbers = #tpu.dot_dimension_numbers<[1], [0], [0], [1], [0, 0, 1, 1], [], []>} : vector<8x8xbf16>, vector<8x8xbf16>, vector<8x8xf32> -> vector<8x8xf32>
    %230 = arith.addf %224, %229 : vector<8x8xf32>
    %c0_275 = arith.constant 0 : index
    %c8_276 = arith.constant 8 : index
    %c1_277 = arith.constant 1 : index
    %c0_278 = arith.constant 0 : index
    %231 = vector.load %arg1[%c0_275, %c8_276, %c1_277, %c0_278] : memref<1x9x9x8xbf16, #tpu.memory_space<vmem>>, vector<1x1x8x8xbf16>
    %232 = vector.shape_cast %231 : vector<1x1x8x8xbf16> to vector<8x8xbf16>
    %c3_279 = arith.constant 3 : index
    %c0_280 = arith.constant 0 : index
    %c0_281 = arith.constant 0 : index
    %233 = vector.load %arg2[%c3_279, %c0_280, %c0_281] : memref<4x8x8xbf16, #tpu.memory_space<vmem>>, vector<1x8x8xbf16>
    %234 = vector.shape_cast %233 : vector<1x8x8xbf16> to vector<8x8xbf16>
    %cst_282 = arith.constant dense<0.000000e+00> : vector<8x8xf32>
    %235 = tpu.matmul %232, %234, %cst_282 {dimension_numbers = #tpu.dot_dimension_numbers<[1], [0], [0], [1], [0, 0, 1, 1], [], []>} : vector<8x8xbf16>, vector<8x8xbf16>, vector<8x8xf32> -> vector<8x8xf32>
    %236 = arith.addf %230, %235 : vector<8x8xf32>
    %cst_283 = arith.constant 0.000000e+00 : f32
    %237 = vector.broadcast %cst_283 : f32 to vector<8x8xf32>
    %238 = arith.maximumf %236, %237 : vector<8x8xf32>
    %239 = arith.truncf %238 : vector<8x8xf32> to vector<8x8xbf16>
    %c0_284 = arith.constant 0 : index
    %c7_285 = arith.constant 7 : index
    %c0_286 = arith.constant 0 : index
    %c0_287 = arith.constant 0 : index
    %240 = vector.load %arg4[%c0_284, %c7_285, %c0_286, %c0_287] : memref<1x8x8x8xbf16, #tpu.memory_space<vmem>>, vector<1x1x8x8xbf16>
    %241 = vector.shape_cast %240 : vector<1x1x8x8xbf16> to vector<8x8xbf16>
    %242 = vector.shape_cast %239 : vector<8x8xbf16> to vector<1x1x8x8xbf16>
    tpu.vector_store %arg4[%c0_284, %c7_285, %c0_286, %c0_287], %242 {strides = array<i32>} : memref<1x8x8x8xbf16, #tpu.memory_space<vmem>>, vector<1x1x8x8xbf16>,
    return
  }
  func.func @transform_0(%arg0: i32) -> (i32, i32, i32, i32) {
    %c0_i32 = arith.constant 0 : i32
    %c0_i32_0 = arith.constant 0 : i32
    %c0_i32_1 = arith.constant 0 : i32
    %c0_i32_2 = arith.constant 0 : i32
    return %arg0, %c0_i32, %c0_i32_0, %c0_i32_1 : i32, i32, i32, i32
  }
  func.func @transform_1(%arg0: i32) -> (i32, i32, i32) {
    %c0_i32 = arith.constant 0 : i32
    %c0_i32_0 = arith.constant 0 : i32
    %c0_i32_1 = arith.constant 0 : i32
    %c0_i32_2 = arith.constant 0 : i32
    return %c0_i32, %c0_i32_0, %c0_i32_1 : i32, i32, i32
  }
  func.func @transform_2(%arg0: i32) -> (i32, i32) {
    %c0_i32 = arith.constant 0 : i32
    %c0_i32_0 = arith.constant 0 : i32
    %c0_i32_1 = arith.constant 0 : i32
    return %c0_i32, %c0_i32_0 : i32, i32
  }
  func.func @transform_3(%arg0: i32) -> (i32, i32, i32, i32) {
    %c0_i32 = arith.constant 0 : i32
    %c0_i32_0 = arith.constant 0 : i32
    %c0_i32_1 = arith.constant 0 : i32
    %c0_i32_2 = arith.constant 0 : i32
    return %arg0, %c0_i32, %c0_i32_0, %c0_i32_1 : i32, i32, i32, i32
  }
}

module attributes {stable_mosaic.version = 11 : i64} {
  func.func @_decode_fuse_kernel(%arg0: i32, %arg1: memref<32x16xbf16, #tpu.memory_space<vmem>>, %arg2: memref<32x16xbf16, #tpu.memory_space<vmem>>, %arg3: memref<16x96xbf16, #tpu.memory_space<vmem>>, %arg4: memref<1x96xf32, #tpu.memory_space<vmem>>, %arg5: memref<16x96xbf16, #tpu.memory_space<vmem>>, %arg6: memref<1x96xf32, #tpu.memory_space<vmem>>, %arg7: memref<96x96xbf16, #tpu.memory_space<vmem>>, %arg8: memref<96x96xbf16, #tpu.memory_space<vmem>>, %arg9: memref<1x96xf32, #tpu.memory_space<vmem>>, %arg10: memref<96x16xbf16, #tpu.memory_space<vmem>>, %arg11: memref<32x16xbf16, #tpu.memory_space<vmem>>) attributes {dimension_semantics = [#tpu.dimension_semantics<parallel>], iteration_bounds = array<i64: 1>, scalar_prefetch = 0 : i64, scratch_operands = 0 : i64, tpu.core_type = #tpu.core_type<tc>, window_params = [{transform_indices = @transform_0, window_bounds = array<i64: 32, 16>}, {transform_indices = @transform_1, window_bounds = array<i64: 32, 16>}, {pipeline_mode = #tpu.pipeline_mode<synchronous>, transform_indices = @transform_2, window_bounds = array<i64: 16, 96>}, {pipeline_mode = #tpu.pipeline_mode<synchronous>, transform_indices = @transform_3, window_bounds = array<i64: 1, 96>}, {pipeline_mode = #tpu.pipeline_mode<synchronous>, transform_indices = @transform_4, window_bounds = array<i64: 16, 96>}, {pipeline_mode = #tpu.pipeline_mode<synchronous>, transform_indices = @transform_5, window_bounds = array<i64: 1, 96>}, {pipeline_mode = #tpu.pipeline_mode<synchronous>, transform_indices = @transform_6, window_bounds = array<i64: 96, 96>}, {pipeline_mode = #tpu.pipeline_mode<synchronous>, transform_indices = @transform_7, window_bounds = array<i64: 96, 96>}, {pipeline_mode = #tpu.pipeline_mode<synchronous>, transform_indices = @transform_8, window_bounds = array<i64: 1, 96>}, {pipeline_mode = #tpu.pipeline_mode<synchronous>, transform_indices = @transform_9, window_bounds = array<i64: 96, 16>}, {transform_indices = @transform_10, window_bounds = array<i64: 32, 16>}]} {
    %c0 = arith.constant 0 : index
    %c0_0 = arith.constant 0 : index
    %0 = vector.load %arg1[%c0, %c0_0] : memref<32x16xbf16, #tpu.memory_space<vmem>>, vector<32x16xbf16>
    %c0_1 = arith.constant 0 : index
    %c0_2 = arith.constant 0 : index
    %1 = vector.load %arg3[%c0_1, %c0_2] : memref<16x96xbf16, #tpu.memory_space<vmem>>, vector<16x96xbf16>
    %cst = arith.constant dense<0.000000e+00> : vector<32x96xf32>
    %2 = tpu.matmul %0, %1, %cst {dimension_numbers = #tpu.dot_dimension_numbers<[1], [0], [0], [1], [0, 0, 1, 1], [], []>} : vector<32x16xbf16>, vector<16x96xbf16>, vector<32x96xf32> -> vector<32x96xf32>
    %c0_3 = arith.constant 0 : index
    %c0_4 = arith.constant 0 : index
    %3 = vector.load %arg4[%c0_3, %c0_4] : memref<1x96xf32, #tpu.memory_space<vmem>>, vector<1x96xf32>
    %4 = vector.broadcast %3 : vector<1x96xf32> to vector<32x96xf32>
    %5 = arith.addf %2, %4 : vector<32x96xf32>
    %cst_5 = arith.constant 0.000000e+00 : f32
    %6 = vector.broadcast %cst_5 : f32 to vector<32x96xf32>
    %7 = arith.maximumf %5, %6 : vector<32x96xf32>
    %c0_6 = arith.constant 0 : index
    %c0_7 = arith.constant 0 : index
    %8 = vector.load %arg2[%c0_6, %c0_7] : memref<32x16xbf16, #tpu.memory_space<vmem>>, vector<32x16xbf16>
    %c0_8 = arith.constant 0 : index
    %c0_9 = arith.constant 0 : index
    %9 = vector.load %arg5[%c0_8, %c0_9] : memref<16x96xbf16, #tpu.memory_space<vmem>>, vector<16x96xbf16>
    %cst_10 = arith.constant dense<0.000000e+00> : vector<32x96xf32>
    %10 = tpu.matmul %8, %9, %cst_10 {dimension_numbers = #tpu.dot_dimension_numbers<[1], [0], [0], [1], [0, 0, 1, 1], [], []>} : vector<32x16xbf16>, vector<16x96xbf16>, vector<32x96xf32> -> vector<32x96xf32>
    %c0_11 = arith.constant 0 : index
    %c0_12 = arith.constant 0 : index
    %11 = vector.load %arg6[%c0_11, %c0_12] : memref<1x96xf32, #tpu.memory_space<vmem>>, vector<1x96xf32>
    %12 = vector.broadcast %11 : vector<1x96xf32> to vector<32x96xf32>
    %13 = arith.addf %10, %12 : vector<32x96xf32>
    %cst_13 = arith.constant 0.000000e+00 : f32
    %14 = vector.broadcast %cst_13 : f32 to vector<32x96xf32>
    %15 = arith.maximumf %13, %14 : vector<32x96xf32>
    %16 = arith.truncf %7 : vector<32x96xf32> to vector<32x96xbf16>
    %c0_14 = arith.constant 0 : index
    %c0_15 = arith.constant 0 : index
    %17 = vector.load %arg7[%c0_14, %c0_15] : memref<96x96xbf16, #tpu.memory_space<vmem>>, vector<96x96xbf16>
    %cst_16 = arith.constant dense<0.000000e+00> : vector<32x96xf32>
    %18 = tpu.matmul %16, %17, %cst_16 {dimension_numbers = #tpu.dot_dimension_numbers<[1], [0], [0], [1], [0, 0, 1, 1], [], []>} : vector<32x96xbf16>, vector<96x96xbf16>, vector<32x96xf32> -> vector<32x96xf32>
    %19 = arith.truncf %15 : vector<32x96xf32> to vector<32x96xbf16>
    %c0_17 = arith.constant 0 : index
    %c0_18 = arith.constant 0 : index
    %20 = vector.load %arg8[%c0_17, %c0_18] : memref<96x96xbf16, #tpu.memory_space<vmem>>, vector<96x96xbf16>
    %cst_19 = arith.constant dense<0.000000e+00> : vector<32x96xf32>
    %21 = tpu.matmul %19, %20, %cst_19 {dimension_numbers = #tpu.dot_dimension_numbers<[1], [0], [0], [1], [0, 0, 1, 1], [], []>} : vector<32x96xbf16>, vector<96x96xbf16>, vector<32x96xf32> -> vector<32x96xf32>
    %22 = arith.addf %18, %21 : vector<32x96xf32>
    %c0_20 = arith.constant 0 : index
    %c0_21 = arith.constant 0 : index
    %23 = vector.load %arg9[%c0_20, %c0_21] : memref<1x96xf32, #tpu.memory_space<vmem>>, vector<1x96xf32>
    %24 = vector.broadcast %23 : vector<1x96xf32> to vector<32x96xf32>
    %25 = arith.addf %22, %24 : vector<32x96xf32>
    %cst_22 = arith.constant 0.000000e+00 : f32
    %26 = vector.broadcast %cst_22 : f32 to vector<32x96xf32>
    %27 = arith.maximumf %25, %26 : vector<32x96xf32>
    %28 = arith.truncf %27 : vector<32x96xf32> to vector<32x96xbf16>
    %c0_23 = arith.constant 0 : index
    %c0_24 = arith.constant 0 : index
    %29 = vector.load %arg10[%c0_23, %c0_24] : memref<96x16xbf16, #tpu.memory_space<vmem>>, vector<96x16xbf16>
    %cst_25 = arith.constant dense<0.000000e+00> : vector<32x16xf32>
    %30 = tpu.matmul %28, %29, %cst_25 {dimension_numbers = #tpu.dot_dimension_numbers<[1], [0], [0], [1], [0, 0, 1, 1], [], []>} : vector<32x96xbf16>, vector<96x16xbf16>, vector<32x16xf32> -> vector<32x16xf32>
    %31 = arith.truncf %30 : vector<32x16xf32> to vector<32x16xbf16>
    %c0_26 = arith.constant 0 : index
    %c0_27 = arith.constant 0 : index
    %32 = vector.load %arg11[%c0_26, %c0_27] : memref<32x16xbf16, #tpu.memory_space<vmem>>, vector<32x16xbf16>
    tpu.vector_store %arg11[%c0_26, %c0_27], %31 {strides = array<i32>} : memref<32x16xbf16, #tpu.memory_space<vmem>>, vector<32x16xbf16>,
    return
  }
  func.func @transform_0(%arg0: i32) -> (i32, i32) {
    %c0_i32 = arith.constant 0 : i32
    %c0_i32_0 = arith.constant 0 : i32
    return %arg0, %c0_i32 : i32, i32
  }
  func.func @transform_1(%arg0: i32) -> (i32, i32) {
    %c0_i32 = arith.constant 0 : i32
    %c0_i32_0 = arith.constant 0 : i32
    return %arg0, %c0_i32 : i32, i32
  }
  func.func @transform_2(%arg0: i32) -> (i32, i32) {
    %c0_i32 = arith.constant 0 : i32
    %c0_i32_0 = arith.constant 0 : i32
    %c0_i32_1 = arith.constant 0 : i32
    return %c0_i32, %c0_i32_0 : i32, i32
  }
  func.func @transform_3(%arg0: i32) -> (i32, i32) {
    %c0_i32 = arith.constant 0 : i32
    %c0_i32_0 = arith.constant 0 : i32
    %c0_i32_1 = arith.constant 0 : i32
    return %c0_i32, %c0_i32_0 : i32, i32
  }
  func.func @transform_4(%arg0: i32) -> (i32, i32) {
    %c0_i32 = arith.constant 0 : i32
    %c0_i32_0 = arith.constant 0 : i32
    %c0_i32_1 = arith.constant 0 : i32
    return %c0_i32, %c0_i32_0 : i32, i32
  }
  func.func @transform_5(%arg0: i32) -> (i32, i32) {
    %c0_i32 = arith.constant 0 : i32
    %c0_i32_0 = arith.constant 0 : i32
    %c0_i32_1 = arith.constant 0 : i32
    return %c0_i32, %c0_i32_0 : i32, i32
  }
  func.func @transform_6(%arg0: i32) -> (i32, i32) {
    %c0_i32 = arith.constant 0 : i32
    %c0_i32_0 = arith.constant 0 : i32
    %c0_i32_1 = arith.constant 0 : i32
    return %c0_i32, %c0_i32_0 : i32, i32
  }
  func.func @transform_7(%arg0: i32) -> (i32, i32) {
    %c0_i32 = arith.constant 0 : i32
    %c0_i32_0 = arith.constant 0 : i32
    %c0_i32_1 = arith.constant 0 : i32
    return %c0_i32, %c0_i32_0 : i32, i32
  }
  func.func @transform_8(%arg0: i32) -> (i32, i32) {
    %c0_i32 = arith.constant 0 : i32
    %c0_i32_0 = arith.constant 0 : i32
    %c0_i32_1 = arith.constant 0 : i32
    return %c0_i32, %c0_i32_0 : i32, i32
  }
  func.func @transform_9(%arg0: i32) -> (i32, i32) {
    %c0_i32 = arith.constant 0 : i32
    %c0_i32_0 = arith.constant 0 : i32
    %c0_i32_1 = arith.constant 0 : i32
    return %c0_i32, %c0_i32_0 : i32, i32
  }
  func.func @transform_10(%arg0: i32) -> (i32, i32) {
    %c0_i32 = arith.constant 0 : i32
    %c0_i32_0 = arith.constant 0 : i32
    return %arg0, %c0_i32 : i32, i32
  }
}

module attributes {stable_mosaic.version = 11 : i64} {
  func.func @_conv_s1_kernel(%arg0: i32, %arg1: memref<1x6x6x16xbf16, #tpu.memory_space<vmem>>, %arg2: memref<9x16x1xbf16, #tpu.memory_space<vmem>>, %arg3: memref<1x1xf32, #tpu.memory_space<vmem>>, %arg4: memref<1x4x4x1xf32, #tpu.memory_space<vmem>>) attributes {dimension_semantics = [#tpu.dimension_semantics<parallel>], iteration_bounds = array<i64: 2>, scalar_prefetch = 0 : i64, scratch_operands = 0 : i64, tpu.core_type = #tpu.core_type<tc>, window_params = [{transform_indices = @transform_0, window_bounds = array<i64: 1, 6, 6, 16>}, {pipeline_mode = #tpu.pipeline_mode<synchronous>, transform_indices = @transform_1, window_bounds = array<i64: 9, 16, 1>}, {pipeline_mode = #tpu.pipeline_mode<synchronous>, transform_indices = @transform_2, window_bounds = array<i64: 1, 1>}, {transform_indices = @transform_3, window_bounds = array<i64: 1, 4, 4, 1>}]} {
    %c0 = arith.constant 0 : index
    %c0_0 = arith.constant 0 : index
    %0 = vector.load %arg3[%c0, %c0_0] : memref<1x1xf32, #tpu.memory_space<vmem>>, vector<1x1xf32>
    %1 = vector.shape_cast %0 : vector<1x1xf32> to vector<1x1xf32>
    %2 = vector.broadcast %1 : vector<1x1xf32> to vector<4x1xf32>
    %c0_1 = arith.constant 0 : index
    %c0_2 = arith.constant 0 : index
    %c0_3 = arith.constant 0 : index
    %c0_4 = arith.constant 0 : index
    %3 = vector.load %arg1[%c0_1, %c0_2, %c0_3, %c0_4] : memref<1x6x6x16xbf16, #tpu.memory_space<vmem>>, vector<1x1x4x16xbf16>
    %4 = vector.shape_cast %3 : vector<1x1x4x16xbf16> to vector<4x16xbf16>
    %c0_5 = arith.constant 0 : index
    %c0_6 = arith.constant 0 : index
    %c0_7 = arith.constant 0 : index
    %5 = vector.load %arg2[%c0_5, %c0_6, %c0_7] : memref<9x16x1xbf16, #tpu.memory_space<vmem>>, vector<1x16x1xbf16>
    %6 = vector.shape_cast %5 : vector<1x16x1xbf16> to vector<16x1xbf16>
    %cst = arith.constant dense<0.000000e+00> : vector<4x1xf32>
    %7 = tpu.matmul %4, %6, %cst {dimension_numbers = #tpu.dot_dimension_numbers<[1], [0], [0], [1], [0, 0, 1, 1], [], []>} : vector<4x16xbf16>, vector<16x1xbf16>, vector<4x1xf32> -> vector<4x1xf32>
    %8 = arith.addf %2, %7 : vector<4x1xf32>
    %c0_8 = arith.constant 0 : index
    %c0_9 = arith.constant 0 : index
    %c1 = arith.constant 1 : index
    %c0_10 = arith.constant 0 : index
    %9 = vector.load %arg1[%c0_8, %c0_9, %c1, %c0_10] : memref<1x6x6x16xbf16, #tpu.memory_space<vmem>>, vector<1x1x4x16xbf16>
    %10 = vector.shape_cast %9 : vector<1x1x4x16xbf16> to vector<4x16xbf16>
    %c1_11 = arith.constant 1 : index
    %c0_12 = arith.constant 0 : index
    %c0_13 = arith.constant 0 : index
    %11 = vector.load %arg2[%c1_11, %c0_12, %c0_13] : memref<9x16x1xbf16, #tpu.memory_space<vmem>>, vector<1x16x1xbf16>
    %12 = vector.shape_cast %11 : vector<1x16x1xbf16> to vector<16x1xbf16>
    %cst_14 = arith.constant dense<0.000000e+00> : vector<4x1xf32>
    %13 = tpu.matmul %10, %12, %cst_14 {dimension_numbers = #tpu.dot_dimension_numbers<[1], [0], [0], [1], [0, 0, 1, 1], [], []>} : vector<4x16xbf16>, vector<16x1xbf16>, vector<4x1xf32> -> vector<4x1xf32>
    %14 = arith.addf %8, %13 : vector<4x1xf32>
    %c0_15 = arith.constant 0 : index
    %c0_16 = arith.constant 0 : index
    %c2 = arith.constant 2 : index
    %c0_17 = arith.constant 0 : index
    %15 = vector.load %arg1[%c0_15, %c0_16, %c2, %c0_17] : memref<1x6x6x16xbf16, #tpu.memory_space<vmem>>, vector<1x1x4x16xbf16>
    %16 = vector.shape_cast %15 : vector<1x1x4x16xbf16> to vector<4x16xbf16>
    %c2_18 = arith.constant 2 : index
    %c0_19 = arith.constant 0 : index
    %c0_20 = arith.constant 0 : index
    %17 = vector.load %arg2[%c2_18, %c0_19, %c0_20] : memref<9x16x1xbf16, #tpu.memory_space<vmem>>, vector<1x16x1xbf16>
    %18 = vector.shape_cast %17 : vector<1x16x1xbf16> to vector<16x1xbf16>
    %cst_21 = arith.constant dense<0.000000e+00> : vector<4x1xf32>
    %19 = tpu.matmul %16, %18, %cst_21 {dimension_numbers = #tpu.dot_dimension_numbers<[1], [0], [0], [1], [0, 0, 1, 1], [], []>} : vector<4x16xbf16>, vector<16x1xbf16>, vector<4x1xf32> -> vector<4x1xf32>
    %20 = arith.addf %14, %19 : vector<4x1xf32>
    %c0_22 = arith.constant 0 : index
    %c1_23 = arith.constant 1 : index
    %c0_24 = arith.constant 0 : index
    %c0_25 = arith.constant 0 : index
    %21 = vector.load %arg1[%c0_22, %c1_23, %c0_24, %c0_25] : memref<1x6x6x16xbf16, #tpu.memory_space<vmem>>, vector<1x1x4x16xbf16>
    %22 = vector.shape_cast %21 : vector<1x1x4x16xbf16> to vector<4x16xbf16>
    %c3 = arith.constant 3 : index
    %c0_26 = arith.constant 0 : index
    %c0_27 = arith.constant 0 : index
    %23 = vector.load %arg2[%c3, %c0_26, %c0_27] : memref<9x16x1xbf16, #tpu.memory_space<vmem>>, vector<1x16x1xbf16>
    %24 = vector.shape_cast %23 : vector<1x16x1xbf16> to vector<16x1xbf16>
    %cst_28 = arith.constant dense<0.000000e+00> : vector<4x1xf32>
    %25 = tpu.matmul %22, %24, %cst_28 {dimension_numbers = #tpu.dot_dimension_numbers<[1], [0], [0], [1], [0, 0, 1, 1], [], []>} : vector<4x16xbf16>, vector<16x1xbf16>, vector<4x1xf32> -> vector<4x1xf32>
    %26 = arith.addf %20, %25 : vector<4x1xf32>
    %c0_29 = arith.constant 0 : index
    %c1_30 = arith.constant 1 : index
    %c1_31 = arith.constant 1 : index
    %c0_32 = arith.constant 0 : index
    %27 = vector.load %arg1[%c0_29, %c1_30, %c1_31, %c0_32] : memref<1x6x6x16xbf16, #tpu.memory_space<vmem>>, vector<1x1x4x16xbf16>
    %28 = vector.shape_cast %27 : vector<1x1x4x16xbf16> to vector<4x16xbf16>
    %c4 = arith.constant 4 : index
    %c0_33 = arith.constant 0 : index
    %c0_34 = arith.constant 0 : index
    %29 = vector.load %arg2[%c4, %c0_33, %c0_34] : memref<9x16x1xbf16, #tpu.memory_space<vmem>>, vector<1x16x1xbf16>
    %30 = vector.shape_cast %29 : vector<1x16x1xbf16> to vector<16x1xbf16>
    %cst_35 = arith.constant dense<0.000000e+00> : vector<4x1xf32>
    %31 = tpu.matmul %28, %30, %cst_35 {dimension_numbers = #tpu.dot_dimension_numbers<[1], [0], [0], [1], [0, 0, 1, 1], [], []>} : vector<4x16xbf16>, vector<16x1xbf16>, vector<4x1xf32> -> vector<4x1xf32>
    %32 = arith.addf %26, %31 : vector<4x1xf32>
    %c0_36 = arith.constant 0 : index
    %c1_37 = arith.constant 1 : index
    %c2_38 = arith.constant 2 : index
    %c0_39 = arith.constant 0 : index
    %33 = vector.load %arg1[%c0_36, %c1_37, %c2_38, %c0_39] : memref<1x6x6x16xbf16, #tpu.memory_space<vmem>>, vector<1x1x4x16xbf16>
    %34 = vector.shape_cast %33 : vector<1x1x4x16xbf16> to vector<4x16xbf16>
    %c5 = arith.constant 5 : index
    %c0_40 = arith.constant 0 : index
    %c0_41 = arith.constant 0 : index
    %35 = vector.load %arg2[%c5, %c0_40, %c0_41] : memref<9x16x1xbf16, #tpu.memory_space<vmem>>, vector<1x16x1xbf16>
    %36 = vector.shape_cast %35 : vector<1x16x1xbf16> to vector<16x1xbf16>
    %cst_42 = arith.constant dense<0.000000e+00> : vector<4x1xf32>
    %37 = tpu.matmul %34, %36, %cst_42 {dimension_numbers = #tpu.dot_dimension_numbers<[1], [0], [0], [1], [0, 0, 1, 1], [], []>} : vector<4x16xbf16>, vector<16x1xbf16>, vector<4x1xf32> -> vector<4x1xf32>
    %38 = arith.addf %32, %37 : vector<4x1xf32>
    %c0_43 = arith.constant 0 : index
    %c2_44 = arith.constant 2 : index
    %c0_45 = arith.constant 0 : index
    %c0_46 = arith.constant 0 : index
    %39 = vector.load %arg1[%c0_43, %c2_44, %c0_45, %c0_46] : memref<1x6x6x16xbf16, #tpu.memory_space<vmem>>, vector<1x1x4x16xbf16>
    %40 = vector.shape_cast %39 : vector<1x1x4x16xbf16> to vector<4x16xbf16>
    %c6 = arith.constant 6 : index
    %c0_47 = arith.constant 0 : index
    %c0_48 = arith.constant 0 : index
    %41 = vector.load %arg2[%c6, %c0_47, %c0_48] : memref<9x16x1xbf16, #tpu.memory_space<vmem>>, vector<1x16x1xbf16>
    %42 = vector.shape_cast %41 : vector<1x16x1xbf16> to vector<16x1xbf16>
    %cst_49 = arith.constant dense<0.000000e+00> : vector<4x1xf32>
    %43 = tpu.matmul %40, %42, %cst_49 {dimension_numbers = #tpu.dot_dimension_numbers<[1], [0], [0], [1], [0, 0, 1, 1], [], []>} : vector<4x16xbf16>, vector<16x1xbf16>, vector<4x1xf32> -> vector<4x1xf32>
    %44 = arith.addf %38, %43 : vector<4x1xf32>
    %c0_50 = arith.constant 0 : index
    %c2_51 = arith.constant 2 : index
    %c1_52 = arith.constant 1 : index
    %c0_53 = arith.constant 0 : index
    %45 = vector.load %arg1[%c0_50, %c2_51, %c1_52, %c0_53] : memref<1x6x6x16xbf16, #tpu.memory_space<vmem>>, vector<1x1x4x16xbf16>
    %46 = vector.shape_cast %45 : vector<1x1x4x16xbf16> to vector<4x16xbf16>
    %c7 = arith.constant 7 : index
    %c0_54 = arith.constant 0 : index
    %c0_55 = arith.constant 0 : index
    %47 = vector.load %arg2[%c7, %c0_54, %c0_55] : memref<9x16x1xbf16, #tpu.memory_space<vmem>>, vector<1x16x1xbf16>
    %48 = vector.shape_cast %47 : vector<1x16x1xbf16> to vector<16x1xbf16>
    %cst_56 = arith.constant dense<0.000000e+00> : vector<4x1xf32>
    %49 = tpu.matmul %46, %48, %cst_56 {dimension_numbers = #tpu.dot_dimension_numbers<[1], [0], [0], [1], [0, 0, 1, 1], [], []>} : vector<4x16xbf16>, vector<16x1xbf16>, vector<4x1xf32> -> vector<4x1xf32>
    %50 = arith.addf %44, %49 : vector<4x1xf32>
    %c0_57 = arith.constant 0 : index
    %c2_58 = arith.constant 2 : index
    %c2_59 = arith.constant 2 : index
    %c0_60 = arith.constant 0 : index
    %51 = vector.load %arg1[%c0_57, %c2_58, %c2_59, %c0_60] : memref<1x6x6x16xbf16, #tpu.memory_space<vmem>>, vector<1x1x4x16xbf16>
    %52 = vector.shape_cast %51 : vector<1x1x4x16xbf16> to vector<4x16xbf16>
    %c8 = arith.constant 8 : index
    %c0_61 = arith.constant 0 : index
    %c0_62 = arith.constant 0 : index
    %53 = vector.load %arg2[%c8, %c0_61, %c0_62] : memref<9x16x1xbf16, #tpu.memory_space<vmem>>, vector<1x16x1xbf16>
    %54 = vector.shape_cast %53 : vector<1x16x1xbf16> to vector<16x1xbf16>
    %cst_63 = arith.constant dense<0.000000e+00> : vector<4x1xf32>
    %55 = tpu.matmul %52, %54, %cst_63 {dimension_numbers = #tpu.dot_dimension_numbers<[1], [0], [0], [1], [0, 0, 1, 1], [], []>} : vector<4x16xbf16>, vector<16x1xbf16>, vector<4x1xf32> -> vector<4x1xf32>
    %56 = arith.addf %50, %55 : vector<4x1xf32>
    %cst_64 = arith.constant 0.000000e+00 : f32
    %57 = vector.broadcast %cst_64 : f32 to vector<4x1xf32>
    %58 = arith.subf %57, %56 : vector<4x1xf32>
    %59 = math.exp %58 : vector<4x1xf32>
    %cst_65 = arith.constant 1.000000e+00 : f32
    %60 = vector.broadcast %cst_65 : f32 to vector<4x1xf32>
    %61 = arith.addf %60, %59 : vector<4x1xf32>
    %cst_66 = arith.constant 1.000000e+00 : f32
    %62 = vector.broadcast %cst_66 : f32 to vector<4x1xf32>
    %63 = arith.divf %62, %61 : vector<4x1xf32>
    %c0_67 = arith.constant 0 : index
    %c0_68 = arith.constant 0 : index
    %c0_69 = arith.constant 0 : index
    %c0_70 = arith.constant 0 : index
    %64 = vector.load %arg4[%c0_67, %c0_68, %c0_69, %c0_70] : memref<1x4x4x1xf32, #tpu.memory_space<vmem>>, vector<1x1x4x1xf32>
    %65 = vector.shape_cast %64 : vector<1x1x4x1xf32> to vector<4x1xf32>
    %66 = vector.shape_cast %63 : vector<4x1xf32> to vector<1x1x4x1xf32>
    tpu.vector_store %arg4[%c0_67, %c0_68, %c0_69, %c0_70], %66 {strides = array<i32>} : memref<1x4x4x1xf32, #tpu.memory_space<vmem>>, vector<1x1x4x1xf32>,
    %c0_71 = arith.constant 0 : index
    %c1_72 = arith.constant 1 : index
    %c0_73 = arith.constant 0 : index
    %c0_74 = arith.constant 0 : index
    %67 = vector.load %arg1[%c0_71, %c1_72, %c0_73, %c0_74] : memref<1x6x6x16xbf16, #tpu.memory_space<vmem>>, vector<1x1x4x16xbf16>
    %68 = vector.shape_cast %67 : vector<1x1x4x16xbf16> to vector<4x16xbf16>
    %c0_75 = arith.constant 0 : index
    %c0_76 = arith.constant 0 : index
    %c0_77 = arith.constant 0 : index
    %69 = vector.load %arg2[%c0_75, %c0_76, %c0_77] : memref<9x16x1xbf16, #tpu.memory_space<vmem>>, vector<1x16x1xbf16>
    %70 = vector.shape_cast %69 : vector<1x16x1xbf16> to vector<16x1xbf16>
    %cst_78 = arith.constant dense<0.000000e+00> : vector<4x1xf32>
    %71 = tpu.matmul %68, %70, %cst_78 {dimension_numbers = #tpu.dot_dimension_numbers<[1], [0], [0], [1], [0, 0, 1, 1], [], []>} : vector<4x16xbf16>, vector<16x1xbf16>, vector<4x1xf32> -> vector<4x1xf32>
    %72 = arith.addf %2, %71 : vector<4x1xf32>
    %c0_79 = arith.constant 0 : index
    %c1_80 = arith.constant 1 : index
    %c1_81 = arith.constant 1 : index
    %c0_82 = arith.constant 0 : index
    %73 = vector.load %arg1[%c0_79, %c1_80, %c1_81, %c0_82] : memref<1x6x6x16xbf16, #tpu.memory_space<vmem>>, vector<1x1x4x16xbf16>
    %74 = vector.shape_cast %73 : vector<1x1x4x16xbf16> to vector<4x16xbf16>
    %c1_83 = arith.constant 1 : index
    %c0_84 = arith.constant 0 : index
    %c0_85 = arith.constant 0 : index
    %75 = vector.load %arg2[%c1_83, %c0_84, %c0_85] : memref<9x16x1xbf16, #tpu.memory_space<vmem>>, vector<1x16x1xbf16>
    %76 = vector.shape_cast %75 : vector<1x16x1xbf16> to vector<16x1xbf16>
    %cst_86 = arith.constant dense<0.000000e+00> : vector<4x1xf32>
    %77 = tpu.matmul %74, %76, %cst_86 {dimension_numbers = #tpu.dot_dimension_numbers<[1], [0], [0], [1], [0, 0, 1, 1], [], []>} : vector<4x16xbf16>, vector<16x1xbf16>, vector<4x1xf32> -> vector<4x1xf32>
    %78 = arith.addf %72, %77 : vector<4x1xf32>
    %c0_87 = arith.constant 0 : index
    %c1_88 = arith.constant 1 : index
    %c2_89 = arith.constant 2 : index
    %c0_90 = arith.constant 0 : index
    %79 = vector.load %arg1[%c0_87, %c1_88, %c2_89, %c0_90] : memref<1x6x6x16xbf16, #tpu.memory_space<vmem>>, vector<1x1x4x16xbf16>
    %80 = vector.shape_cast %79 : vector<1x1x4x16xbf16> to vector<4x16xbf16>
    %c2_91 = arith.constant 2 : index
    %c0_92 = arith.constant 0 : index
    %c0_93 = arith.constant 0 : index
    %81 = vector.load %arg2[%c2_91, %c0_92, %c0_93] : memref<9x16x1xbf16, #tpu.memory_space<vmem>>, vector<1x16x1xbf16>
    %82 = vector.shape_cast %81 : vector<1x16x1xbf16> to vector<16x1xbf16>
    %cst_94 = arith.constant dense<0.000000e+00> : vector<4x1xf32>
    %83 = tpu.matmul %80, %82, %cst_94 {dimension_numbers = #tpu.dot_dimension_numbers<[1], [0], [0], [1], [0, 0, 1, 1], [], []>} : vector<4x16xbf16>, vector<16x1xbf16>, vector<4x1xf32> -> vector<4x1xf32>
    %84 = arith.addf %78, %83 : vector<4x1xf32>
    %c0_95 = arith.constant 0 : index
    %c2_96 = arith.constant 2 : index
    %c0_97 = arith.constant 0 : index
    %c0_98 = arith.constant 0 : index
    %85 = vector.load %arg1[%c0_95, %c2_96, %c0_97, %c0_98] : memref<1x6x6x16xbf16, #tpu.memory_space<vmem>>, vector<1x1x4x16xbf16>
    %86 = vector.shape_cast %85 : vector<1x1x4x16xbf16> to vector<4x16xbf16>
    %c3_99 = arith.constant 3 : index
    %c0_100 = arith.constant 0 : index
    %c0_101 = arith.constant 0 : index
    %87 = vector.load %arg2[%c3_99, %c0_100, %c0_101] : memref<9x16x1xbf16, #tpu.memory_space<vmem>>, vector<1x16x1xbf16>
    %88 = vector.shape_cast %87 : vector<1x16x1xbf16> to vector<16x1xbf16>
    %cst_102 = arith.constant dense<0.000000e+00> : vector<4x1xf32>
    %89 = tpu.matmul %86, %88, %cst_102 {dimension_numbers = #tpu.dot_dimension_numbers<[1], [0], [0], [1], [0, 0, 1, 1], [], []>} : vector<4x16xbf16>, vector<16x1xbf16>, vector<4x1xf32> -> vector<4x1xf32>
    %90 = arith.addf %84, %89 : vector<4x1xf32>
    %c0_103 = arith.constant 0 : index
    %c2_104 = arith.constant 2 : index
    %c1_105 = arith.constant 1 : index
    %c0_106 = arith.constant 0 : index
    %91 = vector.load %arg1[%c0_103, %c2_104, %c1_105, %c0_106] : memref<1x6x6x16xbf16, #tpu.memory_space<vmem>>, vector<1x1x4x16xbf16>
    %92 = vector.shape_cast %91 : vector<1x1x4x16xbf16> to vector<4x16xbf16>
    %c4_107 = arith.constant 4 : index
    %c0_108 = arith.constant 0 : index
    %c0_109 = arith.constant 0 : index
    %93 = vector.load %arg2[%c4_107, %c0_108, %c0_109] : memref<9x16x1xbf16, #tpu.memory_space<vmem>>, vector<1x16x1xbf16>
    %94 = vector.shape_cast %93 : vector<1x16x1xbf16> to vector<16x1xbf16>
    %cst_110 = arith.constant dense<0.000000e+00> : vector<4x1xf32>
    %95 = tpu.matmul %92, %94, %cst_110 {dimension_numbers = #tpu.dot_dimension_numbers<[1], [0], [0], [1], [0, 0, 1, 1], [], []>} : vector<4x16xbf16>, vector<16x1xbf16>, vector<4x1xf32> -> vector<4x1xf32>
    %96 = arith.addf %90, %95 : vector<4x1xf32>
    %c0_111 = arith.constant 0 : index
    %c2_112 = arith.constant 2 : index
    %c2_113 = arith.constant 2 : index
    %c0_114 = arith.constant 0 : index
    %97 = vector.load %arg1[%c0_111, %c2_112, %c2_113, %c0_114] : memref<1x6x6x16xbf16, #tpu.memory_space<vmem>>, vector<1x1x4x16xbf16>
    %98 = vector.shape_cast %97 : vector<1x1x4x16xbf16> to vector<4x16xbf16>
    %c5_115 = arith.constant 5 : index
    %c0_116 = arith.constant 0 : index
    %c0_117 = arith.constant 0 : index
    %99 = vector.load %arg2[%c5_115, %c0_116, %c0_117] : memref<9x16x1xbf16, #tpu.memory_space<vmem>>, vector<1x16x1xbf16>
    %100 = vector.shape_cast %99 : vector<1x16x1xbf16> to vector<16x1xbf16>
    %cst_118 = arith.constant dense<0.000000e+00> : vector<4x1xf32>
    %101 = tpu.matmul %98, %100, %cst_118 {dimension_numbers = #tpu.dot_dimension_numbers<[1], [0], [0], [1], [0, 0, 1, 1], [], []>} : vector<4x16xbf16>, vector<16x1xbf16>, vector<4x1xf32> -> vector<4x1xf32>
    %102 = arith.addf %96, %101 : vector<4x1xf32>
    %c0_119 = arith.constant 0 : index
    %c3_120 = arith.constant 3 : index
    %c0_121 = arith.constant 0 : index
    %c0_122 = arith.constant 0 : index
    %103 = vector.load %arg1[%c0_119, %c3_120, %c0_121, %c0_122] : memref<1x6x6x16xbf16, #tpu.memory_space<vmem>>, vector<1x1x4x16xbf16>
    %104 = vector.shape_cast %103 : vector<1x1x4x16xbf16> to vector<4x16xbf16>
    %c6_123 = arith.constant 6 : index
    %c0_124 = arith.constant 0 : index
    %c0_125 = arith.constant 0 : index
    %105 = vector.load %arg2[%c6_123, %c0_124, %c0_125] : memref<9x16x1xbf16, #tpu.memory_space<vmem>>, vector<1x16x1xbf16>
    %106 = vector.shape_cast %105 : vector<1x16x1xbf16> to vector<16x1xbf16>
    %cst_126 = arith.constant dense<0.000000e+00> : vector<4x1xf32>
    %107 = tpu.matmul %104, %106, %cst_126 {dimension_numbers = #tpu.dot_dimension_numbers<[1], [0], [0], [1], [0, 0, 1, 1], [], []>} : vector<4x16xbf16>, vector<16x1xbf16>, vector<4x1xf32> -> vector<4x1xf32>
    %108 = arith.addf %102, %107 : vector<4x1xf32>
    %c0_127 = arith.constant 0 : index
    %c3_128 = arith.constant 3 : index
    %c1_129 = arith.constant 1 : index
    %c0_130 = arith.constant 0 : index
    %109 = vector.load %arg1[%c0_127, %c3_128, %c1_129, %c0_130] : memref<1x6x6x16xbf16, #tpu.memory_space<vmem>>, vector<1x1x4x16xbf16>
    %110 = vector.shape_cast %109 : vector<1x1x4x16xbf16> to vector<4x16xbf16>
    %c7_131 = arith.constant 7 : index
    %c0_132 = arith.constant 0 : index
    %c0_133 = arith.constant 0 : index
    %111 = vector.load %arg2[%c7_131, %c0_132, %c0_133] : memref<9x16x1xbf16, #tpu.memory_space<vmem>>, vector<1x16x1xbf16>
    %112 = vector.shape_cast %111 : vector<1x16x1xbf16> to vector<16x1xbf16>
    %cst_134 = arith.constant dense<0.000000e+00> : vector<4x1xf32>
    %113 = tpu.matmul %110, %112, %cst_134 {dimension_numbers = #tpu.dot_dimension_numbers<[1], [0], [0], [1], [0, 0, 1, 1], [], []>} : vector<4x16xbf16>, vector<16x1xbf16>, vector<4x1xf32> -> vector<4x1xf32>
    %114 = arith.addf %108, %113 : vector<4x1xf32>
    %c0_135 = arith.constant 0 : index
    %c3_136 = arith.constant 3 : index
    %c2_137 = arith.constant 2 : index
    %c0_138 = arith.constant 0 : index
    %115 = vector.load %arg1[%c0_135, %c3_136, %c2_137, %c0_138] : memref<1x6x6x16xbf16, #tpu.memory_space<vmem>>, vector<1x1x4x16xbf16>
    %116 = vector.shape_cast %115 : vector<1x1x4x16xbf16> to vector<4x16xbf16>
    %c8_139 = arith.constant 8 : index
    %c0_140 = arith.constant 0 : index
    %c0_141 = arith.constant 0 : index
    %117 = vector.load %arg2[%c8_139, %c0_140, %c0_141] : memref<9x16x1xbf16, #tpu.memory_space<vmem>>, vector<1x16x1xbf16>
    %118 = vector.shape_cast %117 : vector<1x16x1xbf16> to vector<16x1xbf16>
    %cst_142 = arith.constant dense<0.000000e+00> : vector<4x1xf32>
    %119 = tpu.matmul %116, %118, %cst_142 {dimension_numbers = #tpu.dot_dimension_numbers<[1], [0], [0], [1], [0, 0, 1, 1], [], []>} : vector<4x16xbf16>, vector<16x1xbf16>, vector<4x1xf32> -> vector<4x1xf32>
    %120 = arith.addf %114, %119 : vector<4x1xf32>
    %cst_143 = arith.constant 0.000000e+00 : f32
    %121 = vector.broadcast %cst_143 : f32 to vector<4x1xf32>
    %122 = arith.subf %121, %120 : vector<4x1xf32>
    %123 = math.exp %122 : vector<4x1xf32>
    %cst_144 = arith.constant 1.000000e+00 : f32
    %124 = vector.broadcast %cst_144 : f32 to vector<4x1xf32>
    %125 = arith.addf %124, %123 : vector<4x1xf32>
    %cst_145 = arith.constant 1.000000e+00 : f32
    %126 = vector.broadcast %cst_145 : f32 to vector<4x1xf32>
    %127 = arith.divf %126, %125 : vector<4x1xf32>
    %c0_146 = arith.constant 0 : index
    %c1_147 = arith.constant 1 : index
    %c0_148 = arith.constant 0 : index
    %c0_149 = arith.constant 0 : index
    %128 = vector.load %arg4[%c0_146, %c1_147, %c0_148, %c0_149] : memref<1x4x4x1xf32, #tpu.memory_space<vmem>>, vector<1x1x4x1xf32>
    %129 = vector.shape_cast %128 : vector<1x1x4x1xf32> to vector<4x1xf32>
    %130 = vector.shape_cast %127 : vector<4x1xf32> to vector<1x1x4x1xf32>
    tpu.vector_store %arg4[%c0_146, %c1_147, %c0_148, %c0_149], %130 {strides = array<i32>} : memref<1x4x4x1xf32, #tpu.memory_space<vmem>>, vector<1x1x4x1xf32>,
    %c0_150 = arith.constant 0 : index
    %c2_151 = arith.constant 2 : index
    %c0_152 = arith.constant 0 : index
    %c0_153 = arith.constant 0 : index
    %131 = vector.load %arg1[%c0_150, %c2_151, %c0_152, %c0_153] : memref<1x6x6x16xbf16, #tpu.memory_space<vmem>>, vector<1x1x4x16xbf16>
    %132 = vector.shape_cast %131 : vector<1x1x4x16xbf16> to vector<4x16xbf16>
    %c0_154 = arith.constant 0 : index
    %c0_155 = arith.constant 0 : index
    %c0_156 = arith.constant 0 : index
    %133 = vector.load %arg2[%c0_154, %c0_155, %c0_156] : memref<9x16x1xbf16, #tpu.memory_space<vmem>>, vector<1x16x1xbf16>
    %134 = vector.shape_cast %133 : vector<1x16x1xbf16> to vector<16x1xbf16>
    %cst_157 = arith.constant dense<0.000000e+00> : vector<4x1xf32>
    %135 = tpu.matmul %132, %134, %cst_157 {dimension_numbers = #tpu.dot_dimension_numbers<[1], [0], [0], [1], [0, 0, 1, 1], [], []>} : vector<4x16xbf16>, vector<16x1xbf16>, vector<4x1xf32> -> vector<4x1xf32>
    %136 = arith.addf %2, %135 : vector<4x1xf32>
    %c0_158 = arith.constant 0 : index
    %c2_159 = arith.constant 2 : index
    %c1_160 = arith.constant 1 : index
    %c0_161 = arith.constant 0 : index
    %137 = vector.load %arg1[%c0_158, %c2_159, %c1_160, %c0_161] : memref<1x6x6x16xbf16, #tpu.memory_space<vmem>>, vector<1x1x4x16xbf16>
    %138 = vector.shape_cast %137 : vector<1x1x4x16xbf16> to vector<4x16xbf16>
    %c1_162 = arith.constant 1 : index
    %c0_163 = arith.constant 0 : index
    %c0_164 = arith.constant 0 : index
    %139 = vector.load %arg2[%c1_162, %c0_163, %c0_164] : memref<9x16x1xbf16, #tpu.memory_space<vmem>>, vector<1x16x1xbf16>
    %140 = vector.shape_cast %139 : vector<1x16x1xbf16> to vector<16x1xbf16>
    %cst_165 = arith.constant dense<0.000000e+00> : vector<4x1xf32>
    %141 = tpu.matmul %138, %140, %cst_165 {dimension_numbers = #tpu.dot_dimension_numbers<[1], [0], [0], [1], [0, 0, 1, 1], [], []>} : vector<4x16xbf16>, vector<16x1xbf16>, vector<4x1xf32> -> vector<4x1xf32>
    %142 = arith.addf %136, %141 : vector<4x1xf32>
    %c0_166 = arith.constant 0 : index
    %c2_167 = arith.constant 2 : index
    %c2_168 = arith.constant 2 : index
    %c0_169 = arith.constant 0 : index
    %143 = vector.load %arg1[%c0_166, %c2_167, %c2_168, %c0_169] : memref<1x6x6x16xbf16, #tpu.memory_space<vmem>>, vector<1x1x4x16xbf16>
    %144 = vector.shape_cast %143 : vector<1x1x4x16xbf16> to vector<4x16xbf16>
    %c2_170 = arith.constant 2 : index
    %c0_171 = arith.constant 0 : index
    %c0_172 = arith.constant 0 : index
    %145 = vector.load %arg2[%c2_170, %c0_171, %c0_172] : memref<9x16x1xbf16, #tpu.memory_space<vmem>>, vector<1x16x1xbf16>
    %146 = vector.shape_cast %145 : vector<1x16x1xbf16> to vector<16x1xbf16>
    %cst_173 = arith.constant dense<0.000000e+00> : vector<4x1xf32>
    %147 = tpu.matmul %144, %146, %cst_173 {dimension_numbers = #tpu.dot_dimension_numbers<[1], [0], [0], [1], [0, 0, 1, 1], [], []>} : vector<4x16xbf16>, vector<16x1xbf16>, vector<4x1xf32> -> vector<4x1xf32>
    %148 = arith.addf %142, %147 : vector<4x1xf32>
    %c0_174 = arith.constant 0 : index
    %c3_175 = arith.constant 3 : index
    %c0_176 = arith.constant 0 : index
    %c0_177 = arith.constant 0 : index
    %149 = vector.load %arg1[%c0_174, %c3_175, %c0_176, %c0_177] : memref<1x6x6x16xbf16, #tpu.memory_space<vmem>>, vector<1x1x4x16xbf16>
    %150 = vector.shape_cast %149 : vector<1x1x4x16xbf16> to vector<4x16xbf16>
    %c3_178 = arith.constant 3 : index
    %c0_179 = arith.constant 0 : index
    %c0_180 = arith.constant 0 : index
    %151 = vector.load %arg2[%c3_178, %c0_179, %c0_180] : memref<9x16x1xbf16, #tpu.memory_space<vmem>>, vector<1x16x1xbf16>
    %152 = vector.shape_cast %151 : vector<1x16x1xbf16> to vector<16x1xbf16>
    %cst_181 = arith.constant dense<0.000000e+00> : vector<4x1xf32>
    %153 = tpu.matmul %150, %152, %cst_181 {dimension_numbers = #tpu.dot_dimension_numbers<[1], [0], [0], [1], [0, 0, 1, 1], [], []>} : vector<4x16xbf16>, vector<16x1xbf16>, vector<4x1xf32> -> vector<4x1xf32>
    %154 = arith.addf %148, %153 : vector<4x1xf32>
    %c0_182 = arith.constant 0 : index
    %c3_183 = arith.constant 3 : index
    %c1_184 = arith.constant 1 : index
    %c0_185 = arith.constant 0 : index
    %155 = vector.load %arg1[%c0_182, %c3_183, %c1_184, %c0_185] : memref<1x6x6x16xbf16, #tpu.memory_space<vmem>>, vector<1x1x4x16xbf16>
    %156 = vector.shape_cast %155 : vector<1x1x4x16xbf16> to vector<4x16xbf16>
    %c4_186 = arith.constant 4 : index
    %c0_187 = arith.constant 0 : index
    %c0_188 = arith.constant 0 : index
    %157 = vector.load %arg2[%c4_186, %c0_187, %c0_188] : memref<9x16x1xbf16, #tpu.memory_space<vmem>>, vector<1x16x1xbf16>
    %158 = vector.shape_cast %157 : vector<1x16x1xbf16> to vector<16x1xbf16>
    %cst_189 = arith.constant dense<0.000000e+00> : vector<4x1xf32>
    %159 = tpu.matmul %156, %158, %cst_189 {dimension_numbers = #tpu.dot_dimension_numbers<[1], [0], [0], [1], [0, 0, 1, 1], [], []>} : vector<4x16xbf16>, vector<16x1xbf16>, vector<4x1xf32> -> vector<4x1xf32>
    %160 = arith.addf %154, %159 : vector<4x1xf32>
    %c0_190 = arith.constant 0 : index
    %c3_191 = arith.constant 3 : index
    %c2_192 = arith.constant 2 : index
    %c0_193 = arith.constant 0 : index
    %161 = vector.load %arg1[%c0_190, %c3_191, %c2_192, %c0_193] : memref<1x6x6x16xbf16, #tpu.memory_space<vmem>>, vector<1x1x4x16xbf16>
    %162 = vector.shape_cast %161 : vector<1x1x4x16xbf16> to vector<4x16xbf16>
    %c5_194 = arith.constant 5 : index
    %c0_195 = arith.constant 0 : index
    %c0_196 = arith.constant 0 : index
    %163 = vector.load %arg2[%c5_194, %c0_195, %c0_196] : memref<9x16x1xbf16, #tpu.memory_space<vmem>>, vector<1x16x1xbf16>
    %164 = vector.shape_cast %163 : vector<1x16x1xbf16> to vector<16x1xbf16>
    %cst_197 = arith.constant dense<0.000000e+00> : vector<4x1xf32>
    %165 = tpu.matmul %162, %164, %cst_197 {dimension_numbers = #tpu.dot_dimension_numbers<[1], [0], [0], [1], [0, 0, 1, 1], [], []>} : vector<4x16xbf16>, vector<16x1xbf16>, vector<4x1xf32> -> vector<4x1xf32>
    %166 = arith.addf %160, %165 : vector<4x1xf32>
    %c0_198 = arith.constant 0 : index
    %c4_199 = arith.constant 4 : index
    %c0_200 = arith.constant 0 : index
    %c0_201 = arith.constant 0 : index
    %167 = vector.load %arg1[%c0_198, %c4_199, %c0_200, %c0_201] : memref<1x6x6x16xbf16, #tpu.memory_space<vmem>>, vector<1x1x4x16xbf16>
    %168 = vector.shape_cast %167 : vector<1x1x4x16xbf16> to vector<4x16xbf16>
    %c6_202 = arith.constant 6 : index
    %c0_203 = arith.constant 0 : index
    %c0_204 = arith.constant 0 : index
    %169 = vector.load %arg2[%c6_202, %c0_203, %c0_204] : memref<9x16x1xbf16, #tpu.memory_space<vmem>>, vector<1x16x1xbf16>
    %170 = vector.shape_cast %169 : vector<1x16x1xbf16> to vector<16x1xbf16>
    %cst_205 = arith.constant dense<0.000000e+00> : vector<4x1xf32>
    %171 = tpu.matmul %168, %170, %cst_205 {dimension_numbers = #tpu.dot_dimension_numbers<[1], [0], [0], [1], [0, 0, 1, 1], [], []>} : vector<4x16xbf16>, vector<16x1xbf16>, vector<4x1xf32> -> vector<4x1xf32>
    %172 = arith.addf %166, %171 : vector<4x1xf32>
    %c0_206 = arith.constant 0 : index
    %c4_207 = arith.constant 4 : index
    %c1_208 = arith.constant 1 : index
    %c0_209 = arith.constant 0 : index
    %173 = vector.load %arg1[%c0_206, %c4_207, %c1_208, %c0_209] : memref<1x6x6x16xbf16, #tpu.memory_space<vmem>>, vector<1x1x4x16xbf16>
    %174 = vector.shape_cast %173 : vector<1x1x4x16xbf16> to vector<4x16xbf16>
    %c7_210 = arith.constant 7 : index
    %c0_211 = arith.constant 0 : index
    %c0_212 = arith.constant 0 : index
    %175 = vector.load %arg2[%c7_210, %c0_211, %c0_212] : memref<9x16x1xbf16, #tpu.memory_space<vmem>>, vector<1x16x1xbf16>
    %176 = vector.shape_cast %175 : vector<1x16x1xbf16> to vector<16x1xbf16>
    %cst_213 = arith.constant dense<0.000000e+00> : vector<4x1xf32>
    %177 = tpu.matmul %174, %176, %cst_213 {dimension_numbers = #tpu.dot_dimension_numbers<[1], [0], [0], [1], [0, 0, 1, 1], [], []>} : vector<4x16xbf16>, vector<16x1xbf16>, vector<4x1xf32> -> vector<4x1xf32>
    %178 = arith.addf %172, %177 : vector<4x1xf32>
    %c0_214 = arith.constant 0 : index
    %c4_215 = arith.constant 4 : index
    %c2_216 = arith.constant 2 : index
    %c0_217 = arith.constant 0 : index
    %179 = vector.load %arg1[%c0_214, %c4_215, %c2_216, %c0_217] : memref<1x6x6x16xbf16, #tpu.memory_space<vmem>>, vector<1x1x4x16xbf16>
    %180 = vector.shape_cast %179 : vector<1x1x4x16xbf16> to vector<4x16xbf16>
    %c8_218 = arith.constant 8 : index
    %c0_219 = arith.constant 0 : index
    %c0_220 = arith.constant 0 : index
    %181 = vector.load %arg2[%c8_218, %c0_219, %c0_220] : memref<9x16x1xbf16, #tpu.memory_space<vmem>>, vector<1x16x1xbf16>
    %182 = vector.shape_cast %181 : vector<1x16x1xbf16> to vector<16x1xbf16>
    %cst_221 = arith.constant dense<0.000000e+00> : vector<4x1xf32>
    %183 = tpu.matmul %180, %182, %cst_221 {dimension_numbers = #tpu.dot_dimension_numbers<[1], [0], [0], [1], [0, 0, 1, 1], [], []>} : vector<4x16xbf16>, vector<16x1xbf16>, vector<4x1xf32> -> vector<4x1xf32>
    %184 = arith.addf %178, %183 : vector<4x1xf32>
    %cst_222 = arith.constant 0.000000e+00 : f32
    %185 = vector.broadcast %cst_222 : f32 to vector<4x1xf32>
    %186 = arith.subf %185, %184 : vector<4x1xf32>
    %187 = math.exp %186 : vector<4x1xf32>
    %cst_223 = arith.constant 1.000000e+00 : f32
    %188 = vector.broadcast %cst_223 : f32 to vector<4x1xf32>
    %189 = arith.addf %188, %187 : vector<4x1xf32>
    %cst_224 = arith.constant 1.000000e+00 : f32
    %190 = vector.broadcast %cst_224 : f32 to vector<4x1xf32>
    %191 = arith.divf %190, %189 : vector<4x1xf32>
    %c0_225 = arith.constant 0 : index
    %c2_226 = arith.constant 2 : index
    %c0_227 = arith.constant 0 : index
    %c0_228 = arith.constant 0 : index
    %192 = vector.load %arg4[%c0_225, %c2_226, %c0_227, %c0_228] : memref<1x4x4x1xf32, #tpu.memory_space<vmem>>, vector<1x1x4x1xf32>
    %193 = vector.shape_cast %192 : vector<1x1x4x1xf32> to vector<4x1xf32>
    %194 = vector.shape_cast %191 : vector<4x1xf32> to vector<1x1x4x1xf32>
    tpu.vector_store %arg4[%c0_225, %c2_226, %c0_227, %c0_228], %194 {strides = array<i32>} : memref<1x4x4x1xf32, #tpu.memory_space<vmem>>, vector<1x1x4x1xf32>,
    %c0_229 = arith.constant 0 : index
    %c3_230 = arith.constant 3 : index
    %c0_231 = arith.constant 0 : index
    %c0_232 = arith.constant 0 : index
    %195 = vector.load %arg1[%c0_229, %c3_230, %c0_231, %c0_232] : memref<1x6x6x16xbf16, #tpu.memory_space<vmem>>, vector<1x1x4x16xbf16>
    %196 = vector.shape_cast %195 : vector<1x1x4x16xbf16> to vector<4x16xbf16>
    %c0_233 = arith.constant 0 : index
    %c0_234 = arith.constant 0 : index
    %c0_235 = arith.constant 0 : index
    %197 = vector.load %arg2[%c0_233, %c0_234, %c0_235] : memref<9x16x1xbf16, #tpu.memory_space<vmem>>, vector<1x16x1xbf16>
    %198 = vector.shape_cast %197 : vector<1x16x1xbf16> to vector<16x1xbf16>
    %cst_236 = arith.constant dense<0.000000e+00> : vector<4x1xf32>
    %199 = tpu.matmul %196, %198, %cst_236 {dimension_numbers = #tpu.dot_dimension_numbers<[1], [0], [0], [1], [0, 0, 1, 1], [], []>} : vector<4x16xbf16>, vector<16x1xbf16>, vector<4x1xf32> -> vector<4x1xf32>
    %200 = arith.addf %2, %199 : vector<4x1xf32>
    %c0_237 = arith.constant 0 : index
    %c3_238 = arith.constant 3 : index
    %c1_239 = arith.constant 1 : index
    %c0_240 = arith.constant 0 : index
    %201 = vector.load %arg1[%c0_237, %c3_238, %c1_239, %c0_240] : memref<1x6x6x16xbf16, #tpu.memory_space<vmem>>, vector<1x1x4x16xbf16>
    %202 = vector.shape_cast %201 : vector<1x1x4x16xbf16> to vector<4x16xbf16>
    %c1_241 = arith.constant 1 : index
    %c0_242 = arith.constant 0 : index
    %c0_243 = arith.constant 0 : index
    %203 = vector.load %arg2[%c1_241, %c0_242, %c0_243] : memref<9x16x1xbf16, #tpu.memory_space<vmem>>, vector<1x16x1xbf16>
    %204 = vector.shape_cast %203 : vector<1x16x1xbf16> to vector<16x1xbf16>
    %cst_244 = arith.constant dense<0.000000e+00> : vector<4x1xf32>
    %205 = tpu.matmul %202, %204, %cst_244 {dimension_numbers = #tpu.dot_dimension_numbers<[1], [0], [0], [1], [0, 0, 1, 1], [], []>} : vector<4x16xbf16>, vector<16x1xbf16>, vector<4x1xf32> -> vector<4x1xf32>
    %206 = arith.addf %200, %205 : vector<4x1xf32>
    %c0_245 = arith.constant 0 : index
    %c3_246 = arith.constant 3 : index
    %c2_247 = arith.constant 2 : index
    %c0_248 = arith.constant 0 : index
    %207 = vector.load %arg1[%c0_245, %c3_246, %c2_247, %c0_248] : memref<1x6x6x16xbf16, #tpu.memory_space<vmem>>, vector<1x1x4x16xbf16>
    %208 = vector.shape_cast %207 : vector<1x1x4x16xbf16> to vector<4x16xbf16>
    %c2_249 = arith.constant 2 : index
    %c0_250 = arith.constant 0 : index
    %c0_251 = arith.constant 0 : index
    %209 = vector.load %arg2[%c2_249, %c0_250, %c0_251] : memref<9x16x1xbf16, #tpu.memory_space<vmem>>, vector<1x16x1xbf16>
    %210 = vector.shape_cast %209 : vector<1x16x1xbf16> to vector<16x1xbf16>
    %cst_252 = arith.constant dense<0.000000e+00> : vector<4x1xf32>
    %211 = tpu.matmul %208, %210, %cst_252 {dimension_numbers = #tpu.dot_dimension_numbers<[1], [0], [0], [1], [0, 0, 1, 1], [], []>} : vector<4x16xbf16>, vector<16x1xbf16>, vector<4x1xf32> -> vector<4x1xf32>
    %212 = arith.addf %206, %211 : vector<4x1xf32>
    %c0_253 = arith.constant 0 : index
    %c4_254 = arith.constant 4 : index
    %c0_255 = arith.constant 0 : index
    %c0_256 = arith.constant 0 : index
    %213 = vector.load %arg1[%c0_253, %c4_254, %c0_255, %c0_256] : memref<1x6x6x16xbf16, #tpu.memory_space<vmem>>, vector<1x1x4x16xbf16>
    %214 = vector.shape_cast %213 : vector<1x1x4x16xbf16> to vector<4x16xbf16>
    %c3_257 = arith.constant 3 : index
    %c0_258 = arith.constant 0 : index
    %c0_259 = arith.constant 0 : index
    %215 = vector.load %arg2[%c3_257, %c0_258, %c0_259] : memref<9x16x1xbf16, #tpu.memory_space<vmem>>, vector<1x16x1xbf16>
    %216 = vector.shape_cast %215 : vector<1x16x1xbf16> to vector<16x1xbf16>
    %cst_260 = arith.constant dense<0.000000e+00> : vector<4x1xf32>
    %217 = tpu.matmul %214, %216, %cst_260 {dimension_numbers = #tpu.dot_dimension_numbers<[1], [0], [0], [1], [0, 0, 1, 1], [], []>} : vector<4x16xbf16>, vector<16x1xbf16>, vector<4x1xf32> -> vector<4x1xf32>
    %218 = arith.addf %212, %217 : vector<4x1xf32>
    %c0_261 = arith.constant 0 : index
    %c4_262 = arith.constant 4 : index
    %c1_263 = arith.constant 1 : index
    %c0_264 = arith.constant 0 : index
    %219 = vector.load %arg1[%c0_261, %c4_262, %c1_263, %c0_264] : memref<1x6x6x16xbf16, #tpu.memory_space<vmem>>, vector<1x1x4x16xbf16>
    %220 = vector.shape_cast %219 : vector<1x1x4x16xbf16> to vector<4x16xbf16>
    %c4_265 = arith.constant 4 : index
    %c0_266 = arith.constant 0 : index
    %c0_267 = arith.constant 0 : index
    %221 = vector.load %arg2[%c4_265, %c0_266, %c0_267] : memref<9x16x1xbf16, #tpu.memory_space<vmem>>, vector<1x16x1xbf16>
    %222 = vector.shape_cast %221 : vector<1x16x1xbf16> to vector<16x1xbf16>
    %cst_268 = arith.constant dense<0.000000e+00> : vector<4x1xf32>
    %223 = tpu.matmul %220, %222, %cst_268 {dimension_numbers = #tpu.dot_dimension_numbers<[1], [0], [0], [1], [0, 0, 1, 1], [], []>} : vector<4x16xbf16>, vector<16x1xbf16>, vector<4x1xf32> -> vector<4x1xf32>
    %224 = arith.addf %218, %223 : vector<4x1xf32>
    %c0_269 = arith.constant 0 : index
    %c4_270 = arith.constant 4 : index
    %c2_271 = arith.constant 2 : index
    %c0_272 = arith.constant 0 : index
    %225 = vector.load %arg1[%c0_269, %c4_270, %c2_271, %c0_272] : memref<1x6x6x16xbf16, #tpu.memory_space<vmem>>, vector<1x1x4x16xbf16>
    %226 = vector.shape_cast %225 : vector<1x1x4x16xbf16> to vector<4x16xbf16>
    %c5_273 = arith.constant 5 : index
    %c0_274 = arith.constant 0 : index
    %c0_275 = arith.constant 0 : index
    %227 = vector.load %arg2[%c5_273, %c0_274, %c0_275] : memref<9x16x1xbf16, #tpu.memory_space<vmem>>, vector<1x16x1xbf16>
    %228 = vector.shape_cast %227 : vector<1x16x1xbf16> to vector<16x1xbf16>
    %cst_276 = arith.constant dense<0.000000e+00> : vector<4x1xf32>
    %229 = tpu.matmul %226, %228, %cst_276 {dimension_numbers = #tpu.dot_dimension_numbers<[1], [0], [0], [1], [0, 0, 1, 1], [], []>} : vector<4x16xbf16>, vector<16x1xbf16>, vector<4x1xf32> -> vector<4x1xf32>
    %230 = arith.addf %224, %229 : vector<4x1xf32>
    %c0_277 = arith.constant 0 : index
    %c5_278 = arith.constant 5 : index
    %c0_279 = arith.constant 0 : index
    %c0_280 = arith.constant 0 : index
    %231 = vector.load %arg1[%c0_277, %c5_278, %c0_279, %c0_280] : memref<1x6x6x16xbf16, #tpu.memory_space<vmem>>, vector<1x1x4x16xbf16>
    %232 = vector.shape_cast %231 : vector<1x1x4x16xbf16> to vector<4x16xbf16>
    %c6_281 = arith.constant 6 : index
    %c0_282 = arith.constant 0 : index
    %c0_283 = arith.constant 0 : index
    %233 = vector.load %arg2[%c6_281, %c0_282, %c0_283] : memref<9x16x1xbf16, #tpu.memory_space<vmem>>, vector<1x16x1xbf16>
    %234 = vector.shape_cast %233 : vector<1x16x1xbf16> to vector<16x1xbf16>
    %cst_284 = arith.constant dense<0.000000e+00> : vector<4x1xf32>
    %235 = tpu.matmul %232, %234, %cst_284 {dimension_numbers = #tpu.dot_dimension_numbers<[1], [0], [0], [1], [0, 0, 1, 1], [], []>} : vector<4x16xbf16>, vector<16x1xbf16>, vector<4x1xf32> -> vector<4x1xf32>
    %236 = arith.addf %230, %235 : vector<4x1xf32>
    %c0_285 = arith.constant 0 : index
    %c5_286 = arith.constant 5 : index
    %c1_287 = arith.constant 1 : index
    %c0_288 = arith.constant 0 : index
    %237 = vector.load %arg1[%c0_285, %c5_286, %c1_287, %c0_288] : memref<1x6x6x16xbf16, #tpu.memory_space<vmem>>, vector<1x1x4x16xbf16>
    %238 = vector.shape_cast %237 : vector<1x1x4x16xbf16> to vector<4x16xbf16>
    %c7_289 = arith.constant 7 : index
    %c0_290 = arith.constant 0 : index
    %c0_291 = arith.constant 0 : index
    %239 = vector.load %arg2[%c7_289, %c0_290, %c0_291] : memref<9x16x1xbf16, #tpu.memory_space<vmem>>, vector<1x16x1xbf16>
    %240 = vector.shape_cast %239 : vector<1x16x1xbf16> to vector<16x1xbf16>
    %cst_292 = arith.constant dense<0.000000e+00> : vector<4x1xf32>
    %241 = tpu.matmul %238, %240, %cst_292 {dimension_numbers = #tpu.dot_dimension_numbers<[1], [0], [0], [1], [0, 0, 1, 1], [], []>} : vector<4x16xbf16>, vector<16x1xbf16>, vector<4x1xf32> -> vector<4x1xf32>
    %242 = arith.addf %236, %241 : vector<4x1xf32>
    %c0_293 = arith.constant 0 : index
    %c5_294 = arith.constant 5 : index
    %c2_295 = arith.constant 2 : index
    %c0_296 = arith.constant 0 : index
    %243 = vector.load %arg1[%c0_293, %c5_294, %c2_295, %c0_296] : memref<1x6x6x16xbf16, #tpu.memory_space<vmem>>, vector<1x1x4x16xbf16>
    %244 = vector.shape_cast %243 : vector<1x1x4x16xbf16> to vector<4x16xbf16>
    %c8_297 = arith.constant 8 : index
    %c0_298 = arith.constant 0 : index
    %c0_299 = arith.constant 0 : index
    %245 = vector.load %arg2[%c8_297, %c0_298, %c0_299] : memref<9x16x1xbf16, #tpu.memory_space<vmem>>, vector<1x16x1xbf16>
    %246 = vector.shape_cast %245 : vector<1x16x1xbf16> to vector<16x1xbf16>
    %cst_300 = arith.constant dense<0.000000e+00> : vector<4x1xf32>
    %247 = tpu.matmul %244, %246, %cst_300 {dimension_numbers = #tpu.dot_dimension_numbers<[1], [0], [0], [1], [0, 0, 1, 1], [], []>} : vector<4x16xbf16>, vector<16x1xbf16>, vector<4x1xf32> -> vector<4x1xf32>
    %248 = arith.addf %242, %247 : vector<4x1xf32>
    %cst_301 = arith.constant 0.000000e+00 : f32
    %249 = vector.broadcast %cst_301 : f32 to vector<4x1xf32>
    %250 = arith.subf %249, %248 : vector<4x1xf32>
    %251 = math.exp %250 : vector<4x1xf32>
    %cst_302 = arith.constant 1.000000e+00 : f32
    %252 = vector.broadcast %cst_302 : f32 to vector<4x1xf32>
    %253 = arith.addf %252, %251 : vector<4x1xf32>
    %cst_303 = arith.constant 1.000000e+00 : f32
    %254 = vector.broadcast %cst_303 : f32 to vector<4x1xf32>
    %255 = arith.divf %254, %253 : vector<4x1xf32>
    %c0_304 = arith.constant 0 : index
    %c3_305 = arith.constant 3 : index
    %c0_306 = arith.constant 0 : index
    %c0_307 = arith.constant 0 : index
    %256 = vector.load %arg4[%c0_304, %c3_305, %c0_306, %c0_307] : memref<1x4x4x1xf32, #tpu.memory_space<vmem>>, vector<1x1x4x1xf32>
    %257 = vector.shape_cast %256 : vector<1x1x4x1xf32> to vector<4x1xf32>
    %258 = vector.shape_cast %255 : vector<4x1xf32> to vector<1x1x4x1xf32>
    tpu.vector_store %arg4[%c0_304, %c3_305, %c0_306, %c0_307], %258 {strides = array<i32>} : memref<1x4x4x1xf32, #tpu.memory_space<vmem>>, vector<1x1x4x1xf32>,
    return
  }
  func.func @transform_0(%arg0: i32) -> (i32, i32, i32, i32) {
    %c0_i32 = arith.constant 0 : i32
    %c0_i32_0 = arith.constant 0 : i32
    %c0_i32_1 = arith.constant 0 : i32
    %c0_i32_2 = arith.constant 0 : i32
    return %arg0, %c0_i32, %c0_i32_0, %c0_i32_1 : i32, i32, i32, i32
  }
  func.func @transform_1(%arg0: i32) -> (i32, i32, i32) {
    %c0_i32 = arith.constant 0 : i32
    %c0_i32_0 = arith.constant 0 : i32
    %c0_i32_1 = arith.constant 0 : i32
    %c0_i32_2 = arith.constant 0 : i32
    return %c0_i32, %c0_i32_0, %c0_i32_1 : i32, i32, i32
  }
  func.func @transform_2(%arg0: i32) -> (i32, i32) {
    %c0_i32 = arith.constant 0 : i32
    %c0_i32_0 = arith.constant 0 : i32
    %c0_i32_1 = arith.constant 0 : i32
    return %c0_i32, %c0_i32_0 : i32, i32
  }
  func.func @transform_3(%arg0: i32) -> (i32, i32, i32, i32) {
    %c0_i32 = arith.constant 0 : i32
    %c0_i32_0 = arith.constant 0 : i32
    %c0_i32_1 = arith.constant 0 : i32
    %c0_i32_2 = arith.constant 0 : i32
    return %arg0, %c0_i32, %c0_i32_0, %c0_i32_1 : i32, i32, i32, i32
  }
}

</mosaic_0001>

<bundles_post_ra>
// kernel: depth_ans_forward.9
= control target key start
LH: loop header
LB: loop body
LE: loop exit
PB: predicated region body
PF: predicated region fallthrough
CT: control target
= control target key end

     0   :  { %s1704_s12 = smov 0   ;;  %s1938_s0 = inlined_call_operand.vmem [shape: bf16[2,5,5,32], index: 0, kind: input, shape index: {}]   ;;  %s1939_s1 = inlined_call_operand.vmem [shape: bf16[4,32,16], index: 1, kind: input, shape index: {}]   ;;  %s1940_s2 = inlined_call_operand.vmem [shape: f32[1,16], index: 2, kind: input, shape index: {}]   ;;  %s1941_s3 = inlined_call_operand.vmem [shape: bf16[2,4,4,16], index: 3, kind: output, shape index: {}]  }
   0x1 LB: > { %s1314_s13 = sadd.s32 4294967295, %s1680_s12   ;;  %p1318_p0 = scmp.ge.s32.totalorder %s1680_s12, 1  ;;  %s1680_s12 = sphi %s1704_s12, %s13_s12  }
   0x2   : > { %p137_p1 = scmp.lt.s32.totalorder %s1680_s12, 3 }
   0x4   : > { %p138_p2 = pnand %p1318_p0, %p137_p1 }
   0x5   : > { %p161_p3 = scmp.lt.s32.totalorder (!%p138_p2), %s1314_s13, 1 }
   0x6   : > { %141 = sbr.rel (%p138_p2) target bundleno = 279 (0x117), region = 32 }
   0xb   : > { %v1634_v0 = vld [vmem:[%s1939_s1 + $0x8] sm:$0xff]   ;;  %v1682_v1 = vmov 0.0   ;;  %v1635_v2 = vld [vmem:[%s1939_s1] sm:$0xff]   ;;  %v1636_v3 = vld [vmem:[%s1939_s1 + $0x18] sm:$0xff]   ;;  %vm1683_vm0 = vmmov 0   ;;  %s1943_s13 = smov (!%p161_p3, %s1314_s13), 1 }
   0xc   : > { %1495 = vmatprep.subr.bf16.mxu0 %v1682_v1  ;;  %1503 = vmatprep.subr.bf16.mxu1 %v1682_v1  ;;  %v1638_v4 = vld [vmem:[%s1939_s1 + $0x10] sm:$0xff]   ;;  %s1623_s22 = smul.u32 20, %s1943_s13  ;;  %vm196_vm1 = vcmask 261120   ;;  %v1637_v5 = vld [vmem:[%s1939_s1 + $0x28] sm:$0xff]   ;;  %v1639_v7 = vld [vmem:[%s1939_s1 + $0x20] sm:$0xff]   ;;  %s1446_s8 = sshll.u32 %s1943_s13, 3 }
   0xd   : > { %1496 = vmatpush3.bf16.msra.mxu0 %v1634_v0  ;;  %1499 = vmatprep.mubr.msk.bf16.mxu0 %vm1683_vm0, %v1682_v1  ;;  %v1641_v13 = vld [vmem:[%s1939_s1 + $0x38] sm:$0xff]   ;;  %v1642_v14 = vld [vmem:[%s1939_s1 + $0x8] sm:$0xff]   ;;  %v1643_v18 = vld [vmem:[%s1939_s1 + $0x30] sm:$0xff]   ;;  %s1922_s11 = scalar_lea.vmem %s1941_s3, %s1446_s8  ;;  %vm450_vm2 = vcmask 123904  }
   0xe   : > { %1497 = vmatprep.subr.bf16.mxu0 %v1682_v1  ;;  %1507 = vmatprep.mubr.msk.bf16.mxu1 %vm1683_vm0, %v1682_v1  ;;  %s1742_s27 = scalar_lea.vmem %s1938_s0, %s1623_s22  ;;  %v1644_v22 = vld [vmem:[%s1939_s1] sm:$0xff]   ;;  %v1646_v24 = vld [vmem:[%s1939_s1 + $0x18] sm:$0xff]   ;;  %v1647_v27 = vld [vmem:[%s1939_s1 + $0x28] sm:$0xff]  }
   0xf   : > { %1504 = vmatpush3.bf16.msra.mxu1 %v1636_v3  ;;  %v179_v6 = vld [vmem:[%s1742_s27] sm:$0x3]  ;;  %v1645_v11 = vld [vmem:[%s1742_s27 + $0x4] ss:$0 sps:$4 sm:$0x77]   ;;  %v1648_v29 = vld [vmem:[%s1939_s1 + $0x10] sm:$0xff]  }
  0x10   : > { %1505 = vmatprep.subr.bf16.mxu1 %v1682_v1  ;;  %v1640_v8 = vld [vmem:[%s1742_s27] ss:$0 sps:$4 sm:$0x77]   ;;  %v388_v15 = vshll.u32 %v1645_v11, 16  ;;  %v1334_v16 = vld [vmem:[%s1742_s27 + $0x4] sm:$0x3] }
  0x11   : > { %1498 = vmatpush3.bf16.msra.mxu0 %v1635_v2  ;;  %v251_v9 = vshrl.u32 %v1640_v8, 16  ;;  %v253_v10 = vshll.u32 %v1640_v8, 16  ;;  %v1650_v19 = vld [vmem:[%s1742_s27 + $0x4] ss:$0 sps:$4 sm:$0x77]   ;;  %v386_v20 = vshrl.u32 %v1645_v11, 16 }
  0x12   : > { %1511 = vmatprep.subr.bf16.mxu0 %v1682_v1  ;;  %v390_v21 = vrot.slane %v388_v15, 1  ;;  %v1351_v25 = vld [vmem:[%s1742_s27 + $0x4] sm:$0x3]  ;;  %v524_v26 = vshll.u32 %v1650_v19, 16  ;;  %v522_v30 = vshrl.u32 %v1650_v19, 16  ;;  %v1651_v33 = vld [vmem:[%s1939_s1 + $0x38] sm:$0xff]  }
  0x13   : > { %1506 = vmatpush3.bf16.msra.mxu1 %v1638_v4  ;;  %v255_v12 = vrot.slane %v253_v10, 1  ;;  %v1655_v28 = vld [vmem:[%s1742_s27 + $0x8] ss:$0 sps:$4 sm:$0x77]   ;;  %v1649_v32 = vld [vmem:[%s1939_s1 + $0x20] sm:$0xff]   ;;  %v1653_v41 = vld [vmem:[%s1939_s1 + $0x30] sm:$0xff]  }
  0x14   : > { %1519 = vmatprep.subr.bf16.mxu1 %v1682_v1  ;;  %1500 = vmatmul.mubr.msk.bf16.vlgmr.msra.gmra.mxu0 %vm196_vm1, %v179_v6  ;;  %v391_v23 = vor.u32 %v390_v21, %v386_v20  ;;  %v526_v31 = vrot.slane %v524_v26, 1  ;;  %v1364_v35 = vld [vmem:[%s1742_s27 + $0x8] sm:$0x3]  ;;  %v657_v37 = vshll.u32 %v1655_v28, 16  ;;  %v655_v39 = vshrl.u32 %v1655_v28, 16  ;;  %v1654_v42 = vld [vmem:[%s1939_s1] sm:$0xff]  }
  0x15   : > { %1512 = vmatpush3.bf16.msra.mxu0 %v1637_v5  ;;  %1515 = vmatprep.mubr.msk.bf16.mxu0 %vm1683_vm0, %v1682_v1  ;;  %v256_v17 = vor.u32 %v255_v12, %v251_v9  ;;  %v1652_v36 = vld [vmem:[%s1939_s1 + $0x8] sm:$0xff]   ;;  %v1656_v44 = vld [vmem:[%s1939_s1 + $0x18] sm:$0xff]   ;;  %v1658_v51 = vld [vmem:[%s1939_s1 + $0x10] sm:$0xff]  }
  0x16   : > { %1513 = vmatprep.subr.bf16.mxu0 %v1682_v1  ;;  %v527_v34 = vor.u32 %v526_v31, %v522_v30  ;;  %v1660_v38 = vld [vmem:[%s1742_s27 + $0x8] ss:$0 sps:$4 sm:$0x77]   ;;  %v659_v40 = vrot.slane %v657_v37, 1  ;;  %v1659_v52 = vld [vmem:[%s1939_s1 + $0x20] sm:$0xff]   ;;  %v1661_v55 = vld [vmem:[%s1939_s1 + $0x38] sm:$0xff]  }
  0x17   : > { %1508 = vmatmul.mubr.msk.bf16.vlgmr.msra.gmra.mxu1 %vm196_vm1, %v256_v17  ;;  %v1382_v45 = vld [vmem:[%s1742_s27 + $0x8] sm:$0x3]  ;;  %v793_v46 = vshll.u32 %v1660_v38, 16  ;;  %v791_v48 = vshrl.u32 %v1660_v38, 16  ;;  %v1395_v56 = vld [vmem:[%s1742_s27 + $0xc] sm:$0x3] }
  0x18   : > { %1520 = vmatpush3.bf16.msra.mxu1 %v1641_v13  ;;  %1523 = vmatprep.mubr.msk.bf16.mxu1 %vm1683_vm0, %v1682_v1  ;;  %v660_v43 = vor.u32 %v659_v40, %v655_v39  ;;  %v1657_v47 = vld [vmem:[%s1939_s1 + $0x28] sm:$0xff]   ;;  %v1663_v61 = vld [vmem:[%s1939_s1 + $0x30] sm:$0xff]   ;;  %v1664_v62 = vld [vmem:[%s1939_s1] sm:$0xff]  }
  0x19   : > { %1514 = vmatpush3.bf16.msra.mxu0 %v1639_v7  ;;  %1521 = vmatprep.subr.bf16.mxu1 %v1682_v1  ;;  %v795_v49 = vrot.slane %v793_v46, 1  ;;  %v1665_v50 = vld [vmem:[%s1742_s27 + $0xc] ss:$0 sps:$4 sm:$0x77]   ;;  %v1666_v2 = vld [vmem:[%s1939_s1 + $0x18] sm:$0xff]   ;;  %v1668_v8 = vld [vmem:[%s1939_s1 + $0x10] sm:$0xff]  }
  0x1a   : > { %1527 = vmatprep.subr.bf16.mxu0 %v1682_v1  ;;  %v926_v54 = vshll.u32 %v1665_v50, 16  ;;  %v1662_v57 = vld [vmem:[%s1939_s1 + $0x8] sm:$0xff]   ;;  %v924_v58 = vshrl.u32 %v1665_v50, 16  ;;  %v1673_v7 = vld [vmem:[%s1742_s27 + $0x10] ss:$0 sps:$4 sm:$0x77]  }
  0x1b   : > { %v796_v53 = vor.u32 %v795_v49, %v791_v48  ;;  %v1670_v60 = vld [vmem:[%s1742_s27 + $0xc] ss:$0 sps:$4 sm:$0x77]   ;;  %v1669_v9 = vld [vmem:[%s1939_s1 + $0x20] sm:$0xff]   ;;  %v1195_v11 = vshll.u32 %v1673_v7, 16  ;;  %v1671_v12 = vld [vmem:[%s1939_s1 + $0x38] sm:$0xff]  }
  0x1c   : > { %1516 = vmatmul.mubr.msk.bf16.vlgmr.msra.gmra.mxu0 %vm196_vm1, %v1334_v16  ;;  %1522 = vmatpush3.bf16.msra.mxu1 %v1643_v18  ;;  %v928_v59 = vrot.slane %v926_v54, 1  ;;  %v1062_v0 = vshll.u32 %v1670_v60, 16  ;;  %v1413_v3 = vld [vmem:[%s1742_s27 + $0xc] sm:$0x3]  ;;  %v1060_v5 = vshrl.u32 %v1670_v60, 16  ;;  %v1672_v16 = vld [vmem:[%s1939_s1 + $0x30] sm:$0xff]  }
  0x1d   : > { %1528 = vmatpush3.bf16.msra.mxu0 %v1642_v14  ;;  %1531 = vmatprep.mubr.msk.bf16.mxu0 %vm1683_vm0, %v1682_v1  ;;  %v1667_v4 = vld [vmem:[%s1939_s1 + $0x28] sm:$0xff]   ;;  %v1426_v13 = vld [vmem:[%s1742_s27 + $0x10] sm:$0x3]  ;;  %v1193_v14 = vshrl.u32 %v1673_v7, 16  ;;  %v1197_v15 = vrot.slane %v1195_v11, 1 }
  0x1e   : > { %1529 = vmatprep.subr.bf16.mxu0 %v1682_v1  ;;  %1535 = vmatprep.subr.bf16.mxu1 %v1682_v1  ;;  %v929_v63 = vor.u32 %v928_v59, %v924_v58  ;;  %v1064_v6 = vrot.slane %v1062_v0, 1  ;;  %v1915_v20 = vld [vmem:[%s1940_s2] ss:$0 sm:$0xff] }
  0x1f   : > { %1524 = vmatmul.mubr.msk.bf16.vlgmr.msra.gmra.mxu1 %vm196_vm1, %v391_v23  ;;  %v1198_v17 = vor.u32 %v1197_v15, %v1193_v14 }
  0x20   : > { %1536 = vmatpush3.bf16.msra.mxu1 %v1646_v24  ;;  %1539 = vmatprep.mubr.msk.bf16.mxu1 %vm1683_vm0, %v1682_v1  ;;  %v1065_v10 = vor.u32 %v1064_v6, %v1060_v5 }
  0x21   : > { %1530 = vmatpush3.bf16.msra.mxu0 %v1644_v22  ;;  %1537 = vmatprep.subr.bf16.mxu1 %v1682_v1 }
  0x22   : > { %1543 = vmatprep.subr.bf16.mxu0 %v1682_v1 }
  0x24   : > { %1532 = vmatmul.mubr.msk.bf16.vlgmr.msra.gmra.mxu0 %vm196_vm1, %v1351_v25  ;;  %1538 = vmatpush3.bf16.msra.mxu1 %v1648_v29 }
  0x25   : > { %1544 = vmatpush3.bf16.msra.mxu0 %v1647_v27  ;;  %1547 = vmatprep.mubr.msk.bf16.mxu0 %vm1683_vm0, %v1682_v1 }
  0x26   : > { %1545 = vmatprep.subr.bf16.mxu0 %v1682_v1  ;;  %1551 = vmatprep.subr.bf16.mxu1 %v1682_v1 }
  0x27   : > { %1540 = vmatmul.mubr.msk.bf16.vlgmr.msra.gmra.mxu1 %vm196_vm1, %v527_v34 }
  0x28   : > { %1552 = vmatpush3.bf16.msra.mxu1 %v1651_v33  ;;  %1555 = vmatprep.mubr.msk.bf16.mxu1 %vm1683_vm0, %v1682_v1 }
  0x29   : > { %1546 = vmatpush3.bf16.msra.mxu0 %v1649_v32  ;;  %1553 = vmatprep.subr.bf16.mxu1 %v1682_v1 }
  0x2a   : > { %1559 = vmatprep.subr.bf16.mxu0 %v1682_v1 }
  0x2c   : > { %1548 = vmatmul.mubr.msk.bf16.vlgmr.msra.gmra.mxu0 %vm196_vm1, %v1364_v35  ;;  %1554 = vmatpush3.bf16.msra.mxu1 %v1653_v41 }
  0x2d   : > { %1560 = vmatpush3.bf16.msra.mxu0 %v1652_v36  ;;  %1563 = vmatprep.mubr.msk.bf16.mxu0 %vm1683_vm0, %v1682_v1 }
  0x2e   : > { %1561 = vmatprep.subr.bf16.mxu0 %v1682_v1  ;;  %1567 = vmatprep.subr.bf16.mxu1 %v1682_v1 }
  0x2f   : > { %1556 = vmatmul.mubr.msk.bf16.vlgmr.msra.gmra.mxu1 %vm196_vm1, %v660_v43 }
  0x30   : > { %1568 = vmatpush3.bf16.msra.mxu1 %v1656_v44  ;;  %1571 = vmatprep.mubr.msk.bf16.mxu1 %vm1683_vm0, %v1682_v1 }
  0x31   : > { %1562 = vmatpush3.bf16.msra.mxu0 %v1654_v42  ;;  %1569 = vmatprep.subr.bf16.mxu1 %v1682_v1 }
  0x32   : > { %1575 = vmatprep.subr.bf16.mxu0 %v1682_v1 }
  0x34   : > { %1564 = vmatmul.mubr.msk.bf16.vlgmr.msra.gmra.mxu0 %vm196_vm1, %v1382_v45  ;;  %1570 = vmatpush3.bf16.msra.mxu1 %v1658_v51 }
  0x35   : > { %1576 = vmatpush3.bf16.msra.mxu0 %v1657_v47  ;;  %1579 = vmatprep.mubr.msk.bf16.mxu0 %vm1683_vm0, %v1682_v1 }
  0x36   : > { %1577 = vmatprep.subr.bf16.mxu0 %v1682_v1  ;;  %1583 = vmatprep.subr.bf16.mxu1 %v1682_v1 }
  0x37   : > { %1572 = vmatmul.mubr.msk.bf16.vlgmr.msra.gmra.mxu1 %vm196_vm1, %v796_v53 }
  0x38   : > { %1584 = vmatpush3.bf16.msra.mxu1 %v1661_v55  ;;  %1587 = vmatprep.mubr.msk.bf16.mxu1 %vm1683_vm0, %v1682_v1 }
  0x39   : > { %1578 = vmatpush3.bf16.msra.mxu0 %v1659_v52  ;;  %1585 = vmatprep.subr.bf16.mxu1 %v1682_v1 }
  0x3a   : > { %1591 = vmatprep.subr.bf16.mxu0 %v1682_v1 }
  0x3c   : > { %1580 = vmatmul.mubr.msk.bf16.vlgmr.msra.gmra.mxu0 %vm196_vm1, %v1395_v56  ;;  %1586 = vmatpush3.bf16.msra.mxu1 %v1663_v61 }
  0x3d   : > { %1592 = vmatpush3.bf16.msra.mxu0 %v1662_v57  ;;  %1595 = vmatprep.mubr.msk.bf16.mxu0 %vm1683_vm0, %v1682_v1 }
  0x3e   : > { %1593 = vmatprep.subr.bf16.mxu0 %v1682_v1  ;;  %1599 = vmatprep.subr.bf16.mxu1 %v1682_v1 }
  0x3f   : > { %1588 = vmatmul.mubr.msk.bf16.vlgmr.msra.gmra.mxu1 %vm196_vm1, %v929_v63 }
  0x40   : > { %1600 = vmatpush3.bf16.msra.mxu1 %v1666_v2  ;;  %1603 = vmatprep.mubr.msk.bf16.mxu1 %vm1683_vm0, %v1682_v1 }
  0x41   : > { %1594 = vmatpush3.bf16.msra.mxu0 %v1664_v62  ;;  %1601 = vmatprep.subr.bf16.mxu1 %v1682_v1 }
  0x42   : > { %1607 = vmatprep.subr.bf16.mxu0 %v1682_v1 }
  0x44   : > { %1596 = vmatmul.mubr.msk.bf16.vlgmr.msra.gmra.mxu0 %vm196_vm1, %v1413_v3  ;;  %1602 = vmatpush3.bf16.msra.mxu1 %v1668_v8 }
  0x45   : > { %1608 = vmatpush3.bf16.msra.mxu0 %v1667_v4  ;;  %1611 = vmatprep.mubr.msk.bf16.mxu0 %vm1683_vm0, %v1682_v1 }
  0x46   : > { %1609 = vmatprep.subr.bf16.mxu0 %v1682_v1  ;;  %1615 = vmatprep.subr.bf16.mxu1 %v1682_v1 }
  0x47   : > { %1604 = vmatmul.mubr.msk.bf16.vlgmr.msra.gmra.mxu1 %vm196_vm1, %v1065_v10 }
  0x48   : > { %1616 = vmatpush3.bf16.msra.mxu1 %v1671_v12  ;;  %1619 = vmatprep.mubr.msk.bf16.mxu1 %vm1683_vm0, %v1682_v1 }
  0x49   : > { %1610 = vmatpush3.bf16.msra.mxu0 %v1669_v9  ;;  %1617 = vmatprep.subr.bf16.mxu1 %v1682_v1 }
  0x4c   : > { %1612 = vmatmul.mubr.msk.bf16.vlgmr.msra.gmra.mxu0 %vm196_vm1, %v1426_v13  ;;  %1618 = vmatpush3.bf16.msra.mxu1 %v1672_v16 }
  0x4f   : > { %1620 = vmatmul.mubr.msk.bf16.vlgmr.msra.gmra.mxu1 %vm196_vm1, %v1198_v17 }
  0xd4   : > { %v234_v18 = vpop.f32.mrf.mxu0 }
  0xd5   : > { %v240_v23 = vadd.f32 %v1915_v20, %v234_v18 }
  0xd6   : > { %v1501_v19 = vpop.f32.mrf.mxu0 }
  0xd7   : > { %v306_v24 = vpop.f32.mrf.mxu1 }
  0xd8   : > { %v237_v21 = vpop.f32.mrf.mxu0  ;;  %v312_v27 = vadd.f32 %v306_v24, %v240_v23 }
  0xd9   : > { %v1509_v26 = vpop.f32.mrf.mxu1 }
  0xda   : > { %v1502_v22 = vpop.f32.mrf.mxu0 }
  0xdb   : > { %v309_v28 = vpop.f32.mrf.mxu1 }
  0xdc   : > { %v369_v25 = vpop.f32.mrf.mxu0 }
  0xdd   : > { %v1510_v30 = vpop.f32.mrf.mxu1  ;;  %v375_v32 = vadd.f32 %v369_v25, %v312_v27 }
  0xde   : > { %v1517_v1 = vpop.f32.mrf.mxu0 }
  0xdf   : > { %v441_v33 = vpop.f32.mrf.mxu1 }
  0xe0   : > { %v372_v29 = vpop.f32.mrf.mxu0  ;;  %v447_v35 = vadd.f32 %v441_v33, %v375_v32 }
  0xe1   : > { %v1525_v36 = vpop.f32.mrf.mxu1 }
  0xe2   : > { %v1518_v31 = vpop.f32.mrf.mxu0  ;;  %v448_v38 = vmax.f32 %v447_v35, 0.0 }
  0xe3   : > { %v444_v39 = vpop.f32.mrf.mxu1 }
  0xe4   : > { %v506_v34 = vpop.f32.mrf.mxu0  ;;  %v449_v41 = vpack.c.bf16 %v448_v38, %v448_v38 }
  0xe5   : > { %v1526_v42 = vpop.f32.mrf.mxu1  ;;  %v512_v44 = vadd.f32 %v1915_v20, %v506_v34 }
  0xe6   : > { %v1533_v37 = vpop.f32.mrf.mxu0  ;;  %451 = vst.msk [vmem:[%s1922_s11] sm:$0x3] %vm450_vm2, %v449_v41 }
  0xe7   : > { %v577_v45 = vpop.f32.mrf.mxu1 }
  0xe8   : > { %v509_v40 = vpop.f32.mrf.mxu0  ;;  %v583_v49 = vadd.f32 %v577_v45, %v512_v44 }
  0xe9   : > { %v1541_v47 = vpop.f32.mrf.mxu1 }
  0xea   : > { %v1534_v43 = vpop.f32.mrf.mxu0 }
  0xeb   : > { %v580_v50 = vpop.f32.mrf.mxu1 }
  0xec   : > { %v639_v46 = vpop.f32.mrf.mxu0 }
  0xed   : > { %v1542_v52 = vpop.f32.mrf.mxu1  ;;  %v645_v54 = vadd.f32 %v639_v46, %v583_v49 }
  0xee   : > { %v1549_v48 = vpop.f32.mrf.mxu0 }
  0xef   : > { %v710_v55 = vpop.f32.mrf.mxu1 }
  0xf0   : > { %v642_v51 = vpop.f32.mrf.mxu0  ;;  %v716_v57 = vadd.f32 %v710_v55, %v645_v54 }
  0xf1   : > { %v1557_v58 = vpop.f32.mrf.mxu1 }
  0xf2   : > { %v1550_v53 = vpop.f32.mrf.mxu0  ;;  %v717_v60 = vmax.f32 %v716_v57, 0.0 }
  0xf3   : > { %v713_v61 = vpop.f32.mrf.mxu1 }
  0xf4   : > { %v775_v56 = vpop.f32.mrf.mxu0  ;;  %v718_v63 = vpack.c.bf16 %v717_v60, %v717_v60 }
  0xf5   : > { %v1558_v0 = vpop.f32.mrf.mxu1  ;;  %v781_v3 = vadd.f32 %v1915_v20, %v775_v56 }
  0xf6   : > { %v1565_v59 = vpop.f32.mrf.mxu0  ;;  %1381 = vst.msk [vmem:[%s1922_s11 + $0x2] sm:$0x3] %vm450_vm2, %v718_v63 }
  0xf7   : > { %v846_v4 = vpop.f32.mrf.mxu1 }
  0xf8   : > { %v778_v62 = vpop.f32.mrf.mxu0  ;;  %v852_v8 = vadd.f32 %v846_v4, %v781_v3 }
  0xf9   : > { %v1573_v6 = vpop.f32.mrf.mxu1 }
  0xfa   : > { %v1566_v2 = vpop.f32.mrf.mxu0 }
  0xfb   : > { %v849_v9 = vpop.f32.mrf.mxu1 }
  0xfc   : > { %v908_v5 = vpop.f32.mrf.mxu0 }
  0xfd   : > { %v1574_v11 = vpop.f32.mrf.mxu1  ;;  %v914_v13 = vadd.f32 %v908_v5, %v852_v8 }
  0xfe   : > { %v1581_v7 = vpop.f32.mrf.mxu0 }
  0xff   : > { %v979_v14 = vpop.f32.mrf.mxu1 }
 0x100   : > { %v911_v10 = vpop.f32.mrf.mxu0  ;;  %v985_v16 = vadd.f32 %v979_v14, %v914_v13 }
 0x101   : > { %v1589_v17 = vpop.f32.mrf.mxu1 }
 0x102   : > { %v1582_v12 = vpop.f32.mrf.mxu0  ;;  %v986_v19 = vmax.f32 %v985_v16, 0.0 }
 0x103   : > { %v982_v21 = vpop.f32.mrf.mxu1 }
 0x104   : > { %v1044_v15 = vpop.f32.mrf.mxu0  ;;  %v987_v23 = vpack.c.bf16 %v986_v19, %v986_v19 }
 0x105   : > { %v1590_v24 = vpop.f32.mrf.mxu1  ;;  %v1050_v26 = vadd.f32 %v1915_v20, %v1044_v15 }
 0x106   : > { %v1597_v18 = vpop.f32.mrf.mxu0  ;;  %1412 = vst.msk [vmem:[%s1922_s11 + $0x4] sm:$0x3] %vm450_vm2, %v987_v23 }
 0x107   : > { %v1115_v1 = vpop.f32.mrf.mxu1 }
 0x108   : > { %v1047_v22 = vpop.f32.mrf.mxu0  ;;  %v1121_v30 = vadd.f32 %v1115_v1, %v1050_v26 }
 0x109   : > { %v1605_v28 = vpop.f32.mrf.mxu1 }
 0x10a   : > { %v1598_v25 = vpop.f32.mrf.mxu0 }
 0x10b   : > { %v1118_v31 = vpop.f32.mrf.mxu1 }
 0x10c   : > { %v1177_v27 = vpop.f32.mrf.mxu0 }
 0x10d   : > { %v1606_v33 = vpop.f32.mrf.mxu1  ;;  %v1183_v35 = vadd.f32 %v1177_v27, %v1121_v30 }
 0x10e   : > { %v1613_v29 = vpop.f32.mrf.mxu0 }
 0x10f   : > { %v1248_v36 = vpop.f32.mrf.mxu1 }
 0x110   : > { %v1180_v32 = vpop.f32.mrf.mxu0  ;;  %v1254_v37 = vadd.f32 %v1248_v36, %v1183_v35 }
 0x111   : > { %v1621_v38 = vpop.f32.mrf.mxu1 }
 0x112   : > { %v1614_v34 = vpop.f32.mrf.mxu0  ;;  %v1255_v39 = vmax.f32 %v1254_v37, 0.0 }
 0x113   : > { %v1251_v40 = vpop.f32.mrf.mxu1 }
 0x114   : > { %v1256_v41 = vpack.c.bf16 %v1255_v39, %v1255_v39 }
 0x115   : > { %v1622_v42 = vpop.f32.mrf.mxu1 }
 0x116   : > { %1443 = vst.msk [vmem:[%s1922_s11 + $0x6] sm:$0x3] %vm450_vm2, %v1256_v41 }
 0x117 PF: > { %s13_s12 = sadd.s32 1, %s1680_s12  }
 0x118   : > { %p10_p4 = scmp.ge.s32.totalorder %s13_s12, 4  }
 0x11a   :  { %12 = sbr.rel (!%p10_p4) target bundleno = 1 (0x1), region = 72 }

// kernel: depth_ans_forward.8
= control target key start
LH: loop header
LB: loop body
LE: loop exit
PB: predicated region body
PF: predicated region fallthrough
CT: control target
= control target key end

     0   :  { %s2784_s12 = smov 0   ;;  %s3126_s0 = inlined_call_operand.vmem [shape: bf16[2,9,9,12], index: 0, kind: input, shape index: {}]   ;;  %s3127_s1 = inlined_call_operand.vmem [shape: bf16[4,12,8], index: 1, kind: input, shape index: {}]   ;;  %s3128_s2 = inlined_call_operand.vmem [shape: f32[1,8], index: 2, kind: input, shape index: {}]   ;;  %s3129_s3 = inlined_call_operand.vmem [shape: bf16[2,8,8,8], index: 3, kind: output, shape index: {}]  }
   0x1 LB: > { %s2247_s13 = sadd.s32 4294967295, %s2760_s12   ;;  %p2251_p0 = scmp.ge.s32.totalorder %s2760_s12, 1  ;;  %s2760_s12 = sphi %s2784_s12, %s13_s12  }
   0x2   : > { %p137_p1 = scmp.lt.s32.totalorder %s2760_s12, 3 }
   0x4   : > { %p138_p2 = pnand %p2251_p0, %p137_p1 }
   0x5   : > { %p161_p3 = scmp.lt.s32.totalorder (!%p138_p2), %s2247_s13, 1 }
   0x6   : > { %141 = sbr.rel (%p138_p2) target bundleno = 343 (0x157), region = 32 }
   0xb   : > { %vm191_vm0 = vcmask 1045504   ;;  %v2762_v0 = vmov 0.0   ;;  %v2706_v1 = vld [vmem:[%s3127_s1] sm:$0x3f]   ;;  %vm2763_vm1 = vmmov 0   ;;  %s3131_s13 = smov (!%p161_p3, %s2247_s13), 1 }
   0xc   : > { %2503 = vmatprep.subr.bf16.mxu0 %v2762_v0  ;;  %2509 = vmatprep.subr.bf16.mxu1 %v2762_v0  ;;  %v2707_v2 = vld [vmem:[%s3127_s1 + $0x8] sm:$0x3f]   ;;  %v193_v3 = vsel %vm191_vm0, %v2706_v1, 0  ;;  %v2708_v5 = vld [vmem:[%s3127_s1 + $0x10] sm:$0x3f]   ;;  %s2695_s20 = smul.u32 72, %s3131_s13 }
   0xd   : > { %2505 = vmatprep.mubr.msk.bf16.mxu0 %vm2763_vm1, %v2762_v0  ;;  %2511 = vmatprep.mubr.msk.bf16.mxu1 %vm2763_vm1, %v2762_v0  ;;  %v262_v4 = vsel %vm191_vm0, %v2707_v2, 0  ;;  %vm187_vm2 = vcmask 97280   ;;  %v319_v6 = vsel %vm191_vm0, %v2708_v5, 0  ;;  %v2710_v9 = vld [vmem:[%s3127_s1 + $0x18] sm:$0x3f]   ;;  %vm433_vm3 = vcmask 60416  }
   0xe   : > { %2504 = vmatpush3.bf16.msra.mxu0 %v193_v3  ;;  %2510 = vmatpush3.bf16.msra.mxu1 %v262_v4  ;;  %s2817_s23 = scalar_lea.vmem %s3126_s0, %s2695_s20  ;;  %v2711_v13 = vld [vmem:[%s3127_s1] sm:$0x3f]   ;;  %v388_v18 = vsel %vm191_vm0, %v2710_v9, 0  ;;  %v2713_v23 = vld [vmem:[%s3127_s1 + $0x8] sm:$0x3f]  }
   0xf   : > { %2515 = vmatprep.subr.bf16.mxu0 %v2762_v0  ;;  %2521 = vmatprep.subr.bf16.mxu1 %v2762_v0  ;;  %v179_v7 = vld [vmem:[%s2817_s23] sm:$0xf]  ;;  %v2712_v10 = vld [vmem:[%s2817_s23 + $0x8] sm:$0x1f]   ;;  %v447_v19 = vsel %vm191_vm0, %v2711_v13, 0  ;;  %v515_v28 = vsel %vm191_vm0, %v2713_v23, 0 }
  0x10   : > { %v2709_v8 = vld [vmem:[%s2817_s23] sm:$0x1f]   ;;  %v375_v15 = vshll.u32 %v2712_v10, 16  ;;  %v2263_v16 = vld [vmem:[%s2817_s23 + $0x8] sm:$0xf]  ;;  %v373_v21 = vshrl.u32 %v2712_v10, 16 }
  0x11   : > { %2506 = vmatmul.mubr.msk.bf16.vlgmr.msra.gmra.mxu0 %vm187_vm2, %v179_v7  ;;  %v247_v11 = vshrl.u32 %v2709_v8, 16  ;;  %v249_v12 = vshll.u32 %v2709_v8, 16  ;;  %v2715_v20 = vld [vmem:[%s2817_s23 + $0x8] sm:$0x1f]   ;;  %v2714_v24 = vld [vmem:[%s3127_s1 + $0x10] sm:$0x3f]  }
  0x12   : > { %2516 = vmatpush3.bf16.msra.mxu0 %v319_v6  ;;  %2517 = vmatprep.mubr.msk.bf16.mxu0 %vm2763_vm1, %v2762_v0  ;;  %v377_v22 = vrot.slane %v375_v15, 1  ;;  %v502_v25 = vshll.u32 %v2715_v20, 16  ;;  %v2275_v27 = vld [vmem:[%s2817_s23 + $0x8] sm:$0xf]  ;;  %v571_v29 = vsel %vm191_vm0, %v2714_v24, 0  ;;  %v500_v30 = vshrl.u32 %v2715_v20, 16 }
  0x13   : > { %2527 = vmatprep.subr.bf16.mxu0 %v2762_v0  ;;  %v251_v14 = vrot.slane %v249_v12, 1  ;;  %v2718_v32 = vld [vmem:[%s2817_s23 + $0x10] sm:$0x1f]   ;;  %v2716_v33 = vld [vmem:[%s3127_s1 + $0x18] sm:$0x3f]  }
  0x14   : > { %v378_v26 = vor.u32 %v377_v22, %v373_v21  ;;  %v504_v31 = vrot.slane %v502_v25, 1  ;;  %v2717_v34 = vld [vmem:[%s3127_s1] sm:$0x3f]   ;;  %v626_v36 = vshll.u32 %v2718_v32, 16  ;;  %v2285_v37 = vld [vmem:[%s2817_s23 + $0x10] sm:$0xf] }
  0x15   : > { %v252_v17 = vor.u32 %v251_v14, %v247_v11  ;;  %v639_v38 = vsel %vm191_vm0, %v2716_v33, 0  ;;  %v698_v39 = vsel %vm191_vm0, %v2717_v34, 0  ;;  %v624_v40 = vshrl.u32 %v2718_v32, 16  ;;  %v2721_v42 = vld [vmem:[%s2817_s23 + $0x10] sm:$0x1f]  }
  0x16   : > { %v505_v35 = vor.u32 %v504_v31, %v500_v30  ;;  %v628_v41 = vrot.slane %v626_v36, 1  ;;  %v2719_v43 = vld [vmem:[%s3127_s1 + $0x8] sm:$0x3f]   ;;  %v2720_v44 = vld [vmem:[%s3127_s1 + $0x10] sm:$0x3f]   ;;  %v753_v46 = vshll.u32 %v2721_v42, 16 }
  0x17   : > { %2512 = vmatmul.mubr.msk.bf16.vlgmr.msra.gmra.mxu1 %vm187_vm2, %v252_v17  ;;  %v2298_v47 = vld [vmem:[%s2817_s23 + $0x10] sm:$0xf]  ;;  %v766_v48 = vsel %vm191_vm0, %v2719_v43, 0  ;;  %v822_v49 = vsel %vm191_vm0, %v2720_v44, 0  ;;  %v2724_v50 = vld [vmem:[%s2817_s23 + $0x18] sm:$0x1f]  }
  0x18   : > { %2522 = vmatpush3.bf16.msra.mxu1 %v388_v18  ;;  %2523 = vmatprep.mubr.msk.bf16.mxu1 %vm2763_vm1, %v2762_v0  ;;  %v629_v45 = vor.u32 %v628_v41, %v624_v40  ;;  %v751_v51 = vshrl.u32 %v2721_v42, 16  ;;  %v755_v52 = vrot.slane %v753_v46, 1  ;;  %v2722_v53 = vld [vmem:[%s3127_s1 + $0x18] sm:$0x3f]   ;;  %v2723_v54 = vld [vmem:[%s3127_s1] sm:$0x3f]  }
  0x19   : > { %2518 = vmatmul.mubr.msk.bf16.vlgmr.msra.gmra.mxu0 %vm187_vm2, %v2263_v16  ;;  %2533 = vmatprep.subr.bf16.mxu1 %v2762_v0  ;;  %v877_v55 = vshll.u32 %v2724_v50, 16  ;;  %v2308_v57 = vld [vmem:[%s2817_s23 + $0x18] sm:$0xf]  ;;  %v890_v58 = vsel %vm191_vm0, %v2722_v53, 0  ;;  %v949_v59 = vsel %vm191_vm0, %v2723_v54, 0  ;;  %v875_v60 = vshrl.u32 %v2724_v50, 16 }
  0x1a   : > { %2528 = vmatpush3.bf16.msra.mxu0 %v447_v19  ;;  %2529 = vmatprep.mubr.msk.bf16.mxu0 %vm2763_vm1, %v2762_v0  ;;  %v756_v56 = vor.u32 %v755_v52, %v751_v51  ;;  %v2727_v62 = vld [vmem:[%s2817_s23 + $0x18] sm:$0x1f]   ;;  %v2725_v63 = vld [vmem:[%s3127_s1 + $0x8] sm:$0x3f]   ;;  %v2726_v1 = vld [vmem:[%s3127_s1 + $0x10] sm:$0x3f]  }
  0x1b   : > { %2539 = vmatprep.subr.bf16.mxu0 %v2762_v0  ;;  %v879_v61 = vrot.slane %v877_v55, 1  ;;  %v1004_v3 = vshll.u32 %v2727_v62, 16  ;;  %v2321_v4 = vld [vmem:[%s2817_s23 + $0x18] sm:$0xf]  ;;  %v1017_v5 = vsel %vm191_vm0, %v2725_v63, 0  ;;  %v1073_v6 = vsel %vm191_vm0, %v2726_v1, 0 }
  0x1c   : > { %v1002_v7 = vshrl.u32 %v2727_v62, 16  ;;  %v2730_v9 = vld [vmem:[%s2817_s23 + $0x20] sm:$0x1f]   ;;  %v2728_v10 = vld [vmem:[%s3127_s1 + $0x18] sm:$0x3f]  }
  0x1d   : > { %v880_v2 = vor.u32 %v879_v61, %v875_v60  ;;  %v1006_v8 = vrot.slane %v1004_v3, 1  ;;  %v2729_v11 = vld [vmem:[%s3127_s1] sm:$0x3f]   ;;  %v1128_v13 = vshll.u32 %v2730_v9, 16  ;;  %v1141_v15 = vsel %vm191_vm0, %v2728_v10, 0 }
  0x1e   : > { %v2331_v14 = vld [vmem:[%s2817_s23 + $0x20] sm:$0xf]  ;;  %v1200_v16 = vsel %vm191_vm0, %v2729_v11, 0  ;;  %v1126_v17 = vshrl.u32 %v2730_v9, 16  ;;  %v2731_v20 = vld [vmem:[%s3127_s1 + $0x8] sm:$0x3f]  }
  0x1f   : > { %2524 = vmatmul.mubr.msk.bf16.vlgmr.msra.gmra.mxu1 %vm187_vm2, %v378_v26  ;;  %v1007_v12 = vor.u32 %v1006_v8, %v1002_v7  ;;  %v1130_v18 = vrot.slane %v1128_v13, 1  ;;  %v2733_v19 = vld [vmem:[%s2817_s23 + $0x20] sm:$0x1f]   ;;  %v2732_v21 = vld [vmem:[%s3127_s1 + $0x10] sm:$0x3f]   ;;  %v1268_v25 = vsel %vm191_vm0, %v2731_v20, 0 }
  0x20   : > { %2534 = vmatpush3.bf16.msra.mxu1 %v515_v28  ;;  %2535 = vmatprep.mubr.msk.bf16.mxu1 %vm2763_vm1, %v2762_v0  ;;  %v1255_v23 = vshll.u32 %v2733_v19, 16  ;;  %v2344_v24 = vld [vmem:[%s2817_s23 + $0x20] sm:$0xf]  ;;  %v1324_v26 = vsel %vm191_vm0, %v2732_v21, 0  ;;  %v2734_v30 = vld [vmem:[%s3127_s1 + $0x18] sm:$0x3f]  }
  0x21   : > { %2530 = vmatmul.mubr.msk.bf16.vlgmr.msra.gmra.mxu0 %vm187_vm2, %v2275_v27  ;;  %2545 = vmatprep.subr.bf16.mxu1 %v2762_v0  ;;  %v1131_v22 = vor.u32 %v1130_v18, %v1126_v17  ;;  %v1253_v27 = vshrl.u32 %v2733_v19, 16  ;;  %v2735_v31 = vld [vmem:[%s3127_s1] sm:$0x3f]   ;;  %v2354_v34 = vld [vmem:[%s2817_s23 + $0x28] sm:$0xf] }
  0x22   : > { %2540 = vmatpush3.bf16.msra.mxu0 %v571_v29  ;;  %2541 = vmatprep.mubr.msk.bf16.mxu0 %vm2763_vm1, %v2762_v0  ;;  %v1257_v28 = vrot.slane %v1255_v23, 1  ;;  %v2736_v29 = vld [vmem:[%s2817_s23 + $0x28] sm:$0x1f]   ;;  %v1451_v36 = vsel %vm191_vm0, %v2735_v31, 0  ;;  %v2738_v41 = vld [vmem:[%s3127_s1 + $0x10] sm:$0x3f]  }
  0x23   : > { %2551 = vmatprep.subr.bf16.mxu0 %v2762_v0  ;;  %v1379_v33 = vshll.u32 %v2736_v29, 16  ;;  %v2737_v40 = vld [vmem:[%s3127_s1 + $0x8] sm:$0x3f]   ;;  %v1575_v46 = vsel %vm191_vm0, %v2738_v41, 0  ;;  %v2740_v50 = vld [vmem:[%s3127_s1 + $0x18] sm:$0x3f]  }
  0x24   : > { %v1258_v32 = vor.u32 %v1257_v28, %v1253_v27  ;;  %v2367_v44 = vld [vmem:[%s2817_s23 + $0x28] sm:$0xf]  ;;  %v2741_v51 = vld [vmem:[%s3127_s1] sm:$0x3f]   ;;  %v2377_v54 = vld [vmem:[%s2817_s23 + $0x30] sm:$0xf] }
  0x25   : > { %v1643_v55 = vsel %vm191_vm0, %v2740_v50, 0  ;;  %v2743_v60 = vld [vmem:[%s3127_s1 + $0x8] sm:$0x3f]   ;;  %v2744_v61 = vld [vmem:[%s3127_s1 + $0x10] sm:$0x3f]  }
  0x26   : > { %v2390_v1 = vld [vmem:[%s2817_s23 + $0x30] sm:$0xf]  ;;  %v1826_v3 = vsel %vm191_vm0, %v2744_v61, 0  ;;  %v2746_v7 = vld [vmem:[%s3127_s1 + $0x18] sm:$0x3f]  }
  0x27   : > { %2536 = vmatmul.mubr.msk.bf16.vlgmr.msra.gmra.mxu1 %vm187_vm2, %v505_v35  ;;  %v1392_v35 = vsel %vm191_vm0, %v2734_v30, 0  ;;  %v2747_v8 = vld [vmem:[%s3127_s1] sm:$0x3f]   ;;  %v2400_v11 = vld [vmem:[%s2817_s23 + $0x38] sm:$0xf] }
  0x28   : > { %2546 = vmatpush3.bf16.msra.mxu1 %v639_v38  ;;  %2547 = vmatprep.mubr.msk.bf16.mxu1 %vm2763_vm1, %v2762_v0  ;;  %v1381_v38 = vrot.slane %v1379_v33, 1  ;;  %v1953_v13 = vsel %vm191_vm0, %v2747_v8, 0  ;;  %v2749_v17 = vld [vmem:[%s3127_s1 + $0x8] sm:$0x3f]   ;;  %v2750_v18 = vld [vmem:[%s3127_s1 + $0x10] sm:$0x3f]  }
  0x29   : > { %2542 = vmatmul.mubr.msk.bf16.vlgmr.msra.gmra.mxu0 %vm187_vm2, %v2285_v37  ;;  %2557 = vmatprep.subr.bf16.mxu1 %v2762_v0  ;;  %v1377_v37 = vshrl.u32 %v2736_v29, 16  ;;  %v2413_v21 = vld [vmem:[%s2817_s23 + $0x38] sm:$0xf]  ;;  %v2077_v23 = vsel %vm191_vm0, %v2750_v18, 0  ;;  %v2423_v30 = vld [vmem:[%s2817_s23 + $0x40] sm:$0xf] }
  0x2a   : > { %2552 = vmatpush3.bf16.msra.mxu0 %v698_v39  ;;  %2553 = vmatprep.mubr.msk.bf16.mxu0 %vm2763_vm1, %v2762_v0  ;;  %v2739_v39 = vld [vmem:[%s2817_s23 + $0x28] sm:$0x1f]   ;;  %v2752_v27 = vld [vmem:[%s3127_s1 + $0x18] sm:$0x3f]  }
  0x2b   : > { %2563 = vmatprep.subr.bf16.mxu0 %v2762_v0  ;;  %v1382_v42 = vor.u32 %v1381_v38, %v1377_v37  ;;  %v1506_v43 = vshll.u32 %v2739_v39, 16  ;;  %v2145_v31 = vsel %vm191_vm0, %v2752_v27, 0  ;;  %v3091_v37 = vld [vmem:[%s3128_s2] ss:$0 sm:$0xff] }
  0x2f   : > { %2548 = vmatmul.mubr.msk.bf16.vlgmr.msra.gmra.mxu1 %vm187_vm2, %v629_v45  ;;  %v1519_v45 = vsel %vm191_vm0, %v2737_v40, 0 }
  0x30   : > { %2558 = vmatpush3.bf16.msra.mxu1 %v766_v48  ;;  %2559 = vmatprep.mubr.msk.bf16.mxu1 %vm2763_vm1, %v2762_v0  ;;  %v1508_v48 = vrot.slane %v1506_v43, 1 }
  0x31   : > { %2554 = vmatmul.mubr.msk.bf16.vlgmr.msra.gmra.mxu0 %vm187_vm2, %v2298_v47  ;;  %2569 = vmatprep.subr.bf16.mxu1 %v2762_v0  ;;  %v1504_v47 = vshrl.u32 %v2739_v39, 16 }
  0x32   : > { %2564 = vmatpush3.bf16.msra.mxu0 %v822_v49  ;;  %2565 = vmatprep.mubr.msk.bf16.mxu0 %vm2763_vm1, %v2762_v0  ;;  %v2742_v49 = vld [vmem:[%s2817_s23 + $0x30] sm:$0x1f]  }
  0x33   : > { %2575 = vmatprep.subr.bf16.mxu0 %v2762_v0  ;;  %v1509_v52 = vor.u32 %v1508_v48, %v1504_v47  ;;  %v1630_v53 = vshll.u32 %v2742_v49, 16 }
  0x37   : > { %2560 = vmatmul.mubr.msk.bf16.vlgmr.msra.gmra.mxu1 %vm187_vm2, %v756_v56  ;;  %v1702_v56 = vsel %vm191_vm0, %v2741_v51, 0 }
  0x38   : > { %2570 = vmatpush3.bf16.msra.mxu1 %v890_v58  ;;  %2571 = vmatprep.mubr.msk.bf16.mxu1 %vm2763_vm1, %v2762_v0  ;;  %v1632_v58 = vrot.slane %v1630_v53, 1 }
  0x39   : > { %2566 = vmatmul.mubr.msk.bf16.vlgmr.msra.gmra.mxu0 %vm187_vm2, %v2308_v57  ;;  %2581 = vmatprep.subr.bf16.mxu1 %v2762_v0  ;;  %v1628_v57 = vshrl.u32 %v2742_v49, 16 }
  0x3a   : > { %2576 = vmatpush3.bf16.msra.mxu0 %v949_v59  ;;  %2577 = vmatprep.mubr.msk.bf16.mxu0 %vm2763_vm1, %v2762_v0  ;;  %v2745_v59 = vld [vmem:[%s2817_s23 + $0x30] sm:$0x1f]  }
  0x3b   : > { %2587 = vmatprep.subr.bf16.mxu0 %v2762_v0  ;;  %v1633_v62 = vor.u32 %v1632_v58, %v1628_v57  ;;  %v1757_v63 = vshll.u32 %v2745_v59, 16 }
  0x3f   : > { %2572 = vmatmul.mubr.msk.bf16.vlgmr.msra.gmra.mxu1 %vm187_vm2, %v880_v2  ;;  %v1770_v2 = vsel %vm191_vm0, %v2743_v60, 0 }
  0x40   : > { %2582 = vmatpush3.bf16.msra.mxu1 %v1017_v5  ;;  %2583 = vmatprep.mubr.msk.bf16.mxu1 %vm2763_vm1, %v2762_v0  ;;  %v1759_v5 = vrot.slane %v1757_v63, 1 }
  0x41   : > { %2578 = vmatmul.mubr.msk.bf16.vlgmr.msra.gmra.mxu0 %vm187_vm2, %v2321_v4  ;;  %2593 = vmatprep.subr.bf16.mxu1 %v2762_v0  ;;  %v1755_v4 = vshrl.u32 %v2745_v59, 16 }
  0x42   : > { %2588 = vmatpush3.bf16.msra.mxu0 %v1073_v6  ;;  %2589 = vmatprep.mubr.msk.bf16.mxu0 %vm2763_vm1, %v2762_v0  ;;  %v2748_v6 = vld [vmem:[%s2817_s23 + $0x38] sm:$0x1f]  }
  0x43   : > { %2599 = vmatprep.subr.bf16.mxu0 %v2762_v0  ;;  %v1760_v9 = vor.u32 %v1759_v5, %v1755_v4  ;;  %v1881_v10 = vshll.u32 %v2748_v6, 16 }
  0x47   : > { %2584 = vmatmul.mubr.msk.bf16.vlgmr.msra.gmra.mxu1 %vm187_vm2, %v1007_v12  ;;  %v1894_v12 = vsel %vm191_vm0, %v2746_v7, 0 }
  0x48   : > { %2594 = vmatpush3.bf16.msra.mxu1 %v1141_v15  ;;  %2595 = vmatprep.mubr.msk.bf16.mxu1 %vm2763_vm1, %v2762_v0  ;;  %v1883_v15 = vrot.slane %v1881_v10, 1 }
  0x49   : > { %2590 = vmatmul.mubr.msk.bf16.vlgmr.msra.gmra.mxu0 %vm187_vm2, %v2331_v14  ;;  %2605 = vmatprep.subr.bf16.mxu1 %v2762_v0  ;;  %v1879_v14 = vshrl.u32 %v2748_v6, 16 }
  0x4a   : > { %2600 = vmatpush3.bf16.msra.mxu0 %v1200_v16  ;;  %2601 = vmatprep.mubr.msk.bf16.mxu0 %vm2763_vm1, %v2762_v0  ;;  %v2751_v16 = vld [vmem:[%s2817_s23 + $0x38] sm:$0x1f]  }
  0x4b   : > { %2611 = vmatprep.subr.bf16.mxu0 %v2762_v0  ;;  %v1884_v19 = vor.u32 %v1883_v15, %v1879_v14  ;;  %v2008_v20 = vshll.u32 %v2751_v16, 16 }
  0x4f   : > { %2596 = vmatmul.mubr.msk.bf16.vlgmr.msra.gmra.mxu1 %vm187_vm2, %v1131_v22  ;;  %v2021_v22 = vsel %vm191_vm0, %v2749_v17, 0 }
  0x50   : > { %2606 = vmatpush3.bf16.msra.mxu1 %v1268_v25  ;;  %2607 = vmatprep.mubr.msk.bf16.mxu1 %vm2763_vm1, %v2762_v0  ;;  %v2010_v25 = vrot.slane %v2008_v20, 1 }
  0x51   : > { %2602 = vmatmul.mubr.msk.bf16.vlgmr.msra.gmra.mxu0 %vm187_vm2, %v2344_v24  ;;  %2617 = vmatprep.subr.bf16.mxu1 %v2762_v0  ;;  %v2006_v24 = vshrl.u32 %v2751_v16, 16 }
  0x52   : > { %2612 = vmatpush3.bf16.msra.mxu0 %v1324_v26  ;;  %2613 = vmatprep.mubr.msk.bf16.mxu0 %vm2763_vm1, %v2762_v0  ;;  %v2753_v26 = vld [vmem:[%s2817_s23 + $0x40] sm:$0x1f]   ;;  %s2438_s23 = sshll.u32 %s3131_s13, 5 }
  0x53   : > { %2623 = vmatprep.subr.bf16.mxu0 %v2762_v0  ;;  %v2011_v28 = vor.u32 %v2010_v25, %v2006_v24  ;;  %v2132_v29 = vshll.u32 %v2753_v26, 16  ;;  %s3098_s11 = scalar_lea.vmem %s3129_s3, %s2438_s23 }
  0x55   : > { %v2134_v33 = vrot.slane %v2132_v29, 1 }
  0x57   : > { %2608 = vmatmul.mubr.msk.bf16.vlgmr.msra.gmra.mxu1 %vm187_vm2, %v1258_v32  ;;  %v2130_v32 = vshrl.u32 %v2753_v26, 16 }
  0x58   : > { %2618 = vmatpush3.bf16.msra.mxu1 %v1392_v35  ;;  %2619 = vmatprep.mubr.msk.bf16.mxu1 %vm2763_vm1, %v2762_v0 }
  0x59   : > { %2614 = vmatmul.mubr.msk.bf16.vlgmr.msra.gmra.mxu0 %vm187_vm2, %v2354_v34  ;;  %2629 = vmatprep.subr.bf16.mxu1 %v2762_v0  ;;  %v2135_v34 = vor.u32 %v2134_v33, %v2130_v32 }
  0x5a   : > { %2624 = vmatpush3.bf16.msra.mxu0 %v1451_v36  ;;  %2625 = vmatprep.mubr.msk.bf16.mxu0 %vm2763_vm1, %v2762_v0 }
  0x5b   : > { %2635 = vmatprep.subr.bf16.mxu0 %v2762_v0 }
  0x5f   : > { %2620 = vmatmul.mubr.msk.bf16.vlgmr.msra.gmra.mxu1 %vm187_vm2, %v1382_v42 }
  0x60   : > { %2630 = vmatpush3.bf16.msra.mxu1 %v1519_v45  ;;  %2631 = vmatprep.mubr.msk.bf16.mxu1 %vm2763_vm1, %v2762_v0 }
  0x61   : > { %2626 = vmatmul.mubr.msk.bf16.vlgmr.msra.gmra.mxu0 %vm187_vm2, %v2367_v44  ;;  %2641 = vmatprep.subr.bf16.mxu1 %v2762_v0 }
  0x62   : > { %2636 = vmatpush3.bf16.msra.mxu0 %v1575_v46  ;;  %2637 = vmatprep.mubr.msk.bf16.mxu0 %vm2763_vm1, %v2762_v0 }
  0x63   : > { %2647 = vmatprep.subr.bf16.mxu0 %v2762_v0 }
  0x67   : > { %2632 = vmatmul.mubr.msk.bf16.vlgmr.msra.gmra.mxu1 %vm187_vm2, %v1509_v52 }
  0x68   : > { %2642 = vmatpush3.bf16.msra.mxu1 %v1643_v55  ;;  %2643 = vmatprep.mubr.msk.bf16.mxu1 %vm2763_vm1, %v2762_v0 }
  0x69   : > { %2638 = vmatmul.mubr.msk.bf16.vlgmr.msra.gmra.mxu0 %vm187_vm2, %v2377_v54  ;;  %2653 = vmatprep.subr.bf16.mxu1 %v2762_v0 }
  0x6a   : > { %2648 = vmatpush3.bf16.msra.mxu0 %v1702_v56  ;;  %2649 = vmatprep.mubr.msk.bf16.mxu0 %vm2763_vm1, %v2762_v0 }
  0x6b   : > { %2659 = vmatprep.subr.bf16.mxu0 %v2762_v0 }
  0x6f   : > { %2644 = vmatmul.mubr.msk.bf16.vlgmr.msra.gmra.mxu1 %vm187_vm2, %v1633_v62 }
  0x70   : > { %2654 = vmatpush3.bf16.msra.mxu1 %v1770_v2  ;;  %2655 = vmatprep.mubr.msk.bf16.mxu1 %vm2763_vm1, %v2762_v0 }
  0x71   : > { %2650 = vmatmul.mubr.msk.bf16.vlgmr.msra.gmra.mxu0 %vm187_vm2, %v2390_v1  ;;  %2665 = vmatprep.subr.bf16.mxu1 %v2762_v0 }
  0x72   : > { %2660 = vmatpush3.bf16.msra.mxu0 %v1826_v3  ;;  %2661 = vmatprep.mubr.msk.bf16.mxu0 %vm2763_vm1, %v2762_v0 }
  0x73   : > { %2671 = vmatprep.subr.bf16.mxu0 %v2762_v0 }
  0x77   : > { %2656 = vmatmul.mubr.msk.bf16.vlgmr.msra.gmra.mxu1 %vm187_vm2, %v1760_v9 }
  0x78   : > { %2666 = vmatpush3.bf16.msra.mxu1 %v1894_v12  ;;  %2667 = vmatprep.mubr.msk.bf16.mxu1 %vm2763_vm1, %v2762_v0 }
  0x79   : > { %2662 = vmatmul.mubr.msk.bf16.vlgmr.msra.gmra.mxu0 %vm187_vm2, %v2400_v11  ;;  %2677 = vmatprep.subr.bf16.mxu1 %v2762_v0 }
  0x7a   : > { %2672 = vmatpush3.bf16.msra.mxu0 %v1953_v13  ;;  %2673 = vmatprep.mubr.msk.bf16.mxu0 %vm2763_vm1, %v2762_v0 }
  0x7b   : > { %2683 = vmatprep.subr.bf16.mxu0 %v2762_v0 }
  0x7f   : > { %2668 = vmatmul.mubr.msk.bf16.vlgmr.msra.gmra.mxu1 %vm187_vm2, %v1884_v19 }
  0x80   : > { %2678 = vmatpush3.bf16.msra.mxu1 %v2021_v22  ;;  %2679 = vmatprep.mubr.msk.bf16.mxu1 %vm2763_vm1, %v2762_v0 }
  0x81   : > { %2674 = vmatmul.mubr.msk.bf16.vlgmr.msra.gmra.mxu0 %vm187_vm2, %v2413_v21  ;;  %2689 = vmatprep.subr.bf16.mxu1 %v2762_v0 }
  0x82   : > { %2684 = vmatpush3.bf16.msra.mxu0 %v2077_v23  ;;  %2685 = vmatprep.mubr.msk.bf16.mxu0 %vm2763_vm1, %v2762_v0 }
  0x87   : > { %2680 = vmatmul.mubr.msk.bf16.vlgmr.msra.gmra.mxu1 %vm187_vm2, %v2011_v28 }
  0x88   : > { %2690 = vmatpush3.bf16.msra.mxu1 %v2145_v31  ;;  %2691 = vmatprep.mubr.msk.bf16.mxu1 %vm2763_vm1, %v2762_v0 }
  0x89   : > { %2686 = vmatmul.mubr.msk.bf16.vlgmr.msra.gmra.mxu0 %vm187_vm2, %v2423_v30 }
  0x8f   : > { %2692 = vmatmul.mubr.msk.bf16.vlgmr.msra.gmra.mxu1 %vm187_vm2, %v2135_v34 }
  0xd1   : > { %v229_v35 = vpop.f32.mrf.mxu0 }
  0xd2   : > { %v235_v40 = vadd.f32 %v3091_v37, %v229_v35 }
  0xd3   : > { %v2507_v36 = vpop.f32.mrf.mxu0 }
  0xd5   : > { %v232_v38 = vpop.f32.mrf.mxu0 }
  0xd7   : > { %v2508_v39 = vpop.f32.mrf.mxu0  ;;  %v298_v41 = vpop.f32.mrf.mxu1 }
  0xd8   : > { %v304_v0 = vadd.f32 %v298_v41, %v235_v40 }
  0xd9   : > { %v355_v42 = vpop.f32.mrf.mxu0  ;;  %v2513_v43 = vpop.f32.mrf.mxu1 }
  0xda   : > { %v361_v49 = vadd.f32 %v355_v42, %v304_v0 }
  0xdb   : > { %v2519_v44 = vpop.f32.mrf.mxu0  ;;  %v301_v45 = vpop.f32.mrf.mxu1 }
  0xdd   : > { %v358_v46 = vpop.f32.mrf.mxu0  ;;  %v2514_v47 = vpop.f32.mrf.mxu1 }
  0xdf   : > { %v2520_v48 = vpop.f32.mrf.mxu0  ;;  %v424_v50 = vpop.f32.mrf.mxu1 }
  0xe0   : > { %v430_v52 = vadd.f32 %v424_v50, %v361_v49 }
  0xe1   : > { %v483_v51 = vpop.f32.mrf.mxu0  ;;  %v2525_v53 = vpop.f32.mrf.mxu1 }
  0xe2   : > { %v431_v55 = vmax.f32 %v430_v52, 0.0  ;;  %v489_v61 = vadd.f32 %v3091_v37, %v483_v51 }
  0xe3   : > { %v2531_v54 = vpop.f32.mrf.mxu0  ;;  %v427_v56 = vpop.f32.mrf.mxu1 }
  0xe4   : > { %v432_v58 = vpack.c.bf16 %v431_v55, %v431_v55 }
  0xe5   : > { %v486_v57 = vpop.f32.mrf.mxu0  ;;  %v2526_v59 = vpop.f32.mrf.mxu1 }
  0xe6   : > { %434 = vst.msk [vmem:[%s3098_s11] sm:$0xf] %vm433_vm3, %v432_v58 }
  0xe7   : > { %v2532_v60 = vpop.f32.mrf.mxu0  ;;  %v551_v62 = vpop.f32.mrf.mxu1 }
  0xe8   : > { %v557_v3 = vadd.f32 %v551_v62, %v489_v61 }
  0xe9   : > { %v607_v63 = vpop.f32.mrf.mxu0  ;;  %v2537_v1 = vpop.f32.mrf.mxu1 }
  0xea   : > { %v613_v8 = vadd.f32 %v607_v63, %v557_v3 }
  0xeb   : > { %v2543_v2 = vpop.f32.mrf.mxu0  ;;  %v554_v4 = vpop.f32.mrf.mxu1 }
  0xed   : > { %v610_v5 = vpop.f32.mrf.mxu0  ;;  %v2538_v6 = vpop.f32.mrf.mxu1 }
  0xef   : > { %v2544_v7 = vpop.f32.mrf.mxu0  ;;  %v675_v9 = vpop.f32.mrf.mxu1 }
  0xf0   : > { %v681_v11 = vadd.f32 %v675_v9, %v613_v8 }
  0xf1   : > { %v734_v10 = vpop.f32.mrf.mxu0  ;;  %v2549_v12 = vpop.f32.mrf.mxu1 }
  0xf2   : > { %v682_v14 = vmax.f32 %v681_v11, 0.0  ;;  %v740_v20 = vadd.f32 %v3091_v37, %v734_v10 }
  0xf3   : > { %v2555_v13 = vpop.f32.mrf.mxu0  ;;  %v678_v15 = vpop.f32.mrf.mxu1 }
  0xf4   : > { %v683_v17 = vpack.c.bf16 %v682_v14, %v682_v14 }
  0xf5   : > { %v737_v16 = vpop.f32.mrf.mxu0  ;;  %v2550_v18 = vpop.f32.mrf.mxu1 }
  0xf6   : > { %2297 = vst.msk [vmem:[%s3098_s11 + $0x4] sm:$0xf] %vm433_vm3, %v683_v17 }
  0xf7   : > { %v2556_v19 = vpop.f32.mrf.mxu0  ;;  %v802_v21 = vpop.f32.mrf.mxu1 }
  0xf8   : > { %v808_v25 = vadd.f32 %v802_v21, %v740_v20 }
  0xf9   : > { %v858_v22 = vpop.f32.mrf.mxu0  ;;  %v2561_v23 = vpop.f32.mrf.mxu1 }
  0xfa   : > { %v864_v30 = vadd.f32 %v858_v22, %v808_v25 }
  0xfb   : > { %v2567_v24 = vpop.f32.mrf.mxu0  ;;  %v805_v26 = vpop.f32.mrf.mxu1 }
  0xfd   : > { %v861_v27 = vpop.f32.mrf.mxu0  ;;  %v2562_v28 = vpop.f32.mrf.mxu1 }
  0xff   : > { %v2568_v29 = vpop.f32.mrf.mxu0  ;;  %v926_v31 = vpop.f32.mrf.mxu1 }
 0x100   : > { %v932_v33 = vadd.f32 %v926_v31, %v864_v30 }
 0x101   : > { %v985_v32 = vpop.f32.mrf.mxu0  ;;  %v2573_v34 = vpop.f32.mrf.mxu1 }
 0x102   : > { %v933_v36 = vmax.f32 %v932_v33, 0.0  ;;  %v991_v43 = vadd.f32 %v3091_v37, %v985_v32 }
 0x103   : > { %v2579_v35 = vpop.f32.mrf.mxu0  ;;  %v929_v38 = vpop.f32.mrf.mxu1 }
 0x104   : > { %v934_v40 = vpack.c.bf16 %v933_v36, %v933_v36 }
 0x105   : > { %v988_v39 = vpop.f32.mrf.mxu0  ;;  %v2574_v41 = vpop.f32.mrf.mxu1 }
 0x106   : > { %2320 = vst.msk [vmem:[%s3098_s11 + $0x8] sm:$0xf] %vm433_vm3, %v934_v40 }
 0x107   : > { %v2580_v42 = vpop.f32.mrf.mxu0  ;;  %v1053_v44 = vpop.f32.mrf.mxu1 }
 0x108   : > { %v1059_v47 = vadd.f32 %v1053_v44, %v991_v43 }
 0x109   : > { %v1109_v0 = vpop.f32.mrf.mxu0  ;;  %v2585_v45 = vpop.f32.mrf.mxu1 }
 0x10a   : > { %v1115_v52 = vadd.f32 %v1109_v0, %v1059_v47 }
 0x10b   : > { %v2591_v46 = vpop.f32.mrf.mxu0  ;;  %v1056_v48 = vpop.f32.mrf.mxu1 }
 0x10d   : > { %v1112_v49 = vpop.f32.mrf.mxu0  ;;  %v2586_v50 = vpop.f32.mrf.mxu1 }
 0x10f   : > { %v2592_v51 = vpop.f32.mrf.mxu0  ;;  %v1177_v53 = vpop.f32.mrf.mxu1 }
 0x110   : > { %v1183_v55 = vadd.f32 %v1177_v53, %v1115_v52 }
 0x111   : > { %v1236_v54 = vpop.f32.mrf.mxu0  ;;  %v2597_v56 = vpop.f32.mrf.mxu1 }
 0x112   : > { %v1184_v58 = vmax.f32 %v1183_v55, 0.0  ;;  %v1242_v1 = vadd.f32 %v3091_v37, %v1236_v54 }
 0x113   : > { %v2603_v57 = vpop.f32.mrf.mxu0  ;;  %v1180_v59 = vpop.f32.mrf.mxu1 }
 0x114   : > { %v1185_v61 = vpack.c.bf16 %v1184_v58, %v1184_v58 }
 0x115   : > { %v1239_v60 = vpop.f32.mrf.mxu0  ;;  %v2598_v62 = vpop.f32.mrf.mxu1 }
 0x116   : > { %2343 = vst.msk [vmem:[%s3098_s11 + $0xc] sm:$0xf] %vm433_vm3, %v1185_v61 }
 0x117   : > { %v2604_v63 = vpop.f32.mrf.mxu0  ;;  %v1304_v2 = vpop.f32.mrf.mxu1 }
 0x118   : > { %v1310_v6 = vadd.f32 %v1304_v2, %v1242_v1 }
 0x119   : > { %v1360_v3 = vpop.f32.mrf.mxu0  ;;  %v2609_v4 = vpop.f32.mrf.mxu1 }
 0x11a   : > { %v1366_v11 = vadd.f32 %v1360_v3, %v1310_v6 }
 0x11b   : > { %v2615_v5 = vpop.f32.mrf.mxu0  ;;  %v1307_v7 = vpop.f32.mrf.mxu1 }
 0x11d   : > { %v1363_v8 = vpop.f32.mrf.mxu0  ;;  %v2610_v9 = vpop.f32.mrf.mxu1 }
 0x11f   : > { %v2616_v10 = vpop.f32.mrf.mxu0  ;;  %v1428_v12 = vpop.f32.mrf.mxu1 }
 0x120   : > { %v1434_v14 = vadd.f32 %v1428_v12, %v1366_v11 }
 0x121   : > { %v1487_v13 = vpop.f32.mrf.mxu0  ;;  %v2621_v15 = vpop.f32.mrf.mxu1 }
 0x122   : > { %v1435_v17 = vmax.f32 %v1434_v14, 0.0  ;;  %v1493_v23 = vadd.f32 %v3091_v37, %v1487_v13 }
 0x123   : > { %v2627_v16 = vpop.f32.mrf.mxu0  ;;  %v1431_v18 = vpop.f32.mrf.mxu1 }
 0x124   : > { %v1436_v20 = vpack.c.bf16 %v1435_v17, %v1435_v17 }
 0x125   : > { %v1490_v19 = vpop.f32.mrf.mxu0  ;;  %v2622_v21 = vpop.f32.mrf.mxu1 }
 0x126   : > { %2366 = vst.msk [vmem:[%s3098_s11 + $0x10] sm:$0xf] %vm433_vm3, %v1436_v20 }
 0x127   : > { %v2628_v22 = vpop.f32.mrf.mxu0  ;;  %v1555_v24 = vpop.f32.mrf.mxu1 }
 0x128   : > { %v1561_v28 = vadd.f32 %v1555_v24, %v1493_v23 }
 0x129   : > { %v1611_v25 = vpop.f32.mrf.mxu0  ;;  %v2633_v26 = vpop.f32.mrf.mxu1 }
 0x12a   : > { %v1617_v33 = vadd.f32 %v1611_v25, %v1561_v28 }
 0x12b   : > { %v2639_v27 = vpop.f32.mrf.mxu0  ;;  %v1558_v29 = vpop.f32.mrf.mxu1 }
 0x12d   : > { %v1614_v30 = vpop.f32.mrf.mxu0  ;;  %v2634_v31 = vpop.f32.mrf.mxu1 }
 0x12f   : > { %v2640_v32 = vpop.f32.mrf.mxu0  ;;  %v1679_v34 = vpop.f32.mrf.mxu1 }
 0x130   : > { %v1685_v36 = vadd.f32 %v1679_v34, %v1617_v33 }
 0x131   : > { %v1738_v35 = vpop.f32.mrf.mxu0  ;;  %v2645_v38 = vpop.f32.mrf.mxu1 }
 0x132   : > { %v1686_v40 = vmax.f32 %v1685_v36, 0.0  ;;  %v1744_v45 = vadd.f32 %v3091_v37, %v1738_v35 }
 0x133   : > { %v2651_v39 = vpop.f32.mrf.mxu0  ;;  %v1682_v41 = vpop.f32.mrf.mxu1 }
 0x134   : > { %v1687_v43 = vpack.c.bf16 %v1686_v40, %v1686_v40 }
 0x135   : > { %v1741_v42 = vpop.f32.mrf.mxu0  ;;  %v2646_v44 = vpop.f32.mrf.mxu1 }
 0x136   : > { %2389 = vst.msk [vmem:[%s3098_s11 + $0x14] sm:$0xf] %vm433_vm3, %v1687_v43 }
 0x137   : > { %v2652_v0 = vpop.f32.mrf.mxu0  ;;  %v1806_v46 = vpop.f32.mrf.mxu1 }
 0x138   : > { %v1812_v50 = vadd.f32 %v1806_v46, %v1744_v45 }
 0x139   : > { %v1862_v47 = vpop.f32.mrf.mxu0  ;;  %v2657_v48 = vpop.f32.mrf.mxu1 }
 0x13a   : > { %v1868_v55 = vadd.f32 %v1862_v47, %v1812_v50 }
 0x13b   : > { %v2663_v49 = vpop.f32.mrf.mxu0  ;;  %v1809_v51 = vpop.f32.mrf.mxu1 }
 0x13d   : > { %v1865_v52 = vpop.f32.mrf.mxu0  ;;  %v2658_v53 = vpop.f32.mrf.mxu1 }
 0x13f   : > { %v2664_v54 = vpop.f32.mrf.mxu0  ;;  %v1930_v56 = vpop.f32.mrf.mxu1 }
 0x140   : > { %v1936_v58 = vadd.f32 %v1930_v56, %v1868_v55 }
 0x141   : > { %v1989_v57 = vpop.f32.mrf.mxu0  ;;  %v2669_v59 = vpop.f32.mrf.mxu1 }
 0x142   : > { %v1937_v61 = vmax.f32 %v1936_v58, 0.0  ;;  %v1995_v4 = vadd.f32 %v3091_v37, %v1989_v57 }
 0x143   : > { %v2675_v60 = vpop.f32.mrf.mxu0  ;;  %v1933_v62 = vpop.f32.mrf.mxu1 }
 0x144   : > { %v1938_v1 = vpack.c.bf16 %v1937_v61, %v1937_v61 }
 0x145   : > { %v1992_v63 = vpop.f32.mrf.mxu0  ;;  %v2670_v2 = vpop.f32.mrf.mxu1 }
 0x146   : > { %2412 = vst.msk [vmem:[%s3098_s11 + $0x18] sm:$0xf] %vm433_vm3, %v1938_v1 }
 0x147   : > { %v2676_v3 = vpop.f32.mrf.mxu0  ;;  %v2057_v5 = vpop.f32.mrf.mxu1 }
 0x148   : > { %v2063_v9 = vadd.f32 %v2057_v5, %v1995_v4 }
 0x149   : > { %v2113_v6 = vpop.f32.mrf.mxu0  ;;  %v2681_v7 = vpop.f32.mrf.mxu1 }
 0x14a   : > { %v2119_v14 = vadd.f32 %v2113_v6, %v2063_v9 }
 0x14b   : > { %v2687_v8 = vpop.f32.mrf.mxu0  ;;  %v2060_v10 = vpop.f32.mrf.mxu1 }
 0x14d   : > { %v2116_v11 = vpop.f32.mrf.mxu0  ;;  %v2682_v12 = vpop.f32.mrf.mxu1 }
 0x14f   : > { %v2688_v13 = vpop.f32.mrf.mxu0  ;;  %v2181_v15 = vpop.f32.mrf.mxu1 }
 0x150   : > { %v2187_v16 = vadd.f32 %v2181_v15, %v2119_v14 }
 0x151   : > { %v2693_v17 = vpop.f32.mrf.mxu1 }
 0x152   : > { %v2188_v18 = vmax.f32 %v2187_v16, 0.0 }
 0x153   : > { %v2184_v19 = vpop.f32.mrf.mxu1 }
 0x154   : > { %v2189_v20 = vpack.c.bf16 %v2188_v18, %v2188_v18 }
 0x155   : > { %v2694_v21 = vpop.f32.mrf.mxu1 }
 0x156   : > { %2435 = vst.msk [vmem:[%s3098_s11 + $0x1c] sm:$0xf] %vm433_vm3, %v2189_v20 }
 0x157 PF: > { %s13_s12 = sadd.s32 1, %s2760_s12  }
 0x158   : > { %p10_p4 = scmp.ge.s32.totalorder %s13_s12, 4  }
 0x15a   :  { %12 = sbr.rel (!%p10_p4) target bundleno = 1 (0x1), region = 80 }

// kernel: depth_ans_forward.10
= control target key start
LH: loop header
LB: loop body
LE: loop exit
PB: predicated region body
PF: predicated region fallthrough
CT: control target
= control target key end

     0   :  { %vm65_vm0 = vcmask 130048   ;;  %vm277_vm1 = vcmask 785408   ;;  %vm560_vm2 = vcmask 125952   ;;  %s886_s2 = inlined_call_operand.vmem [shape: bf16[16,96], index: 2, kind: input, shape index: {}]   ;;  %s887_s0 = inlined_call_operand.vmem [shape: bf16[32,16], index: 0, kind: input, shape index: {}]   ;;  %s888_s4 = inlined_call_operand.vmem [shape: bf16[16,96], index: 4, kind: input, shape index: {}]   ;;  %s889_s1 = inlined_call_operand.vmem [shape: bf16[32,16], index: 1, kind: input, shape index: {}]   ;;  %s890_s6 = inlined_call_operand.vmem [shape: bf16[96,96], index: 6, kind: input, shape index: {}]   ;;  %s891_s7 = inlined_call_operand.vmem [shape: bf16[96,96], index: 7, kind: input, shape index: {}]   ;;  %s892_s3 = inlined_call_operand.vmem [shape: f32[1,96], index: 3, kind: input, shape index: {}]   ;;  %s893_s5 = inlined_call_operand.vmem [shape: f32[1,96], index: 5, kind: input, shape index: {}]   ;;  %s894_s9 = inlined_call_operand.vmem [shape: bf16[96,16], index: 9, kind: input, shape index: {}]   ;;  %s895_s8 = inlined_call_operand.vmem [shape: f32[1,96], index: 8, kind: input, shape index: {}]   ;;  %s896_s10 = inlined_call_operand.vmem [shape: bf16[32,16], index: 10, kind: output, shape index: {}]  }
   0x1   :  { %v704_v0 = vld [vmem:[%s886_s2] sm:$0xff]   ;;  %v706_v2 = vld [vmem:[%s887_s0 + $0x8] sm:$0xff]   ;;  %v713_v9 = vld [vmem:[%s890_s6 + $0x18] sm:$0xff]  }
   0x2   :  { %v705_v1 = vld [vmem:[%s887_s0] sm:$0xff]   ;;  %644 = vmatprep.subr.bf16.mxu1 %v704_v0  ;;  %v710_v5 = vld [vmem:[%s890_s6 + $0x28] sm:$0xff]   ;;  %v715_v11 = vld [vmem:[%s890_s6 + $0x10] sm:$0xff]  }
   0x3   :  { %645 = vmatpush3.bf16.msra.mxu1 %v704_v0  ;;  %646 = vmatprep.mubr.msk.bf16.mxu1 %vm65_vm0, %v705_v1  ;;  %v707_v3 = vld [vmem:[%s888_s4] sm:$0xff]   ;;  %v712_v6 = vld [vmem:[%s891_s7 + $0x28] sm:$0xff]   ;;  %v716_v12 = vld [vmem:[%s891_s7 + $0x18] sm:$0xff]  }
   0x4   :  { %v708_v4 = vld [vmem:[%s889_s1] sm:$0xff]   ;;  %650 = vmatprep.subr.bf16.mxu1 %v707_v3  ;;  %v709_v7 = vld [vmem:[%s889_s1 + $0x8] sm:$0xff]   ;;  %656 = vmatprep.subr.bf16.mxu0 %v712_v6  ;;  %v718_v14 = vld [vmem:[%s891_s7 + $0x10] sm:$0xff]  }
   0x5   :  { %v711_v8 = vld [vmem:[%s890_s6 + $0x20] sm:$0xff]   ;;  %657 = vmatpush3.bf16.msra.mxu0 %v712_v6  ;;  %v717_v13 = vld [vmem:[%s890_s6 + $0x8] sm:$0xff]   ;;  %v724_v50 = vld [vmem:[%s894_s9 + $0x18] sm:$0xff]  }
   0x6   :  { %647 = vmatmul.mubr.msk.bf16.vlgmr.msra.gmra.mxu1 %vm65_vm0, %v706_v2  ;;  %v714_v10 = vld [vmem:[%s891_s7 + $0x20] sm:$0xff]   ;;  %v720_v16 = vld [vmem:[%s891_s7 + $0x8] sm:$0xff]   ;;  %v725_v51 = vld [vmem:[%s894_s9 + $0x10] sm:$0xff]  }
   0x7   :  { %651 = vmatpush3.bf16.msra.mxu1 %v707_v3  ;;  %652 = vmatprep.mubr.msk.bf16.mxu1 %vm65_vm0, %v708_v4  ;;  %v719_v15 = vld [vmem:[%s890_s6] sm:$0xff]   ;;  %v722_v48 = vld [vmem:[%s894_s9 + $0x28] sm:$0xff]  }
   0x8   :  { %672 = vmatprep.subr.bf16.mxu1 %v710_v5  ;;  %658 = vmatprep.subr.bf16.mxu0 %v714_v10  ;;  %v721_v17 = vld [vmem:[%s891_s7] sm:$0xff]   ;;  %v726_v52 = vld [vmem:[%s894_s9 + $0x8] sm:$0xff]  }
   0x9   :  { %659 = vmatpush3.bf16.msra.mxu0 %v714_v10  ;;  %v569_v20 = vld [vmem:[%s892_s3] ss:$0 sm:$0xff] }
   0xa   :  { %660 = vmatprep.subr.bf16.mxu0 %v716_v12  ;;  %v575_v34 = vld [vmem:[%s893_s5] ss:$0 sm:$0xff] }
   0xb   :  { %v723_v49 = vld [vmem:[%s894_s9 + $0x20] sm:$0xff]  }
   0xc   :  { %v727_v53 = vld [vmem:[%s894_s9] sm:$0xff]  }
   0xd   :  { %661 = vmatpush3.bf16.msra.mxu0 %v716_v12  ;;  %v597_v62 = vld [vmem:[%s895_s8] ss:$0 sm:$0xff] }
   0xe   :  { %653 = vmatmul.mubr.msk.bf16.vlgmr.msra.gmra.mxu1 %vm65_vm0, %v709_v7  ;;  %662 = vmatprep.subr.bf16.mxu0 %v718_v14 }
   0xf   :  { %673 = vmatpush3.bf16.msra.mxu1 %v710_v5 }
  0x10   :  { %674 = vmatprep.subr.bf16.mxu1 %v711_v8 }
  0x11   :  { %663 = vmatpush3.bf16.msra.mxu0 %v718_v14 }
  0x12   :  { %664 = vmatprep.subr.bf16.mxu0 %v720_v16 }
  0x13   :  { %675 = vmatpush3.bf16.msra.mxu1 %v711_v8 }
  0x14   :  { %676 = vmatprep.subr.bf16.mxu1 %v713_v9 }
  0x15   :  { %665 = vmatpush3.bf16.msra.mxu0 %v720_v16 }
  0x16   :  { %666 = vmatprep.subr.bf16.mxu0 %v721_v17 }
  0x17   :  { %677 = vmatpush3.bf16.msra.mxu1 %v713_v9 }
  0x18   :  { %678 = vmatprep.subr.bf16.mxu1 %v715_v11 }
  0x19   :  { %667 = vmatpush3.bf16.msra.mxu0 %v721_v17 }
  0x1a   :  { %688 = vmatprep.subr.bf16.mxu0 %v722_v48 }
  0x1b   :  { %679 = vmatpush3.bf16.msra.mxu1 %v715_v11 }
  0x1c   :  { %680 = vmatprep.subr.bf16.mxu1 %v717_v13 }
  0x1f   :  { %681 = vmatpush3.bf16.msra.mxu1 %v717_v13 }
  0x20   :  { %682 = vmatprep.subr.bf16.mxu1 %v719_v15 }
  0x23   :  { %683 = vmatpush3.bf16.msra.mxu1 %v719_v15 }
  0xc6   :  { %v648_v18 = vpop.f32.mrf.mxu1 }
  0xc7   :  { %v115_v24 = vadd.f32 %v648_v18, %v569_v20 }
  0xc8   :  { %v106_v19 = vpop.f32.mrf.mxu1 }
  0xc9   :  { %v107_v22 = vadd.f32 %v569_v20, %v106_v19  ;;  %v123_v31 = vmax.f32 %v115_v24, 0.0 }
  0xca   :  { %v649_v21 = vpop.f32.mrf.mxu1 }
  0xcb   :  { %v118_v23 = vadd.f32 %v649_v21, %v569_v20  ;;  %v121_v29 = vmax.f32 %v107_v22, 0.0 }
  0xcc   :  { %v109_v25 = vpop.f32.mrf.mxu1 }
  0xcd   :  { %v110_v26 = vadd.f32 %v569_v20, %v109_v25  ;;  %v124_v27 = vmax.f32 %v118_v23, 0.0 }
  0xce   :  { %v654_v28 = vpop.f32.mrf.mxu1 }
  0xcf   :  { %v122_v30 = vmax.f32 %v110_v26, 0.0  ;;  %v214_v35 = vpack.c.bf16 %v124_v27, %v123_v31  ;;  %v203_v39 = vadd.f32 %v654_v28, %v575_v34 }
  0xd0   :  { %v194_v32 = vpop.f32.mrf.mxu1 }
  0xd1   :  { %v213_v33 = vpack.c.bf16 %v122_v30, %v121_v29  ;;  %v195_v37 = vadd.f32 %v575_v34, %v194_v32  ;;  %v211_v45 = vmax.f32 %v203_v39, 0.0 }
  0xd2   :  { %v655_v36 = vpop.f32.mrf.mxu1 }
  0xd3   :  { %v206_v38 = vadd.f32 %v655_v36, %v575_v34  ;;  %684 = vmatprep.mubr.msk.bf16.mxu1 %vm277_vm1, %v213_v33  ;;  %v209_v43 = vmax.f32 %v195_v37, 0.0 }
  0xd4   :  { %v197_v40 = vpop.f32.mrf.mxu1  ;;  %685 = vmatmul.mubr.msk.bf16.vlgmr.msra.gmra.mxu1 %vm277_vm1, %v214_v35 }
  0xd5   :  { %v198_v41 = vadd.f32 %v575_v34, %v197_v40  ;;  %v212_v42 = vmax.f32 %v206_v38, 0.0 }
  0xd7   :  { %v210_v44 = vmax.f32 %v198_v41, 0.0  ;;  %v228_v47 = vpack.c.bf16 %v212_v42, %v211_v45 }
  0xd9   :  { %v227_v46 = vpack.c.bf16 %v210_v44, %v209_v43 }
  0xdb   :  { %668 = vmatprep.mubr.msk.bf16.mxu0 %vm277_vm1, %v227_v46 }
  0xdc   :  { %669 = vmatmul.mubr.msk.bf16.vlgmr.msra.gmra.mxu0 %vm277_vm1, %v228_v47 }
  0xdd   :  { %689 = vmatpush3.bf16.msra.mxu0 %v722_v48 }
  0xde   :  { %690 = vmatprep.subr.bf16.mxu0 %v723_v49 }
  0xe1   :  { %691 = vmatpush3.bf16.msra.mxu0 %v723_v49 }
  0xe2   :  { %692 = vmatprep.subr.bf16.mxu0 %v724_v50 }
  0xe5   :  { %693 = vmatpush3.bf16.msra.mxu0 %v724_v50 }
  0xe6   :  { %694 = vmatprep.subr.bf16.mxu0 %v725_v51 }
  0xe9   :  { %695 = vmatpush3.bf16.msra.mxu0 %v725_v51 }
  0xea   :  { %696 = vmatprep.subr.bf16.mxu0 %v726_v52 }
  0xed   :  { %697 = vmatpush3.bf16.msra.mxu0 %v726_v52 }
  0xee   :  { %698 = vmatprep.subr.bf16.mxu0 %v727_v53 }
  0xf1   :  { %699 = vmatpush3.bf16.msra.mxu0 %v727_v53 }
 0x194   :  { %v686_v54 = vpop.f32.mrf.mxu1 }
 0x196   :  { %v409_v55 = vpop.f32.mrf.mxu1 }
 0x198   :  { %v687_v57 = vpop.f32.mrf.mxu1 }
 0x19a   :  { %v412_v0 = vpop.f32.mrf.mxu1 }
 0x19c   :  { %v670_v56 = vpop.f32.mrf.mxu0 }
 0x19d   :  { %v418_v60 = vadd.f32 %v686_v54, %v670_v56 }
 0x19e   :  { %v318_v58 = vpop.f32.mrf.mxu0 }
 0x19f   :  { %v410_v59 = vadd.f32 %v409_v55, %v318_v58  ;;  %v433_v5 = vadd.f32 %v597_v62, %v418_v60 }
 0x1a0   :  { %v671_v61 = vpop.f32.mrf.mxu0 }
 0x1a1   :  { %v421_v63 = vadd.f32 %v687_v57, %v671_v61  ;;  %v431_v2 = vadd.f32 %v597_v62, %v410_v59  ;;  %v437_v10 = vmax.f32 %v433_v5, 0.0 }
 0x1a2   :  { %v321_v1 = vpop.f32.mrf.mxu0 }
 0x1a3   :  { %v434_v3 = vadd.f32 %v597_v62, %v421_v63  ;;  %v413_v4 = vadd.f32 %v412_v0, %v321_v1  ;;  %v435_v8 = vmax.f32 %v431_v2, 0.0 }
 0x1a5   :  { %v432_v6 = vadd.f32 %v597_v62, %v413_v4  ;;  %v438_v7 = vmax.f32 %v434_v3, 0.0 }
 0x1a7   :  { %v436_v9 = vmax.f32 %v432_v6, 0.0  ;;  %v440_v12 = vpack.c.bf16 %v438_v7, %v437_v10 }
 0x1a9   :  { %v439_v11 = vpack.c.bf16 %v436_v9, %v435_v8 }
 0x1ab   :  { %700 = vmatprep.mubr.msk.bf16.mxu0 %vm277_vm1, %v439_v11 }
 0x1ac   :  { %701 = vmatmul.mubr.msk.bf16.vlgmr.msra.gmra.mxu0 %vm277_vm1, %v440_v12 }
 0x26c   :  { %v702_v13 = vpop.f32.mrf.mxu0 }
 0x26d   :  { %v612_v14 = vpack.c.bf16 %v702_v13, %v702_v13 }
 0x26e   :  { %v529_v15 = vpop.f32.mrf.mxu0 }
 0x26f   :  { %563 = vst.msk [vmem:[%s896_s10 + $0x8] sm:$0xf] %vm560_vm2, %v612_v14  ;;  %v610_v16 = vpack.c.bf16 %v529_v15, %v529_v15 }
 0x270   :  { %v703_v17 = vpop.f32.mrf.mxu0 }
 0x271   :  { %561 = vst.msk [vmem:[%s896_s10] sm:$0xf] %vm560_vm2, %v610_v16  ;;  %v613_v18 = vpack.c.bf16 %v703_v17, %v703_v17 }
 0x272   :  { %v532_v19 = vpop.f32.mrf.mxu0 }
 0x273   :  { %564 = vst.msk [vmem:[%s896_s10 + $0xc] sm:$0xf] %vm560_vm2, %v613_v18  ;;  %v611_v20 = vpack.c.bf16 %v532_v19, %v532_v19 }
 0x275   :  { %562 = vst.msk [vmem:[%s896_s10 + $0x4] sm:$0xf] %vm560_vm2, %v611_v20 }

// kernel: depth_ans_forward.6
= control target key start
LH: loop header
LB: loop body
LE: loop exit
PB: predicated region body
PF: predicated region fallthrough
CT: control target
= control target key end

     0   :  { %s2504_s12 = smov 0   ;;  %s2846_s0 = inlined_call_operand.vmem [shape: bf16[2,9,9,8], index: 0, kind: input, shape index: {}]   ;;  %s2847_s1 = inlined_call_operand.vmem [shape: bf16[4,8,8], index: 1, kind: input, shape index: {}]   ;;  %s2848_s2 = inlined_call_operand.vmem [shape: f32[1,8], index: 2, kind: input, shape index: {}]   ;;  %s2849_s3 = inlined_call_operand.vmem [shape: bf16[2,8,8,8], index: 3, kind: output, shape index: {}]  }
   0x1 LB: > { %s2055_s13 = sadd.s32 4294967295, %s2480_s12   ;;  %p2059_p0 = scmp.ge.s32.totalorder %s2480_s12, 1  ;;  %s2480_s12 = sphi %s2504_s12, %s13_s12  }
   0x2   : > { %p137_p1 = scmp.lt.s32.totalorder %s2480_s12, 3 }
   0x4   : > { %p138_p2 = pnand %p2059_p0, %p137_p1 }
   0x5   : > { %p161_p3 = scmp.lt.s32.totalorder (!%p138_p2), %s2055_s13, 1 }
   0x6   : > { %141 = sbr.rel (%p138_p2) target bundleno = 343 (0x157), region = 32 }
   0xb   : > { %v180_v0 = vld [vmem:[%s2847_s1] sm:$0xf]  ;;  %vm185_vm0 = vcmask 1043456   ;;  %v2482_v1 = vmov 0.0   ;;  %vm2483_vm1 = vmmov 0   ;;  %s2851_s13 = smov (!%p161_p3, %s2055_s13), 1 }
   0xc   : > { %2255 = vmatprep.subr.bf16.mxu0 %v2482_v1  ;;  %v187_v2 = vsel %vm185_vm0, %v180_v0, 0  ;;  %2257 = vmatprep.mubr.msk.bf16.mxu0 %vm2483_vm1, %v2482_v1  ;;  %v2065_v3 = vld [vmem:[%s2847_s1 + $0x4] sm:$0xf]  ;;  %v2069_v5 = vld [vmem:[%s2847_s1 + $0x8] sm:$0xf]  ;;  %s2447_s20 = smul.u32 72, %s2851_s13 }
   0xd   : > { %2256 = vmatpush3.bf16.msra.mxu0 %v187_v2  ;;  %2261 = vmatprep.subr.bf16.mxu1 %v2482_v1  ;;  %v250_v4 = vsel %vm185_vm0, %v2065_v3, 0  ;;  %vm181_vm2 = vcmask 64512   ;;  %v301_v6 = vsel %vm185_vm0, %v2069_v5, 0  ;;  %v2073_v12 = vld [vmem:[%s2847_s1 + $0xc] sm:$0xf]  ;;  %vm409_vm3 = vcmask 60416  }
   0xe   : > { %2262 = vmatpush3.bf16.msra.mxu1 %v250_v4  ;;  %2267 = vmatprep.subr.bf16.mxu0 %v2482_v1  ;;  %s2537_s23 = scalar_lea.vmem %s2846_s0, %s2447_s20  ;;  %v412_v13 = vld [vmem:[%s2847_s1] sm:$0xf]  ;;  %v364_v18 = vsel %vm185_vm0, %v2073_v12, 0  ;;  %v2080_v23 = vld [vmem:[%s2847_s1 + $0x4] sm:$0xf] }
   0xf   : > { %2263 = vmatprep.mubr.msk.bf16.mxu1 %vm2483_vm1, %v2482_v1  ;;  %2273 = vmatprep.subr.bf16.mxu1 %v2482_v1  ;;  %v179_v7 = vld [vmem:[%s2537_s23] sm:$0xf]  ;;  %v2459_v9 = vld [vmem:[%s2537_s23 + $0x8] sm:$0x1f]   ;;  %v417_v19 = vsel %vm185_vm0, %v412_v13, 0  ;;  %v479_v28 = vsel %vm185_vm0, %v2080_v23, 0 }
  0x10   : > { %2258 = vmatmul.mubr.msk.bf16.vlgmr.msra.gmra.mxu0 %vm181_vm2, %v179_v7  ;;  %v2458_v8 = vld [vmem:[%s2537_s23] sm:$0x1f]   ;;  %v356_v15 = vshll.u32 %v2459_v9, 16  ;;  %v2068_v16 = vld [vmem:[%s2537_s23 + $0x8] sm:$0xf]  ;;  %v354_v20 = vshrl.u32 %v2459_v9, 16 }
  0x11   : > { %2268 = vmatpush3.bf16.msra.mxu0 %v301_v6  ;;  %2269 = vmatprep.mubr.msk.bf16.mxu0 %vm2483_vm1, %v2482_v1  ;;  %v240_v10 = vshrl.u32 %v2458_v8, 16  ;;  %v242_v11 = vshll.u32 %v2458_v8, 16  ;;  %v2460_v22 = vld [vmem:[%s2537_s23 + $0x8] sm:$0x1f]   ;;  %v2461_v32 = vld [vmem:[%s2537_s23 + $0x10] sm:$0x1f]  }
  0x12   : > { %2279 = vmatprep.subr.bf16.mxu0 %v2482_v1  ;;  %v358_v21 = vrot.slane %v356_v15, 1  ;;  %v2084_v24 = vld [vmem:[%s2847_s1 + $0x8] sm:$0xf]  ;;  %v471_v26 = vshll.u32 %v2460_v22, 16  ;;  %v469_v30 = vshrl.u32 %v2460_v22, 16  ;;  %v583_v36 = vshll.u32 %v2461_v32, 16 }
  0x13   : > { %v244_v14 = vrot.slane %v242_v11, 1  ;;  %v2076_v27 = vld [vmem:[%s2537_s23 + $0x8] sm:$0xf]  ;;  %v529_v29 = vsel %vm185_vm0, %v2084_v24, 0  ;;  %v2088_v33 = vld [vmem:[%s2847_s1 + $0xc] sm:$0xf] }
  0x14   : > { %v359_v25 = vor.u32 %v358_v21, %v354_v20  ;;  %v473_v31 = vrot.slane %v471_v26, 1  ;;  %v639_v34 = vld [vmem:[%s2847_s1] sm:$0xf]  ;;  %v2083_v37 = vld [vmem:[%s2537_s23 + $0x10] sm:$0xf]  ;;  %v591_v38 = vsel %vm185_vm0, %v2088_v33, 0 }
  0x15   : > { %v245_v17 = vor.u32 %v244_v14, %v240_v10  ;;  %v644_v39 = vsel %vm185_vm0, %v639_v34, 0  ;;  %v581_v40 = vshrl.u32 %v2461_v32, 16  ;;  %v585_v41 = vrot.slane %v583_v36, 1  ;;  %v2462_v42 = vld [vmem:[%s2537_s23 + $0x10] sm:$0x1f]  }
  0x16   : > { %v474_v35 = vor.u32 %v473_v31, %v469_v30  ;;  %v2096_v43 = vld [vmem:[%s2847_s1 + $0x4] sm:$0xf]  ;;  %v2100_v44 = vld [vmem:[%s2847_s1 + $0x8] sm:$0xf]  ;;  %v698_v46 = vshll.u32 %v2462_v42, 16  ;;  %v696_v50 = vshrl.u32 %v2462_v42, 16 }
  0x17   : > { %2264 = vmatmul.mubr.msk.bf16.vlgmr.msra.gmra.mxu1 %vm181_vm2, %v245_v17  ;;  %v586_v45 = vor.u32 %v585_v41, %v581_v40  ;;  %v2092_v47 = vld [vmem:[%s2537_s23 + $0x10] sm:$0xf]  ;;  %v706_v48 = vsel %vm185_vm0, %v2096_v43, 0  ;;  %v756_v49 = vsel %vm185_vm0, %v2100_v44, 0  ;;  %v2463_v52 = vld [vmem:[%s2537_s23 + $0x18] sm:$0x1f]  }
  0x18   : > { %2270 = vmatmul.mubr.msk.bf16.vlgmr.msra.gmra.mxu0 %vm181_vm2, %v2068_v16  ;;  %2274 = vmatpush3.bf16.msra.mxu1 %v364_v18  ;;  %v700_v51 = vrot.slane %v698_v46, 1  ;;  %v2104_v53 = vld [vmem:[%s2847_s1 + $0xc] sm:$0xf]  ;;  %v866_v54 = vld [vmem:[%s2847_s1] sm:$0xf]  ;;  %v810_v56 = vshll.u32 %v2463_v52, 16 }
  0x19   : > { %2280 = vmatpush3.bf16.msra.mxu0 %v417_v19  ;;  %2275 = vmatprep.mubr.msk.bf16.mxu1 %vm2483_vm1, %v2482_v1  ;;  %v2099_v57 = vld [vmem:[%s2537_s23 + $0x18] sm:$0xf]  ;;  %v818_v58 = vsel %vm185_vm0, %v2104_v53, 0  ;;  %v871_v59 = vsel %vm185_vm0, %v866_v54, 0  ;;  %v808_v60 = vshrl.u32 %v2463_v52, 16 }
  0x1a   : > { %2281 = vmatprep.mubr.msk.bf16.mxu0 %vm2483_vm1, %v2482_v1  ;;  %2285 = vmatprep.subr.bf16.mxu1 %v2482_v1  ;;  %v701_v55 = vor.u32 %v700_v51, %v696_v50  ;;  %v812_v61 = vrot.slane %v810_v56, 1  ;;  %v2464_v62 = vld [vmem:[%s2537_s23 + $0x18] sm:$0x1f]   ;;  %v2112_v63 = vld [vmem:[%s2847_s1 + $0x4] sm:$0xf] }
  0x1b   : > { %2291 = vmatprep.subr.bf16.mxu0 %v2482_v1  ;;  %v2116_v0 = vld [vmem:[%s2847_s1 + $0x8] sm:$0xf]  ;;  %v925_v3 = vshll.u32 %v2464_v62, 16  ;;  %v2108_v4 = vld [vmem:[%s2537_s23 + $0x18] sm:$0xf]  ;;  %v933_v5 = vsel %vm185_vm0, %v2112_v63, 0 }
  0x1c   : > { %v813_v2 = vor.u32 %v812_v61, %v808_v60  ;;  %v983_v6 = vsel %vm185_vm0, %v2116_v0, 0  ;;  %v923_v7 = vshrl.u32 %v2464_v62, 16  ;;  %v2465_v9 = vld [vmem:[%s2537_s23 + $0x20] sm:$0x1f]   ;;  %v2120_v10 = vld [vmem:[%s2847_s1 + $0xc] sm:$0xf] }
  0x1d   : > { %v927_v8 = vrot.slane %v925_v3, 1  ;;  %v1093_v11 = vld [vmem:[%s2847_s1] sm:$0xf]  ;;  %v1037_v13 = vshll.u32 %v2465_v9, 16  ;;  %v1045_v15 = vsel %vm185_vm0, %v2120_v10, 0  ;;  %v1035_v17 = vshrl.u32 %v2465_v9, 16 }
  0x1e   : > { %v2115_v14 = vld [vmem:[%s2537_s23 + $0x20] sm:$0xf]  ;;  %v1098_v16 = vsel %vm185_vm0, %v1093_v11, 0  ;;  %v2128_v20 = vld [vmem:[%s2847_s1 + $0x4] sm:$0xf] }
  0x1f   : > { %2276 = vmatmul.mubr.msk.bf16.vlgmr.msra.gmra.mxu1 %vm181_vm2, %v359_v25  ;;  %v928_v12 = vor.u32 %v927_v8, %v923_v7  ;;  %v1039_v18 = vrot.slane %v1037_v13, 1  ;;  %v2466_v19 = vld [vmem:[%s2537_s23 + $0x20] sm:$0x1f]   ;;  %v2132_v21 = vld [vmem:[%s2847_s1 + $0x8] sm:$0xf]  ;;  %v1160_v25 = vsel %vm185_vm0, %v2128_v20, 0 }
  0x20   : > { %2282 = vmatmul.mubr.msk.bf16.vlgmr.msra.gmra.mxu0 %vm181_vm2, %v2076_v27  ;;  %2286 = vmatpush3.bf16.msra.mxu1 %v479_v28  ;;  %v1152_v23 = vshll.u32 %v2466_v19, 16  ;;  %v2124_v24 = vld [vmem:[%s2537_s23 + $0x20] sm:$0xf]  ;;  %v1210_v26 = vsel %vm185_vm0, %v2132_v21, 0  ;;  %v1150_v27 = vshrl.u32 %v2466_v19, 16 }
  0x21   : > { %2292 = vmatpush3.bf16.msra.mxu0 %v529_v29  ;;  %2287 = vmatprep.mubr.msk.bf16.mxu1 %vm2483_vm1, %v2482_v1  ;;  %v1040_v22 = vor.u32 %v1039_v18, %v1035_v17  ;;  %v2467_v29 = vld [vmem:[%s2537_s23 + $0x28] sm:$0x1f]   ;;  %v1320_v31 = vld [vmem:[%s2847_s1] sm:$0xf]  ;;  %v2144_v40 = vld [vmem:[%s2847_s1 + $0x4] sm:$0xf] }
  0x22   : > { %2293 = vmatprep.mubr.msk.bf16.mxu0 %vm2483_vm1, %v2482_v1  ;;  %2297 = vmatprep.subr.bf16.mxu1 %v2482_v1  ;;  %v1154_v28 = vrot.slane %v1152_v23, 1  ;;  %v2136_v30 = vld [vmem:[%s2847_s1 + $0xc] sm:$0xf]  ;;  %v1264_v33 = vshll.u32 %v2467_v29, 16  ;;  %v2131_v34 = vld [vmem:[%s2537_s23 + $0x28] sm:$0xf] }
  0x23   : > { %2303 = vmatprep.subr.bf16.mxu0 %v2482_v1  ;;  %v1325_v36 = vsel %vm185_vm0, %v1320_v31, 0  ;;  %v2148_v41 = vld [vmem:[%s2847_s1 + $0x8] sm:$0xf]  ;;  %v2152_v50 = vld [vmem:[%s2847_s1 + $0xc] sm:$0xf] }
  0x24   : > { %v1155_v32 = vor.u32 %v1154_v28, %v1150_v27  ;;  %v2140_v44 = vld [vmem:[%s2537_s23 + $0x28] sm:$0xf]  ;;  %v1437_v46 = vsel %vm185_vm0, %v2148_v41, 0  ;;  %v1547_v51 = vld [vmem:[%s2847_s1] sm:$0xf] }
  0x25   : > { %v2147_v54 = vld [vmem:[%s2537_s23 + $0x30] sm:$0xf]  ;;  %v1552_v56 = vsel %vm185_vm0, %v1547_v51, 0  ;;  %v2160_v60 = vld [vmem:[%s2847_s1 + $0x4] sm:$0xf] }
  0x26   : > { %v2164_v61 = vld [vmem:[%s2847_s1 + $0x8] sm:$0xf]  ;;  %v2156_v0 = vld [vmem:[%s2537_s23 + $0x30] sm:$0xf]  ;;  %v2168_v7 = vld [vmem:[%s2847_s1 + $0xc] sm:$0xf] }
  0x27   : > { %2288 = vmatmul.mubr.msk.bf16.vlgmr.msra.gmra.mxu1 %vm181_vm2, %v474_v35  ;;  %v1272_v35 = vsel %vm185_vm0, %v2136_v30, 0  ;;  %v1664_v3 = vsel %vm185_vm0, %v2164_v61, 0  ;;  %v1774_v8 = vld [vmem:[%s2847_s1] sm:$0xf]  ;;  %v2163_v11 = vld [vmem:[%s2537_s23 + $0x38] sm:$0xf] }
  0x28   : > { %2294 = vmatmul.mubr.msk.bf16.vlgmr.msra.gmra.mxu0 %vm181_vm2, %v2083_v37  ;;  %2298 = vmatpush3.bf16.msra.mxu1 %v591_v38  ;;  %v1262_v37 = vshrl.u32 %v2467_v29, 16  ;;  %v1266_v38 = vrot.slane %v1264_v33, 1  ;;  %v1779_v13 = vsel %vm185_vm0, %v1774_v8, 0  ;;  %v2176_v17 = vld [vmem:[%s2847_s1 + $0x4] sm:$0xf] }
  0x29   : > { %2304 = vmatpush3.bf16.msra.mxu0 %v644_v39  ;;  %2299 = vmatprep.mubr.msk.bf16.mxu1 %vm2483_vm1, %v2482_v1  ;;  %v2468_v39 = vld [vmem:[%s2537_s23 + $0x28] sm:$0x1f]   ;;  %v2172_v21 = vld [vmem:[%s2537_s23 + $0x38] sm:$0xf]  ;;  %v2179_v30 = vld [vmem:[%s2537_s23 + $0x40] sm:$0xf] }
  0x2a   : > { %2305 = vmatprep.mubr.msk.bf16.mxu0 %vm2483_vm1, %v2482_v1  ;;  %2309 = vmatprep.subr.bf16.mxu1 %v2482_v1  ;;  %v1267_v42 = vor.u32 %v1266_v38, %v1262_v37  ;;  %v1379_v43 = vshll.u32 %v2468_v39, 16  ;;  %v2180_v18 = vld [vmem:[%s2847_s1 + $0x8] sm:$0xf]  ;;  %v2184_v27 = vld [vmem:[%s2847_s1 + $0xc] sm:$0xf] }
  0x2b   : > { %2315 = vmatprep.subr.bf16.mxu0 %v2482_v1  ;;  %v1891_v23 = vsel %vm185_vm0, %v2180_v18, 0  ;;  %v1953_v31 = vsel %vm185_vm0, %v2184_v27, 0  ;;  %v2811_v37 = vld [vmem:[%s2848_s2] ss:$0 sm:$0xff] }
  0x2f   : > { %2300 = vmatmul.mubr.msk.bf16.vlgmr.msra.gmra.mxu1 %vm181_vm2, %v586_v45  ;;  %v1387_v45 = vsel %vm185_vm0, %v2144_v40, 0 }
  0x30   : > { %2306 = vmatmul.mubr.msk.bf16.vlgmr.msra.gmra.mxu0 %vm181_vm2, %v2092_v47  ;;  %2310 = vmatpush3.bf16.msra.mxu1 %v706_v48  ;;  %v1377_v47 = vshrl.u32 %v2468_v39, 16  ;;  %v1381_v48 = vrot.slane %v1379_v43, 1 }
  0x31   : > { %2316 = vmatpush3.bf16.msra.mxu0 %v756_v49  ;;  %2311 = vmatprep.mubr.msk.bf16.mxu1 %vm2483_vm1, %v2482_v1  ;;  %v2469_v49 = vld [vmem:[%s2537_s23 + $0x30] sm:$0x1f]  }
  0x32   : > { %2317 = vmatprep.mubr.msk.bf16.mxu0 %vm2483_vm1, %v2482_v1  ;;  %2321 = vmatprep.subr.bf16.mxu1 %v2482_v1  ;;  %v1382_v52 = vor.u32 %v1381_v48, %v1377_v47  ;;  %v1491_v53 = vshll.u32 %v2469_v49, 16 }
  0x33   : > { %2327 = vmatprep.subr.bf16.mxu0 %v2482_v1 }
  0x37   : > { %2312 = vmatmul.mubr.msk.bf16.vlgmr.msra.gmra.mxu1 %vm181_vm2, %v701_v55  ;;  %v1499_v55 = vsel %vm185_vm0, %v2152_v50, 0 }
  0x38   : > { %2318 = vmatmul.mubr.msk.bf16.vlgmr.msra.gmra.mxu0 %vm181_vm2, %v2099_v57  ;;  %2322 = vmatpush3.bf16.msra.mxu1 %v818_v58  ;;  %v1489_v57 = vshrl.u32 %v2469_v49, 16  ;;  %v1493_v58 = vrot.slane %v1491_v53, 1 }
  0x39   : > { %2328 = vmatpush3.bf16.msra.mxu0 %v871_v59  ;;  %2323 = vmatprep.mubr.msk.bf16.mxu1 %vm2483_vm1, %v2482_v1  ;;  %v2470_v59 = vld [vmem:[%s2537_s23 + $0x30] sm:$0x1f]  }
  0x3a   : > { %2329 = vmatprep.mubr.msk.bf16.mxu0 %vm2483_vm1, %v2482_v1  ;;  %2333 = vmatprep.subr.bf16.mxu1 %v2482_v1  ;;  %v1494_v62 = vor.u32 %v1493_v58, %v1489_v57  ;;  %v1606_v63 = vshll.u32 %v2470_v59, 16 }
  0x3b   : > { %2339 = vmatprep.subr.bf16.mxu0 %v2482_v1 }
  0x3f   : > { %2324 = vmatmul.mubr.msk.bf16.vlgmr.msra.gmra.mxu1 %vm181_vm2, %v813_v2  ;;  %v1614_v2 = vsel %vm185_vm0, %v2160_v60, 0 }
  0x40   : > { %2330 = vmatmul.mubr.msk.bf16.vlgmr.msra.gmra.mxu0 %vm181_vm2, %v2108_v4  ;;  %2334 = vmatpush3.bf16.msra.mxu1 %v933_v5  ;;  %v1604_v4 = vshrl.u32 %v2470_v59, 16  ;;  %v1608_v5 = vrot.slane %v1606_v63, 1 }
  0x41   : > { %2340 = vmatpush3.bf16.msra.mxu0 %v983_v6  ;;  %2335 = vmatprep.mubr.msk.bf16.mxu1 %vm2483_vm1, %v2482_v1  ;;  %v2471_v6 = vld [vmem:[%s2537_s23 + $0x38] sm:$0x1f]  }
  0x42   : > { %2341 = vmatprep.mubr.msk.bf16.mxu0 %vm2483_vm1, %v2482_v1  ;;  %2345 = vmatprep.subr.bf16.mxu1 %v2482_v1  ;;  %v1609_v9 = vor.u32 %v1608_v5, %v1604_v4  ;;  %v1718_v10 = vshll.u32 %v2471_v6, 16 }
  0x43   : > { %2351 = vmatprep.subr.bf16.mxu0 %v2482_v1 }
  0x47   : > { %2336 = vmatmul.mubr.msk.bf16.vlgmr.msra.gmra.mxu1 %vm181_vm2, %v928_v12  ;;  %v1726_v12 = vsel %vm185_vm0, %v2168_v7, 0 }
  0x48   : > { %2342 = vmatmul.mubr.msk.bf16.vlgmr.msra.gmra.mxu0 %vm181_vm2, %v2115_v14  ;;  %2346 = vmatpush3.bf16.msra.mxu1 %v1045_v15  ;;  %v1716_v14 = vshrl.u32 %v2471_v6, 16  ;;  %v1720_v15 = vrot.slane %v1718_v10, 1 }
  0x49   : > { %2352 = vmatpush3.bf16.msra.mxu0 %v1098_v16  ;;  %2347 = vmatprep.mubr.msk.bf16.mxu1 %vm2483_vm1, %v2482_v1  ;;  %v2472_v16 = vld [vmem:[%s2537_s23 + $0x38] sm:$0x1f]  }
  0x4a   : > { %2353 = vmatprep.mubr.msk.bf16.mxu0 %vm2483_vm1, %v2482_v1  ;;  %2357 = vmatprep.subr.bf16.mxu1 %v2482_v1  ;;  %v1721_v19 = vor.u32 %v1720_v15, %v1716_v14  ;;  %v1833_v20 = vshll.u32 %v2472_v16, 16 }
  0x4b   : > { %2363 = vmatprep.subr.bf16.mxu0 %v2482_v1 }
  0x4f   : > { %2348 = vmatmul.mubr.msk.bf16.vlgmr.msra.gmra.mxu1 %vm181_vm2, %v1040_v22  ;;  %v1841_v22 = vsel %vm185_vm0, %v2176_v17, 0 }
  0x50   : > { %2354 = vmatmul.mubr.msk.bf16.vlgmr.msra.gmra.mxu0 %vm181_vm2, %v2124_v24  ;;  %2358 = vmatpush3.bf16.msra.mxu1 %v1160_v25  ;;  %v1831_v24 = vshrl.u32 %v2472_v16, 16  ;;  %v1835_v25 = vrot.slane %v1833_v20, 1 }
  0x51   : > { %2364 = vmatpush3.bf16.msra.mxu0 %v1210_v26  ;;  %2359 = vmatprep.mubr.msk.bf16.mxu1 %vm2483_vm1, %v2482_v1  ;;  %v2473_v26 = vld [vmem:[%s2537_s23 + $0x40] sm:$0x1f]   ;;  %s2190_s23 = sshll.u32 %s2851_s13, 5 }
  0x52   : > { %2365 = vmatprep.mubr.msk.bf16.mxu0 %vm2483_vm1, %v2482_v1  ;;  %2369 = vmatprep.subr.bf16.mxu1 %v2482_v1  ;;  %v1836_v28 = vor.u32 %v1835_v25, %v1831_v24  ;;  %v1945_v29 = vshll.u32 %v2473_v26, 16  ;;  %s2818_s11 = scalar_lea.vmem %s2849_s3, %s2190_s23 }
  0x53   : > { %2375 = vmatprep.subr.bf16.mxu0 %v2482_v1 }
  0x54   : > { %v1947_v33 = vrot.slane %v1945_v29, 1 }
  0x57   : > { %2360 = vmatmul.mubr.msk.bf16.vlgmr.msra.gmra.mxu1 %vm181_vm2, %v1155_v32  ;;  %v1943_v32 = vshrl.u32 %v2473_v26, 16 }
  0x58   : > { %2366 = vmatmul.mubr.msk.bf16.vlgmr.msra.gmra.mxu0 %vm181_vm2, %v2131_v34  ;;  %2370 = vmatpush3.bf16.msra.mxu1 %v1272_v35 }
  0x59   : > { %2376 = vmatpush3.bf16.msra.mxu0 %v1325_v36  ;;  %2371 = vmatprep.mubr.msk.bf16.mxu1 %vm2483_vm1, %v2482_v1  ;;  %v1948_v34 = vor.u32 %v1947_v33, %v1943_v32 }
  0x5a   : > { %2377 = vmatprep.mubr.msk.bf16.mxu0 %vm2483_vm1, %v2482_v1  ;;  %2381 = vmatprep.subr.bf16.mxu1 %v2482_v1 }
  0x5b   : > { %2387 = vmatprep.subr.bf16.mxu0 %v2482_v1 }
  0x5f   : > { %2372 = vmatmul.mubr.msk.bf16.vlgmr.msra.gmra.mxu1 %vm181_vm2, %v1267_v42 }
  0x60   : > { %2378 = vmatmul.mubr.msk.bf16.vlgmr.msra.gmra.mxu0 %vm181_vm2, %v2140_v44  ;;  %2382 = vmatpush3.bf16.msra.mxu1 %v1387_v45 }
  0x61   : > { %2388 = vmatpush3.bf16.msra.mxu0 %v1437_v46  ;;  %2383 = vmatprep.mubr.msk.bf16.mxu1 %vm2483_vm1, %v2482_v1 }
  0x62   : > { %2389 = vmatprep.mubr.msk.bf16.mxu0 %vm2483_vm1, %v2482_v1  ;;  %2393 = vmatprep.subr.bf16.mxu1 %v2482_v1 }
  0x63   : > { %2399 = vmatprep.subr.bf16.mxu0 %v2482_v1 }
  0x67   : > { %2384 = vmatmul.mubr.msk.bf16.vlgmr.msra.gmra.mxu1 %vm181_vm2, %v1382_v52 }
  0x68   : > { %2390 = vmatmul.mubr.msk.bf16.vlgmr.msra.gmra.mxu0 %vm181_vm2, %v2147_v54  ;;  %2394 = vmatpush3.bf16.msra.mxu1 %v1499_v55 }
  0x69   : > { %2400 = vmatpush3.bf16.msra.mxu0 %v1552_v56  ;;  %2395 = vmatprep.mubr.msk.bf16.mxu1 %vm2483_vm1, %v2482_v1 }
  0x6a   : > { %2401 = vmatprep.mubr.msk.bf16.mxu0 %vm2483_vm1, %v2482_v1  ;;  %2405 = vmatprep.subr.bf16.mxu1 %v2482_v1 }
  0x6b   : > { %2411 = vmatprep.subr.bf16.mxu0 %v2482_v1 }
  0x6f   : > { %2396 = vmatmul.mubr.msk.bf16.vlgmr.msra.gmra.mxu1 %vm181_vm2, %v1494_v62 }
  0x70   : > { %2402 = vmatmul.mubr.msk.bf16.vlgmr.msra.gmra.mxu0 %vm181_vm2, %v2156_v0  ;;  %2406 = vmatpush3.bf16.msra.mxu1 %v1614_v2 }
  0x71   : > { %2412 = vmatpush3.bf16.msra.mxu0 %v1664_v3  ;;  %2407 = vmatprep.mubr.msk.bf16.mxu1 %vm2483_vm1, %v2482_v1 }
  0x72   : > { %2413 = vmatprep.mubr.msk.bf16.mxu0 %vm2483_vm1, %v2482_v1  ;;  %2417 = vmatprep.subr.bf16.mxu1 %v2482_v1 }
  0x73   : > { %2423 = vmatprep.subr.bf16.mxu0 %v2482_v1 }
  0x77   : > { %2408 = vmatmul.mubr.msk.bf16.vlgmr.msra.gmra.mxu1 %vm181_vm2, %v1609_v9 }
  0x78   : > { %2414 = vmatmul.mubr.msk.bf16.vlgmr.msra.gmra.mxu0 %vm181_vm2, %v2163_v11  ;;  %2418 = vmatpush3.bf16.msra.mxu1 %v1726_v12 }
  0x79   : > { %2424 = vmatpush3.bf16.msra.mxu0 %v1779_v13  ;;  %2419 = vmatprep.mubr.msk.bf16.mxu1 %vm2483_vm1, %v2482_v1 }
  0x7a   : > { %2425 = vmatprep.mubr.msk.bf16.mxu0 %vm2483_vm1, %v2482_v1  ;;  %2429 = vmatprep.subr.bf16.mxu1 %v2482_v1 }
  0x7b   : > { %2435 = vmatprep.subr.bf16.mxu0 %v2482_v1 }
  0x7f   : > { %2420 = vmatmul.mubr.msk.bf16.vlgmr.msra.gmra.mxu1 %vm181_vm2, %v1721_v19 }
  0x80   : > { %2426 = vmatmul.mubr.msk.bf16.vlgmr.msra.gmra.mxu0 %vm181_vm2, %v2172_v21  ;;  %2430 = vmatpush3.bf16.msra.mxu1 %v1841_v22 }
  0x81   : > { %2436 = vmatpush3.bf16.msra.mxu0 %v1891_v23  ;;  %2431 = vmatprep.mubr.msk.bf16.mxu1 %vm2483_vm1, %v2482_v1 }
  0x82   : > { %2437 = vmatprep.mubr.msk.bf16.mxu0 %vm2483_vm1, %v2482_v1  ;;  %2441 = vmatprep.subr.bf16.mxu1 %v2482_v1 }
  0x87   : > { %2432 = vmatmul.mubr.msk.bf16.vlgmr.msra.gmra.mxu1 %vm181_vm2, %v1836_v28 }
  0x88   : > { %2438 = vmatmul.mubr.msk.bf16.vlgmr.msra.gmra.mxu0 %vm181_vm2, %v2179_v30  ;;  %2442 = vmatpush3.bf16.msra.mxu1 %v1953_v31 }
  0x89   : > { %2443 = vmatprep.mubr.msk.bf16.mxu1 %vm2483_vm1, %v2482_v1 }
  0x8f   : > { %2444 = vmatmul.mubr.msk.bf16.vlgmr.msra.gmra.mxu1 %vm181_vm2, %v1948_v34 }
  0xd0   : > { %v223_v35 = vpop.f32.mrf.mxu0 }
  0xd1   : > { %v229_v40 = vadd.f32 %v2811_v37, %v223_v35 }
  0xd2   : > { %v2259_v36 = vpop.f32.mrf.mxu0 }
  0xd4   : > { %v226_v38 = vpop.f32.mrf.mxu0 }
  0xd6   : > { %v2260_v39 = vpop.f32.mrf.mxu0 }
  0xd7   : > { %v286_v41 = vpop.f32.mrf.mxu1 }
  0xd8   : > { %v337_v42 = vpop.f32.mrf.mxu0  ;;  %v292_v1 = vadd.f32 %v286_v41, %v229_v40 }
  0xd9   : > { %v2265_v43 = vpop.f32.mrf.mxu1 }
  0xda   : > { %v2271_v44 = vpop.f32.mrf.mxu0  ;;  %v343_v49 = vadd.f32 %v337_v42, %v292_v1 }
  0xdb   : > { %v289_v45 = vpop.f32.mrf.mxu1 }
  0xdc   : > { %v340_v46 = vpop.f32.mrf.mxu0 }
  0xdd   : > { %v2266_v47 = vpop.f32.mrf.mxu1 }
  0xde   : > { %v2272_v48 = vpop.f32.mrf.mxu0 }
  0xdf   : > { %v400_v50 = vpop.f32.mrf.mxu1 }
  0xe0   : > { %v453_v51 = vpop.f32.mrf.mxu0  ;;  %v406_v52 = vadd.f32 %v400_v50, %v343_v49 }
  0xe1   : > { %v2277_v53 = vpop.f32.mrf.mxu1  ;;  %v459_v61 = vadd.f32 %v2811_v37, %v453_v51 }
  0xe2   : > { %v2283_v54 = vpop.f32.mrf.mxu0  ;;  %v407_v55 = vmax.f32 %v406_v52, 0.0 }
  0xe3   : > { %v403_v56 = vpop.f32.mrf.mxu1 }
  0xe4   : > { %v456_v57 = vpop.f32.mrf.mxu0  ;;  %v408_v58 = vpack.c.bf16 %v407_v55, %v407_v55 }
  0xe5   : > { %v2278_v59 = vpop.f32.mrf.mxu1 }
  0xe6   : > { %v2284_v60 = vpop.f32.mrf.mxu0  ;;  %410 = vst.msk [vmem:[%s2818_s11] sm:$0xf] %vm409_vm3, %v408_v58 }
  0xe7   : > { %v515_v62 = vpop.f32.mrf.mxu1 }
  0xe8   : > { %v565_v63 = vpop.f32.mrf.mxu0  ;;  %v521_v3 = vadd.f32 %v515_v62, %v459_v61 }
  0xe9   : > { %v2289_v0 = vpop.f32.mrf.mxu1 }
  0xea   : > { %v2295_v2 = vpop.f32.mrf.mxu0  ;;  %v571_v8 = vadd.f32 %v565_v63, %v521_v3 }
  0xeb   : > { %v518_v4 = vpop.f32.mrf.mxu1 }
  0xec   : > { %v568_v5 = vpop.f32.mrf.mxu0 }
  0xed   : > { %v2290_v6 = vpop.f32.mrf.mxu1 }
  0xee   : > { %v2296_v7 = vpop.f32.mrf.mxu0 }
  0xef   : > { %v627_v9 = vpop.f32.mrf.mxu1 }
  0xf0   : > { %v680_v10 = vpop.f32.mrf.mxu0  ;;  %v633_v11 = vadd.f32 %v627_v9, %v571_v8 }
  0xf1   : > { %v2301_v12 = vpop.f32.mrf.mxu1  ;;  %v686_v20 = vadd.f32 %v2811_v37, %v680_v10 }
  0xf2   : > { %v2307_v13 = vpop.f32.mrf.mxu0  ;;  %v634_v14 = vmax.f32 %v633_v11, 0.0 }
  0xf3   : > { %v630_v15 = vpop.f32.mrf.mxu1 }
  0xf4   : > { %v683_v16 = vpop.f32.mrf.mxu0  ;;  %v635_v17 = vpack.c.bf16 %v634_v14, %v634_v14 }
  0xf5   : > { %v2302_v18 = vpop.f32.mrf.mxu1 }
  0xf6   : > { %v2308_v19 = vpop.f32.mrf.mxu0  ;;  %2091 = vst.msk [vmem:[%s2818_s11 + $0x4] sm:$0xf] %vm409_vm3, %v635_v17 }
  0xf7   : > { %v742_v21 = vpop.f32.mrf.mxu1 }
  0xf8   : > { %v792_v22 = vpop.f32.mrf.mxu0  ;;  %v748_v25 = vadd.f32 %v742_v21, %v686_v20 }
  0xf9   : > { %v2313_v23 = vpop.f32.mrf.mxu1 }
  0xfa   : > { %v2319_v24 = vpop.f32.mrf.mxu0  ;;  %v798_v30 = vadd.f32 %v792_v22, %v748_v25 }
  0xfb   : > { %v745_v26 = vpop.f32.mrf.mxu1 }
  0xfc   : > { %v795_v27 = vpop.f32.mrf.mxu0 }
  0xfd   : > { %v2314_v28 = vpop.f32.mrf.mxu1 }
  0xfe   : > { %v2320_v29 = vpop.f32.mrf.mxu0 }
  0xff   : > { %v854_v31 = vpop.f32.mrf.mxu1 }
 0x100   : > { %v907_v32 = vpop.f32.mrf.mxu0  ;;  %v860_v33 = vadd.f32 %v854_v31, %v798_v30 }
 0x101   : > { %v2325_v34 = vpop.f32.mrf.mxu1  ;;  %v913_v43 = vadd.f32 %v2811_v37, %v907_v32 }
 0x102   : > { %v2331_v35 = vpop.f32.mrf.mxu0  ;;  %v861_v36 = vmax.f32 %v860_v33, 0.0 }
 0x103   : > { %v857_v38 = vpop.f32.mrf.mxu1 }
 0x104   : > { %v910_v39 = vpop.f32.mrf.mxu0  ;;  %v862_v40 = vpack.c.bf16 %v861_v36, %v861_v36 }
 0x105   : > { %v2326_v41 = vpop.f32.mrf.mxu1 }
 0x106   : > { %v2332_v42 = vpop.f32.mrf.mxu0  ;;  %2107 = vst.msk [vmem:[%s2818_s11 + $0x8] sm:$0xf] %vm409_vm3, %v862_v40 }
 0x107   : > { %v969_v44 = vpop.f32.mrf.mxu1 }
 0x108   : > { %v1019_v1 = vpop.f32.mrf.mxu0  ;;  %v975_v47 = vadd.f32 %v969_v44, %v913_v43 }
 0x109   : > { %v2337_v45 = vpop.f32.mrf.mxu1 }
 0x10a   : > { %v2343_v46 = vpop.f32.mrf.mxu0  ;;  %v1025_v52 = vadd.f32 %v1019_v1, %v975_v47 }
 0x10b   : > { %v972_v48 = vpop.f32.mrf.mxu1 }
 0x10c   : > { %v1022_v49 = vpop.f32.mrf.mxu0 }
 0x10d   : > { %v2338_v50 = vpop.f32.mrf.mxu1 }
 0x10e   : > { %v2344_v51 = vpop.f32.mrf.mxu0 }
 0x10f   : > { %v1081_v53 = vpop.f32.mrf.mxu1 }
 0x110   : > { %v1134_v54 = vpop.f32.mrf.mxu0  ;;  %v1087_v55 = vadd.f32 %v1081_v53, %v1025_v52 }
 0x111   : > { %v2349_v56 = vpop.f32.mrf.mxu1  ;;  %v1140_v0 = vadd.f32 %v2811_v37, %v1134_v54 }
 0x112   : > { %v2355_v57 = vpop.f32.mrf.mxu0  ;;  %v1088_v58 = vmax.f32 %v1087_v55, 0.0 }
 0x113   : > { %v1084_v59 = vpop.f32.mrf.mxu1 }
 0x114   : > { %v1137_v60 = vpop.f32.mrf.mxu0  ;;  %v1089_v61 = vpack.c.bf16 %v1088_v58, %v1088_v58 }
 0x115   : > { %v2350_v62 = vpop.f32.mrf.mxu1 }
 0x116   : > { %v2356_v63 = vpop.f32.mrf.mxu0  ;;  %2123 = vst.msk [vmem:[%s2818_s11 + $0xc] sm:$0xf] %vm409_vm3, %v1089_v61 }
 0x117   : > { %v1196_v2 = vpop.f32.mrf.mxu1 }
 0x118   : > { %v1246_v3 = vpop.f32.mrf.mxu0  ;;  %v1202_v6 = vadd.f32 %v1196_v2, %v1140_v0 }
 0x119   : > { %v2361_v4 = vpop.f32.mrf.mxu1 }
 0x11a   : > { %v2367_v5 = vpop.f32.mrf.mxu0  ;;  %v1252_v11 = vadd.f32 %v1246_v3, %v1202_v6 }
 0x11b   : > { %v1199_v7 = vpop.f32.mrf.mxu1 }
 0x11c   : > { %v1249_v8 = vpop.f32.mrf.mxu0 }
 0x11d   : > { %v2362_v9 = vpop.f32.mrf.mxu1 }
 0x11e   : > { %v2368_v10 = vpop.f32.mrf.mxu0 }
 0x11f   : > { %v1308_v12 = vpop.f32.mrf.mxu1 }
 0x120   : > { %v1361_v13 = vpop.f32.mrf.mxu0  ;;  %v1314_v14 = vadd.f32 %v1308_v12, %v1252_v11 }
 0x121   : > { %v2373_v15 = vpop.f32.mrf.mxu1  ;;  %v1367_v23 = vadd.f32 %v2811_v37, %v1361_v13 }
 0x122   : > { %v2379_v16 = vpop.f32.mrf.mxu0  ;;  %v1315_v17 = vmax.f32 %v1314_v14, 0.0 }
 0x123   : > { %v1311_v18 = vpop.f32.mrf.mxu1 }
 0x124   : > { %v1364_v19 = vpop.f32.mrf.mxu0  ;;  %v1316_v20 = vpack.c.bf16 %v1315_v17, %v1315_v17 }
 0x125   : > { %v2374_v21 = vpop.f32.mrf.mxu1 }
 0x126   : > { %v2380_v22 = vpop.f32.mrf.mxu0  ;;  %2139 = vst.msk [vmem:[%s2818_s11 + $0x10] sm:$0xf] %vm409_vm3, %v1316_v20 }
 0x127   : > { %v1423_v24 = vpop.f32.mrf.mxu1 }
 0x128   : > { %v1473_v25 = vpop.f32.mrf.mxu0  ;;  %v1429_v28 = vadd.f32 %v1423_v24, %v1367_v23 }
 0x129   : > { %v2385_v26 = vpop.f32.mrf.mxu1 }
 0x12a   : > { %v2391_v27 = vpop.f32.mrf.mxu0  ;;  %v1479_v33 = vadd.f32 %v1473_v25, %v1429_v28 }
 0x12b   : > { %v1426_v29 = vpop.f32.mrf.mxu1 }
 0x12c   : > { %v1476_v30 = vpop.f32.mrf.mxu0 }
 0x12d   : > { %v2386_v31 = vpop.f32.mrf.mxu1 }
 0x12e   : > { %v2392_v32 = vpop.f32.mrf.mxu0 }
 0x12f   : > { %v1535_v34 = vpop.f32.mrf.mxu1 }
 0x130   : > { %v1588_v35 = vpop.f32.mrf.mxu0  ;;  %v1541_v36 = vadd.f32 %v1535_v34, %v1479_v33 }
 0x131   : > { %v2397_v38 = vpop.f32.mrf.mxu1  ;;  %v1594_v45 = vadd.f32 %v2811_v37, %v1588_v35 }
 0x132   : > { %v2403_v39 = vpop.f32.mrf.mxu0  ;;  %v1542_v40 = vmax.f32 %v1541_v36, 0.0 }
 0x133   : > { %v1538_v41 = vpop.f32.mrf.mxu1 }
 0x134   : > { %v1591_v42 = vpop.f32.mrf.mxu0  ;;  %v1543_v43 = vpack.c.bf16 %v1542_v40, %v1542_v40 }
 0x135   : > { %v2398_v44 = vpop.f32.mrf.mxu1 }
 0x136   : > { %v2404_v1 = vpop.f32.mrf.mxu0  ;;  %2155 = vst.msk [vmem:[%s2818_s11 + $0x14] sm:$0xf] %vm409_vm3, %v1543_v43 }
 0x137   : > { %v1650_v46 = vpop.f32.mrf.mxu1 }
 0x138   : > { %v1700_v47 = vpop.f32.mrf.mxu0  ;;  %v1656_v50 = vadd.f32 %v1650_v46, %v1594_v45 }
 0x139   : > { %v2409_v48 = vpop.f32.mrf.mxu1 }
 0x13a   : > { %v2415_v49 = vpop.f32.mrf.mxu0  ;;  %v1706_v55 = vadd.f32 %v1700_v47, %v1656_v50 }
 0x13b   : > { %v1653_v51 = vpop.f32.mrf.mxu1 }
 0x13c   : > { %v1703_v52 = vpop.f32.mrf.mxu0 }
 0x13d   : > { %v2410_v53 = vpop.f32.mrf.mxu1 }
 0x13e   : > { %v2416_v54 = vpop.f32.mrf.mxu0 }
 0x13f   : > { %v1762_v56 = vpop.f32.mrf.mxu1 }
 0x140   : > { %v1815_v57 = vpop.f32.mrf.mxu0  ;;  %v1768_v58 = vadd.f32 %v1762_v56, %v1706_v55 }
 0x141   : > { %v2421_v59 = vpop.f32.mrf.mxu1  ;;  %v1821_v4 = vadd.f32 %v2811_v37, %v1815_v57 }
 0x142   : > { %v2427_v60 = vpop.f32.mrf.mxu0  ;;  %v1769_v61 = vmax.f32 %v1768_v58, 0.0 }
 0x143   : > { %v1765_v62 = vpop.f32.mrf.mxu1 }
 0x144   : > { %v1818_v63 = vpop.f32.mrf.mxu0  ;;  %v1770_v0 = vpack.c.bf16 %v1769_v61, %v1769_v61 }
 0x145   : > { %v2422_v2 = vpop.f32.mrf.mxu1 }
 0x146   : > { %v2428_v3 = vpop.f32.mrf.mxu0  ;;  %2171 = vst.msk [vmem:[%s2818_s11 + $0x18] sm:$0xf] %vm409_vm3, %v1770_v0 }
 0x147   : > { %v1877_v5 = vpop.f32.mrf.mxu1 }
 0x148   : > { %v1927_v6 = vpop.f32.mrf.mxu0  ;;  %v1883_v9 = vadd.f32 %v1877_v5, %v1821_v4 }
 0x149   : > { %v2433_v7 = vpop.f32.mrf.mxu1 }
 0x14a   : > { %v2439_v8 = vpop.f32.mrf.mxu0  ;;  %v1933_v14 = vadd.f32 %v1927_v6, %v1883_v9 }
 0x14b   : > { %v1880_v10 = vpop.f32.mrf.mxu1 }
 0x14c   : > { %v1930_v11 = vpop.f32.mrf.mxu0 }
 0x14d   : > { %v2434_v12 = vpop.f32.mrf.mxu1 }
 0x14e   : > { %v2440_v13 = vpop.f32.mrf.mxu0 }
 0x14f   : > { %v1989_v15 = vpop.f32.mrf.mxu1 }
 0x150   : > { %v1995_v16 = vadd.f32 %v1989_v15, %v1933_v14 }
 0x151   : > { %v2445_v17 = vpop.f32.mrf.mxu1 }
 0x152   : > { %v1996_v18 = vmax.f32 %v1995_v16, 0.0 }
 0x153   : > { %v1992_v19 = vpop.f32.mrf.mxu1 }
 0x154   : > { %v1997_v20 = vpack.c.bf16 %v1996_v18, %v1996_v18 }
 0x155   : > { %v2446_v21 = vpop.f32.mrf.mxu1 }
 0x156   : > { %2187 = vst.msk [vmem:[%s2818_s11 + $0x1c] sm:$0xf] %vm409_vm3, %v1997_v20 }
 0x157 PF: > { %s13_s12 = sadd.s32 1, %s2480_s12  }
 0x158   : > { %p10_p4 = scmp.ge.s32.totalorder %s13_s12, 4  }
 0x15a   :  { %12 = sbr.rel (!%p10_p4) target bundleno = 1 (0x1), region = 80 }

// kernel: depth_ans_forward.11
= control target key start
LH: loop header
LB: loop body
LE: loop exit
PB: predicated region body
PF: predicated region fallthrough
CT: control target
= control target key end

     0   :  { %s2974_s14 = smov 0   ;;  %s3301_s0 = inlined_call_operand.vmem [shape: bf16[2,6,6,16], index: 0, kind: input, shape index: {}]   ;;  %s3302_s1 = inlined_call_operand.vmem [shape: bf16[9,16,1], index: 1, kind: input, shape index: {}]   ;;  %s3303_s2 = inlined_call_operand.<no memory space> [shape: f32[1,1], index: 2, kind: input, shape index: {}]   ;;  %s3304_s3 = inlined_call_operand.vmem [shape: f32[2,4,4,1], index: 3, kind: output, shape index: {}]  }
   0x1   :  { %v8_v0 = vstv %s3303_s2 }
   0x2   :  { %9 = vst [vmem:[#allocation2] sm:$0x1] %v8_v0 }
   0x3 LB: > { %s2358_s15 = sadd.s32 4294967295, %s2947_s14   ;;  %p2362_p0 = scmp.ge.s32.totalorder %s2947_s14, 1  ;;  %s2947_s14 = sphi %s2974_s14, %s15_s14  }
   0x4   : > { %p139_p1 = scmp.lt.s32.totalorder %s2947_s14, 3 }
   0x6   : > { %p140_p2 = pnand %p2362_p0, %p139_p1 }
   0x7   : > { %p163_p3 = scmp.lt.s32.totalorder (!%p140_p2), %s2358_s15, 1 }
   0x8   : > { %143 = sbr.rel (%p140_p2) target bundleno = 391 (0x187), region = 32 }
   0xd   : > { %v2865_v1 = vld [vmem:[%s3302_s1] sm:$0xff]   ;;  %v2949_v2 = vmov 0.0   ;;  %v2866_v3 = vld [vmem:[%s3302_s1 + $0x8] sm:$0xff]   ;;  %vm2950_vm0 = vmmov 0   ;;  %s3306_s15 = smov (!%p163_p3, %s2358_s15), 1  ;;  %vm190_vm1 = vcmask 130048  }
   0xe   : > { %2638 = vmatprep.subr.bf16.mxu0 %v2949_v2  ;;  %2644 = vmatprep.subr.bf16.mxu1 %v2949_v2  ;;  %s2854_s19 = smul.u32 24, %s3306_s15  ;;  %v2867_v4 = vld [vmem:[%s3302_s1 + $0x10] sm:$0xff]   ;;  %v2870_v13 = vld [vmem:[%s3302_s1 + $0x18] sm:$0xff]   ;;  %v2871_v15 = vld [vmem:[%s3302_s1 + $0x20] sm:$0xff]   ;;  %vm717_vm2 = vcmask 3072  }
   0xf   : > { %2639 = vmatpush3.bf16.msra.mxu0 %v2865_v1  ;;  %2640 = vmatprep.mubr.msk.bf16.mxu0 %vm2950_vm0, %v2949_v2  ;;  %v2873_v20 = vld [vmem:[%s3302_s1 + $0x28] sm:$0xff]   ;;  %v2874_v22 = vld [vmem:[%s3302_s1 + $0x30] sm:$0xff]   ;;  %v2876_v28 = vld [vmem:[%s3302_s1 + $0x38] sm:$0xff]  }
  0x10   : > { %2645 = vmatpush3.bf16.msra.mxu1 %v2866_v3  ;;  %2650 = vmatprep.subr.bf16.mxu0 %v2949_v2  ;;  %s3005_s24 = scalar_lea.vmem %s3301_s0, %s2854_s19  ;;  %v2877_v29 = vld [vmem:[%s3302_s1 + $0x40] sm:$0xff]   ;;  %v2881_v38 = vld [vmem:[%s3302_s1 + $0x8] sm:$0xff]   ;;  %v2883_v43 = vld [vmem:[%s3302_s1 + $0x10] sm:$0xff]  }
  0x11   : > { %2646 = vmatprep.mubr.msk.bf16.mxu1 %vm2950_vm0, %v2949_v2  ;;  %2656 = vmatprep.subr.bf16.mxu1 %v2949_v2  ;;  %v181_v5 = vld [vmem:[%s3005_s24] sm:$0x3]  ;;  %v2872_v10 = vld [vmem:[%s3005_s24 + $0x4] ss:$0 sps:$4 sm:$0x77]   ;;  %v2884_v44 = vld [vmem:[%s3302_s1 + $0x18] sm:$0xff]  }
  0x12   : > { %2641 = vmatmul.mubr.msk.bf16.vlgmr.msra.gmra.mxu0 %vm190_vm1, %v181_v5  ;;  %v2868_v6 = vld [vmem:[%s3005_s24] ss:$0 sps:$4 sm:$0x77]   ;;  %v422_v14 = vshll.u32 %v2872_v10, 16  ;;  %v420_v17 = vshrl.u32 %v2872_v10, 16  ;;  %v2887_v51 = vld [vmem:[%s3302_s1 + $0x28] sm:$0xff]  }
  0x13   : > { %v2869_v7 = vld [vmem:[%s3005_s24] ss:$0 sps:$4 sm:$0x66]   ;;  %2651 = vmatpush3.bf16.msra.mxu0 %v2867_v4  ;;  %2652 = vmatprep.mubr.msk.bf16.mxu0 %vm2950_vm0, %v2949_v2  ;;  %v243_v8 = vshrl.u32 %v2868_v6, 16  ;;  %v245_v9 = vshll.u32 %v2868_v6, 16  ;;  %v2890_v58 = vld [vmem:[%s3302_s1 + $0x30] sm:$0xff]  }
  0x14   : > { %2662 = vmatprep.subr.bf16.mxu0 %v2949_v2  ;;  %v306_v12 = vrot.slane %v2869_v7, 1  ;;  %v424_v18 = vrot.slane %v422_v14, 1  ;;  %v2379_v21 = vld [vmem:[%s3005_s24 + $0x4] sm:$0x3]  ;;  %v2396_v25 = vld [vmem:[%s3005_s24 + $0x8] sm:$0x3] }
  0x15   : > { %v247_v11 = vrot.slane %v245_v9, 1  ;;  %v2875_v23 = vld [vmem:[%s3005_s24 + $0x4] ss:$0 sps:$4 sm:$0x66]   ;;  %v2428_v50 = vld [vmem:[%s3005_s24 + $0x8] sm:$0x3] }
  0x16   : > { %v425_v19 = vor.u32 %v424_v18, %v420_v17  ;;  %v2878_v24 = vld [vmem:[%s3005_s24 + $0x8] ss:$0 sps:$4 sm:$0x77]   ;;  %v483_v26 = vrot.slane %v2875_v23, 1  ;;  %v2880_v37 = vld [vmem:[%s3302_s1] sm:$0xff]   ;;  %v2891_v59 = vld [vmem:[%s3302_s1 + $0x38] sm:$0xff]  }
  0x17   : > { %v248_v16 = vor.u32 %v247_v11, %v243_v8  ;;  %v599_v27 = vshll.u32 %v2878_v24, 16  ;;  %v2879_v30 = vld [vmem:[%s3005_s24 + $0x8] ss:$0 sps:$4 sm:$0x66]   ;;  %v597_v32 = vshrl.u32 %v2878_v24, 16  ;;  %v2886_v48 = vld [vmem:[%s3302_s1 + $0x20] sm:$0xff]  }
  0x18   : > { %v2882_v31 = vld [vmem:[%s3005_s24 + $0x4] ss:$0 sps:$4 sm:$0x77]   ;;  %v660_v36 = vrot.slane %v2879_v30, 1  ;;  %v2445_v0 = vld [vmem:[%s3005_s24 + $0xc] sm:$0x3] }
  0x19   : > { %2647 = vmatmul.mubr.msk.bf16.vlgmr.msra.gmra.mxu1 %vm190_vm1, %v248_v16  ;;  %v601_v33 = vrot.slane %v599_v27, 1  ;;  %v781_v34 = vshll.u32 %v2882_v31, 16  ;;  %v779_v39 = vshrl.u32 %v2882_v31, 16  ;;  %v2413_v41 = vld [vmem:[%s3005_s24 + $0x4] sm:$0x3]  ;;  %v2896_v9 = vld [vmem:[%s3302_s1 + $0x8] sm:$0xff]  }
  0x1a   : > { %2653 = vmatmul.mubr.msk.bf16.vlgmr.msra.gmra.mxu0 %vm190_vm1, %v306_v12  ;;  %2657 = vmatpush3.bf16.msra.mxu1 %v2870_v13  ;;  %v2885_v45 = vld [vmem:[%s3005_s24 + $0x4] ss:$0 sps:$4 sm:$0x66]   ;;  %v2888_v46 = vld [vmem:[%s3005_s24 + $0x8] ss:$0 sps:$4 sm:$0x77]  }
  0x1b   : > { %2663 = vmatpush3.bf16.msra.mxu0 %v2871_v15  ;;  %2658 = vmatprep.mubr.msk.bf16.mxu1 %vm2950_vm0, %v2949_v2  ;;  %v602_v35 = vor.u32 %v601_v33, %v597_v32  ;;  %v783_v40 = vrot.slane %v781_v34, 1  ;;  %v841_v47 = vrot.slane %v2885_v45, 1  ;;  %v954_v49 = vshll.u32 %v2888_v46, 16  ;;  %v2889_v52 = vld [vmem:[%s3005_s24 + $0x8] ss:$0 sps:$4 sm:$0x66]  }
  0x1c   : > { %2664 = vmatprep.mubr.msk.bf16.mxu0 %vm2950_vm0, %v2949_v2  ;;  %2668 = vmatprep.subr.bf16.mxu1 %v2949_v2  ;;  %v952_v53 = vshrl.u32 %v2888_v46, 16  ;;  %v2892_v55 = vld [vmem:[%s3005_s24 + $0xc] ss:$0 sps:$4 sm:$0x77]   ;;  %v1014_v57 = vrot.slane %v2889_v52, 1  ;;  %v2893_v1 = vld [vmem:[%s3302_s1 + $0x40] sm:$0xff]  }
  0x1d   : > { %2674 = vmatprep.subr.bf16.mxu0 %v2949_v2  ;;  %v784_v42 = vor.u32 %v783_v40, %v779_v39  ;;  %v956_v54 = vrot.slane %v954_v49, 1  ;;  %v1128_v60 = vshll.u32 %v2892_v55, 16  ;;  %v1126_v61 = vshrl.u32 %v2892_v55, 16  ;;  %v2894_v3 = vld [vmem:[%s3302_s1] sm:$0xff]   ;;  %v2463_v8 = vld [vmem:[%s3005_s24 + $0x8] sm:$0x3] }
  0x1e   : > { %v2895_v4 = vld [vmem:[%s3005_s24 + $0xc] ss:$0 sps:$4 sm:$0x66]   ;;  %v2898_v5 = vld [vmem:[%s3005_s24 + $0x8] ss:$0 sps:$4 sm:$0x77]  }
  0x1f   : > { %v957_v56 = vor.u32 %v956_v54, %v952_v53  ;;  %v1130_v62 = vrot.slane %v1128_v60, 1  ;;  %v1188_v6 = vrot.slane %v2895_v4, 1  ;;  %v1309_v7 = vshll.u32 %v2898_v5, 16  ;;  %v2897_v10 = vld [vmem:[%s3302_s1 + $0x10] sm:$0xff]   ;;  %v2900_v18 = vld [vmem:[%s3302_s1 + $0x18] sm:$0xff]   ;;  %v2903_v24 = vld [vmem:[%s3302_s1 + $0x28] sm:$0xff]  }
  0x20   : > { %v2899_v11 = vld [vmem:[%s3005_s24 + $0x8] ss:$0 sps:$4 sm:$0x66]   ;;  %v1307_v12 = vshrl.u32 %v2898_v5, 16  ;;  %v2478_v23 = vld [vmem:[%s3005_s24 + $0xc] sm:$0x3] }
  0x21   : > { %2659 = vmatmul.mubr.msk.bf16.vlgmr.msra.gmra.mxu1 %vm190_vm1, %v2379_v21  ;;  %v1131_v63 = vor.u32 %v1130_v62, %v1126_v61  ;;  %v1311_v13 = vrot.slane %v1309_v7, 1  ;;  %v2902_v14 = vld [vmem:[%s3005_s24 + $0xc] ss:$0 sps:$4 sm:$0x77]   ;;  %v1369_v16 = vrot.slane %v2899_v11, 1  ;;  %v2906_v31 = vld [vmem:[%s3302_s1 + $0x38] sm:$0xff]  }
  0x22   : > { %2665 = vmatmul.mubr.msk.bf16.vlgmr.msra.gmra.mxu0 %vm190_vm1, %v425_v19  ;;  %2669 = vmatpush3.bf16.msra.mxu1 %v2873_v20  ;;  %v1482_v17 = vshll.u32 %v2902_v14, 16  ;;  %v2901_v19 = vld [vmem:[%s3302_s1 + $0x20] sm:$0xff]   ;;  %v1480_v20 = vshrl.u32 %v2902_v14, 16  ;;  %v2908_v27 = vld [vmem:[%s3005_s24 + $0x10] ss:$0 sps:$4 sm:$0x77]  }
  0x23   : > { %2675 = vmatpush3.bf16.msra.mxu0 %v2874_v22  ;;  %2670 = vmatprep.mubr.msk.bf16.mxu1 %vm2950_vm0, %v2949_v2  ;;  %v1312_v15 = vor.u32 %v1311_v13, %v1307_v12  ;;  %v2495_v30 = vld [vmem:[%s3005_s24 + $0x10] sm:$0x3]  ;;  %v2907_v32 = vld [vmem:[%s3302_s1 + $0x40] sm:$0xff]   ;;  %v1654_v34 = vshrl.u32 %v2908_v27, 16  ;;  %v2513_v45 = vld [vmem:[%s3005_s24 + $0xc] sm:$0x3] }
  0x24   : > { %2676 = vmatprep.mubr.msk.bf16.mxu0 %vm2950_vm0, %v2949_v2  ;;  %2680 = vmatprep.subr.bf16.mxu1 %v2949_v2  ;;  %v1484_v21 = vrot.slane %v1482_v17, 1  ;;  %v2909_v33 = vld [vmem:[%s3005_s24 + $0x10] ss:$0 sps:$4 sm:$0x66]   ;;  %v2910_v40 = vld [vmem:[%s3302_s1] sm:$0xff]   ;;  %v2917_v54 = vld [vmem:[%s3302_s1 + $0x28] sm:$0xff]  }
  0x25   : > { %2686 = vmatprep.subr.bf16.mxu0 %v2949_v2  ;;  %v2913_v46 = vld [vmem:[%s3302_s1 + $0x10] sm:$0xff]   ;;  %v2916_v53 = vld [vmem:[%s3302_s1 + $0x20] sm:$0xff]  }
  0x26   : > { %v1485_v22 = vor.u32 %v1484_v21, %v1480_v20  ;;  %v2918_v49 = vld [vmem:[%s3005_s24 + $0x10] ss:$0 sps:$4 sm:$0x77]   ;;  %v2545_v4 = vld [vmem:[%s3005_s24 + $0x14] sm:$0x3]  ;;  %v2923_v5 = vld [vmem:[%s3302_s1 + $0x40] sm:$0xff]  }
  0x27   : > { %v2528_v52 = vld [vmem:[%s3005_s24 + $0x10] sm:$0x3]  ;;  %v3278_v12 = vld [vmem:[#allocation2] ss:$0 sm:$0xff] }
  0x28   : > { %v2919_v55 = vld [vmem:[%s3005_s24 + $0x10] ss:$0 sps:$4 sm:$0x66]  }
  0x29   : > { %2671 = vmatmul.mubr.msk.bf16.vlgmr.msra.gmra.mxu1 %vm190_vm1, %v483_v26  ;;  %v2905_v26 = vld [vmem:[%s3005_s24 + $0xc] ss:$0 sps:$4 sm:$0x66]   ;;  %v2070_v60 = vrot.slane %v2919_v55, 1  ;;  %v2920_v62 = vld [vmem:[%s3302_s1 + $0x30] sm:$0xff]  }
  0x2a   : > { %2677 = vmatmul.mubr.msk.bf16.vlgmr.msra.gmra.mxu0 %vm190_vm1, %v2396_v25  ;;  %2681 = vmatpush3.bf16.msra.mxu1 %v2876_v28  ;;  %v2904_v25 = vld [vmem:[%s3302_s1 + $0x30] sm:$0xff]   ;;  %v1542_v28 = vrot.slane %v2905_v26, 1 }
  0x2b   : > { %2687 = vmatpush3.bf16.msra.mxu0 %v2877_v29  ;;  %2682 = vmatprep.mubr.msk.bf16.mxu1 %vm2950_vm0, %v2949_v2  ;;  %v1656_v29 = vshll.u32 %v2908_v27, 16 }
  0x2c   : > { %2688 = vmatprep.mubr.msk.bf16.mxu0 %vm2950_vm0, %v2949_v2  ;;  %2692 = vmatprep.subr.bf16.mxu1 %v2949_v2 }
  0x2d   : > { %2698 = vmatprep.subr.bf16.mxu0 %v2949_v2 }
  0x31   : > { %2683 = vmatmul.mubr.msk.bf16.vlgmr.msra.gmra.mxu1 %vm190_vm1, %v602_v35  ;;  %v1658_v35 = vrot.slane %v1656_v29, 1 }
  0x32   : > { %2689 = vmatmul.mubr.msk.bf16.vlgmr.msra.gmra.mxu0 %vm190_vm1, %v660_v36  ;;  %2693 = vmatpush3.bf16.msra.mxu1 %v2880_v37  ;;  %v2912_v36 = vld [vmem:[%s3005_s24 + $0xc] ss:$0 sps:$4 sm:$0x77]  }
  0x33   : > { %2699 = vmatpush3.bf16.msra.mxu0 %v2881_v38  ;;  %2694 = vmatprep.mubr.msk.bf16.mxu1 %vm2950_vm0, %v2949_v2  ;;  %v1659_v37 = vor.u32 %v1658_v35, %v1654_v34  ;;  %v1716_v38 = vrot.slane %v2909_v33, 1  ;;  %v1837_v39 = vshll.u32 %v2912_v36, 16 }
  0x34   : > { %2700 = vmatprep.mubr.msk.bf16.mxu0 %vm2950_vm0, %v2949_v2  ;;  %2704 = vmatprep.subr.bf16.mxu1 %v2949_v2 }
  0x35   : > { %2710 = vmatprep.subr.bf16.mxu0 %v2949_v2 }
  0x39   : > { %2695 = vmatmul.mubr.msk.bf16.vlgmr.msra.gmra.mxu1 %vm190_vm1, %v2413_v41  ;;  %v2911_v41 = vld [vmem:[%s3302_s1 + $0x8] sm:$0xff]  }
  0x3a   : > { %2701 = vmatmul.mubr.msk.bf16.vlgmr.msra.gmra.mxu0 %vm190_vm1, %v784_v42  ;;  %2705 = vmatpush3.bf16.msra.mxu1 %v2883_v43  ;;  %v1835_v42 = vshrl.u32 %v2912_v36, 16  ;;  %v1839_v43 = vrot.slane %v1837_v39, 1 }
  0x3b   : > { %2711 = vmatpush3.bf16.msra.mxu0 %v2884_v44  ;;  %2706 = vmatprep.mubr.msk.bf16.mxu1 %vm2950_vm0, %v2949_v2 }
  0x3c   : > { %2712 = vmatprep.mubr.msk.bf16.mxu0 %vm2950_vm0, %v2949_v2  ;;  %2716 = vmatprep.subr.bf16.mxu1 %v2949_v2  ;;  %v1840_v44 = vor.u32 %v1839_v43, %v1835_v42 }
  0x3d   : > { %2722 = vmatprep.subr.bf16.mxu0 %v2949_v2 }
  0x41   : > { %2707 = vmatmul.mubr.msk.bf16.vlgmr.msra.gmra.mxu1 %vm190_vm1, %v841_v47  ;;  %v2914_v47 = vld [vmem:[%s3302_s1 + $0x18] sm:$0xff]  }
  0x42   : > { %2713 = vmatmul.mubr.msk.bf16.vlgmr.msra.gmra.mxu0 %vm190_vm1, %v2428_v50  ;;  %2717 = vmatpush3.bf16.msra.mxu1 %v2886_v48  ;;  %v2915_v48 = vld [vmem:[%s3005_s24 + $0xc] ss:$0 sps:$4 sm:$0x66]  }
  0x43   : > { %2723 = vmatpush3.bf16.msra.mxu0 %v2887_v51  ;;  %2718 = vmatprep.mubr.msk.bf16.mxu1 %vm2950_vm0, %v2949_v2  ;;  %v1897_v50 = vrot.slane %v2915_v48, 1  ;;  %v2010_v51 = vshll.u32 %v2918_v49, 16 }
  0x44   : > { %2724 = vmatprep.mubr.msk.bf16.mxu0 %vm2950_vm0, %v2949_v2  ;;  %2728 = vmatprep.subr.bf16.mxu1 %v2949_v2 }
  0x45   : > { %2734 = vmatprep.subr.bf16.mxu0 %v2949_v2 }
  0x49   : > { %2719 = vmatmul.mubr.msk.bf16.vlgmr.msra.gmra.mxu1 %vm190_vm1, %v957_v56  ;;  %v2008_v56 = vshrl.u32 %v2918_v49, 16 }
  0x4a   : > { %2725 = vmatmul.mubr.msk.bf16.vlgmr.msra.gmra.mxu0 %vm190_vm1, %v1014_v57  ;;  %2729 = vmatpush3.bf16.msra.mxu1 %v2890_v58  ;;  %v2012_v57 = vrot.slane %v2010_v51, 1  ;;  %v2922_v58 = vld [vmem:[%s3005_s24 + $0x14] ss:$0 sps:$4 sm:$0x77]  }
  0x4b   : > { %2735 = vmatpush3.bf16.msra.mxu0 %v2891_v59  ;;  %2730 = vmatprep.mubr.msk.bf16.mxu1 %vm2950_vm0, %v2949_v2  ;;  %v2184_v61 = vshll.u32 %v2922_v58, 16 }
  0x4c   : > { %2736 = vmatprep.mubr.msk.bf16.mxu0 %vm2950_vm0, %v2949_v2  ;;  %2740 = vmatprep.subr.bf16.mxu1 %v2949_v2  ;;  %v2013_v59 = vor.u32 %v2012_v57, %v2008_v56 }
  0x4d   : > { %2746 = vmatprep.subr.bf16.mxu0 %v2949_v2 }
  0x51   : > { %2731 = vmatmul.mubr.msk.bf16.vlgmr.msra.gmra.mxu1 %vm190_vm1, %v2445_v0  ;;  %v2182_v0 = vshrl.u32 %v2922_v58, 16 }
  0x52   : > { %2737 = vmatmul.mubr.msk.bf16.vlgmr.msra.gmra.mxu0 %vm190_vm1, %v1131_v63  ;;  %2741 = vmatpush3.bf16.msra.mxu1 %v2893_v1  ;;  %v2921_v63 = vld [vmem:[%s3302_s1 + $0x38] sm:$0xff]   ;;  %v2186_v1 = vrot.slane %v2184_v61, 1 }
  0x53   : > { %2747 = vmatpush3.bf16.msra.mxu0 %v2894_v3  ;;  %2742 = vmatprep.mubr.msk.bf16.mxu1 %vm2950_vm0, %v2949_v2 }
  0x54   : > { %2748 = vmatprep.mubr.msk.bf16.mxu0 %vm2950_vm0, %v2949_v2  ;;  %2752 = vmatprep.subr.bf16.mxu1 %v2949_v2  ;;  %v2187_v3 = vor.u32 %v2186_v1, %v2182_v0 }
  0x55   : > { %2758 = vmatprep.subr.bf16.mxu0 %v2949_v2 }
  0x59   : > { %2743 = vmatmul.mubr.msk.bf16.vlgmr.msra.gmra.mxu1 %vm190_vm1, %v1188_v6  ;;  %v2924_v6 = vld [vmem:[%s3005_s24 + $0x14] ss:$0 sps:$4 sm:$0x66]   ;;  %s2565_s24 = sshll.u32 %s3306_s15, 4 }
  0x5a   : > { %2749 = vmatmul.mubr.msk.bf16.vlgmr.msra.gmra.mxu0 %vm190_vm1, %v2463_v8  ;;  %2753 = vmatpush3.bf16.msra.mxu1 %v2896_v9  ;;  %v2244_v7 = vrot.slane %v2924_v6, 1  ;;  %s3286_s2 = scalar_lea.vmem %s3304_s3, %s2565_s24 }
  0x5b   : > { %2759 = vmatpush3.bf16.msra.mxu0 %v2897_v10  ;;  %2754 = vmatprep.mubr.msk.bf16.mxu1 %vm2950_vm0, %v2949_v2 }
  0x5c   : > { %2760 = vmatprep.mubr.msk.bf16.mxu0 %vm2950_vm0, %v2949_v2  ;;  %2764 = vmatprep.subr.bf16.mxu1 %v2949_v2 }
  0x5d   : > { %2770 = vmatprep.subr.bf16.mxu0 %v2949_v2 }
  0x61   : > { %2755 = vmatmul.mubr.msk.bf16.vlgmr.msra.gmra.mxu1 %vm190_vm1, %v1312_v15 }
  0x62   : > { %2761 = vmatmul.mubr.msk.bf16.vlgmr.msra.gmra.mxu0 %vm190_vm1, %v1369_v16  ;;  %2765 = vmatpush3.bf16.msra.mxu1 %v2900_v18 }
  0x63   : > { %2771 = vmatpush3.bf16.msra.mxu0 %v2901_v19  ;;  %2766 = vmatprep.mubr.msk.bf16.mxu1 %vm2950_vm0, %v2949_v2 }
  0x64   : > { %2772 = vmatprep.mubr.msk.bf16.mxu0 %vm2950_vm0, %v2949_v2  ;;  %2776 = vmatprep.subr.bf16.mxu1 %v2949_v2 }
  0x65   : > { %2782 = vmatprep.subr.bf16.mxu0 %v2949_v2 }
  0x69   : > { %2767 = vmatmul.mubr.msk.bf16.vlgmr.msra.gmra.mxu1 %vm190_vm1, %v2478_v23 }
  0x6a   : > { %2773 = vmatmul.mubr.msk.bf16.vlgmr.msra.gmra.mxu0 %vm190_vm1, %v1485_v22  ;;  %2777 = vmatpush3.bf16.msra.mxu1 %v2903_v24 }
  0x6b   : > { %2783 = vmatpush3.bf16.msra.mxu0 %v2904_v25  ;;  %2778 = vmatprep.mubr.msk.bf16.mxu1 %vm2950_vm0, %v2949_v2 }
  0x6c   : > { %2784 = vmatprep.mubr.msk.bf16.mxu0 %vm2950_vm0, %v2949_v2  ;;  %2788 = vmatprep.subr.bf16.mxu1 %v2949_v2 }
  0x6d   : > { %2794 = vmatprep.subr.bf16.mxu0 %v2949_v2 }
  0x71   : > { %2779 = vmatmul.mubr.msk.bf16.vlgmr.msra.gmra.mxu1 %vm190_vm1, %v1542_v28 }
  0x72   : > { %2785 = vmatmul.mubr.msk.bf16.vlgmr.msra.gmra.mxu0 %vm190_vm1, %v2495_v30  ;;  %2789 = vmatpush3.bf16.msra.mxu1 %v2906_v31 }
  0x73   : > { %2795 = vmatpush3.bf16.msra.mxu0 %v2907_v32  ;;  %2790 = vmatprep.mubr.msk.bf16.mxu1 %vm2950_vm0, %v2949_v2 }
  0x74   : > { %2796 = vmatprep.mubr.msk.bf16.mxu0 %vm2950_vm0, %v2949_v2  ;;  %2800 = vmatprep.subr.bf16.mxu1 %v2949_v2 }
  0x75   : > { %2806 = vmatprep.subr.bf16.mxu0 %v2949_v2 }
  0x79   : > { %2791 = vmatmul.mubr.msk.bf16.vlgmr.msra.gmra.mxu1 %vm190_vm1, %v1659_v37 }
  0x7a   : > { %2797 = vmatmul.mubr.msk.bf16.vlgmr.msra.gmra.mxu0 %vm190_vm1, %v1716_v38  ;;  %2801 = vmatpush3.bf16.msra.mxu1 %v2910_v40 }
  0x7b   : > { %2807 = vmatpush3.bf16.msra.mxu0 %v2911_v41  ;;  %2802 = vmatprep.mubr.msk.bf16.mxu1 %vm2950_vm0, %v2949_v2 }
  0x7c   : > { %2808 = vmatprep.mubr.msk.bf16.mxu0 %vm2950_vm0, %v2949_v2  ;;  %2812 = vmatprep.subr.bf16.mxu1 %v2949_v2 }
  0x7d   : > { %2818 = vmatprep.subr.bf16.mxu0 %v2949_v2 }
  0x81   : > { %2803 = vmatmul.mubr.msk.bf16.vlgmr.msra.gmra.mxu1 %vm190_vm1, %v2513_v45 }
  0x82   : > { %2809 = vmatmul.mubr.msk.bf16.vlgmr.msra.gmra.mxu0 %vm190_vm1, %v1840_v44  ;;  %2813 = vmatpush3.bf16.msra.mxu1 %v2913_v46 }
  0x83   : > { %2819 = vmatpush3.bf16.msra.mxu0 %v2914_v47  ;;  %2814 = vmatprep.mubr.msk.bf16.mxu1 %vm2950_vm0, %v2949_v2 }
  0x84   : > { %2820 = vmatprep.mubr.msk.bf16.mxu0 %vm2950_vm0, %v2949_v2  ;;  %2824 = vmatprep.subr.bf16.mxu1 %v2949_v2 }
  0x85   : > { %2830 = vmatprep.subr.bf16.mxu0 %v2949_v2 }
  0x89   : > { %2815 = vmatmul.mubr.msk.bf16.vlgmr.msra.gmra.mxu1 %vm190_vm1, %v1897_v50 }
  0x8a   : > { %2821 = vmatmul.mubr.msk.bf16.vlgmr.msra.gmra.mxu0 %vm190_vm1, %v2528_v52  ;;  %2825 = vmatpush3.bf16.msra.mxu1 %v2916_v53 }
  0x8b   : > { %2831 = vmatpush3.bf16.msra.mxu0 %v2917_v54  ;;  %2826 = vmatprep.mubr.msk.bf16.mxu1 %vm2950_vm0, %v2949_v2 }
  0x8c   : > { %2832 = vmatprep.mubr.msk.bf16.mxu0 %vm2950_vm0, %v2949_v2  ;;  %2836 = vmatprep.subr.bf16.mxu1 %v2949_v2 }
  0x8d   : > { %2842 = vmatprep.subr.bf16.mxu0 %v2949_v2 }
  0x91   : > { %2827 = vmatmul.mubr.msk.bf16.vlgmr.msra.gmra.mxu1 %vm190_vm1, %v2013_v59 }
  0x92   : > { %2833 = vmatmul.mubr.msk.bf16.vlgmr.msra.gmra.mxu0 %vm190_vm1, %v2070_v60  ;;  %2837 = vmatpush3.bf16.msra.mxu1 %v2920_v62 }
  0x93   : > { %2843 = vmatpush3.bf16.msra.mxu0 %v2921_v63  ;;  %2838 = vmatprep.mubr.msk.bf16.mxu1 %vm2950_vm0, %v2949_v2 }
  0x94   : > { %2844 = vmatprep.mubr.msk.bf16.mxu0 %vm2950_vm0, %v2949_v2  ;;  %2848 = vmatprep.subr.bf16.mxu1 %v2949_v2 }
  0x99   : > { %2839 = vmatmul.mubr.msk.bf16.vlgmr.msra.gmra.mxu1 %vm190_vm1, %v2545_v4 }
  0x9a   : > { %2845 = vmatmul.mubr.msk.bf16.vlgmr.msra.gmra.mxu0 %vm190_vm1, %v2187_v3  ;;  %2849 = vmatpush3.bf16.msra.mxu1 %v2923_v5 }
  0x9b   : > { %2850 = vmatprep.mubr.msk.bf16.mxu1 %vm2950_vm0, %v2949_v2 }
  0xa1   : > { %2851 = vmatmul.mubr.msk.bf16.vlgmr.msra.gmra.mxu1 %vm190_vm1, %v2244_v7 }
  0xd2   : > { %v228_v8 = vpop.f32.mrf.mxu0 }
  0xd3   : > { %v234_v17 = vadd.f32 %v3278_v12, %v228_v8 }
  0xd4   : > { %v2642_v9 = vpop.f32.mrf.mxu0 }
  0xd6   : > { %v231_v10 = vpop.f32.mrf.mxu0 }
  0xd8   : > { %v2643_v11 = vpop.f32.mrf.mxu0 }
  0xd9   : > { %v292_v13 = vpop.f32.mrf.mxu1 }
  0xda   : > { %v350_v14 = vpop.f32.mrf.mxu0  ;;  %v298_v2 = vadd.f32 %v292_v13, %v234_v17 }
  0xdb   : > { %v2648_v15 = vpop.f32.mrf.mxu1 }
  0xdc   : > { %v2654_v16 = vpop.f32.mrf.mxu0  ;;  %v356_v26 = vadd.f32 %v350_v14, %v298_v2 }
  0xdd   : > { %v295_v18 = vpop.f32.mrf.mxu1 }
  0xde   : > { %v353_v19 = vpop.f32.mrf.mxu0 }
  0xdf   : > { %v2649_v20 = vpop.f32.mrf.mxu1 }
  0xe0   : > { %v2655_v21 = vpop.f32.mrf.mxu0 }
  0xe1   : > { %v405_v22 = vpop.f32.mrf.mxu1 }
  0xe2   : > { %v469_v23 = vpop.f32.mrf.mxu0  ;;  %v411_v29 = vadd.f32 %v405_v22, %v356_v26 }
  0xe3   : > { %v2660_v24 = vpop.f32.mrf.mxu1 }
  0xe4   : > { %v2666_v25 = vpop.f32.mrf.mxu0  ;;  %v475_v34 = vadd.f32 %v469_v23, %v411_v29 }
  0xe5   : > { %v408_v27 = vpop.f32.mrf.mxu1 }
  0xe6   : > { %v472_v28 = vpop.f32.mrf.mxu0 }
  0xe7   : > { %v2661_v30 = vpop.f32.mrf.mxu1 }
  0xe8   : > { %v2667_v31 = vpop.f32.mrf.mxu0 }
  0xe9   : > { %v527_v32 = vpop.f32.mrf.mxu1 }
  0xea   : > { %v582_v33 = vpop.f32.mrf.mxu0  ;;  %v533_v37 = vadd.f32 %v527_v32, %v475_v34 }
  0xeb   : > { %v2672_v35 = vpop.f32.mrf.mxu1 }
  0xec   : > { %v2678_v36 = vpop.f32.mrf.mxu0  ;;  %v588_v42 = vadd.f32 %v582_v33, %v533_v37 }
  0xed   : > { %v530_v38 = vpop.f32.mrf.mxu1 }
  0xee   : > { %v585_v39 = vpop.f32.mrf.mxu0 }
  0xef   : > { %v2673_v40 = vpop.f32.mrf.mxu1 }
  0xf0   : > { %v2679_v41 = vpop.f32.mrf.mxu0 }
  0xf1   : > { %v646_v43 = vpop.f32.mrf.mxu1 }
  0xf2   : > { %v704_v44 = vpop.f32.mrf.mxu0  ;;  %v652_v45 = vadd.f32 %v646_v43, %v588_v42 }
  0xf3   : > { %v2684_v46 = vpop.f32.mrf.mxu1 }
  0xf4   : > { %v2690_v47 = vpop.f32.mrf.mxu0  ;;  %v710_v48 = vadd.f32 %v704_v44, %v652_v45 }
  0xf5   : > { %v649_v49 = vpop.f32.mrf.mxu1 }
  0xf6   : > { %v707_v50 = vpop.f32.mrf.mxu0  ;;  %v711_v51 = vsub.f32 0.0, %v710_v48 }
  0xf7   : > { %v2685_v52 = vpop.f32.mrf.mxu1 }
  0xf8   : > { %v2691_v53 = vpop.f32.mrf.mxu0  ;;  %v712_v54 = vmul.f32 1.442695, %v711_v51 }
  0xf9   : > { %v765_v55 = vpop.f32.mrf.mxu1 }
  0xfa   : > { %v828_v56 = vpop.f32.mrf.mxu0  ;;  %2925 = vpow2.f32 %v712_v54  ;;  %v771_v1 = vadd.f32 %v3278_v12, %v765_v55 }
  0xfb   : > { %v2696_v57 = vpop.f32.mrf.mxu1 }
  0xfc   : > { %v2702_v58 = vpop.f32.mrf.mxu0  ;;  %v834_v7 = vadd.f32 %v828_v56, %v771_v1 }
  0xfd   : > { %v768_v59 = vpop.f32.mrf.mxu1 }
  0xfe   : > { %v831_v60 = vpop.f32.mrf.mxu0 }
  0xff   : > { %v2697_v61 = vpop.f32.mrf.mxu1 }
 0x100   : > { %v2703_v62 = vpop.f32.mrf.mxu0 }
 0x101   : > { %v885_v63 = vpop.f32.mrf.mxu1 }
 0x102   : > { %v938_v0 = vpop.f32.mrf.mxu0  ;;  %v891_v13 = vadd.f32 %v885_v63, %v834_v7 }
 0x103   : > { %v2708_v3 = vpop.f32.mrf.mxu1 }
 0x104   : > { %v2714_v4 = vpop.f32.mrf.mxu0  ;;  %v944_v18 = vadd.f32 %v938_v0, %v891_v13 }
 0x105   : > { %v888_v5 = vpop.f32.mrf.mxu1 }
 0x106   : > { %v941_v6 = vpop.f32.mrf.mxu0 }
 0x107   : > { %v2926_v8 = vpop.eup %2925  ;;  %v2709_v9 = vpop.f32.mrf.mxu1 }
 0x108   : > { %v2715_v10 = vpop.f32.mrf.mxu0  ;;  %v714_v11 = vadd.f32 1.0, %v2926_v8 }
 0x109   : > { %v1001_v14 = vpop.f32.mrf.mxu1 }
 0x10a   : > { %v1058_v15 = vpop.f32.mrf.mxu0  ;;  %2927 = vrcp.f32 %v714_v11  ;;  %v1007_v21 = vadd.f32 %v1001_v14, %v944_v18 }
 0x10b   : > { %v2720_v16 = vpop.f32.mrf.mxu1 }
 0x10c   : > { %v2726_v17 = vpop.f32.mrf.mxu0  ;;  %v1064_v25 = vadd.f32 %v1058_v15, %v1007_v21 }
 0x10d   : > { %v1004_v19 = vpop.f32.mrf.mxu1 }
 0x10e   : > { %v1061_v20 = vpop.f32.mrf.mxu0 }
 0x10f   : > { %v2721_v2 = vpop.f32.mrf.mxu1 }
 0x110   : > { %v2727_v22 = vpop.f32.mrf.mxu0 }
 0x111   : > { %v1112_v23 = vpop.f32.mrf.mxu1 }
 0x112   : > { %v1175_v24 = vpop.f32.mrf.mxu0  ;;  %v1118_v28 = vadd.f32 %v1112_v23, %v1064_v25 }
 0x113   : > { %v2732_v26 = vpop.f32.mrf.mxu1 }
 0x114   : > { %v2738_v27 = vpop.f32.mrf.mxu0  ;;  %v1181_v34 = vadd.f32 %v1175_v24, %v1118_v28 }
 0x115   : > { %v1115_v29 = vpop.f32.mrf.mxu1 }
 0x116   : > { %v1178_v30 = vpop.f32.mrf.mxu0 }
 0x117   : > { %v2928_v31 = vpop.eup %2927  ;;  %v2733_v32 = vpop.f32.mrf.mxu1 }
 0x118   : > { %v2739_v33 = vpop.f32.mrf.mxu0  ;;  %718 = vst.msk [vmem:[%s3286_s2] sm:$0xf] %vm717_vm2, %v2928_v31 }
 0x119   : > { %v1232_v35 = vpop.f32.mrf.mxu1 }
 0x11a   : > { %v1293_v36 = vpop.f32.mrf.mxu0  ;;  %v1238_v37 = vadd.f32 %v1232_v35, %v1181_v34 }
 0x11b   : > { %v2744_v38 = vpop.f32.mrf.mxu1  ;;  %v1299_v50 = vadd.f32 %v3278_v12, %v1293_v36 }
 0x11c   : > { %v2750_v39 = vpop.f32.mrf.mxu0  ;;  %v1239_v40 = vsub.f32 0.0, %v1238_v37 }
 0x11d   : > { %v1235_v41 = vpop.f32.mrf.mxu1 }
 0x11e   : > { %v1296_v42 = vpop.f32.mrf.mxu0  ;;  %v1240_v43 = vmul.f32 1.442695, %v1239_v40 }
 0x11f   : > { %v2745_v44 = vpop.f32.mrf.mxu1 }
 0x120   : > { %v2751_v45 = vpop.f32.mrf.mxu0  ;;  %2929 = vpow2.f32 %v1240_v43 }
 0x121   : > { %v1356_v46 = vpop.f32.mrf.mxu1 }
 0x122   : > { %v1413_v47 = vpop.f32.mrf.mxu0  ;;  %v1362_v55 = vadd.f32 %v1356_v46, %v1299_v50 }
 0x123   : > { %v2756_v48 = vpop.f32.mrf.mxu1 }
 0x124   : > { %v2762_v49 = vpop.f32.mrf.mxu0  ;;  %v1419_v60 = vadd.f32 %v1413_v47, %v1362_v55 }
 0x125   : > { %v1359_v51 = vpop.f32.mrf.mxu1 }
 0x126   : > { %v1416_v52 = vpop.f32.mrf.mxu0 }
 0x127   : > { %v2757_v53 = vpop.f32.mrf.mxu1 }
 0x128   : > { %v2763_v54 = vpop.f32.mrf.mxu0 }
 0x129   : > { %v1466_v56 = vpop.f32.mrf.mxu1 }
 0x12a   : > { %v1529_v57 = vpop.f32.mrf.mxu0  ;;  %v1472_v1 = vadd.f32 %v1466_v56, %v1419_v60 }
 0x12b   : > { %v2768_v58 = vpop.f32.mrf.mxu1 }
 0x12c   : > { %v2774_v59 = vpop.f32.mrf.mxu0  ;;  %v1535_v7 = vadd.f32 %v1529_v57, %v1472_v1 }
 0x12d   : > { %v2930_v61 = vpop.eup %2929  ;;  %v1469_v62 = vpop.f32.mrf.mxu1 }
 0x12e   : > { %v1532_v63 = vpop.f32.mrf.mxu0  ;;  %v1242_v0 = vadd.f32 1.0, %v2930_v61 }
 0x12f   : > { %v2769_v3 = vpop.f32.mrf.mxu1 }
 0x130   : > { %v2775_v4 = vpop.f32.mrf.mxu0  ;;  %2931 = vrcp.f32 %v1242_v0 }
 0x131   : > { %v1586_v5 = vpop.f32.mrf.mxu1 }
 0x132   : > { %v1640_v6 = vpop.f32.mrf.mxu0  ;;  %v1592_v10 = vadd.f32 %v1586_v5, %v1535_v7 }
 0x133   : > { %v2780_v8 = vpop.f32.mrf.mxu1 }
 0x134   : > { %v2786_v9 = vpop.f32.mrf.mxu0  ;;  %v1646_v16 = vadd.f32 %v1640_v6, %v1592_v10 }
 0x135   : > { %v1589_v11 = vpop.f32.mrf.mxu1 }
 0x136   : > { %v1643_v13 = vpop.f32.mrf.mxu0 }
 0x137   : > { %v2781_v14 = vpop.f32.mrf.mxu1 }
 0x138   : > { %v2787_v15 = vpop.f32.mrf.mxu0 }
 0x139   : > { %v1703_v17 = vpop.f32.mrf.mxu1 }
 0x13a   : > { %v1760_v18 = vpop.f32.mrf.mxu0  ;;  %v1709_v19 = vadd.f32 %v1703_v17, %v1646_v16 }
 0x13b   : > { %v2792_v20 = vpop.f32.mrf.mxu1 }
 0x13c   : > { %v2798_v21 = vpop.f32.mrf.mxu0  ;;  %v1766_v2 = vadd.f32 %v1760_v18, %v1709_v19 }
 0x13d   : > { %v2932_v22 = vpop.eup %2931  ;;  %v1706_v23 = vpop.f32.mrf.mxu1 }
 0x13e   : > { %v1763_v24 = vpop.f32.mrf.mxu0  ;;  %2462 = vst.msk [vmem:[%s3286_s2 + $0x4] sm:$0xf] %vm717_vm2, %v2932_v22  ;;  %v1767_v25 = vsub.f32 0.0, %v1766_v2 }
 0x13f   : > { %v2793_v26 = vpop.f32.mrf.mxu1 }
 0x140   : > { %v2799_v27 = vpop.f32.mrf.mxu0  ;;  %v1768_v28 = vmul.f32 1.442695, %v1767_v25 }
 0x141   : > { %v1821_v29 = vpop.f32.mrf.mxu1 }
 0x142   : > { %v1884_v30 = vpop.f32.mrf.mxu0  ;;  %2933 = vpow2.f32 %v1768_v28  ;;  %v1827_v39 = vadd.f32 %v3278_v12, %v1821_v29 }
 0x143   : > { %v2804_v31 = vpop.f32.mrf.mxu1 }
 0x144   : > { %v2810_v32 = vpop.f32.mrf.mxu0  ;;  %v1890_v44 = vadd.f32 %v1884_v30, %v1827_v39 }
 0x145   : > { %v1824_v33 = vpop.f32.mrf.mxu1 }
 0x146   : > { %v1887_v34 = vpop.f32.mrf.mxu0 }
 0x147   : > { %v2805_v35 = vpop.f32.mrf.mxu1 }
 0x148   : > { %v2811_v36 = vpop.f32.mrf.mxu0 }
 0x149   : > { %v1941_v37 = vpop.f32.mrf.mxu1 }
 0x14a   : > { %v1994_v38 = vpop.f32.mrf.mxu0  ;;  %v1947_v49 = vadd.f32 %v1941_v37, %v1890_v44 }
 0x14b   : > { %v2816_v40 = vpop.f32.mrf.mxu1 }
 0x14c   : > { %v2822_v41 = vpop.f32.mrf.mxu0  ;;  %v2000_v54 = vadd.f32 %v1994_v38, %v1947_v49 }
 0x14d   : > { %v1944_v42 = vpop.f32.mrf.mxu1 }
 0x14e   : > { %v1997_v43 = vpop.f32.mrf.mxu0 }
 0x14f   : > { %v2934_v45 = vpop.eup %2933  ;;  %v2817_v46 = vpop.f32.mrf.mxu1 }
 0x150   : > { %v2823_v47 = vpop.f32.mrf.mxu0  ;;  %v1770_v48 = vadd.f32 1.0, %v2934_v45 }
 0x151   : > { %v2057_v50 = vpop.f32.mrf.mxu1 }
 0x152   : > { %v2114_v51 = vpop.f32.mrf.mxu0  ;;  %2935 = vrcp.f32 %v1770_v48  ;;  %v2063_v12 = vadd.f32 %v2057_v50, %v2000_v54 }
 0x153   : > { %v2828_v52 = vpop.f32.mrf.mxu1 }
 0x154   : > { %v2834_v53 = vpop.f32.mrf.mxu0  ;;  %v2120_v61 = vadd.f32 %v2114_v51, %v2063_v12 }
 0x155   : > { %v2060_v55 = vpop.f32.mrf.mxu1 }
 0x156   : > { %v2117_v56 = vpop.f32.mrf.mxu0 }
 0x157   : > { %v2829_v57 = vpop.f32.mrf.mxu1 }
 0x158   : > { %v2835_v58 = vpop.f32.mrf.mxu0 }
 0x159   : > { %v2168_v59 = vpop.f32.mrf.mxu1 }
 0x15a   : > { %v2231_v60 = vpop.f32.mrf.mxu0  ;;  %v2174_v0 = vadd.f32 %v2168_v59, %v2120_v61 }
 0x15b   : > { %v2840_v62 = vpop.f32.mrf.mxu1 }
 0x15c   : > { %v2846_v63 = vpop.f32.mrf.mxu0  ;;  %v2237_v7 = vadd.f32 %v2231_v60, %v2174_v0 }
 0x15d   : > { %v2171_v1 = vpop.f32.mrf.mxu1 }
 0x15e   : > { %v2234_v3 = vpop.f32.mrf.mxu0 }
 0x15f   : > { %v2936_v4 = vpop.eup %2935  ;;  %v2841_v5 = vpop.f32.mrf.mxu1 }
 0x160   : > { %v2847_v6 = vpop.f32.mrf.mxu0  ;;  %2512 = vst.msk [vmem:[%s3286_s2 + $0x8] sm:$0xf] %vm717_vm2, %v2936_v4 }
 0x161   : > { %v2288_v8 = vpop.f32.mrf.mxu1 }
 0x162   : > { %v2294_v9 = vadd.f32 %v2288_v8, %v2237_v7 }
 0x163   : > { %v2852_v10 = vpop.f32.mrf.mxu1 }
 0x164   : > { %v2295_v11 = vsub.f32 0.0, %v2294_v9 }
 0x165   : > { %v2291_v13 = vpop.f32.mrf.mxu1 }
 0x166   : > { %v2296_v14 = vmul.f32 1.442695, %v2295_v11 }
 0x167   : > { %v2853_v15 = vpop.f32.mrf.mxu1 }
 0x168   : > { %2937 = vpow2.f32 %v2296_v14 }
 0x175   : > { %v2938_v16 = vpop.eup %2937 }
 0x176   : > { %v2298_v17 = vadd.f32 1.0, %v2938_v16 }
 0x178   : > { %2939 = vrcp.f32 %v2298_v17 }
 0x185   : > { %v2940_v18 = vpop.eup %2939 }
 0x186   : > { %2562 = vst.msk [vmem:[%s3286_s2 + $0xc] sm:$0xf] %vm717_vm2, %v2940_v18 }
 0x187 PF: > { %s15_s14 = sadd.s32 1, %s2947_s14  }
 0x188   : > { %p12_p4 = scmp.ge.s32.totalorder %s15_s14, 4  }
 0x18a   :  { %14 = sbr.rel (!%p12_p4) target bundleno = 3 (0x3), region = 78 }

</bundles_post_ra>
